<compile_context>
chip_gen: v5e
topology: v5e:2x2
jax: 0.10.0
libtpu: 0.0.40
codegen_flags: <defaults>
</compile_context>

<pallas_src>
import jax
import jax.numpy as jnp
from jax.experimental import pallas as pl
from jax.experimental.pallas import tpu as pltpu


# ----------------------------------------------------------------------------
# In-kernel helpers (pure functions on VMEM-resident values; B, T, K, H are
# small compile-time constants, so all loops are statically unrolled).
# ----------------------------------------------------------------------------
def _conv1d_bn(x, w2d, scale, shift, *, relu):
    """PyTorch Conv1d(padding=K//2, bias=False) -> (relu) -> eval BatchNorm,
    output cropped to the first T frames (matters for even K).

    x: [B, T, Cin]; w2d: [K*Cin, Cout] (tap-major); scale/shift: [1, Cout].
    Batched im2col -> single matmul over the whole batch.
    """
    B, T, cin = x.shape
    K = w2d.shape[0] // cin
    pad_l = K // 2
    pad_r = K - 1 - pad_l
    parts = []
    if pad_l:
        parts.append(jnp.zeros((B, pad_l, cin), jnp.float32))
    parts.append(x)
    if pad_r:
        parts.append(jnp.zeros((B, pad_r, cin), jnp.float32))
    xp = jnp.concatenate(parts, axis=1) if len(parts) > 1 else x
    if K > 1:
        cols = jnp.concatenate([xp[:, j:j + T, :] for j in range(K)], axis=-1)
    else:
        cols = xp
    y = jnp.dot(cols.reshape(B * T, K * cin), w2d,
                preferred_element_type=jnp.float32)
    if relu:
        y = jnp.maximum(y, 0.0)
    y = y * scale + shift
    return y.reshape(B, T, -1)


def _bigru(x, wi, bi, wh, bh, H):
    """Fused bidirectional GRU (PyTorch equations), h0 = 0.

    x:  [B, T, In]
    wi: [In, 6H]   columns = [r|z|n fwd | r|z|n bwd]   (input projection)
    bi: [1, 6H]
    wh: [2H, 6H]   block-diag(wh_fwd.T, wh_bwd.T)      (hidden projection)
    bh: [1, 6H]
    Returns [B, T, 2H] with fwd states in [:, :, :H] and bwd in [:, :, H:].
    Both directions + full batch share ONE hidden matmul per timestep.
    """
    B, T, In = x.shape
    gi = jnp.dot(x.reshape(B * T, In), wi,
                 preferred_element_type=jnp.float32) + bi
    gi = gi.reshape(B, T, 6 * H)

    h = jnp.zeros((B, 2 * H), jnp.float32)        # [h_fwd | h_bwd]
    out_f = [None] * T
    out_b = [None] * T
    for t in range(T):
        gh = jnp.dot(h, wh, preferred_element_type=jnp.float32) + bh
        g_f = gi[:, t, 0:3 * H]                   # fwd reads time t
        g_b = gi[:, T - 1 - t, 3 * H:6 * H]       # bwd reads time T-1-t
        r_f = jax.nn.sigmoid(g_f[:, 0:H] + gh[:, 0:H])
        z_f = jax.nn.sigmoid(g_f[:, H:2 * H] + gh[:, H:2 * H])
        n_f = jnp.tanh(g_f[:, 2 * H:3 * H] + r_f * gh[:, 2 * H:3 * H])
        r_b = jax.nn.sigmoid(g_b[:, 0:H] + gh[:, 3 * H:4 * H])
        z_b = jax.nn.sigmoid(g_b[:, H:2 * H] + gh[:, 4 * H:5 * H])
        n_b = jnp.tanh(g_b[:, 2 * H:3 * H] + r_b * gh[:, 5 * H:6 * H])
        h_f = (1.0 - z_f) * n_f + z_f * h[:, 0:H]
        h_b = (1.0 - z_b) * n_b + z_b * h[:, H:2 * H]
        h = jnp.concatenate([h_f, h_b], axis=-1)
        out_f[t] = h_f
        out_b[T - 1 - t] = h_b
    rows = [jnp.concatenate([out_f[t], out_b[t]], axis=-1)[:, None, :]
            for t in range(T)]
    return jnp.concatenate(rows, axis=1)          # [B, T, 2H]


# ----------------------------------------------------------------------------
# The single fused forward kernel.
# ----------------------------------------------------------------------------
def _fused_forward_kernel(
        emb_ref,
        # SeriesPredictor (dur_pred)
        dc0_w, dc0_s, dc0_b, dc1_w, dc1_s, dc1_b, dc2_w, dc2_s, dc2_b,
        dgru_wi, dgru_bi, dgru_wh, dgru_bh,
        dlin_w, dlin_b,
        # CBHG prenet
        bank_w, bank_s, bank_b,
        p1_w, p1_s, p1_b, p2_w, p2_s, p2_b,
        prehw_w, hw_w, hw_b,
        cgru_wi, cgru_bi, cgru_wh, cgru_bh,
        # outputs
        x_out_ref, dur_out_ref):
    B, T, E = emb_ref.shape
    Hd = dgru_wh.shape[0] // 2
    Hc = cgru_wh.shape[0] // 2
    n_highways = hw_w.shape[0]

    xb = emb_ref[...]                                        # [B, T, E]

    # ---------------- dur_pred (SeriesPredictor), eval mode -----------------
    h = xb
    for (w, s, sh) in ((dc0_w, dc0_s, dc0_b),
                       (dc1_w, dc1_s, dc1_b),
                       (dc2_w, dc2_s, dc2_b)):
        h = _conv1d_bn(h, w[...], s[...], sh[...], relu=True)
        # F.dropout(training=False) == identity
    g = _bigru(h, dgru_wi[...], dgru_bi[...], dgru_wh[...], dgru_bh[...], Hd)
    # Linear(2H -> 1) as a lane reduction; 1/alpha pre-folded into w / b.
    dur_out_ref[...] = (jnp.sum(g * dlin_w[...], axis=-1, keepdims=True)
                        + dlin_b[...])

    # ---------------- prenet (CBHGWrapper) ----------------------------------
    # Fused conv bank (all K zero-padded to a common width, channel concat).
    cb = _conv1d_bn(xb, bank_w[...], bank_s[...], bank_b[...], relu=True)
    # MaxPool2d((2,1), stride 1, pad (1,0)) + crop == max(x[t-1], x[t]).
    prev = jnp.concatenate(
        [jnp.full((B, 1, cb.shape[-1]), -jnp.inf, jnp.float32),
         cb[:, :T - 1, :]], axis=1)
    pooled = jnp.maximum(cb, prev)
    x = _conv1d_bn(pooled, p1_w[...], p1_s[...], p1_b[...], relu=True)
    x = _conv1d_bn(x, p2_w[...], p2_s[...], p2_b[...], relu=False) + xb
    # torch x.transpose(1,2) is a no-op in channel-last layout.
    # highway_mismatch == True -> pre_highway Linear(E -> P, bias=False).
    P = prehw_w.shape[1]
    x2 = jnp.dot(x.reshape(B * T, E), prehw_w[...],
                 preferred_element_type=jnp.float32)         # [B*T, P]
    for i in range(n_highways):
        y = jnp.dot(x2, hw_w[i], preferred_element_type=jnp.float32) + hw_b[i]
        gate = jax.nn.sigmoid(y[:, P:2 * P])
        x2 = gate * jnp.maximum(y[:, 0:P], 0.0) + (1.0 - gate) * x2
    x3 = _bigru(x2.reshape(B, T, P),
                cgru_wi[...], cgru_bi[...], cgru_wh[...], cgru_bh[...], Hc)
    x_out_ref[...] = x3                                      # [B, T, 2*Hc]


# ----------------------------------------------------------------------------
# Host-side one-time parameter folding into the fused-kernel layout.
# ----------------------------------------------------------------------------
def prepare_fused_params(params):
    def conv_w2d(w):                     # [K, Cin, Cout] -> [K*Cin, Cout]
        K, cin, cout = w.shape
        return w.reshape(K * cin, cout)

    def row(v):
        return v.reshape(1, -1)

    def bigru_combine(fwd, bwd):
        # PyTorch layout: w_ih [3H, In], w_hh [3H, H], b [3H]; gates r|z|n.
        H = fwd["w_hh"].shape[1]
        wi = jnp.concatenate([fwd["w_ih"].T, bwd["w_ih"].T], axis=1)     # [In,6H]
        bi = row(jnp.concatenate([fwd["b_ih"], bwd["b_ih"]]))            # [1,6H]
        wh = jnp.zeros((2 * H, 6 * H), jnp.float32)                      # blockdiag
        wh = wh.at[0:H, 0:3 * H].set(fwd["w_hh"].T)
        wh = wh.at[H:2 * H, 3 * H:6 * H].set(bwd["w_hh"].T)
        bh = row(jnp.concatenate([fwd["b_hh"], bwd["b_hh"]]))
        return dict(wi=wi, bi=bi, wh=wh, bh=bh)

    # Fused conv bank: zero-pad each kernel to a common K, concat out channels.
    bank = params["bank_convs"]
    k_max = max(w.shape[0] for (w, _, _) in bank)
    e = bank[0][0].shape[1]
    p_ch = bank[0][0].shape[2]
    bank_w = jnp.zeros((k_max, e, len(bank) * p_ch), jnp.float32)
    for i, (w, _, _) in enumerate(bank):
        k = w.shape[0]
        off = k_max // 2 - k // 2        # aligns each kernel's padding=k//2
        bank_w = bank_w.at[off:off + k, :, i * p_ch:(i + 1) * p_ch].set(w)
    bank_s = row(jnp.concatenate([s for (_, s, _) in bank]))
    bank_b = row(jnp.concatenate([sh for (_, _, sh) in bank]))

    hw_w = jnp.stack([jnp.concatenate([w1, w2], axis=1)
                      for (w1, b1, w2, b2) in params["highways"]])   # [n, P, 2P]
    hw_b = jnp.stack([row(jnp.concatenate([b1, b2]))
                      for (w1, b1, w2, b2) in params["highways"]])   # [n, 1, 2P]

    return dict(
        embedding=params["embedding"],
        dur_convs=[(conv_w2d(w), row(s), row(sh))
                   for (w, s, sh) in params["dur_convs"]],
        dur_gru=bigru_combine(params["dur_gru_fwd"], params["dur_gru_bwd"]),
        dur_lin_w=params["dur_lin_w"].reshape(1, 1, -1),    # [1,1,2H]
        dur_lin_b=params["dur_lin_b"].reshape(1, 1, 1),
        bank_w=bank_w.reshape(k_max * e, len(bank) * p_ch),
        bank_s=bank_s, bank_b=bank_b,
        proj1=(conv_w2d(params["proj1"][0]), row(params["proj1"][1]),
               row(params["proj1"][2])),
        proj2=(conv_w2d(params["proj2"][0]), row(params["proj2"][1]),
               row(params["proj2"][2])),
        pre_highway_w=params["pre_highway_w"],
        hw_w=hw_w, hw_b=hw_b,
        cbhg_gru=bigru_combine(params["cbhg_gru_fwd"], params["cbhg_gru_bwd"]),
    )


# ----------------------------------------------------------------------------
# Full DurationPredictor forward: gather embedding + ONE pallas_call.
# ----------------------------------------------------------------------------
def duration_predictor_forward(fused, token_ids, alpha=1.0):
    B, T = token_ids.shape
    emb = jnp.take(fused["embedding"], token_ids, axis=0)          # [B, T, E]
    x_dim = fused["cbhg_gru"]["wh"].shape[0]                       # 2 * Hc

    inv_alpha = 1.0 / alpha                                        # fold /alpha
    dlin_w = fused["dur_lin_w"] * inv_alpha
    dlin_b = fused["dur_lin_b"] * inv_alpha

    g = lambda d: (d["wi"], d["bi"], d["wh"], d["bh"])
    args = [emb]
    for (w, s, sh) in fused["dur_convs"]:
        args += [w, s, sh]
    args += list(g(fused["dur_gru"]))
    args += [dlin_w, dlin_b]
    args += [fused["bank_w"], fused["bank_s"], fused["bank_b"]]
    args += list(fused["proj1"]) + list(fused["proj2"])
    args += [fused["pre_highway_w"], fused["hw_w"], fused["hw_b"]]
    args += list(g(fused["cbhg_gru"]))

    x_out, dur = pl.pallas_call(
        _fused_forward_kernel,
        out_shape=(jax.ShapeDtypeStruct((B, T, x_dim), jnp.float32),
                   jax.ShapeDtypeStruct((B, T, 1), jnp.float32)),
        compiler_params=pltpu.CompilerParams(vmem_limit_bytes=64 * 1024 * 1024),
    )(*args)
    return x_out, dur


# ----------------------------------------------------------------------------
# Deterministic synthetic parameters (PyTorch layouts).
# ----------------------------------------------------------------------------
def make_params(key):
    num_chars, embed_dims = 16, 32            # embedding
    dur_conv_dims, dur_rnn_dims = 32, 16      # SeriesPredictor
    k_bank, prenet_dims, n_highways = 4, 16, 2  # prenet_dims != E -> highway_mismatch

    keys = iter(jax.random.split(key, 256))
    nk = lambda: next(keys)

    def conv_bn(k, cin, cout):
        w = 0.1 * jax.random.normal(nk(), (k, cin, cout), jnp.float32)
        gamma = 1.0 + 0.1 * jax.random.normal(nk(), (cout,), jnp.float32)
        beta = 0.1 * jax.random.normal(nk(), (cout,), jnp.float32)
        mean = 0.1 * jax.random.normal(nk(), (cout,), jnp.float32)
        var = 0.5 + jnp.abs(jax.random.normal(nk(), (cout,), jnp.float32))
        scale = gamma / jnp.sqrt(var + 1e-5)    # eval-mode BatchNorm folded
        shift = beta - mean * scale
        return (w, scale, shift)

    def gru_dir(in_dim, h):
        return dict(
            w_ih=0.1 * jax.random.normal(nk(), (3 * h, in_dim), jnp.float32),  # r|z|n
            w_hh=0.1 * jax.random.normal(nk(), (3 * h, h), jnp.float32),
            b_ih=0.1 * jax.random.normal(nk(), (3 * h,), jnp.float32),
            b_hh=0.1 * jax.random.normal(nk(), (3 * h,), jnp.float32))

    params = dict(
        embedding=0.1 * jax.random.normal(nk(), (num_chars, embed_dims), jnp.float32),
        dur_convs=[conv_bn(5, embed_dims, dur_conv_dims),
                   conv_bn(5, dur_conv_dims, dur_conv_dims),
                   conv_bn(5, dur_conv_dims, dur_conv_dims)],
        dur_gru_fwd=gru_dir(dur_conv_dims, dur_rnn_dims),
        dur_gru_bwd=gru_dir(dur_conv_dims, dur_rnn_dims),
        dur_lin_w=0.1 * jax.random.normal(nk(), (2 * dur_rnn_dims, 1), jnp.float32),
        dur_lin_b=0.1 * jax.random.normal(nk(), (1,), jnp.float32),
        bank_convs=[conv_bn(k, embed_dims, prenet_dims) for k in range(1, k_bank + 1)],
        proj1=conv_bn(3, k_bank * prenet_dims, prenet_dims),
        proj2=conv_bn(3, prenet_dims, embed_dims),
        pre_highway_w=0.1 * jax.random.normal(nk(), (embed_dims, prenet_dims), jnp.float32),
        highways=[(0.1 * jax.random.normal(nk(), (prenet_dims, prenet_dims), jnp.float32),
                   jnp.zeros((prenet_dims,), jnp.float32),     # W1.bias.fill_(0.)
                   0.1 * jax.random.normal(nk(), (prenet_dims, prenet_dims), jnp.float32),
                   0.1 * jax.random.normal(nk(), (prenet_dims,), jnp.float32))
                  for _ in range(n_highways)],
        cbhg_gru_fwd=gru_dir(prenet_dims, prenet_dims // 2),
        cbhg_gru_bwd=gru_dir(prenet_dims, prenet_dims // 2),
    )
    cfg = dict(num_chars=num_chars, embed_dims=embed_dims, prenet_dims=prenet_dims)
    return params, cfg


if __name__ == "__main__":
    key = jax.random.PRNGKey(0)
    params, cfg = make_params(key)
    fused = prepare_fused_params(params)        # one-time weight folding (host side)

    B, T = 2, 8
    token_ids = jax.random.randint(jax.random.fold_in(key, 123), (B, T),
                                   0, cfg["num_chars"], dtype=jnp.int32)

    fwd = jax.jit(lambda p, ids: duration_predictor_forward(p, ids, alpha=1.0))
    x_out, dur = fwd(fused, token_ids)
    jax.block_until_ready((x_out, dur))

    assert x_out.shape == (B, T, cfg["prenet_dims"])
    assert dur.shape == (B, T, 1)
    assert bool(jnp.all(jnp.isfinite(x_out))) and bool(jnp.all(jnp.isfinite(dur)))
    print("KERNEL_OK")
</pallas_src>

<mosaic_0001>
module attributes {stable_mosaic.version = 11 : i64} {
  func.func @_fused_forward_kernel(%arg0: memref<2x8x32xf32, #tpu.memory_space<vmem>>, %arg1: memref<160x32xf32, #tpu.memory_space<vmem>>, %arg2: memref<1x32xf32, #tpu.memory_space<vmem>>, %arg3: memref<1x32xf32, #tpu.memory_space<vmem>>, %arg4: memref<160x32xf32, #tpu.memory_space<vmem>>, %arg5: memref<1x32xf32, #tpu.memory_space<vmem>>, %arg6: memref<1x32xf32, #tpu.memory_space<vmem>>, %arg7: memref<160x32xf32, #tpu.memory_space<vmem>>, %arg8: memref<1x32xf32, #tpu.memory_space<vmem>>, %arg9: memref<1x32xf32, #tpu.memory_space<vmem>>, %arg10: memref<32x96xf32, #tpu.memory_space<vmem>>, %arg11: memref<1x96xf32, #tpu.memory_space<vmem>>, %arg12: memref<32x96xf32, #tpu.memory_space<vmem>>, %arg13: memref<1x96xf32, #tpu.memory_space<vmem>>, %arg14: memref<1x1x32xf32, #tpu.memory_space<vmem>>, %arg15: memref<1x1x1xf32, #tpu.memory_space<vmem>>, %arg16: memref<128x64xf32, #tpu.memory_space<vmem>>, %arg17: memref<1x64xf32, #tpu.memory_space<vmem>>, %arg18: memref<1x64xf32, #tpu.memory_space<vmem>>, %arg19: memref<192x16xf32, #tpu.memory_space<vmem>>, %arg20: memref<1x16xf32, #tpu.memory_space<vmem>>, %arg21: memref<1x16xf32, #tpu.memory_space<vmem>>, %arg22: memref<48x32xf32, #tpu.memory_space<vmem>>, %arg23: memref<1x32xf32, #tpu.memory_space<vmem>>, %arg24: memref<1x32xf32, #tpu.memory_space<vmem>>, %arg25: memref<32x16xf32, #tpu.memory_space<vmem>>, %arg26: memref<2x16x32xf32, #tpu.memory_space<vmem>>, %arg27: memref<2x1x32xf32, #tpu.memory_space<vmem>>, %arg28: memref<16x48xf32, #tpu.memory_space<vmem>>, %arg29: memref<1x48xf32, #tpu.memory_space<vmem>>, %arg30: memref<16x48xf32, #tpu.memory_space<vmem>>, %arg31: memref<1x48xf32, #tpu.memory_space<vmem>>, %arg32: memref<2x8x16xf32, #tpu.memory_space<vmem>>, %arg33: memref<2x8x1xf32, #tpu.memory_space<vmem>>) attributes {dimension_semantics = [], scalar_prefetch = 0 : i64, scratch_operands = 0 : i64, tpu.core_type = #tpu.core_type<tc>} {
    %c0 = arith.constant 0 : index
    %c0_0 = arith.constant 0 : index
    %c0_1 = arith.constant 0 : index
    %0 = vector.load %arg0[%c0, %c0_0, %c0_1] : memref<2x8x32xf32, #tpu.memory_space<vmem>>, vector<2x8x32xf32>
    %c0_2 = arith.constant 0 : index
    %c0_3 = arith.constant 0 : index
    %1 = vector.load %arg1[%c0_2, %c0_3] : memref<160x32xf32, #tpu.memory_space<vmem>>, vector<160x32xf32>
    %c0_4 = arith.constant 0 : index
    %c0_5 = arith.constant 0 : index
    %2 = vector.load %arg2[%c0_4, %c0_5] : memref<1x32xf32, #tpu.memory_space<vmem>>, vector<1x32xf32>
    %c0_6 = arith.constant 0 : index
    %c0_7 = arith.constant 0 : index
    %3 = vector.load %arg3[%c0_6, %c0_7] : memref<1x32xf32, #tpu.memory_space<vmem>>, vector<1x32xf32>
    %cst = arith.constant 0.000000e+00 : f32
    %4 = vector.broadcast %cst : f32 to vector<2x2x32xf32>
    %cst_8 = arith.constant 0.000000e+00 : f32
    %5 = vector.broadcast %cst_8 : f32 to vector<2x2x32xf32>
    %6 = tpu.concatenate %4, %0, %5 in 1 : vector<2x2x32xf32>, vector<2x8x32xf32>, vector<2x2x32xf32> -> vector<2x12x32xf32>
    %7 = vector.extract_strided_slice %6 {offsets = [0, 0, 0], sizes = [2, 8, 32], strides = [1, 1, 1]} : vector<2x12x32xf32> to vector<2x8x32xf32>
    %8 = vector.extract_strided_slice %6 {offsets = [0, 1, 0], sizes = [2, 8, 32], strides = [1, 1, 1]} : vector<2x12x32xf32> to vector<2x8x32xf32>
    %9 = vector.extract_strided_slice %6 {offsets = [0, 2, 0], sizes = [2, 8, 32], strides = [1, 1, 1]} : vector<2x12x32xf32> to vector<2x8x32xf32>
    %10 = vector.extract_strided_slice %6 {offsets = [0, 3, 0], sizes = [2, 8, 32], strides = [1, 1, 1]} : vector<2x12x32xf32> to vector<2x8x32xf32>
    %11 = vector.extract_strided_slice %6 {offsets = [0, 4, 0], sizes = [2, 8, 32], strides = [1, 1, 1]} : vector<2x12x32xf32> to vector<2x8x32xf32>
    %12 = tpu.concatenate %7, %8, %9, %10, %11 in 2 : vector<2x8x32xf32>, vector<2x8x32xf32>, vector<2x8x32xf32>, vector<2x8x32xf32>, vector<2x8x32xf32> -> vector<2x8x160xf32>
    %13 = vector.shape_cast %12 : vector<2x8x160xf32> to vector<16x160xf32>
    %cst_9 = arith.constant dense<0.000000e+00> : vector<16x32xf32>
    %14 = tpu.matmul %13, %1, %cst_9 {dimension_numbers = #tpu.dot_dimension_numbers<[1], [0], [0], [1], [0, 0, 1, 1], [], []>} : vector<16x160xf32>, vector<160x32xf32>, vector<16x32xf32> -> vector<16x32xf32>
    %cst_10 = arith.constant 0.000000e+00 : f32
    %15 = vector.broadcast %cst_10 : f32 to vector<16x32xf32>
    %16 = arith.maximumf %14, %15 : vector<16x32xf32>
    %17 = vector.broadcast %2 : vector<1x32xf32> to vector<16x32xf32>
    %18 = arith.mulf %16, %17 : vector<16x32xf32>
    %19 = vector.broadcast %3 : vector<1x32xf32> to vector<16x32xf32>
    %20 = arith.addf %18, %19 : vector<16x32xf32>
    %21 = vector.shape_cast %20 : vector<16x32xf32> to vector<2x8x32xf32>
    %c0_11 = arith.constant 0 : index
    %c0_12 = arith.constant 0 : index
    %22 = vector.load %arg4[%c0_11, %c0_12] : memref<160x32xf32, #tpu.memory_space<vmem>>, vector<160x32xf32>
    %c0_13 = arith.constant 0 : index
    %c0_14 = arith.constant 0 : index
    %23 = vector.load %arg5[%c0_13, %c0_14] : memref<1x32xf32, #tpu.memory_space<vmem>>, vector<1x32xf32>
    %c0_15 = arith.constant 0 : index
    %c0_16 = arith.constant 0 : index
    %24 = vector.load %arg6[%c0_15, %c0_16] : memref<1x32xf32, #tpu.memory_space<vmem>>, vector<1x32xf32>
    %cst_17 = arith.constant 0.000000e+00 : f32
    %25 = vector.broadcast %cst_17 : f32 to vector<2x2x32xf32>
    %cst_18 = arith.constant 0.000000e+00 : f32
    %26 = vector.broadcast %cst_18 : f32 to vector<2x2x32xf32>
    %27 = tpu.concatenate %25, %21, %26 in 1 : vector<2x2x32xf32>, vector<2x8x32xf32>, vector<2x2x32xf32> -> vector<2x12x32xf32>
    %28 = vector.extract_strided_slice %27 {offsets = [0, 0, 0], sizes = [2, 8, 32], strides = [1, 1, 1]} : vector<2x12x32xf32> to vector<2x8x32xf32>
    %29 = vector.extract_strided_slice %27 {offsets = [0, 1, 0], sizes = [2, 8, 32], strides = [1, 1, 1]} : vector<2x12x32xf32> to vector<2x8x32xf32>
    %30 = vector.extract_strided_slice %27 {offsets = [0, 2, 0], sizes = [2, 8, 32], strides = [1, 1, 1]} : vector<2x12x32xf32> to vector<2x8x32xf32>
    %31 = vector.extract_strided_slice %27 {offsets = [0, 3, 0], sizes = [2, 8, 32], strides = [1, 1, 1]} : vector<2x12x32xf32> to vector<2x8x32xf32>
    %32 = vector.extract_strided_slice %27 {offsets = [0, 4, 0], sizes = [2, 8, 32], strides = [1, 1, 1]} : vector<2x12x32xf32> to vector<2x8x32xf32>
    %33 = tpu.concatenate %28, %29, %30, %31, %32 in 2 : vector<2x8x32xf32>, vector<2x8x32xf32>, vector<2x8x32xf32>, vector<2x8x32xf32>, vector<2x8x32xf32> -> vector<2x8x160xf32>
    %34 = vector.shape_cast %33 : vector<2x8x160xf32> to vector<16x160xf32>
    %cst_19 = arith.constant dense<0.000000e+00> : vector<16x32xf32>
    %35 = tpu.matmul %34, %22, %cst_19 {dimension_numbers = #tpu.dot_dimension_numbers<[1], [0], [0], [1], [0, 0, 1, 1], [], []>} : vector<16x160xf32>, vector<160x32xf32>, vector<16x32xf32> -> vector<16x32xf32>
    %cst_20 = arith.constant 0.000000e+00 : f32
    %36 = vector.broadcast %cst_20 : f32 to vector<16x32xf32>
    %37 = arith.maximumf %35, %36 : vector<16x32xf32>
    %38 = vector.broadcast %23 : vector<1x32xf32> to vector<16x32xf32>
    %39 = arith.mulf %37, %38 : vector<16x32xf32>
    %40 = vector.broadcast %24 : vector<1x32xf32> to vector<16x32xf32>
    %41 = arith.addf %39, %40 : vector<16x32xf32>
    %42 = vector.shape_cast %41 : vector<16x32xf32> to vector<2x8x32xf32>
    %c0_21 = arith.constant 0 : index
    %c0_22 = arith.constant 0 : index
    %43 = vector.load %arg7[%c0_21, %c0_22] : memref<160x32xf32, #tpu.memory_space<vmem>>, vector<160x32xf32>
    %c0_23 = arith.constant 0 : index
    %c0_24 = arith.constant 0 : index
    %44 = vector.load %arg8[%c0_23, %c0_24] : memref<1x32xf32, #tpu.memory_space<vmem>>, vector<1x32xf32>
    %c0_25 = arith.constant 0 : index
    %c0_26 = arith.constant 0 : index
    %45 = vector.load %arg9[%c0_25, %c0_26] : memref<1x32xf32, #tpu.memory_space<vmem>>, vector<1x32xf32>
    %cst_27 = arith.constant 0.000000e+00 : f32
    %46 = vector.broadcast %cst_27 : f32 to vector<2x2x32xf32>
    %cst_28 = arith.constant 0.000000e+00 : f32
    %47 = vector.broadcast %cst_28 : f32 to vector<2x2x32xf32>
    %48 = tpu.concatenate %46, %42, %47 in 1 : vector<2x2x32xf32>, vector<2x8x32xf32>, vector<2x2x32xf32> -> vector<2x12x32xf32>
    %49 = vector.extract_strided_slice %48 {offsets = [0, 0, 0], sizes = [2, 8, 32], strides = [1, 1, 1]} : vector<2x12x32xf32> to vector<2x8x32xf32>
    %50 = vector.extract_strided_slice %48 {offsets = [0, 1, 0], sizes = [2, 8, 32], strides = [1, 1, 1]} : vector<2x12x32xf32> to vector<2x8x32xf32>
    %51 = vector.extract_strided_slice %48 {offsets = [0, 2, 0], sizes = [2, 8, 32], strides = [1, 1, 1]} : vector<2x12x32xf32> to vector<2x8x32xf32>
    %52 = vector.extract_strided_slice %48 {offsets = [0, 3, 0], sizes = [2, 8, 32], strides = [1, 1, 1]} : vector<2x12x32xf32> to vector<2x8x32xf32>
    %53 = vector.extract_strided_slice %48 {offsets = [0, 4, 0], sizes = [2, 8, 32], strides = [1, 1, 1]} : vector<2x12x32xf32> to vector<2x8x32xf32>
    %54 = tpu.concatenate %49, %50, %51, %52, %53 in 2 : vector<2x8x32xf32>, vector<2x8x32xf32>, vector<2x8x32xf32>, vector<2x8x32xf32>, vector<2x8x32xf32> -> vector<2x8x160xf32>
    %55 = vector.shape_cast %54 : vector<2x8x160xf32> to vector<16x160xf32>
    %cst_29 = arith.constant dense<0.000000e+00> : vector<16x32xf32>
    %56 = tpu.matmul %55, %43, %cst_29 {dimension_numbers = #tpu.dot_dimension_numbers<[1], [0], [0], [1], [0, 0, 1, 1], [], []>} : vector<16x160xf32>, vector<160x32xf32>, vector<16x32xf32> -> vector<16x32xf32>
    %cst_30 = arith.constant 0.000000e+00 : f32
    %57 = vector.broadcast %cst_30 : f32 to vector<16x32xf32>
    %58 = arith.maximumf %56, %57 : vector<16x32xf32>
    %59 = vector.broadcast %44 : vector<1x32xf32> to vector<16x32xf32>
    %60 = arith.mulf %58, %59 : vector<16x32xf32>
    %61 = vector.broadcast %45 : vector<1x32xf32> to vector<16x32xf32>
    %62 = arith.addf %60, %61 : vector<16x32xf32>
    %63 = vector.shape_cast %62 : vector<16x32xf32> to vector<2x8x32xf32>
    %c0_31 = arith.constant 0 : index
    %c0_32 = arith.constant 0 : index
    %64 = vector.load %arg10[%c0_31, %c0_32] : memref<32x96xf32, #tpu.memory_space<vmem>>, vector<32x96xf32>
    %c0_33 = arith.constant 0 : index
    %c0_34 = arith.constant 0 : index
    %65 = vector.load %arg11[%c0_33, %c0_34] : memref<1x96xf32, #tpu.memory_space<vmem>>, vector<1x96xf32>
    %c0_35 = arith.constant 0 : index
    %c0_36 = arith.constant 0 : index
    %66 = vector.load %arg12[%c0_35, %c0_36] : memref<32x96xf32, #tpu.memory_space<vmem>>, vector<32x96xf32>
    %c0_37 = arith.constant 0 : index
    %c0_38 = arith.constant 0 : index
    %67 = vector.load %arg13[%c0_37, %c0_38] : memref<1x96xf32, #tpu.memory_space<vmem>>, vector<1x96xf32>
    %68 = vector.shape_cast %63 : vector<2x8x32xf32> to vector<16x32xf32>
    %cst_39 = arith.constant dense<0.000000e+00> : vector<16x96xf32>
    %69 = tpu.matmul %68, %64, %cst_39 {dimension_numbers = #tpu.dot_dimension_numbers<[1], [0], [0], [1], [0, 0, 1, 1], [], []>} : vector<16x32xf32>, vector<32x96xf32>, vector<16x96xf32> -> vector<16x96xf32>
    %70 = vector.broadcast %65 : vector<1x96xf32> to vector<16x96xf32>
    %71 = arith.addf %69, %70 : vector<16x96xf32>
    %72 = vector.shape_cast %71 : vector<16x96xf32> to vector<2x8x96xf32>
    %cst_40 = arith.constant 0.000000e+00 : f32
    %73 = vector.broadcast %cst_40 : f32 to vector<2x32xf32>
    %cst_41 = arith.constant dense<0.000000e+00> : vector<2x96xf32>
    %74 = tpu.matmul %73, %66, %cst_41 {dimension_numbers = #tpu.dot_dimension_numbers<[1], [0], [0], [1], [0, 0, 1, 1], [], []>} : vector<2x32xf32>, vector<32x96xf32>, vector<2x96xf32> -> vector<2x96xf32>
    %75 = vector.broadcast %67 : vector<1x96xf32> to vector<2x96xf32>
    %76 = arith.addf %74, %75 : vector<2x96xf32>
    %77 = vector.extract_strided_slice %72 {offsets = [0, 0, 0], sizes = [2, 1, 48], strides = [1, 1, 1]} : vector<2x8x96xf32> to vector<2x1x48xf32>
    %78 = vector.shape_cast %77 : vector<2x1x48xf32> to vector<2x48xf32>
    %79 = vector.extract_strided_slice %72 {offsets = [0, 7, 48], sizes = [2, 1, 48], strides = [1, 1, 1]} : vector<2x8x96xf32> to vector<2x1x48xf32>
    %80 = vector.shape_cast %79 : vector<2x1x48xf32> to vector<2x48xf32>
    %81 = vector.extract_strided_slice %78 {offsets = [0, 0], sizes = [2, 16], strides = [1, 1]} : vector<2x48xf32> to vector<2x16xf32>
    %82 = vector.extract_strided_slice %76 {offsets = [0, 0], sizes = [2, 16], strides = [1, 1]} : vector<2x96xf32> to vector<2x16xf32>
    %83 = arith.addf %81, %82 : vector<2x16xf32>
    %84 = arith.negf %83 : vector<2x16xf32>
    %85 = math.exp %84 : vector<2x16xf32>
    %cst_42 = arith.constant 1.000000e+00 : f32
    %86 = vector.broadcast %cst_42 : f32 to vector<2x16xf32>
    %87 = arith.addf %86, %85 : vector<2x16xf32>
    %88 = arith.divf %86, %87 : vector<2x16xf32>
    %89 = vector.extract_strided_slice %78 {offsets = [0, 16], sizes = [2, 16], strides = [1, 1]} : vector<2x48xf32> to vector<2x16xf32>
    %90 = vector.extract_strided_slice %76 {offsets = [0, 16], sizes = [2, 16], strides = [1, 1]} : vector<2x96xf32> to vector<2x16xf32>
    %91 = arith.addf %89, %90 : vector<2x16xf32>
    %92 = arith.negf %91 : vector<2x16xf32>
    %93 = math.exp %92 : vector<2x16xf32>
    %cst_43 = arith.constant 1.000000e+00 : f32
    %94 = vector.broadcast %cst_43 : f32 to vector<2x16xf32>
    %95 = arith.addf %94, %93 : vector<2x16xf32>
    %96 = arith.divf %94, %95 : vector<2x16xf32>
    %97 = vector.extract_strided_slice %78 {offsets = [0, 32], sizes = [2, 16], strides = [1, 1]} : vector<2x48xf32> to vector<2x16xf32>
    %98 = vector.extract_strided_slice %76 {offsets = [0, 32], sizes = [2, 16], strides = [1, 1]} : vector<2x96xf32> to vector<2x16xf32>
    %99 = arith.mulf %88, %98 : vector<2x16xf32>
    %100 = arith.addf %97, %99 : vector<2x16xf32>
    %101 = math.tanh %100 : vector<2x16xf32>
    %102 = vector.extract_strided_slice %80 {offsets = [0, 0], sizes = [2, 16], strides = [1, 1]} : vector<2x48xf32> to vector<2x16xf32>
    %103 = vector.extract_strided_slice %76 {offsets = [0, 48], sizes = [2, 16], strides = [1, 1]} : vector<2x96xf32> to vector<2x16xf32>
    %104 = arith.addf %102, %103 : vector<2x16xf32>
    %105 = arith.negf %104 : vector<2x16xf32>
    %106 = math.exp %105 : vector<2x16xf32>
    %cst_44 = arith.constant 1.000000e+00 : f32
    %107 = vector.broadcast %cst_44 : f32 to vector<2x16xf32>
    %108 = arith.addf %107, %106 : vector<2x16xf32>
    %109 = arith.divf %107, %108 : vector<2x16xf32>
    %110 = vector.extract_strided_slice %80 {offsets = [0, 16], sizes = [2, 16], strides = [1, 1]} : vector<2x48xf32> to vector<2x16xf32>
    %111 = vector.extract_strided_slice %76 {offsets = [0, 64], sizes = [2, 16], strides = [1, 1]} : vector<2x96xf32> to vector<2x16xf32>
    %112 = arith.addf %110, %111 : vector<2x16xf32>
    %113 = arith.negf %112 : vector<2x16xf32>
    %114 = math.exp %113 : vector<2x16xf32>
    %cst_45 = arith.constant 1.000000e+00 : f32
    %115 = vector.broadcast %cst_45 : f32 to vector<2x16xf32>
    %116 = arith.addf %115, %114 : vector<2x16xf32>
    %117 = arith.divf %115, %116 : vector<2x16xf32>
    %118 = vector.extract_strided_slice %80 {offsets = [0, 32], sizes = [2, 16], strides = [1, 1]} : vector<2x48xf32> to vector<2x16xf32>
    %119 = vector.extract_strided_slice %76 {offsets = [0, 80], sizes = [2, 16], strides = [1, 1]} : vector<2x96xf32> to vector<2x16xf32>
    %120 = arith.mulf %109, %119 : vector<2x16xf32>
    %121 = arith.addf %118, %120 : vector<2x16xf32>
    %122 = math.tanh %121 : vector<2x16xf32>
    %cst_46 = arith.constant 1.000000e+00 : f32
    %123 = vector.broadcast %cst_46 : f32 to vector<2x16xf32>
    %124 = arith.subf %123, %96 : vector<2x16xf32>
    %125 = arith.mulf %124, %101 : vector<2x16xf32>
    %126 = vector.extract_strided_slice %73 {offsets = [0, 0], sizes = [2, 16], strides = [1, 1]} : vector<2x32xf32> to vector<2x16xf32>
    %127 = arith.mulf %96, %126 : vector<2x16xf32>
    %128 = arith.addf %125, %127 : vector<2x16xf32>
    %cst_47 = arith.constant 1.000000e+00 : f32
    %129 = vector.broadcast %cst_47 : f32 to vector<2x16xf32>
    %130 = arith.subf %129, %117 : vector<2x16xf32>
    %131 = arith.mulf %130, %122 : vector<2x16xf32>
    %132 = vector.extract_strided_slice %73 {offsets = [0, 16], sizes = [2, 16], strides = [1, 1]} : vector<2x32xf32> to vector<2x16xf32>
    %133 = arith.mulf %117, %132 : vector<2x16xf32>
    %134 = arith.addf %131, %133 : vector<2x16xf32>
    %135 = tpu.concatenate %128, %134 in 1 : vector<2x16xf32>, vector<2x16xf32> -> vector<2x32xf32>
    %cst_48 = arith.constant dense<0.000000e+00> : vector<2x96xf32>
    %136 = tpu.matmul %135, %66, %cst_48 {dimension_numbers = #tpu.dot_dimension_numbers<[1], [0], [0], [1], [0, 0, 1, 1], [], []>} : vector<2x32xf32>, vector<32x96xf32>, vector<2x96xf32> -> vector<2x96xf32>
    %137 = vector.broadcast %67 : vector<1x96xf32> to vector<2x96xf32>
    %138 = arith.addf %136, %137 : vector<2x96xf32>
    %139 = vector.extract_strided_slice %72 {offsets = [0, 1, 0], sizes = [2, 1, 48], strides = [1, 1, 1]} : vector<2x8x96xf32> to vector<2x1x48xf32>
    %140 = vector.shape_cast %139 : vector<2x1x48xf32> to vector<2x48xf32>
    %141 = vector.extract_strided_slice %72 {offsets = [0, 6, 48], sizes = [2, 1, 48], strides = [1, 1, 1]} : vector<2x8x96xf32> to vector<2x1x48xf32>
    %142 = vector.shape_cast %141 : vector<2x1x48xf32> to vector<2x48xf32>
    %143 = vector.extract_strided_slice %140 {offsets = [0, 0], sizes = [2, 16], strides = [1, 1]} : vector<2x48xf32> to vector<2x16xf32>
    %144 = vector.extract_strided_slice %138 {offsets = [0, 0], sizes = [2, 16], strides = [1, 1]} : vector<2x96xf32> to vector<2x16xf32>
    %145 = arith.addf %143, %144 : vector<2x16xf32>
    %146 = arith.negf %145 : vector<2x16xf32>
    %147 = math.exp %146 : vector<2x16xf32>
    %cst_49 = arith.constant 1.000000e+00 : f32
    %148 = vector.broadcast %cst_49 : f32 to vector<2x16xf32>
    %149 = arith.addf %148, %147 : vector<2x16xf32>
    %150 = arith.divf %148, %149 : vector<2x16xf32>
    %151 = vector.extract_strided_slice %140 {offsets = [0, 16], sizes = [2, 16], strides = [1, 1]} : vector<2x48xf32> to vector<2x16xf32>
    %152 = vector.extract_strided_slice %138 {offsets = [0, 16], sizes = [2, 16], strides = [1, 1]} : vector<2x96xf32> to vector<2x16xf32>
    %153 = arith.addf %151, %152 : vector<2x16xf32>
    %154 = arith.negf %153 : vector<2x16xf32>
    %155 = math.exp %154 : vector<2x16xf32>
    %cst_50 = arith.constant 1.000000e+00 : f32
    %156 = vector.broadcast %cst_50 : f32 to vector<2x16xf32>
    %157 = arith.addf %156, %155 : vector<2x16xf32>
    %158 = arith.divf %156, %157 : vector<2x16xf32>
    %159 = vector.extract_strided_slice %140 {offsets = [0, 32], sizes = [2, 16], strides = [1, 1]} : vector<2x48xf32> to vector<2x16xf32>
    %160 = vector.extract_strided_slice %138 {offsets = [0, 32], sizes = [2, 16], strides = [1, 1]} : vector<2x96xf32> to vector<2x16xf32>
    %161 = arith.mulf %150, %160 : vector<2x16xf32>
    %162 = arith.addf %159, %161 : vector<2x16xf32>
    %163 = math.tanh %162 : vector<2x16xf32>
    %164 = vector.extract_strided_slice %142 {offsets = [0, 0], sizes = [2, 16], strides = [1, 1]} : vector<2x48xf32> to vector<2x16xf32>
    %165 = vector.extract_strided_slice %138 {offsets = [0, 48], sizes = [2, 16], strides = [1, 1]} : vector<2x96xf32> to vector<2x16xf32>
    %166 = arith.addf %164, %165 : vector<2x16xf32>
    %167 = arith.negf %166 : vector<2x16xf32>
    %168 = math.exp %167 : vector<2x16xf32>
    %cst_51 = arith.constant 1.000000e+00 : f32
    %169 = vector.broadcast %cst_51 : f32 to vector<2x16xf32>
    %170 = arith.addf %169, %168 : vector<2x16xf32>
    %171 = arith.divf %169, %170 : vector<2x16xf32>
    %172 = vector.extract_strided_slice %142 {offsets = [0, 16], sizes = [2, 16], strides = [1, 1]} : vector<2x48xf32> to vector<2x16xf32>
    %173 = vector.extract_strided_slice %138 {offsets = [0, 64], sizes = [2, 16], strides = [1, 1]} : vector<2x96xf32> to vector<2x16xf32>
    %174 = arith.addf %172, %173 : vector<2x16xf32>
    %175 = arith.negf %174 : vector<2x16xf32>
    %176 = math.exp %175 : vector<2x16xf32>
    %cst_52 = arith.constant 1.000000e+00 : f32
    %177 = vector.broadcast %cst_52 : f32 to vector<2x16xf32>
    %178 = arith.addf %177, %176 : vector<2x16xf32>
    %179 = arith.divf %177, %178 : vector<2x16xf32>
    %180 = vector.extract_strided_slice %142 {offsets = [0, 32], sizes = [2, 16], strides = [1, 1]} : vector<2x48xf32> to vector<2x16xf32>
    %181 = vector.extract_strided_slice %138 {offsets = [0, 80], sizes = [2, 16], strides = [1, 1]} : vector<2x96xf32> to vector<2x16xf32>
    %182 = arith.mulf %171, %181 : vector<2x16xf32>
    %183 = arith.addf %180, %182 : vector<2x16xf32>
    %184 = math.tanh %183 : vector<2x16xf32>
    %cst_53 = arith.constant 1.000000e+00 : f32
    %185 = vector.broadcast %cst_53 : f32 to vector<2x16xf32>
    %186 = arith.subf %185, %158 : vector<2x16xf32>
    %187 = arith.mulf %186, %163 : vector<2x16xf32>
    %188 = vector.extract_strided_slice %135 {offsets = [0, 0], sizes = [2, 16], strides = [1, 1]} : vector<2x32xf32> to vector<2x16xf32>
    %189 = arith.mulf %158, %188 : vector<2x16xf32>
    %190 = arith.addf %187, %189 : vector<2x16xf32>
    %cst_54 = arith.constant 1.000000e+00 : f32
    %191 = vector.broadcast %cst_54 : f32 to vector<2x16xf32>
    %192 = arith.subf %191, %179 : vector<2x16xf32>
    %193 = arith.mulf %192, %184 : vector<2x16xf32>
    %194 = vector.extract_strided_slice %135 {offsets = [0, 16], sizes = [2, 16], strides = [1, 1]} : vector<2x32xf32> to vector<2x16xf32>
    %195 = arith.mulf %179, %194 : vector<2x16xf32>
    %196 = arith.addf %193, %195 : vector<2x16xf32>
    %197 = tpu.concatenate %190, %196 in 1 : vector<2x16xf32>, vector<2x16xf32> -> vector<2x32xf32>
    %cst_55 = arith.constant dense<0.000000e+00> : vector<2x96xf32>
    %198 = tpu.matmul %197, %66, %cst_55 {dimension_numbers = #tpu.dot_dimension_numbers<[1], [0], [0], [1], [0, 0, 1, 1], [], []>} : vector<2x32xf32>, vector<32x96xf32>, vector<2x96xf32> -> vector<2x96xf32>
    %199 = vector.broadcast %67 : vector<1x96xf32> to vector<2x96xf32>
    %200 = arith.addf %198, %199 : vector<2x96xf32>
    %201 = vector.extract_strided_slice %72 {offsets = [0, 2, 0], sizes = [2, 1, 48], strides = [1, 1, 1]} : vector<2x8x96xf32> to vector<2x1x48xf32>
    %202 = vector.shape_cast %201 : vector<2x1x48xf32> to vector<2x48xf32>
    %203 = vector.extract_strided_slice %72 {offsets = [0, 5, 48], sizes = [2, 1, 48], strides = [1, 1, 1]} : vector<2x8x96xf32> to vector<2x1x48xf32>
    %204 = vector.shape_cast %203 : vector<2x1x48xf32> to vector<2x48xf32>
    %205 = vector.extract_strided_slice %202 {offsets = [0, 0], sizes = [2, 16], strides = [1, 1]} : vector<2x48xf32> to vector<2x16xf32>
    %206 = vector.extract_strided_slice %200 {offsets = [0, 0], sizes = [2, 16], strides = [1, 1]} : vector<2x96xf32> to vector<2x16xf32>
    %207 = arith.addf %205, %206 : vector<2x16xf32>
    %208 = arith.negf %207 : vector<2x16xf32>
    %209 = math.exp %208 : vector<2x16xf32>
    %cst_56 = arith.constant 1.000000e+00 : f32
    %210 = vector.broadcast %cst_56 : f32 to vector<2x16xf32>
    %211 = arith.addf %210, %209 : vector<2x16xf32>
    %212 = arith.divf %210, %211 : vector<2x16xf32>
    %213 = vector.extract_strided_slice %202 {offsets = [0, 16], sizes = [2, 16], strides = [1, 1]} : vector<2x48xf32> to vector<2x16xf32>
    %214 = vector.extract_strided_slice %200 {offsets = [0, 16], sizes = [2, 16], strides = [1, 1]} : vector<2x96xf32> to vector<2x16xf32>
    %215 = arith.addf %213, %214 : vector<2x16xf32>
    %216 = arith.negf %215 : vector<2x16xf32>
    %217 = math.exp %216 : vector<2x16xf32>
    %cst_57 = arith.constant 1.000000e+00 : f32
    %218 = vector.broadcast %cst_57 : f32 to vector<2x16xf32>
    %219 = arith.addf %218, %217 : vector<2x16xf32>
    %220 = arith.divf %218, %219 : vector<2x16xf32>
    %221 = vector.extract_strided_slice %202 {offsets = [0, 32], sizes = [2, 16], strides = [1, 1]} : vector<2x48xf32> to vector<2x16xf32>
    %222 = vector.extract_strided_slice %200 {offsets = [0, 32], sizes = [2, 16], strides = [1, 1]} : vector<2x96xf32> to vector<2x16xf32>
    %223 = arith.mulf %212, %222 : vector<2x16xf32>
    %224 = arith.addf %221, %223 : vector<2x16xf32>
    %225 = math.tanh %224 : vector<2x16xf32>
    %226 = vector.extract_strided_slice %204 {offsets = [0, 0], sizes = [2, 16], strides = [1, 1]} : vector<2x48xf32> to vector<2x16xf32>
    %227 = vector.extract_strided_slice %200 {offsets = [0, 48], sizes = [2, 16], strides = [1, 1]} : vector<2x96xf32> to vector<2x16xf32>
    %228 = arith.addf %226, %227 : vector<2x16xf32>
    %229 = arith.negf %228 : vector<2x16xf32>
    %230 = math.exp %229 : vector<2x16xf32>
    %cst_58 = arith.constant 1.000000e+00 : f32
    %231 = vector.broadcast %cst_58 : f32 to vector<2x16xf32>
    %232 = arith.addf %231, %230 : vector<2x16xf32>
    %233 = arith.divf %231, %232 : vector<2x16xf32>
    %234 = vector.extract_strided_slice %204 {offsets = [0, 16], sizes = [2, 16], strides = [1, 1]} : vector<2x48xf32> to vector<2x16xf32>
    %235 = vector.extract_strided_slice %200 {offsets = [0, 64], sizes = [2, 16], strides = [1, 1]} : vector<2x96xf32> to vector<2x16xf32>
    %236 = arith.addf %234, %235 : vector<2x16xf32>
    %237 = arith.negf %236 : vector<2x16xf32>
    %238 = math.exp %237 : vector<2x16xf32>
    %cst_59 = arith.constant 1.000000e+00 : f32
    %239 = vector.broadcast %cst_59 : f32 to vector<2x16xf32>
    %240 = arith.addf %239, %238 : vector<2x16xf32>
    %241 = arith.divf %239, %240 : vector<2x16xf32>
    %242 = vector.extract_strided_slice %204 {offsets = [0, 32], sizes = [2, 16], strides = [1, 1]} : vector<2x48xf32> to vector<2x16xf32>
    %243 = vector.extract_strided_slice %200 {offsets = [0, 80], sizes = [2, 16], strides = [1, 1]} : vector<2x96xf32> to vector<2x16xf32>
    %244 = arith.mulf %233, %243 : vector<2x16xf32>
    %245 = arith.addf %242, %244 : vector<2x16xf32>
    %246 = math.tanh %245 : vector<2x16xf32>
    %cst_60 = arith.constant 1.000000e+00 : f32
    %247 = vector.broadcast %cst_60 : f32 to vector<2x16xf32>
    %248 = arith.subf %247, %220 : vector<2x16xf32>
    %249 = arith.mulf %248, %225 : vector<2x16xf32>
    %250 = vector.extract_strided_slice %197 {offsets = [0, 0], sizes = [2, 16], strides = [1, 1]} : vector<2x32xf32> to vector<2x16xf32>
    %251 = arith.mulf %220, %250 : vector<2x16xf32>
    %252 = arith.addf %249, %251 : vector<2x16xf32>
    %cst_61 = arith.constant 1.000000e+00 : f32
    %253 = vector.broadcast %cst_61 : f32 to vector<2x16xf32>
    %254 = arith.subf %253, %241 : vector<2x16xf32>
    %255 = arith.mulf %254, %246 : vector<2x16xf32>
    %256 = vector.extract_strided_slice %197 {offsets = [0, 16], sizes = [2, 16], strides = [1, 1]} : vector<2x32xf32> to vector<2x16xf32>
    %257 = arith.mulf %241, %256 : vector<2x16xf32>
    %258 = arith.addf %255, %257 : vector<2x16xf32>
    %259 = tpu.concatenate %252, %258 in 1 : vector<2x16xf32>, vector<2x16xf32> -> vector<2x32xf32>
    %cst_62 = arith.constant dense<0.000000e+00> : vector<2x96xf32>
    %260 = tpu.matmul %259, %66, %cst_62 {dimension_numbers = #tpu.dot_dimension_numbers<[1], [0], [0], [1], [0, 0, 1, 1], [], []>} : vector<2x32xf32>, vector<32x96xf32>, vector<2x96xf32> -> vector<2x96xf32>
    %261 = vector.broadcast %67 : vector<1x96xf32> to vector<2x96xf32>
    %262 = arith.addf %260, %261 : vector<2x96xf32>
    %263 = vector.extract_strided_slice %72 {offsets = [0, 3, 0], sizes = [2, 1, 48], strides = [1, 1, 1]} : vector<2x8x96xf32> to vector<2x1x48xf32>
    %264 = vector.shape_cast %263 : vector<2x1x48xf32> to vector<2x48xf32>
    %265 = vector.extract_strided_slice %72 {offsets = [0, 4, 48], sizes = [2, 1, 48], strides = [1, 1, 1]} : vector<2x8x96xf32> to vector<2x1x48xf32>
    %266 = vector.shape_cast %265 : vector<2x1x48xf32> to vector<2x48xf32>
    %267 = vector.extract_strided_slice %264 {offsets = [0, 0], sizes = [2, 16], strides = [1, 1]} : vector<2x48xf32> to vector<2x16xf32>
    %268 = vector.extract_strided_slice %262 {offsets = [0, 0], sizes = [2, 16], strides = [1, 1]} : vector<2x96xf32> to vector<2x16xf32>
    %269 = arith.addf %267, %268 : vector<2x16xf32>
    %270 = arith.negf %269 : vector<2x16xf32>
    %271 = math.exp %270 : vector<2x16xf32>
    %cst_63 = arith.constant 1.000000e+00 : f32
    %272 = vector.broadcast %cst_63 : f32 to vector<2x16xf32>
    %273 = arith.addf %272, %271 : vector<2x16xf32>
    %274 = arith.divf %272, %273 : vector<2x16xf32>
    %275 = vector.extract_strided_slice %264 {offsets = [0, 16], sizes = [2, 16], strides = [1, 1]} : vector<2x48xf32> to vector<2x16xf32>
    %276 = vector.extract_strided_slice %262 {offsets = [0, 16], sizes = [2, 16], strides = [1, 1]} : vector<2x96xf32> to vector<2x16xf32>
    %277 = arith.addf %275, %276 : vector<2x16xf32>
    %278 = arith.negf %277 : vector<2x16xf32>
    %279 = math.exp %278 : vector<2x16xf32>
    %cst_64 = arith.constant 1.000000e+00 : f32
    %280 = vector.broadcast %cst_64 : f32 to vector<2x16xf32>
    %281 = arith.addf %280, %279 : vector<2x16xf32>
    %282 = arith.divf %280, %281 : vector<2x16xf32>
    %283 = vector.extract_strided_slice %264 {offsets = [0, 32], sizes = [2, 16], strides = [1, 1]} : vector<2x48xf32> to vector<2x16xf32>
    %284 = vector.extract_strided_slice %262 {offsets = [0, 32], sizes = [2, 16], strides = [1, 1]} : vector<2x96xf32> to vector<2x16xf32>
    %285 = arith.mulf %274, %284 : vector<2x16xf32>
    %286 = arith.addf %283, %285 : vector<2x16xf32>
    %287 = math.tanh %286 : vector<2x16xf32>
    %288 = vector.extract_strided_slice %266 {offsets = [0, 0], sizes = [2, 16], strides = [1, 1]} : vector<2x48xf32> to vector<2x16xf32>
    %289 = vector.extract_strided_slice %262 {offsets = [0, 48], sizes = [2, 16], strides = [1, 1]} : vector<2x96xf32> to vector<2x16xf32>
    %290 = arith.addf %288, %289 : vector<2x16xf32>
    %291 = arith.negf %290 : vector<2x16xf32>
    %292 = math.exp %291 : vector<2x16xf32>
    %cst_65 = arith.constant 1.000000e+00 : f32
    %293 = vector.broadcast %cst_65 : f32 to vector<2x16xf32>
    %294 = arith.addf %293, %292 : vector<2x16xf32>
    %295 = arith.divf %293, %294 : vector<2x16xf32>
    %296 = vector.extract_strided_slice %266 {offsets = [0, 16], sizes = [2, 16], strides = [1, 1]} : vector<2x48xf32> to vector<2x16xf32>
    %297 = vector.extract_strided_slice %262 {offsets = [0, 64], sizes = [2, 16], strides = [1, 1]} : vector<2x96xf32> to vector<2x16xf32>
    %298 = arith.addf %296, %297 : vector<2x16xf32>
    %299 = arith.negf %298 : vector<2x16xf32>
    %300 = math.exp %299 : vector<2x16xf32>
    %cst_66 = arith.constant 1.000000e+00 : f32
    %301 = vector.broadcast %cst_66 : f32 to vector<2x16xf32>
    %302 = arith.addf %301, %300 : vector<2x16xf32>
    %303 = arith.divf %301, %302 : vector<2x16xf32>
    %304 = vector.extract_strided_slice %266 {offsets = [0, 32], sizes = [2, 16], strides = [1, 1]} : vector<2x48xf32> to vector<2x16xf32>
    %305 = vector.extract_strided_slice %262 {offsets = [0, 80], sizes = [2, 16], strides = [1, 1]} : vector<2x96xf32> to vector<2x16xf32>
    %306 = arith.mulf %295, %305 : vector<2x16xf32>
    %307 = arith.addf %304, %306 : vector<2x16xf32>
    %308 = math.tanh %307 : vector<2x16xf32>
    %cst_67 = arith.constant 1.000000e+00 : f32
    %309 = vector.broadcast %cst_67 : f32 to vector<2x16xf32>
    %310 = arith.subf %309, %282 : vector<2x16xf32>
    %311 = arith.mulf %310, %287 : vector<2x16xf32>
    %312 = vector.extract_strided_slice %259 {offsets = [0, 0], sizes = [2, 16], strides = [1, 1]} : vector<2x32xf32> to vector<2x16xf32>
    %313 = arith.mulf %282, %312 : vector<2x16xf32>
    %314 = arith.addf %311, %313 : vector<2x16xf32>
    %cst_68 = arith.constant 1.000000e+00 : f32
    %315 = vector.broadcast %cst_68 : f32 to vector<2x16xf32>
    %316 = arith.subf %315, %303 : vector<2x16xf32>
    %317 = arith.mulf %316, %308 : vector<2x16xf32>
    %318 = vector.extract_strided_slice %259 {offsets = [0, 16], sizes = [2, 16], strides = [1, 1]} : vector<2x32xf32> to vector<2x16xf32>
    %319 = arith.mulf %303, %318 : vector<2x16xf32>
    %320 = arith.addf %317, %319 : vector<2x16xf32>
    %321 = tpu.concatenate %314, %320 in 1 : vector<2x16xf32>, vector<2x16xf32> -> vector<2x32xf32>
    %cst_69 = arith.constant dense<0.000000e+00> : vector<2x96xf32>
    %322 = tpu.matmul %321, %66, %cst_69 {dimension_numbers = #tpu.dot_dimension_numbers<[1], [0], [0], [1], [0, 0, 1, 1], [], []>} : vector<2x32xf32>, vector<32x96xf32>, vector<2x96xf32> -> vector<2x96xf32>
    %323 = vector.broadcast %67 : vector<1x96xf32> to vector<2x96xf32>
    %324 = arith.addf %322, %323 : vector<2x96xf32>
    %325 = vector.extract_strided_slice %72 {offsets = [0, 4, 0], sizes = [2, 1, 48], strides = [1, 1, 1]} : vector<2x8x96xf32> to vector<2x1x48xf32>
    %326 = vector.shape_cast %325 : vector<2x1x48xf32> to vector<2x48xf32>
    %327 = vector.extract_strided_slice %72 {offsets = [0, 3, 48], sizes = [2, 1, 48], strides = [1, 1, 1]} : vector<2x8x96xf32> to vector<2x1x48xf32>
    %328 = vector.shape_cast %327 : vector<2x1x48xf32> to vector<2x48xf32>
    %329 = vector.extract_strided_slice %326 {offsets = [0, 0], sizes = [2, 16], strides = [1, 1]} : vector<2x48xf32> to vector<2x16xf32>
    %330 = vector.extract_strided_slice %324 {offsets = [0, 0], sizes = [2, 16], strides = [1, 1]} : vector<2x96xf32> to vector<2x16xf32>
    %331 = arith.addf %329, %330 : vector<2x16xf32>
    %332 = arith.negf %331 : vector<2x16xf32>
    %333 = math.exp %332 : vector<2x16xf32>
    %cst_70 = arith.constant 1.000000e+00 : f32
    %334 = vector.broadcast %cst_70 : f32 to vector<2x16xf32>
    %335 = arith.addf %334, %333 : vector<2x16xf32>
    %336 = arith.divf %334, %335 : vector<2x16xf32>
    %337 = vector.extract_strided_slice %326 {offsets = [0, 16], sizes = [2, 16], strides = [1, 1]} : vector<2x48xf32> to vector<2x16xf32>
    %338 = vector.extract_strided_slice %324 {offsets = [0, 16], sizes = [2, 16], strides = [1, 1]} : vector<2x96xf32> to vector<2x16xf32>
    %339 = arith.addf %337, %338 : vector<2x16xf32>
    %340 = arith.negf %339 : vector<2x16xf32>
    %341 = math.exp %340 : vector<2x16xf32>
    %cst_71 = arith.constant 1.000000e+00 : f32
    %342 = vector.broadcast %cst_71 : f32 to vector<2x16xf32>
    %343 = arith.addf %342, %341 : vector<2x16xf32>
    %344 = arith.divf %342, %343 : vector<2x16xf32>
    %345 = vector.extract_strided_slice %326 {offsets = [0, 32], sizes = [2, 16], strides = [1, 1]} : vector<2x48xf32> to vector<2x16xf32>
    %346 = vector.extract_strided_slice %324 {offsets = [0, 32], sizes = [2, 16], strides = [1, 1]} : vector<2x96xf32> to vector<2x16xf32>
    %347 = arith.mulf %336, %346 : vector<2x16xf32>
    %348 = arith.addf %345, %347 : vector<2x16xf32>
    %349 = math.tanh %348 : vector<2x16xf32>
    %350 = vector.extract_strided_slice %328 {offsets = [0, 0], sizes = [2, 16], strides = [1, 1]} : vector<2x48xf32> to vector<2x16xf32>
    %351 = vector.extract_strided_slice %324 {offsets = [0, 48], sizes = [2, 16], strides = [1, 1]} : vector<2x96xf32> to vector<2x16xf32>
    %352 = arith.addf %350, %351 : vector<2x16xf32>
    %353 = arith.negf %352 : vector<2x16xf32>
    %354 = math.exp %353 : vector<2x16xf32>
    %cst_72 = arith.constant 1.000000e+00 : f32
    %355 = vector.broadcast %cst_72 : f32 to vector<2x16xf32>
    %356 = arith.addf %355, %354 : vector<2x16xf32>
    %357 = arith.divf %355, %356 : vector<2x16xf32>
    %358 = vector.extract_strided_slice %328 {offsets = [0, 16], sizes = [2, 16], strides = [1, 1]} : vector<2x48xf32> to vector<2x16xf32>
    %359 = vector.extract_strided_slice %324 {offsets = [0, 64], sizes = [2, 16], strides = [1, 1]} : vector<2x96xf32> to vector<2x16xf32>
    %360 = arith.addf %358, %359 : vector<2x16xf32>
    %361 = arith.negf %360 : vector<2x16xf32>
    %362 = math.exp %361 : vector<2x16xf32>
    %cst_73 = arith.constant 1.000000e+00 : f32
    %363 = vector.broadcast %cst_73 : f32 to vector<2x16xf32>
    %364 = arith.addf %363, %362 : vector<2x16xf32>
    %365 = arith.divf %363, %364 : vector<2x16xf32>
    %366 = vector.extract_strided_slice %328 {offsets = [0, 32], sizes = [2, 16], strides = [1, 1]} : vector<2x48xf32> to vector<2x16xf32>
    %367 = vector.extract_strided_slice %324 {offsets = [0, 80], sizes = [2, 16], strides = [1, 1]} : vector<2x96xf32> to vector<2x16xf32>
    %368 = arith.mulf %357, %367 : vector<2x16xf32>
    %369 = arith.addf %366, %368 : vector<2x16xf32>
    %370 = math.tanh %369 : vector<2x16xf32>
    %cst_74 = arith.constant 1.000000e+00 : f32
    %371 = vector.broadcast %cst_74 : f32 to vector<2x16xf32>
    %372 = arith.subf %371, %344 : vector<2x16xf32>
    %373 = arith.mulf %372, %349 : vector<2x16xf32>
    %374 = vector.extract_strided_slice %321 {offsets = [0, 0], sizes = [2, 16], strides = [1, 1]} : vector<2x32xf32> to vector<2x16xf32>
    %375 = arith.mulf %344, %374 : vector<2x16xf32>
    %376 = arith.addf %373, %375 : vector<2x16xf32>
    %cst_75 = arith.constant 1.000000e+00 : f32
    %377 = vector.broadcast %cst_75 : f32 to vector<2x16xf32>
    %378 = arith.subf %377, %365 : vector<2x16xf32>
    %379 = arith.mulf %378, %370 : vector<2x16xf32>
    %380 = vector.extract_strided_slice %321 {offsets = [0, 16], sizes = [2, 16], strides = [1, 1]} : vector<2x32xf32> to vector<2x16xf32>
    %381 = arith.mulf %365, %380 : vector<2x16xf32>
    %382 = arith.addf %379, %381 : vector<2x16xf32>
    %383 = tpu.concatenate %376, %382 in 1 : vector<2x16xf32>, vector<2x16xf32> -> vector<2x32xf32>
    %cst_76 = arith.constant dense<0.000000e+00> : vector<2x96xf32>
    %384 = tpu.matmul %383, %66, %cst_76 {dimension_numbers = #tpu.dot_dimension_numbers<[1], [0], [0], [1], [0, 0, 1, 1], [], []>} : vector<2x32xf32>, vector<32x96xf32>, vector<2x96xf32> -> vector<2x96xf32>
    %385 = vector.broadcast %67 : vector<1x96xf32> to vector<2x96xf32>
    %386 = arith.addf %384, %385 : vector<2x96xf32>
    %387 = vector.extract_strided_slice %72 {offsets = [0, 5, 0], sizes = [2, 1, 48], strides = [1, 1, 1]} : vector<2x8x96xf32> to vector<2x1x48xf32>
    %388 = vector.shape_cast %387 : vector<2x1x48xf32> to vector<2x48xf32>
    %389 = vector.extract_strided_slice %72 {offsets = [0, 2, 48], sizes = [2, 1, 48], strides = [1, 1, 1]} : vector<2x8x96xf32> to vector<2x1x48xf32>
    %390 = vector.shape_cast %389 : vector<2x1x48xf32> to vector<2x48xf32>
    %391 = vector.extract_strided_slice %388 {offsets = [0, 0], sizes = [2, 16], strides = [1, 1]} : vector<2x48xf32> to vector<2x16xf32>
    %392 = vector.extract_strided_slice %386 {offsets = [0, 0], sizes = [2, 16], strides = [1, 1]} : vector<2x96xf32> to vector<2x16xf32>
    %393 = arith.addf %391, %392 : vector<2x16xf32>
    %394 = arith.negf %393 : vector<2x16xf32>
    %395 = math.exp %394 : vector<2x16xf32>
    %cst_77 = arith.constant 1.000000e+00 : f32
    %396 = vector.broadcast %cst_77 : f32 to vector<2x16xf32>
    %397 = arith.addf %396, %395 : vector<2x16xf32>
    %398 = arith.divf %396, %397 : vector<2x16xf32>
    %399 = vector.extract_strided_slice %388 {offsets = [0, 16], sizes = [2, 16], strides = [1, 1]} : vector<2x48xf32> to vector<2x16xf32>
    %400 = vector.extract_strided_slice %386 {offsets = [0, 16], sizes = [2, 16], strides = [1, 1]} : vector<2x96xf32> to vector<2x16xf32>
    %401 = arith.addf %399, %400 : vector<2x16xf32>
    %402 = arith.negf %401 : vector<2x16xf32>
    %403 = math.exp %402 : vector<2x16xf32>
    %cst_78 = arith.constant 1.000000e+00 : f32
    %404 = vector.broadcast %cst_78 : f32 to vector<2x16xf32>
    %405 = arith.addf %404, %403 : vector<2x16xf32>
    %406 = arith.divf %404, %405 : vector<2x16xf32>
    %407 = vector.extract_strided_slice %388 {offsets = [0, 32], sizes = [2, 16], strides = [1, 1]} : vector<2x48xf32> to vector<2x16xf32>
    %408 = vector.extract_strided_slice %386 {offsets = [0, 32], sizes = [2, 16], strides = [1, 1]} : vector<2x96xf32> to vector<2x16xf32>
    %409 = arith.mulf %398, %408 : vector<2x16xf32>
    %410 = arith.addf %407, %409 : vector<2x16xf32>
    %411 = math.tanh %410 : vector<2x16xf32>
    %412 = vector.extract_strided_slice %390 {offsets = [0, 0], sizes = [2, 16], strides = [1, 1]} : vector<2x48xf32> to vector<2x16xf32>
    %413 = vector.extract_strided_slice %386 {offsets = [0, 48], sizes = [2, 16], strides = [1, 1]} : vector<2x96xf32> to vector<2x16xf32>
    %414 = arith.addf %412, %413 : vector<2x16xf32>
    %415 = arith.negf %414 : vector<2x16xf32>
    %416 = math.exp %415 : vector<2x16xf32>
    %cst_79 = arith.constant 1.000000e+00 : f32
    %417 = vector.broadcast %cst_79 : f32 to vector<2x16xf32>
    %418 = arith.addf %417, %416 : vector<2x16xf32>
    %419 = arith.divf %417, %418 : vector<2x16xf32>
    %420 = vector.extract_strided_slice %390 {offsets = [0, 16], sizes = [2, 16], strides = [1, 1]} : vector<2x48xf32> to vector<2x16xf32>
    %421 = vector.extract_strided_slice %386 {offsets = [0, 64], sizes = [2, 16], strides = [1, 1]} : vector<2x96xf32> to vector<2x16xf32>
    %422 = arith.addf %420, %421 : vector<2x16xf32>
    %423 = arith.negf %422 : vector<2x16xf32>
    %424 = math.exp %423 : vector<2x16xf32>
    %cst_80 = arith.constant 1.000000e+00 : f32
    %425 = vector.broadcast %cst_80 : f32 to vector<2x16xf32>
    %426 = arith.addf %425, %424 : vector<2x16xf32>
    %427 = arith.divf %425, %426 : vector<2x16xf32>
    %428 = vector.extract_strided_slice %390 {offsets = [0, 32], sizes = [2, 16], strides = [1, 1]} : vector<2x48xf32> to vector<2x16xf32>
    %429 = vector.extract_strided_slice %386 {offsets = [0, 80], sizes = [2, 16], strides = [1, 1]} : vector<2x96xf32> to vector<2x16xf32>
    %430 = arith.mulf %419, %429 : vector<2x16xf32>
    %431 = arith.addf %428, %430 : vector<2x16xf32>
    %432 = math.tanh %431 : vector<2x16xf32>
    %cst_81 = arith.constant 1.000000e+00 : f32
    %433 = vector.broadcast %cst_81 : f32 to vector<2x16xf32>
    %434 = arith.subf %433, %406 : vector<2x16xf32>
    %435 = arith.mulf %434, %411 : vector<2x16xf32>
    %436 = vector.extract_strided_slice %383 {offsets = [0, 0], sizes = [2, 16], strides = [1, 1]} : vector<2x32xf32> to vector<2x16xf32>
    %437 = arith.mulf %406, %436 : vector<2x16xf32>
    %438 = arith.addf %435, %437 : vector<2x16xf32>
    %cst_82 = arith.constant 1.000000e+00 : f32
    %439 = vector.broadcast %cst_82 : f32 to vector<2x16xf32>
    %440 = arith.subf %439, %427 : vector<2x16xf32>
    %441 = arith.mulf %440, %432 : vector<2x16xf32>
    %442 = vector.extract_strided_slice %383 {offsets = [0, 16], sizes = [2, 16], strides = [1, 1]} : vector<2x32xf32> to vector<2x16xf32>
    %443 = arith.mulf %427, %442 : vector<2x16xf32>
    %444 = arith.addf %441, %443 : vector<2x16xf32>
    %445 = tpu.concatenate %438, %444 in 1 : vector<2x16xf32>, vector<2x16xf32> -> vector<2x32xf32>
    %cst_83 = arith.constant dense<0.000000e+00> : vector<2x96xf32>
    %446 = tpu.matmul %445, %66, %cst_83 {dimension_numbers = #tpu.dot_dimension_numbers<[1], [0], [0], [1], [0, 0, 1, 1], [], []>} : vector<2x32xf32>, vector<32x96xf32>, vector<2x96xf32> -> vector<2x96xf32>
    %447 = vector.broadcast %67 : vector<1x96xf32> to vector<2x96xf32>
    %448 = arith.addf %446, %447 : vector<2x96xf32>
    %449 = vector.extract_strided_slice %72 {offsets = [0, 6, 0], sizes = [2, 1, 48], strides = [1, 1, 1]} : vector<2x8x96xf32> to vector<2x1x48xf32>
    %450 = vector.shape_cast %449 : vector<2x1x48xf32> to vector<2x48xf32>
    %451 = vector.extract_strided_slice %72 {offsets = [0, 1, 48], sizes = [2, 1, 48], strides = [1, 1, 1]} : vector<2x8x96xf32> to vector<2x1x48xf32>
    %452 = vector.shape_cast %451 : vector<2x1x48xf32> to vector<2x48xf32>
    %453 = vector.extract_strided_slice %450 {offsets = [0, 0], sizes = [2, 16], strides = [1, 1]} : vector<2x48xf32> to vector<2x16xf32>
    %454 = vector.extract_strided_slice %448 {offsets = [0, 0], sizes = [2, 16], strides = [1, 1]} : vector<2x96xf32> to vector<2x16xf32>
    %455 = arith.addf %453, %454 : vector<2x16xf32>
    %456 = arith.negf %455 : vector<2x16xf32>
    %457 = math.exp %456 : vector<2x16xf32>
    %cst_84 = arith.constant 1.000000e+00 : f32
    %458 = vector.broadcast %cst_84 : f32 to vector<2x16xf32>
    %459 = arith.addf %458, %457 : vector<2x16xf32>
    %460 = arith.divf %458, %459 : vector<2x16xf32>
    %461 = vector.extract_strided_slice %450 {offsets = [0, 16], sizes = [2, 16], strides = [1, 1]} : vector<2x48xf32> to vector<2x16xf32>
    %462 = vector.extract_strided_slice %448 {offsets = [0, 16], sizes = [2, 16], strides = [1, 1]} : vector<2x96xf32> to vector<2x16xf32>
    %463 = arith.addf %461, %462 : vector<2x16xf32>
    %464 = arith.negf %463 : vector<2x16xf32>
    %465 = math.exp %464 : vector<2x16xf32>
    %cst_85 = arith.constant 1.000000e+00 : f32
    %466 = vector.broadcast %cst_85 : f32 to vector<2x16xf32>
    %467 = arith.addf %466, %465 : vector<2x16xf32>
    %468 = arith.divf %466, %467 : vector<2x16xf32>
    %469 = vector.extract_strided_slice %450 {offsets = [0, 32], sizes = [2, 16], strides = [1, 1]} : vector<2x48xf32> to vector<2x16xf32>
    %470 = vector.extract_strided_slice %448 {offsets = [0, 32], sizes = [2, 16], strides = [1, 1]} : vector<2x96xf32> to vector<2x16xf32>
    %471 = arith.mulf %460, %470 : vector<2x16xf32>
    %472 = arith.addf %469, %471 : vector<2x16xf32>
    %473 = math.tanh %472 : vector<2x16xf32>
    %474 = vector.extract_strided_slice %452 {offsets = [0, 0], sizes = [2, 16], strides = [1, 1]} : vector<2x48xf32> to vector<2x16xf32>
    %475 = vector.extract_strided_slice %448 {offsets = [0, 48], sizes = [2, 16], strides = [1, 1]} : vector<2x96xf32> to vector<2x16xf32>
    %476 = arith.addf %474, %475 : vector<2x16xf32>
    %477 = arith.negf %476 : vector<2x16xf32>
    %478 = math.exp %477 : vector<2x16xf32>
    %cst_86 = arith.constant 1.000000e+00 : f32
    %479 = vector.broadcast %cst_86 : f32 to vector<2x16xf32>
    %480 = arith.addf %479, %478 : vector<2x16xf32>
    %481 = arith.divf %479, %480 : vector<2x16xf32>
    %482 = vector.extract_strided_slice %452 {offsets = [0, 16], sizes = [2, 16], strides = [1, 1]} : vector<2x48xf32> to vector<2x16xf32>
    %483 = vector.extract_strided_slice %448 {offsets = [0, 64], sizes = [2, 16], strides = [1, 1]} : vector<2x96xf32> to vector<2x16xf32>
    %484 = arith.addf %482, %483 : vector<2x16xf32>
    %485 = arith.negf %484 : vector<2x16xf32>
    %486 = math.exp %485 : vector<2x16xf32>
    %cst_87 = arith.constant 1.000000e+00 : f32
    %487 = vector.broadcast %cst_87 : f32 to vector<2x16xf32>
    %488 = arith.addf %487, %486 : vector<2x16xf32>
    %489 = arith.divf %487, %488 : vector<2x16xf32>
    %490 = vector.extract_strided_slice %452 {offsets = [0, 32], sizes = [2, 16], strides = [1, 1]} : vector<2x48xf32> to vector<2x16xf32>
    %491 = vector.extract_strided_slice %448 {offsets = [0, 80], sizes = [2, 16], strides = [1, 1]} : vector<2x96xf32> to vector<2x16xf32>
    %492 = arith.mulf %481, %491 : vector<2x16xf32>
    %493 = arith.addf %490, %492 : vector<2x16xf32>
    %494 = math.tanh %493 : vector<2x16xf32>
    %cst_88 = arith.constant 1.000000e+00 : f32
    %495 = vector.broadcast %cst_88 : f32 to vector<2x16xf32>
    %496 = arith.subf %495, %468 : vector<2x16xf32>
    %497 = arith.mulf %496, %473 : vector<2x16xf32>
    %498 = vector.extract_strided_slice %445 {offsets = [0, 0], sizes = [2, 16], strides = [1, 1]} : vector<2x32xf32> to vector<2x16xf32>
    %499 = arith.mulf %468, %498 : vector<2x16xf32>
    %500 = arith.addf %497, %499 : vector<2x16xf32>
    %cst_89 = arith.constant 1.000000e+00 : f32
    %501 = vector.broadcast %cst_89 : f32 to vector<2x16xf32>
    %502 = arith.subf %501, %489 : vector<2x16xf32>
    %503 = arith.mulf %502, %494 : vector<2x16xf32>
    %504 = vector.extract_strided_slice %445 {offsets = [0, 16], sizes = [2, 16], strides = [1, 1]} : vector<2x32xf32> to vector<2x16xf32>
    %505 = arith.mulf %489, %504 : vector<2x16xf32>
    %506 = arith.addf %503, %505 : vector<2x16xf32>
    %507 = tpu.concatenate %500, %506 in 1 : vector<2x16xf32>, vector<2x16xf32> -> vector<2x32xf32>
    %cst_90 = arith.constant dense<0.000000e+00> : vector<2x96xf32>
    %508 = tpu.matmul %507, %66, %cst_90 {dimension_numbers = #tpu.dot_dimension_numbers<[1], [0], [0], [1], [0, 0, 1, 1], [], []>} : vector<2x32xf32>, vector<32x96xf32>, vector<2x96xf32> -> vector<2x96xf32>
    %509 = vector.broadcast %67 : vector<1x96xf32> to vector<2x96xf32>
    %510 = arith.addf %508, %509 : vector<2x96xf32>
    %511 = vector.extract_strided_slice %72 {offsets = [0, 7, 0], sizes = [2, 1, 48], strides = [1, 1, 1]} : vector<2x8x96xf32> to vector<2x1x48xf32>
    %512 = vector.shape_cast %511 : vector<2x1x48xf32> to vector<2x48xf32>
    %513 = vector.extract_strided_slice %72 {offsets = [0, 0, 48], sizes = [2, 1, 48], strides = [1, 1, 1]} : vector<2x8x96xf32> to vector<2x1x48xf32>
    %514 = vector.shape_cast %513 : vector<2x1x48xf32> to vector<2x48xf32>
    %515 = vector.extract_strided_slice %512 {offsets = [0, 0], sizes = [2, 16], strides = [1, 1]} : vector<2x48xf32> to vector<2x16xf32>
    %516 = vector.extract_strided_slice %510 {offsets = [0, 0], sizes = [2, 16], strides = [1, 1]} : vector<2x96xf32> to vector<2x16xf32>
    %517 = arith.addf %515, %516 : vector<2x16xf32>
    %518 = arith.negf %517 : vector<2x16xf32>
    %519 = math.exp %518 : vector<2x16xf32>
    %cst_91 = arith.constant 1.000000e+00 : f32
    %520 = vector.broadcast %cst_91 : f32 to vector<2x16xf32>
    %521 = arith.addf %520, %519 : vector<2x16xf32>
    %522 = arith.divf %520, %521 : vector<2x16xf32>
    %523 = vector.extract_strided_slice %512 {offsets = [0, 16], sizes = [2, 16], strides = [1, 1]} : vector<2x48xf32> to vector<2x16xf32>
    %524 = vector.extract_strided_slice %510 {offsets = [0, 16], sizes = [2, 16], strides = [1, 1]} : vector<2x96xf32> to vector<2x16xf32>
    %525 = arith.addf %523, %524 : vector<2x16xf32>
    %526 = arith.negf %525 : vector<2x16xf32>
    %527 = math.exp %526 : vector<2x16xf32>
    %cst_92 = arith.constant 1.000000e+00 : f32
    %528 = vector.broadcast %cst_92 : f32 to vector<2x16xf32>
    %529 = arith.addf %528, %527 : vector<2x16xf32>
    %530 = arith.divf %528, %529 : vector<2x16xf32>
    %531 = vector.extract_strided_slice %512 {offsets = [0, 32], sizes = [2, 16], strides = [1, 1]} : vector<2x48xf32> to vector<2x16xf32>
    %532 = vector.extract_strided_slice %510 {offsets = [0, 32], sizes = [2, 16], strides = [1, 1]} : vector<2x96xf32> to vector<2x16xf32>
    %533 = arith.mulf %522, %532 : vector<2x16xf32>
    %534 = arith.addf %531, %533 : vector<2x16xf32>
    %535 = math.tanh %534 : vector<2x16xf32>
    %536 = vector.extract_strided_slice %514 {offsets = [0, 0], sizes = [2, 16], strides = [1, 1]} : vector<2x48xf32> to vector<2x16xf32>
    %537 = vector.extract_strided_slice %510 {offsets = [0, 48], sizes = [2, 16], strides = [1, 1]} : vector<2x96xf32> to vector<2x16xf32>
    %538 = arith.addf %536, %537 : vector<2x16xf32>
    %539 = arith.negf %538 : vector<2x16xf32>
    %540 = math.exp %539 : vector<2x16xf32>
    %cst_93 = arith.constant 1.000000e+00 : f32
    %541 = vector.broadcast %cst_93 : f32 to vector<2x16xf32>
    %542 = arith.addf %541, %540 : vector<2x16xf32>
    %543 = arith.divf %541, %542 : vector<2x16xf32>
    %544 = vector.extract_strided_slice %514 {offsets = [0, 16], sizes = [2, 16], strides = [1, 1]} : vector<2x48xf32> to vector<2x16xf32>
    %545 = vector.extract_strided_slice %510 {offsets = [0, 64], sizes = [2, 16], strides = [1, 1]} : vector<2x96xf32> to vector<2x16xf32>
    %546 = arith.addf %544, %545 : vector<2x16xf32>
    %547 = arith.negf %546 : vector<2x16xf32>
    %548 = math.exp %547 : vector<2x16xf32>
    %cst_94 = arith.constant 1.000000e+00 : f32
    %549 = vector.broadcast %cst_94 : f32 to vector<2x16xf32>
    %550 = arith.addf %549, %548 : vector<2x16xf32>
    %551 = arith.divf %549, %550 : vector<2x16xf32>
    %552 = vector.extract_strided_slice %514 {offsets = [0, 32], sizes = [2, 16], strides = [1, 1]} : vector<2x48xf32> to vector<2x16xf32>
    %553 = vector.extract_strided_slice %510 {offsets = [0, 80], sizes = [2, 16], strides = [1, 1]} : vector<2x96xf32> to vector<2x16xf32>
    %554 = arith.mulf %543, %553 : vector<2x16xf32>
    %555 = arith.addf %552, %554 : vector<2x16xf32>
    %556 = math.tanh %555 : vector<2x16xf32>
    %cst_95 = arith.constant 1.000000e+00 : f32
    %557 = vector.broadcast %cst_95 : f32 to vector<2x16xf32>
    %558 = arith.subf %557, %530 : vector<2x16xf32>
    %559 = arith.mulf %558, %535 : vector<2x16xf32>
    %560 = vector.extract_strided_slice %507 {offsets = [0, 0], sizes = [2, 16], strides = [1, 1]} : vector<2x32xf32> to vector<2x16xf32>
    %561 = arith.mulf %530, %560 : vector<2x16xf32>
    %562 = arith.addf %559, %561 : vector<2x16xf32>
    %cst_96 = arith.constant 1.000000e+00 : f32
    %563 = vector.broadcast %cst_96 : f32 to vector<2x16xf32>
    %564 = arith.subf %563, %551 : vector<2x16xf32>
    %565 = arith.mulf %564, %556 : vector<2x16xf32>
    %566 = vector.extract_strided_slice %507 {offsets = [0, 16], sizes = [2, 16], strides = [1, 1]} : vector<2x32xf32> to vector<2x16xf32>
    %567 = arith.mulf %551, %566 : vector<2x16xf32>
    %568 = arith.addf %565, %567 : vector<2x16xf32>
    %569 = tpu.concatenate %128, %568 in 1 : vector<2x16xf32>, vector<2x16xf32> -> vector<2x32xf32>
    %570 = vector.shape_cast %569 : vector<2x32xf32> to vector<2x1x32xf32>
    %571 = tpu.concatenate %190, %506 in 1 : vector<2x16xf32>, vector<2x16xf32> -> vector<2x32xf32>
    %572 = vector.shape_cast %571 : vector<2x32xf32> to vector<2x1x32xf32>
    %573 = tpu.concatenate %252, %444 in 1 : vector<2x16xf32>, vector<2x16xf32> -> vector<2x32xf32>
    %574 = vector.shape_cast %573 : vector<2x32xf32> to vector<2x1x32xf32>
    %575 = tpu.concatenate %314, %382 in 1 : vector<2x16xf32>, vector<2x16xf32> -> vector<2x32xf32>
    %576 = vector.shape_cast %575 : vector<2x32xf32> to vector<2x1x32xf32>
    %577 = tpu.concatenate %376, %320 in 1 : vector<2x16xf32>, vector<2x16xf32> -> vector<2x32xf32>
    %578 = vector.shape_cast %577 : vector<2x32xf32> to vector<2x1x32xf32>
    %579 = tpu.concatenate %438, %258 in 1 : vector<2x16xf32>, vector<2x16xf32> -> vector<2x32xf32>
    %580 = vector.shape_cast %579 : vector<2x32xf32> to vector<2x1x32xf32>
    %581 = tpu.concatenate %500, %196 in 1 : vector<2x16xf32>, vector<2x16xf32> -> vector<2x32xf32>
    %582 = vector.shape_cast %581 : vector<2x32xf32> to vector<2x1x32xf32>
    %583 = tpu.concatenate %562, %134 in 1 : vector<2x16xf32>, vector<2x16xf32> -> vector<2x32xf32>
    %584 = vector.shape_cast %583 : vector<2x32xf32> to vector<2x1x32xf32>
    %585 = tpu.concatenate %570, %572, %574, %576, %578, %580, %582, %584 in 1 : vector<2x1x32xf32>, vector<2x1x32xf32>, vector<2x1x32xf32>, vector<2x1x32xf32>, vector<2x1x32xf32>, vector<2x1x32xf32>, vector<2x1x32xf32>, vector<2x1x32xf32> -> vector<2x8x32xf32>
    %c0_97 = arith.constant 0 : index
    %c0_98 = arith.constant 0 : index
    %c0_99 = arith.constant 0 : index
    %586 = vector.load %arg14[%c0_97, %c0_98, %c0_99] : memref<1x1x32xf32, #tpu.memory_space<vmem>>, vector<1x1x32xf32>
    %587 = vector.broadcast %586 : vector<1x1x32xf32> to vector<2x8x32xf32>
    %588 = arith.mulf %585, %587 : vector<2x8x32xf32>
    %cst_100 = arith.constant dense<0.000000e+00> : vector<2x8xf32>
    %589 = vector.multi_reduction <add>, %588, %cst_100 [2] : vector<2x8x32xf32> to vector<2x8xf32>
    %590 = vector.shape_cast %589 : vector<2x8xf32> to vector<2x8x1xf32>
    %c0_101 = arith.constant 0 : index
    %c0_102 = arith.constant 0 : index
    %c0_103 = arith.constant 0 : index
    %591 = vector.load %arg15[%c0_101, %c0_102, %c0_103] : memref<1x1x1xf32, #tpu.memory_space<vmem>>, vector<1x1x1xf32>
    %592 = vector.broadcast %591 : vector<1x1x1xf32> to vector<2x8x1xf32>
    %593 = arith.addf %590, %592 : vector<2x8x1xf32>
    %c0_104 = arith.constant 0 : index
    %c0_105 = arith.constant 0 : index
    %c0_106 = arith.constant 0 : index
    %594 = vector.load %arg33[%c0_104, %c0_105, %c0_106] : memref<2x8x1xf32, #tpu.memory_space<vmem>>, vector<2x8x1xf32>
    tpu.vector_store %arg33[%c0_104, %c0_105, %c0_106], %593 {strides = array<i32>} : memref<2x8x1xf32, #tpu.memory_space<vmem>>, vector<2x8x1xf32>,
    %c0_107 = arith.constant 0 : index
    %c0_108 = arith.constant 0 : index
    %595 = vector.load %arg16[%c0_107, %c0_108] : memref<128x64xf32, #tpu.memory_space<vmem>>, vector<128x64xf32>
    %c0_109 = arith.constant 0 : index
    %c0_110 = arith.constant 0 : index
    %596 = vector.load %arg17[%c0_109, %c0_110] : memref<1x64xf32, #tpu.memory_space<vmem>>, vector<1x64xf32>
    %c0_111 = arith.constant 0 : index
    %c0_112 = arith.constant 0 : index
    %597 = vector.load %arg18[%c0_111, %c0_112] : memref<1x64xf32, #tpu.memory_space<vmem>>, vector<1x64xf32>
    %cst_113 = arith.constant 0.000000e+00 : f32
    %598 = vector.broadcast %cst_113 : f32 to vector<2x2x32xf32>
    %cst_114 = arith.constant 0.000000e+00 : f32
    %599 = vector.broadcast %cst_114 : f32 to vector<2x1x32xf32>
    %600 = tpu.concatenate %598, %0, %599 in 1 : vector<2x2x32xf32>, vector<2x8x32xf32>, vector<2x1x32xf32> -> vector<2x11x32xf32>
    %601 = vector.extract_strided_slice %600 {offsets = [0, 0, 0], sizes = [2, 8, 32], strides = [1, 1, 1]} : vector<2x11x32xf32> to vector<2x8x32xf32>
    %602 = vector.extract_strided_slice %600 {offsets = [0, 1, 0], sizes = [2, 8, 32], strides = [1, 1, 1]} : vector<2x11x32xf32> to vector<2x8x32xf32>
    %603 = vector.extract_strided_slice %600 {offsets = [0, 2, 0], sizes = [2, 8, 32], strides = [1, 1, 1]} : vector<2x11x32xf32> to vector<2x8x32xf32>
    %604 = vector.extract_strided_slice %600 {offsets = [0, 3, 0], sizes = [2, 8, 32], strides = [1, 1, 1]} : vector<2x11x32xf32> to vector<2x8x32xf32>
    %605 = tpu.concatenate %601, %602, %603, %604 in 2 : vector<2x8x32xf32>, vector<2x8x32xf32>, vector<2x8x32xf32>, vector<2x8x32xf32> -> vector<2x8x128xf32>
    %606 = vector.shape_cast %605 : vector<2x8x128xf32> to vector<16x128xf32>
    %cst_115 = arith.constant dense<0.000000e+00> : vector<16x64xf32>
    %607 = tpu.matmul %606, %595, %cst_115 {dimension_numbers = #tpu.dot_dimension_numbers<[1], [0], [0], [1], [0, 0, 1, 1], [], []>} : vector<16x128xf32>, vector<128x64xf32>, vector<16x64xf32> -> vector<16x64xf32>
    %cst_116 = arith.constant 0.000000e+00 : f32
    %608 = vector.broadcast %cst_116 : f32 to vector<16x64xf32>
    %609 = arith.maximumf %607, %608 : vector<16x64xf32>
    %610 = vector.broadcast %596 : vector<1x64xf32> to vector<16x64xf32>
    %611 = arith.mulf %609, %610 : vector<16x64xf32>
    %612 = vector.broadcast %597 : vector<1x64xf32> to vector<16x64xf32>
    %613 = arith.addf %611, %612 : vector<16x64xf32>
    %614 = vector.shape_cast %613 : vector<16x64xf32> to vector<2x8x64xf32>
    %cst_117 = arith.constant 0xFF800000 : f32
    %615 = vector.broadcast %cst_117 : f32 to vector<2x1x64xf32>
    %616 = vector.extract_strided_slice %614 {offsets = [0, 0, 0], sizes = [2, 7, 64], strides = [1, 1, 1]} : vector<2x8x64xf32> to vector<2x7x64xf32>
    %617 = tpu.concatenate %615, %616 in 1 : vector<2x1x64xf32>, vector<2x7x64xf32> -> vector<2x8x64xf32>
    %618 = arith.maximumf %614, %617 : vector<2x8x64xf32>
    %c0_118 = arith.constant 0 : index
    %c0_119 = arith.constant 0 : index
    %619 = vector.load %arg19[%c0_118, %c0_119] : memref<192x16xf32, #tpu.memory_space<vmem>>, vector<192x16xf32>
    %c0_120 = arith.constant 0 : index
    %c0_121 = arith.constant 0 : index
    %620 = vector.load %arg20[%c0_120, %c0_121] : memref<1x16xf32, #tpu.memory_space<vmem>>, vector<1x16xf32>
    %c0_122 = arith.constant 0 : index
    %c0_123 = arith.constant 0 : index
    %621 = vector.load %arg21[%c0_122, %c0_123] : memref<1x16xf32, #tpu.memory_space<vmem>>, vector<1x16xf32>
    %cst_124 = arith.constant 0.000000e+00 : f32
    %622 = vector.broadcast %cst_124 : f32 to vector<2x1x64xf32>
    %cst_125 = arith.constant 0.000000e+00 : f32
    %623 = vector.broadcast %cst_125 : f32 to vector<2x1x64xf32>
    %624 = tpu.concatenate %622, %618, %623 in 1 : vector<2x1x64xf32>, vector<2x8x64xf32>, vector<2x1x64xf32> -> vector<2x10x64xf32>
    %625 = vector.extract_strided_slice %624 {offsets = [0, 0, 0], sizes = [2, 8, 64], strides = [1, 1, 1]} : vector<2x10x64xf32> to vector<2x8x64xf32>
    %626 = vector.extract_strided_slice %624 {offsets = [0, 1, 0], sizes = [2, 8, 64], strides = [1, 1, 1]} : vector<2x10x64xf32> to vector<2x8x64xf32>
    %627 = vector.extract_strided_slice %624 {offsets = [0, 2, 0], sizes = [2, 8, 64], strides = [1, 1, 1]} : vector<2x10x64xf32> to vector<2x8x64xf32>
    %628 = tpu.concatenate %625, %626, %627 in 2 : vector<2x8x64xf32>, vector<2x8x64xf32>, vector<2x8x64xf32> -> vector<2x8x192xf32>
    %629 = vector.shape_cast %628 : vector<2x8x192xf32> to vector<16x192xf32>
    %cst_126 = arith.constant dense<0.000000e+00> : vector<16x16xf32>
    %630 = tpu.matmul %629, %619, %cst_126 {dimension_numbers = #tpu.dot_dimension_numbers<[1], [0], [0], [1], [0, 0, 1, 1], [], []>} : vector<16x192xf32>, vector<192x16xf32>, vector<16x16xf32> -> vector<16x16xf32>
    %cst_127 = arith.constant 0.000000e+00 : f32
    %631 = vector.broadcast %cst_127 : f32 to vector<16x16xf32>
    %632 = arith.maximumf %630, %631 : vector<16x16xf32>
    %633 = vector.broadcast %620 : vector<1x16xf32> to vector<16x16xf32>
    %634 = arith.mulf %632, %633 : vector<16x16xf32>
    %635 = vector.broadcast %621 : vector<1x16xf32> to vector<16x16xf32>
    %636 = arith.addf %634, %635 : vector<16x16xf32>
    %637 = vector.shape_cast %636 : vector<16x16xf32> to vector<2x8x16xf32>
    %c0_128 = arith.constant 0 : index
    %c0_129 = arith.constant 0 : index
    %638 = vector.load %arg22[%c0_128, %c0_129] : memref<48x32xf32, #tpu.memory_space<vmem>>, vector<48x32xf32>
    %c0_130 = arith.constant 0 : index
    %c0_131 = arith.constant 0 : index
    %639 = vector.load %arg23[%c0_130, %c0_131] : memref<1x32xf32, #tpu.memory_space<vmem>>, vector<1x32xf32>
    %c0_132 = arith.constant 0 : index
    %c0_133 = arith.constant 0 : index
    %640 = vector.load %arg24[%c0_132, %c0_133] : memref<1x32xf32, #tpu.memory_space<vmem>>, vector<1x32xf32>
    %cst_134 = arith.constant 0.000000e+00 : f32
    %641 = vector.broadcast %cst_134 : f32 to vector<2x1x16xf32>
    %cst_135 = arith.constant 0.000000e+00 : f32
    %642 = vector.broadcast %cst_135 : f32 to vector<2x1x16xf32>
    %643 = tpu.concatenate %641, %637, %642 in 1 : vector<2x1x16xf32>, vector<2x8x16xf32>, vector<2x1x16xf32> -> vector<2x10x16xf32>
    %644 = vector.extract_strided_slice %643 {offsets = [0, 0, 0], sizes = [2, 8, 16], strides = [1, 1, 1]} : vector<2x10x16xf32> to vector<2x8x16xf32>
    %645 = vector.extract_strided_slice %643 {offsets = [0, 1, 0], sizes = [2, 8, 16], strides = [1, 1, 1]} : vector<2x10x16xf32> to vector<2x8x16xf32>
    %646 = vector.extract_strided_slice %643 {offsets = [0, 2, 0], sizes = [2, 8, 16], strides = [1, 1, 1]} : vector<2x10x16xf32> to vector<2x8x16xf32>
    %647 = tpu.concatenate %644, %645, %646 in 2 : vector<2x8x16xf32>, vector<2x8x16xf32>, vector<2x8x16xf32> -> vector<2x8x48xf32>
    %648 = vector.shape_cast %647 : vector<2x8x48xf32> to vector<16x48xf32>
    %cst_136 = arith.constant dense<0.000000e+00> : vector<16x32xf32>
    %649 = tpu.matmul %648, %638, %cst_136 {dimension_numbers = #tpu.dot_dimension_numbers<[1], [0], [0], [1], [0, 0, 1, 1], [], []>} : vector<16x48xf32>, vector<48x32xf32>, vector<16x32xf32> -> vector<16x32xf32>
    %650 = vector.broadcast %639 : vector<1x32xf32> to vector<16x32xf32>
    %651 = arith.mulf %649, %650 : vector<16x32xf32>
    %652 = vector.broadcast %640 : vector<1x32xf32> to vector<16x32xf32>
    %653 = arith.addf %651, %652 : vector<16x32xf32>
    %654 = vector.shape_cast %653 : vector<16x32xf32> to vector<2x8x32xf32>
    %655 = arith.addf %654, %0 : vector<2x8x32xf32>
    %656 = vector.shape_cast %655 : vector<2x8x32xf32> to vector<16x32xf32>
    %c0_137 = arith.constant 0 : index
    %c0_138 = arith.constant 0 : index
    %657 = vector.load %arg25[%c0_137, %c0_138] : memref<32x16xf32, #tpu.memory_space<vmem>>, vector<32x16xf32>
    %cst_139 = arith.constant dense<0.000000e+00> : vector<16x16xf32>
    %658 = tpu.matmul %656, %657, %cst_139 {dimension_numbers = #tpu.dot_dimension_numbers<[1], [0], [0], [1], [0, 0, 1, 1], [], []>} : vector<16x32xf32>, vector<32x16xf32>, vector<16x16xf32> -> vector<16x16xf32>
    %c0_140 = arith.constant 0 : index
    %c0_141 = arith.constant 0 : index
    %c0_142 = arith.constant 0 : index
    %659 = vector.load %arg26[%c0_140, %c0_141, %c0_142] : memref<2x16x32xf32, #tpu.memory_space<vmem>>, vector<1x16x32xf32>
    %660 = vector.shape_cast %659 : vector<1x16x32xf32> to vector<16x32xf32>
    %cst_143 = arith.constant dense<0.000000e+00> : vector<16x32xf32>
    %661 = tpu.matmul %658, %660, %cst_143 {dimension_numbers = #tpu.dot_dimension_numbers<[1], [0], [0], [1], [0, 0, 1, 1], [], []>} : vector<16x16xf32>, vector<16x32xf32>, vector<16x32xf32> -> vector<16x32xf32>
    %c0_144 = arith.constant 0 : index
    %c0_145 = arith.constant 0 : index
    %c0_146 = arith.constant 0 : index
    %662 = vector.load %arg27[%c0_144, %c0_145, %c0_146] : memref<2x1x32xf32, #tpu.memory_space<vmem>>, vector<1x1x32xf32>
    %663 = vector.shape_cast %662 : vector<1x1x32xf32> to vector<1x32xf32>
    %664 = vector.broadcast %663 : vector<1x32xf32> to vector<16x32xf32>
    %665 = arith.addf %661, %664 : vector<16x32xf32>
    %666 = vector.extract_strided_slice %665 {offsets = [0, 16], sizes = [16, 16], strides = [1, 1]} : vector<16x32xf32> to vector<16x16xf32>
    %667 = arith.negf %666 : vector<16x16xf32>
    %668 = math.exp %667 : vector<16x16xf32>
    %cst_147 = arith.constant 1.000000e+00 : f32
    %669 = vector.broadcast %cst_147 : f32 to vector<16x16xf32>
    %670 = arith.addf %669, %668 : vector<16x16xf32>
    %671 = arith.divf %669, %670 : vector<16x16xf32>
    %672 = vector.extract_strided_slice %665 {offsets = [0, 0], sizes = [16, 16], strides = [1, 1]} : vector<16x32xf32> to vector<16x16xf32>
    %cst_148 = arith.constant 0.000000e+00 : f32
    %673 = vector.broadcast %cst_148 : f32 to vector<16x16xf32>
    %674 = arith.maximumf %672, %673 : vector<16x16xf32>
    %675 = arith.mulf %671, %674 : vector<16x16xf32>
    %cst_149 = arith.constant 1.000000e+00 : f32
    %676 = vector.broadcast %cst_149 : f32 to vector<16x16xf32>
    %677 = arith.subf %676, %671 : vector<16x16xf32>
    %678 = arith.mulf %677, %658 : vector<16x16xf32>
    %679 = arith.addf %675, %678 : vector<16x16xf32>
    %c1 = arith.constant 1 : index
    %c0_150 = arith.constant 0 : index
    %c0_151 = arith.constant 0 : index
    %680 = vector.load %arg26[%c1, %c0_150, %c0_151] : memref<2x16x32xf32, #tpu.memory_space<vmem>>, vector<1x16x32xf32>
    %681 = vector.shape_cast %680 : vector<1x16x32xf32> to vector<16x32xf32>
    %cst_152 = arith.constant dense<0.000000e+00> : vector<16x32xf32>
    %682 = tpu.matmul %679, %681, %cst_152 {dimension_numbers = #tpu.dot_dimension_numbers<[1], [0], [0], [1], [0, 0, 1, 1], [], []>} : vector<16x16xf32>, vector<16x32xf32>, vector<16x32xf32> -> vector<16x32xf32>
    %c1_153 = arith.constant 1 : index
    %c0_154 = arith.constant 0 : index
    %c0_155 = arith.constant 0 : index
    %683 = vector.load %arg27[%c1_153, %c0_154, %c0_155] : memref<2x1x32xf32, #tpu.memory_space<vmem>>, vector<1x1x32xf32>
    %684 = vector.shape_cast %683 : vector<1x1x32xf32> to vector<1x32xf32>
    %685 = vector.broadcast %684 : vector<1x32xf32> to vector<16x32xf32>
    %686 = arith.addf %682, %685 : vector<16x32xf32>
    %687 = vector.extract_strided_slice %686 {offsets = [0, 16], sizes = [16, 16], strides = [1, 1]} : vector<16x32xf32> to vector<16x16xf32>
    %688 = arith.negf %687 : vector<16x16xf32>
    %689 = math.exp %688 : vector<16x16xf32>
    %cst_156 = arith.constant 1.000000e+00 : f32
    %690 = vector.broadcast %cst_156 : f32 to vector<16x16xf32>
    %691 = arith.addf %690, %689 : vector<16x16xf32>
    %692 = arith.divf %690, %691 : vector<16x16xf32>
    %693 = vector.extract_strided_slice %686 {offsets = [0, 0], sizes = [16, 16], strides = [1, 1]} : vector<16x32xf32> to vector<16x16xf32>
    %cst_157 = arith.constant 0.000000e+00 : f32
    %694 = vector.broadcast %cst_157 : f32 to vector<16x16xf32>
    %695 = arith.maximumf %693, %694 : vector<16x16xf32>
    %696 = arith.mulf %692, %695 : vector<16x16xf32>
    %cst_158 = arith.constant 1.000000e+00 : f32
    %697 = vector.broadcast %cst_158 : f32 to vector<16x16xf32>
    %698 = arith.subf %697, %692 : vector<16x16xf32>
    %699 = arith.mulf %698, %679 : vector<16x16xf32>
    %700 = arith.addf %696, %699 : vector<16x16xf32>
    %701 = vector.shape_cast %700 : vector<16x16xf32> to vector<2x8x16xf32>
    %c0_159 = arith.constant 0 : index
    %c0_160 = arith.constant 0 : index
    %702 = vector.load %arg28[%c0_159, %c0_160] : memref<16x48xf32, #tpu.memory_space<vmem>>, vector<16x48xf32>
    %c0_161 = arith.constant 0 : index
    %c0_162 = arith.constant 0 : index
    %703 = vector.load %arg29[%c0_161, %c0_162] : memref<1x48xf32, #tpu.memory_space<vmem>>, vector<1x48xf32>
    %c0_163 = arith.constant 0 : index
    %c0_164 = arith.constant 0 : index
    %704 = vector.load %arg30[%c0_163, %c0_164] : memref<16x48xf32, #tpu.memory_space<vmem>>, vector<16x48xf32>
    %c0_165 = arith.constant 0 : index
    %c0_166 = arith.constant 0 : index
    %705 = vector.load %arg31[%c0_165, %c0_166] : memref<1x48xf32, #tpu.memory_space<vmem>>, vector<1x48xf32>
    %706 = vector.shape_cast %701 : vector<2x8x16xf32> to vector<16x16xf32>
    %cst_167 = arith.constant dense<0.000000e+00> : vector<16x48xf32>
    %707 = tpu.matmul %706, %702, %cst_167 {dimension_numbers = #tpu.dot_dimension_numbers<[1], [0], [0], [1], [0, 0, 1, 1], [], []>} : vector<16x16xf32>, vector<16x48xf32>, vector<16x48xf32> -> vector<16x48xf32>
    %708 = vector.broadcast %703 : vector<1x48xf32> to vector<16x48xf32>
    %709 = arith.addf %707, %708 : vector<16x48xf32>
    %710 = vector.shape_cast %709 : vector<16x48xf32> to vector<2x8x48xf32>
    %cst_168 = arith.constant 0.000000e+00 : f32
    %711 = vector.broadcast %cst_168 : f32 to vector<2x16xf32>
    %cst_169 = arith.constant dense<0.000000e+00> : vector<2x48xf32>
    %712 = tpu.matmul %711, %704, %cst_169 {dimension_numbers = #tpu.dot_dimension_numbers<[1], [0], [0], [1], [0, 0, 1, 1], [], []>} : vector<2x16xf32>, vector<16x48xf32>, vector<2x48xf32> -> vector<2x48xf32>
    %713 = vector.broadcast %705 : vector<1x48xf32> to vector<2x48xf32>
    %714 = arith.addf %712, %713 : vector<2x48xf32>
    %715 = vector.extract_strided_slice %710 {offsets = [0, 0, 0], sizes = [2, 1, 24], strides = [1, 1, 1]} : vector<2x8x48xf32> to vector<2x1x24xf32>
    %716 = vector.shape_cast %715 : vector<2x1x24xf32> to vector<2x24xf32>
    %717 = vector.extract_strided_slice %710 {offsets = [0, 7, 24], sizes = [2, 1, 24], strides = [1, 1, 1]} : vector<2x8x48xf32> to vector<2x1x24xf32>
    %718 = vector.shape_cast %717 : vector<2x1x24xf32> to vector<2x24xf32>
    %719 = vector.extract_strided_slice %716 {offsets = [0, 0], sizes = [2, 8], strides = [1, 1]} : vector<2x24xf32> to vector<2x8xf32>
    %720 = vector.extract_strided_slice %714 {offsets = [0, 0], sizes = [2, 8], strides = [1, 1]} : vector<2x48xf32> to vector<2x8xf32>
    %721 = arith.addf %719, %720 : vector<2x8xf32>
    %722 = arith.negf %721 : vector<2x8xf32>
    %723 = math.exp %722 : vector<2x8xf32>
    %cst_170 = arith.constant 1.000000e+00 : f32
    %724 = vector.broadcast %cst_170 : f32 to vector<2x8xf32>
    %725 = arith.addf %724, %723 : vector<2x8xf32>
    %726 = arith.divf %724, %725 : vector<2x8xf32>
    %727 = vector.extract_strided_slice %716 {offsets = [0, 8], sizes = [2, 8], strides = [1, 1]} : vector<2x24xf32> to vector<2x8xf32>
    %728 = vector.extract_strided_slice %714 {offsets = [0, 8], sizes = [2, 8], strides = [1, 1]} : vector<2x48xf32> to vector<2x8xf32>
    %729 = arith.addf %727, %728 : vector<2x8xf32>
    %730 = arith.negf %729 : vector<2x8xf32>
    %731 = math.exp %730 : vector<2x8xf32>
    %cst_171 = arith.constant 1.000000e+00 : f32
    %732 = vector.broadcast %cst_171 : f32 to vector<2x8xf32>
    %733 = arith.addf %732, %731 : vector<2x8xf32>
    %734 = arith.divf %732, %733 : vector<2x8xf32>
    %735 = vector.extract_strided_slice %716 {offsets = [0, 16], sizes = [2, 8], strides = [1, 1]} : vector<2x24xf32> to vector<2x8xf32>
    %736 = vector.extract_strided_slice %714 {offsets = [0, 16], sizes = [2, 8], strides = [1, 1]} : vector<2x48xf32> to vector<2x8xf32>
    %737 = arith.mulf %726, %736 : vector<2x8xf32>
    %738 = arith.addf %735, %737 : vector<2x8xf32>
    %739 = math.tanh %738 : vector<2x8xf32>
    %740 = vector.extract_strided_slice %718 {offsets = [0, 0], sizes = [2, 8], strides = [1, 1]} : vector<2x24xf32> to vector<2x8xf32>
    %741 = vector.extract_strided_slice %714 {offsets = [0, 24], sizes = [2, 8], strides = [1, 1]} : vector<2x48xf32> to vector<2x8xf32>
    %742 = arith.addf %740, %741 : vector<2x8xf32>
    %743 = arith.negf %742 : vector<2x8xf32>
    %744 = math.exp %743 : vector<2x8xf32>
    %cst_172 = arith.constant 1.000000e+00 : f32
    %745 = vector.broadcast %cst_172 : f32 to vector<2x8xf32>
    %746 = arith.addf %745, %744 : vector<2x8xf32>
    %747 = arith.divf %745, %746 : vector<2x8xf32>
    %748 = vector.extract_strided_slice %718 {offsets = [0, 8], sizes = [2, 8], strides = [1, 1]} : vector<2x24xf32> to vector<2x8xf32>
    %749 = vector.extract_strided_slice %714 {offsets = [0, 32], sizes = [2, 8], strides = [1, 1]} : vector<2x48xf32> to vector<2x8xf32>
    %750 = arith.addf %748, %749 : vector<2x8xf32>
    %751 = arith.negf %750 : vector<2x8xf32>
    %752 = math.exp %751 : vector<2x8xf32>
    %cst_173 = arith.constant 1.000000e+00 : f32
    %753 = vector.broadcast %cst_173 : f32 to vector<2x8xf32>
    %754 = arith.addf %753, %752 : vector<2x8xf32>
    %755 = arith.divf %753, %754 : vector<2x8xf32>
    %756 = vector.extract_strided_slice %718 {offsets = [0, 16], sizes = [2, 8], strides = [1, 1]} : vector<2x24xf32> to vector<2x8xf32>
    %757 = vector.extract_strided_slice %714 {offsets = [0, 40], sizes = [2, 8], strides = [1, 1]} : vector<2x48xf32> to vector<2x8xf32>
    %758 = arith.mulf %747, %757 : vector<2x8xf32>
    %759 = arith.addf %756, %758 : vector<2x8xf32>
    %760 = math.tanh %759 : vector<2x8xf32>
    %cst_174 = arith.constant 1.000000e+00 : f32
    %761 = vector.broadcast %cst_174 : f32 to vector<2x8xf32>
    %762 = arith.subf %761, %734 : vector<2x8xf32>
    %763 = arith.mulf %762, %739 : vector<2x8xf32>
    %764 = vector.extract_strided_slice %711 {offsets = [0, 0], sizes = [2, 8], strides = [1, 1]} : vector<2x16xf32> to vector<2x8xf32>
    %765 = arith.mulf %734, %764 : vector<2x8xf32>
    %766 = arith.addf %763, %765 : vector<2x8xf32>
    %cst_175 = arith.constant 1.000000e+00 : f32
    %767 = vector.broadcast %cst_175 : f32 to vector<2x8xf32>
    %768 = arith.subf %767, %755 : vector<2x8xf32>
    %769 = arith.mulf %768, %760 : vector<2x8xf32>
    %770 = vector.extract_strided_slice %711 {offsets = [0, 8], sizes = [2, 8], strides = [1, 1]} : vector<2x16xf32> to vector<2x8xf32>
    %771 = arith.mulf %755, %770 : vector<2x8xf32>
    %772 = arith.addf %769, %771 : vector<2x8xf32>
    %773 = tpu.concatenate %766, %772 in 1 : vector<2x8xf32>, vector<2x8xf32> -> vector<2x16xf32>
    %cst_176 = arith.constant dense<0.000000e+00> : vector<2x48xf32>
    %774 = tpu.matmul %773, %704, %cst_176 {dimension_numbers = #tpu.dot_dimension_numbers<[1], [0], [0], [1], [0, 0, 1, 1], [], []>} : vector<2x16xf32>, vector<16x48xf32>, vector<2x48xf32> -> vector<2x48xf32>
    %775 = vector.broadcast %705 : vector<1x48xf32> to vector<2x48xf32>
    %776 = arith.addf %774, %775 : vector<2x48xf32>
    %777 = vector.extract_strided_slice %710 {offsets = [0, 1, 0], sizes = [2, 1, 24], strides = [1, 1, 1]} : vector<2x8x48xf32> to vector<2x1x24xf32>
    %778 = vector.shape_cast %777 : vector<2x1x24xf32> to vector<2x24xf32>
    %779 = vector.extract_strided_slice %710 {offsets = [0, 6, 24], sizes = [2, 1, 24], strides = [1, 1, 1]} : vector<2x8x48xf32> to vector<2x1x24xf32>
    %780 = vector.shape_cast %779 : vector<2x1x24xf32> to vector<2x24xf32>
    %781 = vector.extract_strided_slice %778 {offsets = [0, 0], sizes = [2, 8], strides = [1, 1]} : vector<2x24xf32> to vector<2x8xf32>
    %782 = vector.extract_strided_slice %776 {offsets = [0, 0], sizes = [2, 8], strides = [1, 1]} : vector<2x48xf32> to vector<2x8xf32>
    %783 = arith.addf %781, %782 : vector<2x8xf32>
    %784 = arith.negf %783 : vector<2x8xf32>
    %785 = math.exp %784 : vector<2x8xf32>
    %cst_177 = arith.constant 1.000000e+00 : f32
    %786 = vector.broadcast %cst_177 : f32 to vector<2x8xf32>
    %787 = arith.addf %786, %785 : vector<2x8xf32>
    %788 = arith.divf %786, %787 : vector<2x8xf32>
    %789 = vector.extract_strided_slice %778 {offsets = [0, 8], sizes = [2, 8], strides = [1, 1]} : vector<2x24xf32> to vector<2x8xf32>
    %790 = vector.extract_strided_slice %776 {offsets = [0, 8], sizes = [2, 8], strides = [1, 1]} : vector<2x48xf32> to vector<2x8xf32>
    %791 = arith.addf %789, %790 : vector<2x8xf32>
    %792 = arith.negf %791 : vector<2x8xf32>
    %793 = math.exp %792 : vector<2x8xf32>
    %cst_178 = arith.constant 1.000000e+00 : f32
    %794 = vector.broadcast %cst_178 : f32 to vector<2x8xf32>
    %795 = arith.addf %794, %793 : vector<2x8xf32>
    %796 = arith.divf %794, %795 : vector<2x8xf32>
    %797 = vector.extract_strided_slice %778 {offsets = [0, 16], sizes = [2, 8], strides = [1, 1]} : vector<2x24xf32> to vector<2x8xf32>
    %798 = vector.extract_strided_slice %776 {offsets = [0, 16], sizes = [2, 8], strides = [1, 1]} : vector<2x48xf32> to vector<2x8xf32>
    %799 = arith.mulf %788, %798 : vector<2x8xf32>
    %800 = arith.addf %797, %799 : vector<2x8xf32>
    %801 = math.tanh %800 : vector<2x8xf32>
    %802 = vector.extract_strided_slice %780 {offsets = [0, 0], sizes = [2, 8], strides = [1, 1]} : vector<2x24xf32> to vector<2x8xf32>
    %803 = vector.extract_strided_slice %776 {offsets = [0, 24], sizes = [2, 8], strides = [1, 1]} : vector<2x48xf32> to vector<2x8xf32>
    %804 = arith.addf %802, %803 : vector<2x8xf32>
    %805 = arith.negf %804 : vector<2x8xf32>
    %806 = math.exp %805 : vector<2x8xf32>
    %cst_179 = arith.constant 1.000000e+00 : f32
    %807 = vector.broadcast %cst_179 : f32 to vector<2x8xf32>
    %808 = arith.addf %807, %806 : vector<2x8xf32>
    %809 = arith.divf %807, %808 : vector<2x8xf32>
    %810 = vector.extract_strided_slice %780 {offsets = [0, 8], sizes = [2, 8], strides = [1, 1]} : vector<2x24xf32> to vector<2x8xf32>
    %811 = vector.extract_strided_slice %776 {offsets = [0, 32], sizes = [2, 8], strides = [1, 1]} : vector<2x48xf32> to vector<2x8xf32>
    %812 = arith.addf %810, %811 : vector<2x8xf32>
    %813 = arith.negf %812 : vector<2x8xf32>
    %814 = math.exp %813 : vector<2x8xf32>
    %cst_180 = arith.constant 1.000000e+00 : f32
    %815 = vector.broadcast %cst_180 : f32 to vector<2x8xf32>
    %816 = arith.addf %815, %814 : vector<2x8xf32>
    %817 = arith.divf %815, %816 : vector<2x8xf32>
    %818 = vector.extract_strided_slice %780 {offsets = [0, 16], sizes = [2, 8], strides = [1, 1]} : vector<2x24xf32> to vector<2x8xf32>
    %819 = vector.extract_strided_slice %776 {offsets = [0, 40], sizes = [2, 8], strides = [1, 1]} : vector<2x48xf32> to vector<2x8xf32>
    %820 = arith.mulf %809, %819 : vector<2x8xf32>
    %821 = arith.addf %818, %820 : vector<2x8xf32>
    %822 = math.tanh %821 : vector<2x8xf32>
    %cst_181 = arith.constant 1.000000e+00 : f32
    %823 = vector.broadcast %cst_181 : f32 to vector<2x8xf32>
    %824 = arith.subf %823, %796 : vector<2x8xf32>
    %825 = arith.mulf %824, %801 : vector<2x8xf32>
    %826 = vector.extract_strided_slice %773 {offsets = [0, 0], sizes = [2, 8], strides = [1, 1]} : vector<2x16xf32> to vector<2x8xf32>
    %827 = arith.mulf %796, %826 : vector<2x8xf32>
    %828 = arith.addf %825, %827 : vector<2x8xf32>
    %cst_182 = arith.constant 1.000000e+00 : f32
    %829 = vector.broadcast %cst_182 : f32 to vector<2x8xf32>
    %830 = arith.subf %829, %817 : vector<2x8xf32>
    %831 = arith.mulf %830, %822 : vector<2x8xf32>
    %832 = vector.extract_strided_slice %773 {offsets = [0, 8], sizes = [2, 8], strides = [1, 1]} : vector<2x16xf32> to vector<2x8xf32>
    %833 = arith.mulf %817, %832 : vector<2x8xf32>
    %834 = arith.addf %831, %833 : vector<2x8xf32>
    %835 = tpu.concatenate %828, %834 in 1 : vector<2x8xf32>, vector<2x8xf32> -> vector<2x16xf32>
    %cst_183 = arith.constant dense<0.000000e+00> : vector<2x48xf32>
    %836 = tpu.matmul %835, %704, %cst_183 {dimension_numbers = #tpu.dot_dimension_numbers<[1], [0], [0], [1], [0, 0, 1, 1], [], []>} : vector<2x16xf32>, vector<16x48xf32>, vector<2x48xf32> -> vector<2x48xf32>
    %837 = vector.broadcast %705 : vector<1x48xf32> to vector<2x48xf32>
    %838 = arith.addf %836, %837 : vector<2x48xf32>
    %839 = vector.extract_strided_slice %710 {offsets = [0, 2, 0], sizes = [2, 1, 24], strides = [1, 1, 1]} : vector<2x8x48xf32> to vector<2x1x24xf32>
    %840 = vector.shape_cast %839 : vector<2x1x24xf32> to vector<2x24xf32>
    %841 = vector.extract_strided_slice %710 {offsets = [0, 5, 24], sizes = [2, 1, 24], strides = [1, 1, 1]} : vector<2x8x48xf32> to vector<2x1x24xf32>
    %842 = vector.shape_cast %841 : vector<2x1x24xf32> to vector<2x24xf32>
    %843 = vector.extract_strided_slice %840 {offsets = [0, 0], sizes = [2, 8], strides = [1, 1]} : vector<2x24xf32> to vector<2x8xf32>
    %844 = vector.extract_strided_slice %838 {offsets = [0, 0], sizes = [2, 8], strides = [1, 1]} : vector<2x48xf32> to vector<2x8xf32>
    %845 = arith.addf %843, %844 : vector<2x8xf32>
    %846 = arith.negf %845 : vector<2x8xf32>
    %847 = math.exp %846 : vector<2x8xf32>
    %cst_184 = arith.constant 1.000000e+00 : f32
    %848 = vector.broadcast %cst_184 : f32 to vector<2x8xf32>
    %849 = arith.addf %848, %847 : vector<2x8xf32>
    %850 = arith.divf %848, %849 : vector<2x8xf32>
    %851 = vector.extract_strided_slice %840 {offsets = [0, 8], sizes = [2, 8], strides = [1, 1]} : vector<2x24xf32> to vector<2x8xf32>
    %852 = vector.extract_strided_slice %838 {offsets = [0, 8], sizes = [2, 8], strides = [1, 1]} : vector<2x48xf32> to vector<2x8xf32>
    %853 = arith.addf %851, %852 : vector<2x8xf32>
    %854 = arith.negf %853 : vector<2x8xf32>
    %855 = math.exp %854 : vector<2x8xf32>
    %cst_185 = arith.constant 1.000000e+00 : f32
    %856 = vector.broadcast %cst_185 : f32 to vector<2x8xf32>
    %857 = arith.addf %856, %855 : vector<2x8xf32>
    %858 = arith.divf %856, %857 : vector<2x8xf32>
    %859 = vector.extract_strided_slice %840 {offsets = [0, 16], sizes = [2, 8], strides = [1, 1]} : vector<2x24xf32> to vector<2x8xf32>
    %860 = vector.extract_strided_slice %838 {offsets = [0, 16], sizes = [2, 8], strides = [1, 1]} : vector<2x48xf32> to vector<2x8xf32>
    %861 = arith.mulf %850, %860 : vector<2x8xf32>
    %862 = arith.addf %859, %861 : vector<2x8xf32>
    %863 = math.tanh %862 : vector<2x8xf32>
    %864 = vector.extract_strided_slice %842 {offsets = [0, 0], sizes = [2, 8], strides = [1, 1]} : vector<2x24xf32> to vector<2x8xf32>
    %865 = vector.extract_strided_slice %838 {offsets = [0, 24], sizes = [2, 8], strides = [1, 1]} : vector<2x48xf32> to vector<2x8xf32>
    %866 = arith.addf %864, %865 : vector<2x8xf32>
    %867 = arith.negf %866 : vector<2x8xf32>
    %868 = math.exp %867 : vector<2x8xf32>
    %cst_186 = arith.constant 1.000000e+00 : f32
    %869 = vector.broadcast %cst_186 : f32 to vector<2x8xf32>
    %870 = arith.addf %869, %868 : vector<2x8xf32>
    %871 = arith.divf %869, %870 : vector<2x8xf32>
    %872 = vector.extract_strided_slice %842 {offsets = [0, 8], sizes = [2, 8], strides = [1, 1]} : vector<2x24xf32> to vector<2x8xf32>
    %873 = vector.extract_strided_slice %838 {offsets = [0, 32], sizes = [2, 8], strides = [1, 1]} : vector<2x48xf32> to vector<2x8xf32>
    %874 = arith.addf %872, %873 : vector<2x8xf32>
    %875 = arith.negf %874 : vector<2x8xf32>
    %876 = math.exp %875 : vector<2x8xf32>
    %cst_187 = arith.constant 1.000000e+00 : f32
    %877 = vector.broadcast %cst_187 : f32 to vector<2x8xf32>
    %878 = arith.addf %877, %876 : vector<2x8xf32>
    %879 = arith.divf %877, %878 : vector<2x8xf32>
    %880 = vector.extract_strided_slice %842 {offsets = [0, 16], sizes = [2, 8], strides = [1, 1]} : vector<2x24xf32> to vector<2x8xf32>
    %881 = vector.extract_strided_slice %838 {offsets = [0, 40], sizes = [2, 8], strides = [1, 1]} : vector<2x48xf32> to vector<2x8xf32>
    %882 = arith.mulf %871, %881 : vector<2x8xf32>
    %883 = arith.addf %880, %882 : vector<2x8xf32>
    %884 = math.tanh %883 : vector<2x8xf32>
    %cst_188 = arith.constant 1.000000e+00 : f32
    %885 = vector.broadcast %cst_188 : f32 to vector<2x8xf32>
    %886 = arith.subf %885, %858 : vector<2x8xf32>
    %887 = arith.mulf %886, %863 : vector<2x8xf32>
    %888 = vector.extract_strided_slice %835 {offsets = [0, 0], sizes = [2, 8], strides = [1, 1]} : vector<2x16xf32> to vector<2x8xf32>
    %889 = arith.mulf %858, %888 : vector<2x8xf32>
    %890 = arith.addf %887, %889 : vector<2x8xf32>
    %cst_189 = arith.constant 1.000000e+00 : f32
    %891 = vector.broadcast %cst_189 : f32 to vector<2x8xf32>
    %892 = arith.subf %891, %879 : vector<2x8xf32>
    %893 = arith.mulf %892, %884 : vector<2x8xf32>
    %894 = vector.extract_strided_slice %835 {offsets = [0, 8], sizes = [2, 8], strides = [1, 1]} : vector<2x16xf32> to vector<2x8xf32>
    %895 = arith.mulf %879, %894 : vector<2x8xf32>
    %896 = arith.addf %893, %895 : vector<2x8xf32>
    %897 = tpu.concatenate %890, %896 in 1 : vector<2x8xf32>, vector<2x8xf32> -> vector<2x16xf32>
    %cst_190 = arith.constant dense<0.000000e+00> : vector<2x48xf32>
    %898 = tpu.matmul %897, %704, %cst_190 {dimension_numbers = #tpu.dot_dimension_numbers<[1], [0], [0], [1], [0, 0, 1, 1], [], []>} : vector<2x16xf32>, vector<16x48xf32>, vector<2x48xf32> -> vector<2x48xf32>
    %899 = vector.broadcast %705 : vector<1x48xf32> to vector<2x48xf32>
    %900 = arith.addf %898, %899 : vector<2x48xf32>
    %901 = vector.extract_strided_slice %710 {offsets = [0, 3, 0], sizes = [2, 1, 24], strides = [1, 1, 1]} : vector<2x8x48xf32> to vector<2x1x24xf32>
    %902 = vector.shape_cast %901 : vector<2x1x24xf32> to vector<2x24xf32>
    %903 = vector.extract_strided_slice %710 {offsets = [0, 4, 24], sizes = [2, 1, 24], strides = [1, 1, 1]} : vector<2x8x48xf32> to vector<2x1x24xf32>
    %904 = vector.shape_cast %903 : vector<2x1x24xf32> to vector<2x24xf32>
    %905 = vector.extract_strided_slice %902 {offsets = [0, 0], sizes = [2, 8], strides = [1, 1]} : vector<2x24xf32> to vector<2x8xf32>
    %906 = vector.extract_strided_slice %900 {offsets = [0, 0], sizes = [2, 8], strides = [1, 1]} : vector<2x48xf32> to vector<2x8xf32>
    %907 = arith.addf %905, %906 : vector<2x8xf32>
    %908 = arith.negf %907 : vector<2x8xf32>
    %909 = math.exp %908 : vector<2x8xf32>
    %cst_191 = arith.constant 1.000000e+00 : f32
    %910 = vector.broadcast %cst_191 : f32 to vector<2x8xf32>
    %911 = arith.addf %910, %909 : vector<2x8xf32>
    %912 = arith.divf %910, %911 : vector<2x8xf32>
    %913 = vector.extract_strided_slice %902 {offsets = [0, 8], sizes = [2, 8], strides = [1, 1]} : vector<2x24xf32> to vector<2x8xf32>
    %914 = vector.extract_strided_slice %900 {offsets = [0, 8], sizes = [2, 8], strides = [1, 1]} : vector<2x48xf32> to vector<2x8xf32>
    %915 = arith.addf %913, %914 : vector<2x8xf32>
    %916 = arith.negf %915 : vector<2x8xf32>
    %917 = math.exp %916 : vector<2x8xf32>
    %cst_192 = arith.constant 1.000000e+00 : f32
    %918 = vector.broadcast %cst_192 : f32 to vector<2x8xf32>
    %919 = arith.addf %918, %917 : vector<2x8xf32>
    %920 = arith.divf %918, %919 : vector<2x8xf32>
    %921 = vector.extract_strided_slice %902 {offsets = [0, 16], sizes = [2, 8], strides = [1, 1]} : vector<2x24xf32> to vector<2x8xf32>
    %922 = vector.extract_strided_slice %900 {offsets = [0, 16], sizes = [2, 8], strides = [1, 1]} : vector<2x48xf32> to vector<2x8xf32>
    %923 = arith.mulf %912, %922 : vector<2x8xf32>
    %924 = arith.addf %921, %923 : vector<2x8xf32>
    %925 = math.tanh %924 : vector<2x8xf32>
    %926 = vector.extract_strided_slice %904 {offsets = [0, 0], sizes = [2, 8], strides = [1, 1]} : vector<2x24xf32> to vector<2x8xf32>
    %927 = vector.extract_strided_slice %900 {offsets = [0, 24], sizes = [2, 8], strides = [1, 1]} : vector<2x48xf32> to vector<2x8xf32>
    %928 = arith.addf %926, %927 : vector<2x8xf32>
    %929 = arith.negf %928 : vector<2x8xf32>
    %930 = math.exp %929 : vector<2x8xf32>
    %cst_193 = arith.constant 1.000000e+00 : f32
    %931 = vector.broadcast %cst_193 : f32 to vector<2x8xf32>
    %932 = arith.addf %931, %930 : vector<2x8xf32>
    %933 = arith.divf %931, %932 : vector<2x8xf32>
    %934 = vector.extract_strided_slice %904 {offsets = [0, 8], sizes = [2, 8], strides = [1, 1]} : vector<2x24xf32> to vector<2x8xf32>
    %935 = vector.extract_strided_slice %900 {offsets = [0, 32], sizes = [2, 8], strides = [1, 1]} : vector<2x48xf32> to vector<2x8xf32>
    %936 = arith.addf %934, %935 : vector<2x8xf32>
    %937 = arith.negf %936 : vector<2x8xf32>
    %938 = math.exp %937 : vector<2x8xf32>
    %cst_194 = arith.constant 1.000000e+00 : f32
    %939 = vector.broadcast %cst_194 : f32 to vector<2x8xf32>
    %940 = arith.addf %939, %938 : vector<2x8xf32>
    %941 = arith.divf %939, %940 : vector<2x8xf32>
    %942 = vector.extract_strided_slice %904 {offsets = [0, 16], sizes = [2, 8], strides = [1, 1]} : vector<2x24xf32> to vector<2x8xf32>
    %943 = vector.extract_strided_slice %900 {offsets = [0, 40], sizes = [2, 8], strides = [1, 1]} : vector<2x48xf32> to vector<2x8xf32>
    %944 = arith.mulf %933, %943 : vector<2x8xf32>
    %945 = arith.addf %942, %944 : vector<2x8xf32>
    %946 = math.tanh %945 : vector<2x8xf32>
    %cst_195 = arith.constant 1.000000e+00 : f32
    %947 = vector.broadcast %cst_195 : f32 to vector<2x8xf32>
    %948 = arith.subf %947, %920 : vector<2x8xf32>
    %949 = arith.mulf %948, %925 : vector<2x8xf32>
    %950 = vector.extract_strided_slice %897 {offsets = [0, 0], sizes = [2, 8], strides = [1, 1]} : vector<2x16xf32> to vector<2x8xf32>
    %951 = arith.mulf %920, %950 : vector<2x8xf32>
    %952 = arith.addf %949, %951 : vector<2x8xf32>
    %cst_196 = arith.constant 1.000000e+00 : f32
    %953 = vector.broadcast %cst_196 : f32 to vector<2x8xf32>
    %954 = arith.subf %953, %941 : vector<2x8xf32>
    %955 = arith.mulf %954, %946 : vector<2x8xf32>
    %956 = vector.extract_strided_slice %897 {offsets = [0, 8], sizes = [2, 8], strides = [1, 1]} : vector<2x16xf32> to vector<2x8xf32>
    %957 = arith.mulf %941, %956 : vector<2x8xf32>
    %958 = arith.addf %955, %957 : vector<2x8xf32>
    %959 = tpu.concatenate %952, %958 in 1 : vector<2x8xf32>, vector<2x8xf32> -> vector<2x16xf32>
    %cst_197 = arith.constant dense<0.000000e+00> : vector<2x48xf32>
    %960 = tpu.matmul %959, %704, %cst_197 {dimension_numbers = #tpu.dot_dimension_numbers<[1], [0], [0], [1], [0, 0, 1, 1], [], []>} : vector<2x16xf32>, vector<16x48xf32>, vector<2x48xf32> -> vector<2x48xf32>
    %961 = vector.broadcast %705 : vector<1x48xf32> to vector<2x48xf32>
    %962 = arith.addf %960, %961 : vector<2x48xf32>
    %963 = vector.extract_strided_slice %710 {offsets = [0, 4, 0], sizes = [2, 1, 24], strides = [1, 1, 1]} : vector<2x8x48xf32> to vector<2x1x24xf32>
    %964 = vector.shape_cast %963 : vector<2x1x24xf32> to vector<2x24xf32>
    %965 = vector.extract_strided_slice %710 {offsets = [0, 3, 24], sizes = [2, 1, 24], strides = [1, 1, 1]} : vector<2x8x48xf32> to vector<2x1x24xf32>
    %966 = vector.shape_cast %965 : vector<2x1x24xf32> to vector<2x24xf32>
    %967 = vector.extract_strided_slice %964 {offsets = [0, 0], sizes = [2, 8], strides = [1, 1]} : vector<2x24xf32> to vector<2x8xf32>
    %968 = vector.extract_strided_slice %962 {offsets = [0, 0], sizes = [2, 8], strides = [1, 1]} : vector<2x48xf32> to vector<2x8xf32>
    %969 = arith.addf %967, %968 : vector<2x8xf32>
    %970 = arith.negf %969 : vector<2x8xf32>
    %971 = math.exp %970 : vector<2x8xf32>
    %cst_198 = arith.constant 1.000000e+00 : f32
    %972 = vector.broadcast %cst_198 : f32 to vector<2x8xf32>
    %973 = arith.addf %972, %971 : vector<2x8xf32>
    %974 = arith.divf %972, %973 : vector<2x8xf32>
    %975 = vector.extract_strided_slice %964 {offsets = [0, 8], sizes = [2, 8], strides = [1, 1]} : vector<2x24xf32> to vector<2x8xf32>
    %976 = vector.extract_strided_slice %962 {offsets = [0, 8], sizes = [2, 8], strides = [1, 1]} : vector<2x48xf32> to vector<2x8xf32>
    %977 = arith.addf %975, %976 : vector<2x8xf32>
    %978 = arith.negf %977 : vector<2x8xf32>
    %979 = math.exp %978 : vector<2x8xf32>
    %cst_199 = arith.constant 1.000000e+00 : f32
    %980 = vector.broadcast %cst_199 : f32 to vector<2x8xf32>
    %981 = arith.addf %980, %979 : vector<2x8xf32>
    %982 = arith.divf %980, %981 : vector<2x8xf32>
    %983 = vector.extract_strided_slice %964 {offsets = [0, 16], sizes = [2, 8], strides = [1, 1]} : vector<2x24xf32> to vector<2x8xf32>
    %984 = vector.extract_strided_slice %962 {offsets = [0, 16], sizes = [2, 8], strides = [1, 1]} : vector<2x48xf32> to vector<2x8xf32>
    %985 = arith.mulf %974, %984 : vector<2x8xf32>
    %986 = arith.addf %983, %985 : vector<2x8xf32>
    %987 = math.tanh %986 : vector<2x8xf32>
    %988 = vector.extract_strided_slice %966 {offsets = [0, 0], sizes = [2, 8], strides = [1, 1]} : vector<2x24xf32> to vector<2x8xf32>
    %989 = vector.extract_strided_slice %962 {offsets = [0, 24], sizes = [2, 8], strides = [1, 1]} : vector<2x48xf32> to vector<2x8xf32>
    %990 = arith.addf %988, %989 : vector<2x8xf32>
    %991 = arith.negf %990 : vector<2x8xf32>
    %992 = math.exp %991 : vector<2x8xf32>
    %cst_200 = arith.constant 1.000000e+00 : f32
    %993 = vector.broadcast %cst_200 : f32 to vector<2x8xf32>
    %994 = arith.addf %993, %992 : vector<2x8xf32>
    %995 = arith.divf %993, %994 : vector<2x8xf32>
    %996 = vector.extract_strided_slice %966 {offsets = [0, 8], sizes = [2, 8], strides = [1, 1]} : vector<2x24xf32> to vector<2x8xf32>
    %997 = vector.extract_strided_slice %962 {offsets = [0, 32], sizes = [2, 8], strides = [1, 1]} : vector<2x48xf32> to vector<2x8xf32>
    %998 = arith.addf %996, %997 : vector<2x8xf32>
    %999 = arith.negf %998 : vector<2x8xf32>
    %1000 = math.exp %999 : vector<2x8xf32>
    %cst_201 = arith.constant 1.000000e+00 : f32
    %1001 = vector.broadcast %cst_201 : f32 to vector<2x8xf32>
    %1002 = arith.addf %1001, %1000 : vector<2x8xf32>
    %1003 = arith.divf %1001, %1002 : vector<2x8xf32>
    %1004 = vector.extract_strided_slice %966 {offsets = [0, 16], sizes = [2, 8], strides = [1, 1]} : vector<2x24xf32> to vector<2x8xf32>
    %1005 = vector.extract_strided_slice %962 {offsets = [0, 40], sizes = [2, 8], strides = [1, 1]} : vector<2x48xf32> to vector<2x8xf32>
    %1006 = arith.mulf %995, %1005 : vector<2x8xf32>
    %1007 = arith.addf %1004, %1006 : vector<2x8xf32>
    %1008 = math.tanh %1007 : vector<2x8xf32>
    %cst_202 = arith.constant 1.000000e+00 : f32
    %1009 = vector.broadcast %cst_202 : f32 to vector<2x8xf32>
    %1010 = arith.subf %1009, %982 : vector<2x8xf32>
    %1011 = arith.mulf %1010, %987 : vector<2x8xf32>
    %1012 = vector.extract_strided_slice %959 {offsets = [0, 0], sizes = [2, 8], strides = [1, 1]} : vector<2x16xf32> to vector<2x8xf32>
    %1013 = arith.mulf %982, %1012 : vector<2x8xf32>
    %1014 = arith.addf %1011, %1013 : vector<2x8xf32>
    %cst_203 = arith.constant 1.000000e+00 : f32
    %1015 = vector.broadcast %cst_203 : f32 to vector<2x8xf32>
    %1016 = arith.subf %1015, %1003 : vector<2x8xf32>
    %1017 = arith.mulf %1016, %1008 : vector<2x8xf32>
    %1018 = vector.extract_strided_slice %959 {offsets = [0, 8], sizes = [2, 8], strides = [1, 1]} : vector<2x16xf32> to vector<2x8xf32>
    %1019 = arith.mulf %1003, %1018 : vector<2x8xf32>
    %1020 = arith.addf %1017, %1019 : vector<2x8xf32>
    %1021 = tpu.concatenate %1014, %1020 in 1 : vector<2x8xf32>, vector<2x8xf32> -> vector<2x16xf32>
    %cst_204 = arith.constant dense<0.000000e+00> : vector<2x48xf32>
    %1022 = tpu.matmul %1021, %704, %cst_204 {dimension_numbers = #tpu.dot_dimension_numbers<[1], [0], [0], [1], [0, 0, 1, 1], [], []>} : vector<2x16xf32>, vector<16x48xf32>, vector<2x48xf32> -> vector<2x48xf32>
    %1023 = vector.broadcast %705 : vector<1x48xf32> to vector<2x48xf32>
    %1024 = arith.addf %1022, %1023 : vector<2x48xf32>
    %1025 = vector.extract_strided_slice %710 {offsets = [0, 5, 0], sizes = [2, 1, 24], strides = [1, 1, 1]} : vector<2x8x48xf32> to vector<2x1x24xf32>
    %1026 = vector.shape_cast %1025 : vector<2x1x24xf32> to vector<2x24xf32>
    %1027 = vector.extract_strided_slice %710 {offsets = [0, 2, 24], sizes = [2, 1, 24], strides = [1, 1, 1]} : vector<2x8x48xf32> to vector<2x1x24xf32>
    %1028 = vector.shape_cast %1027 : vector<2x1x24xf32> to vector<2x24xf32>
    %1029 = vector.extract_strided_slice %1026 {offsets = [0, 0], sizes = [2, 8], strides = [1, 1]} : vector<2x24xf32> to vector<2x8xf32>
    %1030 = vector.extract_strided_slice %1024 {offsets = [0, 0], sizes = [2, 8], strides = [1, 1]} : vector<2x48xf32> to vector<2x8xf32>
    %1031 = arith.addf %1029, %1030 : vector<2x8xf32>
    %1032 = arith.negf %1031 : vector<2x8xf32>
    %1033 = math.exp %1032 : vector<2x8xf32>
    %cst_205 = arith.constant 1.000000e+00 : f32
    %1034 = vector.broadcast %cst_205 : f32 to vector<2x8xf32>
    %1035 = arith.addf %1034, %1033 : vector<2x8xf32>
    %1036 = arith.divf %1034, %1035 : vector<2x8xf32>
    %1037 = vector.extract_strided_slice %1026 {offsets = [0, 8], sizes = [2, 8], strides = [1, 1]} : vector<2x24xf32> to vector<2x8xf32>
    %1038 = vector.extract_strided_slice %1024 {offsets = [0, 8], sizes = [2, 8], strides = [1, 1]} : vector<2x48xf32> to vector<2x8xf32>
    %1039 = arith.addf %1037, %1038 : vector<2x8xf32>
    %1040 = arith.negf %1039 : vector<2x8xf32>
    %1041 = math.exp %1040 : vector<2x8xf32>
    %cst_206 = arith.constant 1.000000e+00 : f32
    %1042 = vector.broadcast %cst_206 : f32 to vector<2x8xf32>
    %1043 = arith.addf %1042, %1041 : vector<2x8xf32>
    %1044 = arith.divf %1042, %1043 : vector<2x8xf32>
    %1045 = vector.extract_strided_slice %1026 {offsets = [0, 16], sizes = [2, 8], strides = [1, 1]} : vector<2x24xf32> to vector<2x8xf32>
    %1046 = vector.extract_strided_slice %1024 {offsets = [0, 16], sizes = [2, 8], strides = [1, 1]} : vector<2x48xf32> to vector<2x8xf32>
    %1047 = arith.mulf %1036, %1046 : vector<2x8xf32>
    %1048 = arith.addf %1045, %1047 : vector<2x8xf32>
    %1049 = math.tanh %1048 : vector<2x8xf32>
    %1050 = vector.extract_strided_slice %1028 {offsets = [0, 0], sizes = [2, 8], strides = [1, 1]} : vector<2x24xf32> to vector<2x8xf32>
    %1051 = vector.extract_strided_slice %1024 {offsets = [0, 24], sizes = [2, 8], strides = [1, 1]} : vector<2x48xf32> to vector<2x8xf32>
    %1052 = arith.addf %1050, %1051 : vector<2x8xf32>
    %1053 = arith.negf %1052 : vector<2x8xf32>
    %1054 = math.exp %1053 : vector<2x8xf32>
    %cst_207 = arith.constant 1.000000e+00 : f32
    %1055 = vector.broadcast %cst_207 : f32 to vector<2x8xf32>
    %1056 = arith.addf %1055, %1054 : vector<2x8xf32>
    %1057 = arith.divf %1055, %1056 : vector<2x8xf32>
    %1058 = vector.extract_strided_slice %1028 {offsets = [0, 8], sizes = [2, 8], strides = [1, 1]} : vector<2x24xf32> to vector<2x8xf32>
    %1059 = vector.extract_strided_slice %1024 {offsets = [0, 32], sizes = [2, 8], strides = [1, 1]} : vector<2x48xf32> to vector<2x8xf32>
    %1060 = arith.addf %1058, %1059 : vector<2x8xf32>
    %1061 = arith.negf %1060 : vector<2x8xf32>
    %1062 = math.exp %1061 : vector<2x8xf32>
    %cst_208 = arith.constant 1.000000e+00 : f32
    %1063 = vector.broadcast %cst_208 : f32 to vector<2x8xf32>
    %1064 = arith.addf %1063, %1062 : vector<2x8xf32>
    %1065 = arith.divf %1063, %1064 : vector<2x8xf32>
    %1066 = vector.extract_strided_slice %1028 {offsets = [0, 16], sizes = [2, 8], strides = [1, 1]} : vector<2x24xf32> to vector<2x8xf32>
    %1067 = vector.extract_strided_slice %1024 {offsets = [0, 40], sizes = [2, 8], strides = [1, 1]} : vector<2x48xf32> to vector<2x8xf32>
    %1068 = arith.mulf %1057, %1067 : vector<2x8xf32>
    %1069 = arith.addf %1066, %1068 : vector<2x8xf32>
    %1070 = math.tanh %1069 : vector<2x8xf32>
    %cst_209 = arith.constant 1.000000e+00 : f32
    %1071 = vector.broadcast %cst_209 : f32 to vector<2x8xf32>
    %1072 = arith.subf %1071, %1044 : vector<2x8xf32>
    %1073 = arith.mulf %1072, %1049 : vector<2x8xf32>
    %1074 = vector.extract_strided_slice %1021 {offsets = [0, 0], sizes = [2, 8], strides = [1, 1]} : vector<2x16xf32> to vector<2x8xf32>
    %1075 = arith.mulf %1044, %1074 : vector<2x8xf32>
    %1076 = arith.addf %1073, %1075 : vector<2x8xf32>
    %cst_210 = arith.constant 1.000000e+00 : f32
    %1077 = vector.broadcast %cst_210 : f32 to vector<2x8xf32>
    %1078 = arith.subf %1077, %1065 : vector<2x8xf32>
    %1079 = arith.mulf %1078, %1070 : vector<2x8xf32>
    %1080 = vector.extract_strided_slice %1021 {offsets = [0, 8], sizes = [2, 8], strides = [1, 1]} : vector<2x16xf32> to vector<2x8xf32>
    %1081 = arith.mulf %1065, %1080 : vector<2x8xf32>
    %1082 = arith.addf %1079, %1081 : vector<2x8xf32>
    %1083 = tpu.concatenate %1076, %1082 in 1 : vector<2x8xf32>, vector<2x8xf32> -> vector<2x16xf32>
    %cst_211 = arith.constant dense<0.000000e+00> : vector<2x48xf32>
    %1084 = tpu.matmul %1083, %704, %cst_211 {dimension_numbers = #tpu.dot_dimension_numbers<[1], [0], [0], [1], [0, 0, 1, 1], [], []>} : vector<2x16xf32>, vector<16x48xf32>, vector<2x48xf32> -> vector<2x48xf32>
    %1085 = vector.broadcast %705 : vector<1x48xf32> to vector<2x48xf32>
    %1086 = arith.addf %1084, %1085 : vector<2x48xf32>
    %1087 = vector.extract_strided_slice %710 {offsets = [0, 6, 0], sizes = [2, 1, 24], strides = [1, 1, 1]} : vector<2x8x48xf32> to vector<2x1x24xf32>
    %1088 = vector.shape_cast %1087 : vector<2x1x24xf32> to vector<2x24xf32>
    %1089 = vector.extract_strided_slice %710 {offsets = [0, 1, 24], sizes = [2, 1, 24], strides = [1, 1, 1]} : vector<2x8x48xf32> to vector<2x1x24xf32>
    %1090 = vector.shape_cast %1089 : vector<2x1x24xf32> to vector<2x24xf32>
    %1091 = vector.extract_strided_slice %1088 {offsets = [0, 0], sizes = [2, 8], strides = [1, 1]} : vector<2x24xf32> to vector<2x8xf32>
    %1092 = vector.extract_strided_slice %1086 {offsets = [0, 0], sizes = [2, 8], strides = [1, 1]} : vector<2x48xf32> to vector<2x8xf32>
    %1093 = arith.addf %1091, %1092 : vector<2x8xf32>
    %1094 = arith.negf %1093 : vector<2x8xf32>
    %1095 = math.exp %1094 : vector<2x8xf32>
    %cst_212 = arith.constant 1.000000e+00 : f32
    %1096 = vector.broadcast %cst_212 : f32 to vector<2x8xf32>
    %1097 = arith.addf %1096, %1095 : vector<2x8xf32>
    %1098 = arith.divf %1096, %1097 : vector<2x8xf32>
    %1099 = vector.extract_strided_slice %1088 {offsets = [0, 8], sizes = [2, 8], strides = [1, 1]} : vector<2x24xf32> to vector<2x8xf32>
    %1100 = vector.extract_strided_slice %1086 {offsets = [0, 8], sizes = [2, 8], strides = [1, 1]} : vector<2x48xf32> to vector<2x8xf32>
    %1101 = arith.addf %1099, %1100 : vector<2x8xf32>
    %1102 = arith.negf %1101 : vector<2x8xf32>
    %1103 = math.exp %1102 : vector<2x8xf32>
    %cst_213 = arith.constant 1.000000e+00 : f32
    %1104 = vector.broadcast %cst_213 : f32 to vector<2x8xf32>
    %1105 = arith.addf %1104, %1103 : vector<2x8xf32>
    %1106 = arith.divf %1104, %1105 : vector<2x8xf32>
    %1107 = vector.extract_strided_slice %1088 {offsets = [0, 16], sizes = [2, 8], strides = [1, 1]} : vector<2x24xf32> to vector<2x8xf32>
    %1108 = vector.extract_strided_slice %1086 {offsets = [0, 16], sizes = [2, 8], strides = [1, 1]} : vector<2x48xf32> to vector<2x8xf32>
    %1109 = arith.mulf %1098, %1108 : vector<2x8xf32>
    %1110 = arith.addf %1107, %1109 : vector<2x8xf32>
    %1111 = math.tanh %1110 : vector<2x8xf32>
    %1112 = vector.extract_strided_slice %1090 {offsets = [0, 0], sizes = [2, 8], strides = [1, 1]} : vector<2x24xf32> to vector<2x8xf32>
    %1113 = vector.extract_strided_slice %1086 {offsets = [0, 24], sizes = [2, 8], strides = [1, 1]} : vector<2x48xf32> to vector<2x8xf32>
    %1114 = arith.addf %1112, %1113 : vector<2x8xf32>
    %1115 = arith.negf %1114 : vector<2x8xf32>
    %1116 = math.exp %1115 : vector<2x8xf32>
    %cst_214 = arith.constant 1.000000e+00 : f32
    %1117 = vector.broadcast %cst_214 : f32 to vector<2x8xf32>
    %1118 = arith.addf %1117, %1116 : vector<2x8xf32>
    %1119 = arith.divf %1117, %1118 : vector<2x8xf32>
    %1120 = vector.extract_strided_slice %1090 {offsets = [0, 8], sizes = [2, 8], strides = [1, 1]} : vector<2x24xf32> to vector<2x8xf32>
    %1121 = vector.extract_strided_slice %1086 {offsets = [0, 32], sizes = [2, 8], strides = [1, 1]} : vector<2x48xf32> to vector<2x8xf32>
    %1122 = arith.addf %1120, %1121 : vector<2x8xf32>
    %1123 = arith.negf %1122 : vector<2x8xf32>
    %1124 = math.exp %1123 : vector<2x8xf32>
    %cst_215 = arith.constant 1.000000e+00 : f32
    %1125 = vector.broadcast %cst_215 : f32 to vector<2x8xf32>
    %1126 = arith.addf %1125, %1124 : vector<2x8xf32>
    %1127 = arith.divf %1125, %1126 : vector<2x8xf32>
    %1128 = vector.extract_strided_slice %1090 {offsets = [0, 16], sizes = [2, 8], strides = [1, 1]} : vector<2x24xf32> to vector<2x8xf32>
    %1129 = vector.extract_strided_slice %1086 {offsets = [0, 40], sizes = [2, 8], strides = [1, 1]} : vector<2x48xf32> to vector<2x8xf32>
    %1130 = arith.mulf %1119, %1129 : vector<2x8xf32>
    %1131 = arith.addf %1128, %1130 : vector<2x8xf32>
    %1132 = math.tanh %1131 : vector<2x8xf32>
    %cst_216 = arith.constant 1.000000e+00 : f32
    %1133 = vector.broadcast %cst_216 : f32 to vector<2x8xf32>
    %1134 = arith.subf %1133, %1106 : vector<2x8xf32>
    %1135 = arith.mulf %1134, %1111 : vector<2x8xf32>
    %1136 = vector.extract_strided_slice %1083 {offsets = [0, 0], sizes = [2, 8], strides = [1, 1]} : vector<2x16xf32> to vector<2x8xf32>
    %1137 = arith.mulf %1106, %1136 : vector<2x8xf32>
    %1138 = arith.addf %1135, %1137 : vector<2x8xf32>
    %cst_217 = arith.constant 1.000000e+00 : f32
    %1139 = vector.broadcast %cst_217 : f32 to vector<2x8xf32>
    %1140 = arith.subf %1139, %1127 : vector<2x8xf32>
    %1141 = arith.mulf %1140, %1132 : vector<2x8xf32>
    %1142 = vector.extract_strided_slice %1083 {offsets = [0, 8], sizes = [2, 8], strides = [1, 1]} : vector<2x16xf32> to vector<2x8xf32>
    %1143 = arith.mulf %1127, %1142 : vector<2x8xf32>
    %1144 = arith.addf %1141, %1143 : vector<2x8xf32>
    %1145 = tpu.concatenate %1138, %1144 in 1 : vector<2x8xf32>, vector<2x8xf32> -> vector<2x16xf32>
    %cst_218 = arith.constant dense<0.000000e+00> : vector<2x48xf32>
    %1146 = tpu.matmul %1145, %704, %cst_218 {dimension_numbers = #tpu.dot_dimension_numbers<[1], [0], [0], [1], [0, 0, 1, 1], [], []>} : vector<2x16xf32>, vector<16x48xf32>, vector<2x48xf32> -> vector<2x48xf32>
    %1147 = vector.broadcast %705 : vector<1x48xf32> to vector<2x48xf32>
    %1148 = arith.addf %1146, %1147 : vector<2x48xf32>
    %1149 = vector.extract_strided_slice %710 {offsets = [0, 7, 0], sizes = [2, 1, 24], strides = [1, 1, 1]} : vector<2x8x48xf32> to vector<2x1x24xf32>
    %1150 = vector.shape_cast %1149 : vector<2x1x24xf32> to vector<2x24xf32>
    %1151 = vector.extract_strided_slice %710 {offsets = [0, 0, 24], sizes = [2, 1, 24], strides = [1, 1, 1]} : vector<2x8x48xf32> to vector<2x1x24xf32>
    %1152 = vector.shape_cast %1151 : vector<2x1x24xf32> to vector<2x24xf32>
    %1153 = vector.extract_strided_slice %1150 {offsets = [0, 0], sizes = [2, 8], strides = [1, 1]} : vector<2x24xf32> to vector<2x8xf32>
    %1154 = vector.extract_strided_slice %1148 {offsets = [0, 0], sizes = [2, 8], strides = [1, 1]} : vector<2x48xf32> to vector<2x8xf32>
    %1155 = arith.addf %1153, %1154 : vector<2x8xf32>
    %1156 = arith.negf %1155 : vector<2x8xf32>
    %1157 = math.exp %1156 : vector<2x8xf32>
    %cst_219 = arith.constant 1.000000e+00 : f32
    %1158 = vector.broadcast %cst_219 : f32 to vector<2x8xf32>
    %1159 = arith.addf %1158, %1157 : vector<2x8xf32>
    %1160 = arith.divf %1158, %1159 : vector<2x8xf32>
    %1161 = vector.extract_strided_slice %1150 {offsets = [0, 8], sizes = [2, 8], strides = [1, 1]} : vector<2x24xf32> to vector<2x8xf32>
    %1162 = vector.extract_strided_slice %1148 {offsets = [0, 8], sizes = [2, 8], strides = [1, 1]} : vector<2x48xf32> to vector<2x8xf32>
    %1163 = arith.addf %1161, %1162 : vector<2x8xf32>
    %1164 = arith.negf %1163 : vector<2x8xf32>
    %1165 = math.exp %1164 : vector<2x8xf32>
    %cst_220 = arith.constant 1.000000e+00 : f32
    %1166 = vector.broadcast %cst_220 : f32 to vector<2x8xf32>
    %1167 = arith.addf %1166, %1165 : vector<2x8xf32>
    %1168 = arith.divf %1166, %1167 : vector<2x8xf32>
    %1169 = vector.extract_strided_slice %1150 {offsets = [0, 16], sizes = [2, 8], strides = [1, 1]} : vector<2x24xf32> to vector<2x8xf32>
    %1170 = vector.extract_strided_slice %1148 {offsets = [0, 16], sizes = [2, 8], strides = [1, 1]} : vector<2x48xf32> to vector<2x8xf32>
    %1171 = arith.mulf %1160, %1170 : vector<2x8xf32>
    %1172 = arith.addf %1169, %1171 : vector<2x8xf32>
    %1173 = math.tanh %1172 : vector<2x8xf32>
    %1174 = vector.extract_strided_slice %1152 {offsets = [0, 0], sizes = [2, 8], strides = [1, 1]} : vector<2x24xf32> to vector<2x8xf32>
    %1175 = vector.extract_strided_slice %1148 {offsets = [0, 24], sizes = [2, 8], strides = [1, 1]} : vector<2x48xf32> to vector<2x8xf32>
    %1176 = arith.addf %1174, %1175 : vector<2x8xf32>
    %1177 = arith.negf %1176 : vector<2x8xf32>
    %1178 = math.exp %1177 : vector<2x8xf32>
    %cst_221 = arith.constant 1.000000e+00 : f32
    %1179 = vector.broadcast %cst_221 : f32 to vector<2x8xf32>
    %1180 = arith.addf %1179, %1178 : vector<2x8xf32>
    %1181 = arith.divf %1179, %1180 : vector<2x8xf32>
    %1182 = vector.extract_strided_slice %1152 {offsets = [0, 8], sizes = [2, 8], strides = [1, 1]} : vector<2x24xf32> to vector<2x8xf32>
    %1183 = vector.extract_strided_slice %1148 {offsets = [0, 32], sizes = [2, 8], strides = [1, 1]} : vector<2x48xf32> to vector<2x8xf32>
    %1184 = arith.addf %1182, %1183 : vector<2x8xf32>
    %1185 = arith.negf %1184 : vector<2x8xf32>
    %1186 = math.exp %1185 : vector<2x8xf32>
    %cst_222 = arith.constant 1.000000e+00 : f32
    %1187 = vector.broadcast %cst_222 : f32 to vector<2x8xf32>
    %1188 = arith.addf %1187, %1186 : vector<2x8xf32>
    %1189 = arith.divf %1187, %1188 : vector<2x8xf32>
    %1190 = vector.extract_strided_slice %1152 {offsets = [0, 16], sizes = [2, 8], strides = [1, 1]} : vector<2x24xf32> to vector<2x8xf32>
    %1191 = vector.extract_strided_slice %1148 {offsets = [0, 40], sizes = [2, 8], strides = [1, 1]} : vector<2x48xf32> to vector<2x8xf32>
    %1192 = arith.mulf %1181, %1191 : vector<2x8xf32>
    %1193 = arith.addf %1190, %1192 : vector<2x8xf32>
    %1194 = math.tanh %1193 : vector<2x8xf32>
    %cst_223 = arith.constant 1.000000e+00 : f32
    %1195 = vector.broadcast %cst_223 : f32 to vector<2x8xf32>
    %1196 = arith.subf %1195, %1168 : vector<2x8xf32>
    %1197 = arith.mulf %1196, %1173 : vector<2x8xf32>
    %1198 = vector.extract_strided_slice %1145 {offsets = [0, 0], sizes = [2, 8], strides = [1, 1]} : vector<2x16xf32> to vector<2x8xf32>
    %1199 = arith.mulf %1168, %1198 : vector<2x8xf32>
    %1200 = arith.addf %1197, %1199 : vector<2x8xf32>
    %cst_224 = arith.constant 1.000000e+00 : f32
    %1201 = vector.broadcast %cst_224 : f32 to vector<2x8xf32>
    %1202 = arith.subf %1201, %1189 : vector<2x8xf32>
    %1203 = arith.mulf %1202, %1194 : vector<2x8xf32>
    %1204 = vector.extract_strided_slice %1145 {offsets = [0, 8], sizes = [2, 8], strides = [1, 1]} : vector<2x16xf32> to vector<2x8xf32>
    %1205 = arith.mulf %1189, %1204 : vector<2x8xf32>
    %1206 = arith.addf %1203, %1205 : vector<2x8xf32>
    %1207 = tpu.concatenate %766, %1206 in 1 : vector<2x8xf32>, vector<2x8xf32> -> vector<2x16xf32>
    %1208 = vector.shape_cast %1207 : vector<2x16xf32> to vector<2x1x16xf32>
    %1209 = tpu.concatenate %828, %1144 in 1 : vector<2x8xf32>, vector<2x8xf32> -> vector<2x16xf32>
    %1210 = vector.shape_cast %1209 : vector<2x16xf32> to vector<2x1x16xf32>
    %1211 = tpu.concatenate %890, %1082 in 1 : vector<2x8xf32>, vector<2x8xf32> -> vector<2x16xf32>
    %1212 = vector.shape_cast %1211 : vector<2x16xf32> to vector<2x1x16xf32>
    %1213 = tpu.concatenate %952, %1020 in 1 : vector<2x8xf32>, vector<2x8xf32> -> vector<2x16xf32>
    %1214 = vector.shape_cast %1213 : vector<2x16xf32> to vector<2x1x16xf32>
    %1215 = tpu.concatenate %1014, %958 in 1 : vector<2x8xf32>, vector<2x8xf32> -> vector<2x16xf32>
    %1216 = vector.shape_cast %1215 : vector<2x16xf32> to vector<2x1x16xf32>
    %1217 = tpu.concatenate %1076, %896 in 1 : vector<2x8xf32>, vector<2x8xf32> -> vector<2x16xf32>
    %1218 = vector.shape_cast %1217 : vector<2x16xf32> to vector<2x1x16xf32>
    %1219 = tpu.concatenate %1138, %834 in 1 : vector<2x8xf32>, vector<2x8xf32> -> vector<2x16xf32>
    %1220 = vector.shape_cast %1219 : vector<2x16xf32> to vector<2x1x16xf32>
    %1221 = tpu.concatenate %1200, %772 in 1 : vector<2x8xf32>, vector<2x8xf32> -> vector<2x16xf32>
    %1222 = vector.shape_cast %1221 : vector<2x16xf32> to vector<2x1x16xf32>
    %1223 = tpu.concatenate %1208, %1210, %1212, %1214, %1216, %1218, %1220, %1222 in 1 : vector<2x1x16xf32>, vector<2x1x16xf32>, vector<2x1x16xf32>, vector<2x1x16xf32>, vector<2x1x16xf32>, vector<2x1x16xf32>, vector<2x1x16xf32>, vector<2x1x16xf32> -> vector<2x8x16xf32>
    %c0_225 = arith.constant 0 : index
    %c0_226 = arith.constant 0 : index
    %c0_227 = arith.constant 0 : index
    %1224 = vector.load %arg32[%c0_225, %c0_226, %c0_227] : memref<2x8x16xf32, #tpu.memory_space<vmem>>, vector<2x8x16xf32>
    tpu.vector_store %arg32[%c0_225, %c0_226, %c0_227], %1223 {strides = array<i32>} : memref<2x8x16xf32, #tpu.memory_space<vmem>>, vector<2x8x16xf32>,
    return
  }
}

</mosaic_0001>

<bundles_post_ra>
// kernel: _lambda_.1
= control target key start
LH: loop header
LB: loop body
LE: loop exit
PB: predicated region body
PF: predicated region fallthrough
CT: control target
= control target key end

     0   :  { %s5505_s6 = smov 1   ;;  %s5506_s10 = smov 2   ;;  %s7234_s0 = inlined_call_operand.smem [shape: u32[34], index: -1, kind: input, shape index: {}] }
   0x1   :  { %s5560_s5 = sld [smem:[%s7234_s0]]   ;;  %s5507_s14 = smov 3  }
   0x2   :  { %s5565_s9 = sld [smem:[%s7234_s0 + %s5505_s6]]   ;;  %s5508_s18 = smov 4  }
   0x3   :  { %s5570_s13 = sld [smem:[%s7234_s0 + %s5506_s10]]   ;;  %s5509_s22 = smov 5  }
   0x4   :  { %s5575_s17 = sld [smem:[%s7234_s0 + %s5507_s14]]   ;;  %s5510_s26 = smov 6  }
   0x5   :  { %s5580_s21 = sld [smem:[%s7234_s0 + %s5508_s18]]   ;;  %s5511_s30 = smov 7  }
   0x6   :  { %s5585_s25 = sld [smem:[%s7234_s0 + %s5509_s22]]   ;;  %s5512_s4 = smov 8  }
   0x7   :  { %s5590_s29 = sld [smem:[%s7234_s0 + %s5510_s26]]   ;;  %s5513_s10 = smov 9  }
   0x8   :  { %s5595_s3 = sld [smem:[%s7234_s0 + %s5511_s30]]   ;;  %s5514_s15 = smov 10  }
   0x9   :  { %s5600_s8 = sld [smem:[%s7234_s0 + %s5512_s4]]   ;;  %s5515_s20 = smov 11  }
   0xa   :  { %s5605_s14 = sld [smem:[%s7234_s0 + %s5513_s10]]   ;;  %s5516_s26 = smov 12  }
   0xb   :  { %s5610_s19 = sld [smem:[%s7234_s0 + %s5514_s15]]   ;;  %s5517_s1 = smov 13  }
   0xc   :  { %s5615_s24 = sld [smem:[%s7234_s0 + %s5515_s20]]   ;;  %s5518_s7 = smov 14  }
   0xd   :  { %s5620_s30 = sld [smem:[%s7234_s0 + %s5516_s26]]   ;;  %s5519_s15 = smov 15  }
   0xe   :  { %s5625_s6 = sld [smem:[%s7234_s0 + %s5517_s1]]   ;;  %s5520_s22 = smov 16  }
   0xf   :  { %s5630_s12 = sld [smem:[%s7234_s0 + %s5518_s7]]   ;;  %s5521_s28 = smov 17  }
  0x10   :  { %s4881_s20 = sld [smem:[%s7234_s0 + %s5519_s15]]   ;;  %s5522_s10 = smov 18  }
  0x11   :  { %s5638_s27 = sld [smem:[%s7234_s0 + %s5520_s22]]   ;;  %s5523_s16 = smov 19  }
  0x12   :  { %7252 = sst [smem:[#allocation6_spill]] %s5615_s24  ;;  %s5524_s22 = smov 20  }
  0x13   :  { %s5643_s4 = sld [smem:[%s7234_s0 + %s5521_s28]]   ;;  %s5525_s28 = smov 21  }
  0x14   :  { %s5653_s24 = sld [smem:[%s7234_s0 + %s5523_s16]]   ;;  %s5527_s16 = smov 23  }
  0x15   :  { %7253 = sst [smem:[#allocation7_spill]] %s5630_s12  ;;  %s5528_s23 = smov 24  }
  0x16   :  { %s5648_s12 = sld [smem:[%s7234_s0 + %s5522_s10]]   ;;  %v73_v0 = vstv %s4881_s20  ;;  %s5526_s10 = smov 22  }
  0x17   :  { %7254 = sst [smem:[#allocation8_spill]] %s5638_s27  ;;  %74 = vst [vmem:[#allocation2] sm:$0x1] %v73_v0  ;;  %s5529_s20 = smov 25  }
  0x18   :  { %s5658_s27 = sld [smem:[%s7234_s0 + %s5524_s22]]  }
  0x19   :  { %7255 = sst [smem:[#allocation9_spill]] %s5643_s4 }
  0x1a   :  { %7256 = sst [smem:[#allocation10_spill]] %s5653_s24  ;;  %s5531_s24 = smov 27  }
  0x1b   :  { %s5663_s4 = sld [smem:[%s7234_s0 + %s5525_s28]]  }
  0x1c   :  { %s5668_s15 = sld [smem:[%s7234_s0 + %s5526_s10]]   ;;  %s5530_s10 = smov 26  }
  0x1d   :  { %s5673_s22 = sld [smem:[%s7234_s0 + %s5527_s16]]  }
  0x1e   :  { %7257 = sst [smem:[#allocation11_spill]] %s5658_s27  ;;  %s5532_s27 = smov 28  }
  0x1f   :  { %s5678_s28 = sld [smem:[%s7234_s0 + %s5528_s23]]  }
  0x20   :  { %s5683_s7 = sld [smem:[%s7234_s0 + %s5529_s20]]   ;;  %s5533_s20 = smov 29  }
  0x21   :  { %7258 = sst [smem:[#allocation12_spill]] %s5663_s4 }
  0x22   :  { %7259 = sst [smem:[#allocation13_spill]] %s5668_s15  ;;  %s5534_s15 = smov 30  }
  0x23   :  { %7260 = sst [smem:[#allocation14_spill]] %s5673_s22 }
  0x24   :  { %s5688_s4 = sld [smem:[%s7234_s0 + %s5530_s10]]  }
  0x25   :  { %7261 = sst [smem:[#allocation15_spill]] %s5678_s28 }
  0x26   :  { %7262 = sst [smem:[#allocation16_spill]] %s5683_s7 }
  0x27   :  { %s5693_s22 = sld [smem:[%s7234_s0 + %s5531_s24]]   ;;  %s5535_s24 = smov 31  }
  0x28   :  { %s5698_s28 = sld [smem:[%s7234_s0 + %s5532_s27]]   ;;  %s5536_s27 = smov 32  }
  0x29   :  { %s5703_s7 = sld [smem:[%s7234_s0 + %s5533_s20]]   ;;  %s5537_s20 = smov 33  }
  0x2a   :  { %7263 = sst [smem:[#allocation17_spill]] %s5688_s4 }
  0x2b   :  { %s5708_s4 = sld [smem:[%s7234_s0 + %s5534_s15]]  }
  0x2d   :  { %7264 = sst [smem:[#allocation18_spill]] %s5693_s22 }
  0x2e   :  { %7265 = sst [smem:[#allocation19_spill]] %s5698_s28 }
  0x2f   :  { %7266 = sst [smem:[#allocation20_spill]] %s5703_s7 }
  0x30   :  { %s5713_s22 = sld [smem:[%s7234_s0 + %s5535_s24]]  }
  0x31   :  { %s5718_s28 = sld [smem:[%s7234_s0 + %s5536_s27]]  }
  0x32   :  { %s5723_s7 = sld [smem:[%s7234_s0 + %s5537_s20]]  }
  0x33   :  { %v140_v1 = vld [vmem:[%s5560_s5] sm:$0xff]  ;;  %vm7244_vm0 = vcmask 1041408   ;;  %v141_v3 = vld [vmem:[%s5560_s5 + $0x8] sm:$0xff]  ;;  %v157_v4 = vld [vmem:[%s5565_s9 + $0x78] sm:$0xff]  ;;  %vm7242_vm1 = vcmask 1044480   ;;  %vm7251_vm2 = vcmask 1046528  }
  0x34   :  { %v166_v2 = vrot.slane %v140_v1, 6  ;;  %v156_v5 = vld [vmem:[%s5565_s9 + $0x70] sm:$0xff]  ;;  %v167_v6 = vrot.slane %v141_v3, 6  ;;  %238 = vmatpush.msra.mxu0 %v157_v4  ;;  %v155_v9 = vld [vmem:[%s5565_s9 + $0x68] sm:$0xff]  ;;  %vm7248_vm3 = vcmask 1045504   ;;  %v154_v16 = vld [vmem:[%s5565_s9 + $0x60] sm:$0xff] }
  0x35   :  { %v153_v17 = vld [vmem:[%s5565_s9 + $0x58] sm:$0xff]  ;;  %s5538_s0 = smov 96   ;;  %s5539_s15 = smov 32   ;;  %v152_v26 = vld [vmem:[%s5565_s9 + $0x50] sm:$0xff]  ;;  %v151_v30 = vld [vmem:[%s5565_s9 + $0x48] sm:$0xff] }
  0x36   :  { %v5730_v7 = vsel %vm7244_vm0, 0.0, %v166_v2  ;;  %v5733_v8 = vsel %vm7244_vm0, %v166_v2, 0.0  ;;  %239 = vmatpush.msra.mxu0 %v156_v5  ;;  %v5741_v14 = vsel %vm7244_vm0, 0.0, %v167_v6  ;;  %v5744_v15 = vsel %vm7244_vm0, %v167_v6, 0.0  ;;  %s5540_s10 = smov 64   ;;  %v150_v31 = vld [vmem:[%s5565_s9 + $0x40] sm:$0xff] }
  0x37   :  { %v206_v10 = vrot.slane %v5730_v7, 3  ;;  %v207_v11 = vrot.slane %v5733_v8, 3  ;;  %v180_v12 = vrot.slane %v5730_v7, 1  ;;  %v181_v13 = vrot.slane %v5733_v8, 1 }
  0x38   :  { %v193_v20 = vrot.slane %v5730_v7, 2  ;;  %v194_v21 = vrot.slane %v5733_v8, 2  ;;  %240 = vmatpush.msra.mxu0 %v155_v9  ;;  %v183_v22 = vrot.slane %v5741_v14, 1  ;;  %v184_v23 = vrot.slane %v5744_v15, 1 }
  0x39   :  { %v208_v18 = vsel %vm7242_vm1, %v206_v10, %v207_v11  ;;  %v182_v19 = vsel %vm7251_vm2, %v180_v12, %v181_v13  ;;  %v196_v24 = vrot.slane %v5741_v14, 2  ;;  %v197_v25 = vrot.slane %v5744_v15, 2 }
  0x3a   :  { %212 = vrot.lane.b32.xlu1 %v208_v18, %s5538_s0  ;;  %186 = vrot.lane.b32.xlu0 %v182_v19, %s5539_s15  ;;  %v209_v27 = vrot.slane %v5741_v14, 3  ;;  %v210_v28 = vrot.slane %v5744_v15, 3  ;;  %v185_v32 = vsel %vm7251_vm2, %v183_v22, %v184_v23  ;;  %v195_v33 = vsel %vm7248_vm3, %v193_v20, %v194_v21 }
  0x3b   :  { %241 = vmatpush.msra.mxu0 %v154_v16  ;;  %v198_v29 = vsel %vm7248_vm3, %v196_v24, %v197_v25 }
  0x3c   :  { %201 = vrot.lane.b32.xlu2 %v198_v29, %s5540_s10 }
  0x3d   :  { %242 = vmatpush.msra.mxu0 %v153_v17 }
  0x3f   :  { %243 = vmatpush.msra.mxu0 %v152_v26 }
  0x41   :  { %244 = vmatpush.msra.mxu0 %v151_v30 }
  0x42   :  { %75 = vsyncpa [#allocation4], 0  ;;  %188 = vrot.lane.b32.xlu1 %v185_v32, %s5539_s15  ;;  %199 = vrot.lane.b32.xlu0 %v195_v33, %s5540_s10  ;;  %v211_v34 = vsel %vm7242_vm1, %v209_v27, %v210_v28  ;;  %v149_v35 = vld [vmem:[%s5565_s9 + $0x38] sm:$0xff]  ;;  %v148_v36 = vld [vmem:[%s5565_s9 + $0x30] sm:$0xff]  ;;  %v219_v45 = vrot.slane %v5730_v7, 4  ;;  %v220_v46 = vrot.slane %v5733_v8, 4 }
  0x43   :  { %245 = vmatpush.msra.mxu0 %v150_v31  ;;  %v147_v37 = vld [vmem:[%s5565_s9 + $0x28] sm:$0xff]  ;;  %v146_v38 = vld [vmem:[%s5565_s9 + $0x20] sm:$0xff]  ;;  %v145_v39 = vld [vmem:[%s5565_s9 + $0x18] sm:$0xff]  ;;  %vm7243_vm4 = vcmask 1043456   ;;  %vm7250_vm5 = vcmask 261120   ;;  %v222_v50 = vrot.slane %v5741_v14, 4 }
  0x44   :  { %214 = vrot.lane.b32.xlu2 %v211_v34, %s5538_s0  ;;  %v161_v40 = vld [vmem:[%s5565_s9 + $0x98] sm:$0xff]  ;;  %v160_v41 = vld [vmem:[%s5565_s9 + $0x90] sm:$0xff]  ;;  %v159_v43 = vld [vmem:[%s5565_s9 + $0x88] sm:$0xff]  ;;  %v221_v49 = vsel %vm7243_vm4, %v219_v45, %v220_v46  ;;  %v223_v51 = vrot.slane %v5744_v15, 4  ;;  %vm228_vm6 = vcmask 523264   ;;  %vm231_vm7 = vcmask 785408  }
  0x45   :  { %246 = vmatpush.msra.mxu0 %v149_v35  ;;  %273 = vmatpush.msra.mxu1 %v161_v40  ;;  %v144_v42 = vld [vmem:[%s5565_s9 + $0x10] sm:$0xff]  ;;  %v143_v44 = vld [vmem:[%s5565_s9 + $0x8] sm:$0xff]  ;;  %v142_v47 = vld [vmem:[%s5565_s9] sm:$0xff]  ;;  %s7289_s11 = sld [smem:[#allocation17_spill]]  ;;  %s5546_s27 = smov 120  }
  0x46   :  { %v158_v48 = vld [vmem:[%s5565_s9 + $0x80] sm:$0xff]  ;;  %v224_v52 = vsel %vm7243_vm4, %v222_v50, %v223_v51  ;;  %v315_v1 = vld [vmem:[%s5580_s21 + $0x98] sm:$0xff]  ;;  %v314_v2 = vld [vmem:[%s5580_s21 + $0x90] sm:$0xff]  ;;  %s7267_s9 = sld [smem:[#allocation6_spill]]  ;;  %s5547_s23 = smov 104  }
  0x47   :  { %247 = vmatpush.msra.mxu0 %v148_v36  ;;  %274 = vmatpush.msra.mxu1 %v160_v41  ;;  %v313_v3 = vld [vmem:[%s5580_s21 + $0x88] sm:$0xff]  ;;  %v312_v4 = vld [vmem:[%s5580_s21 + $0x80] sm:$0xff]  ;;  %v311_v5 = vld [vmem:[%s5580_s21 + $0x78] sm:$0xff]  ;;  %s7290_s24 = sld [smem:[#allocation14_spill]]  ;;  %s5548_s26 = smov 8  }
  0x48   :  { %419 = vmatpush.msra.mxu3 %v315_v1  ;;  %v310_v6 = vld [vmem:[%s5580_s21 + $0x70] sm:$0xff]  ;;  %384 = vmatpush.msra.mxu2 %v311_v5  ;;  %v5052_v10 = vld [vmem:[%s5570_s13] ss:$0 sm:$0xff]  ;;  %v309_v51 = vld [vmem:[%s5580_s21 + $0x68] sm:$0xff]  ;;  %s5542_s13 = smov 112   ;;  %s7291_s16 = sld [smem:[#allocation15_spill]] }
  0x49   :  { %248 = vmatpush.msra.mxu0 %v147_v37  ;;  %275 = vmatpush.msra.mxu1 %v159_v43  ;;  %v5053_v12 = vld [vmem:[%s5575_s17] ss:$0 sm:$0xff]  ;;  %v297_v1 = vld [vmem:[%s5580_s21 + $0x8] sm:$0xff]  ;;  %s5543_s17 = smov 80   ;;  %s7292_s18 = sld [smem:[#allocation18_spill]] }
  0x4a   :  { %420 = vmatpush.msra.mxu3 %v314_v2  ;;  %385 = vmatpush.msra.mxu2 %v310_v6  ;;  %v296_v2 = vld [vmem:[%s5580_s21] sm:$0xff]  ;;  %s5549_s20 = smov 24   ;;  %s5550_s1 = smov [#allocation3]  }
  0x4b   :  { %249 = vmatpush.msra.mxu0 %v146_v38  ;;  %276 = vmatpush.msra.mxu1 %v158_v48  ;;  %s4849_s2 = sshll.u32 %s5550_s1, 4  ;;  %s4850_s2 = int_to_ptr.vmem [resolvable:$true] %s4849_s2 }
  0x4c   :  { %4900 = vmatmul.msk.f32.vlgmr.msra.gmra.mxu1 %vm7250_vm5, %v221_v49  ;;  %421 = vmatpush.msra.mxu3 %v313_v3 }
  0x4d   :  { %250 = vmatpush.msra.mxu0 %v145_v39  ;;  %386 = vmatpush.msra.mxu2 %v309_v51 }
  0x4e   :  { %422 = vmatpush.msra.mxu3 %v312_v4 }
  0x4f   :  { %251 = vmatpush.msra.mxu0 %v144_v42 }
  0x51   :  { %252 = vmatpush.msra.mxu0 %v143_v44 }
  0x53   :  { %253 = vmatpush.msra.mxu0 %v142_v47 }
  0x54   :  { %4901 = vmatmul.msk.f32.gmra.mxu1 %vm7250_vm5, %v224_v52  ;;  %v308_v52 = vld [vmem:[%s5580_s21 + $0x60] sm:$0xff] }
  0x55   :  { %387 = vmatpush.msra.mxu2 %v308_v52 }
  0x96   :  { %v202_v55 = vpop.permute.xlu2 %201 }
  0x9e   :  { %v215_v62 = vpop.permute.xlu2 %214 }
  0xac   :  { %v213_v53 = vpop.permute.xlu1 %212  ;;  %v187_v54 = vpop.permute.xlu0 %186 }
  0xad   :  { %v226_v56 = vsel %vm7250_vm5, %v5730_v7, %v187_v54  ;;  %v306_v54 = vld [vmem:[%s5580_s21 + $0x50] sm:$0xff] }
  0xb4   :  { %v200_v57 = vpop.permute.xlu0 %199  ;;  %v189_v58 = vpop.permute.xlu1 %188 }
  0xb5   :  { %v229_v59 = vsel %vm228_vm6, %v226_v56, %v200_v57  ;;  %v227_v61 = vsel %vm7250_vm5, %v5741_v14, %v189_v58  ;;  %v304_v56 = vld [vmem:[%s5580_s21 + $0x40] sm:$0xff]  ;;  %v303_v57 = vld [vmem:[%s5580_s21 + $0x38] sm:$0xff]  ;;  %v302_v58 = vld [vmem:[%s5580_s21 + $0x30] sm:$0xff] }
  0xb6   :  { %v5795_v60 = vsel %vm231_vm7, %v229_v59, %v213_v53  ;;  %v230_v63 = vsel %vm228_vm6, %v227_v61, %v202_v55  ;;  %v307_v53 = vld [vmem:[%s5580_s21 + $0x58] sm:$0xff]  ;;  %v305_v55 = vld [vmem:[%s5580_s21 + $0x48] sm:$0xff]  ;;  %v300_v61 = vld [vmem:[%s5580_s21 + $0x20] sm:$0xff] }
  0xb7   :  { %254 = vmatmul.f32.vlgmr.msra.gmra.mxu0 %v5795_v60  ;;  %v5802_v0 = vsel %vm231_vm7, %v230_v63, %v215_v62  ;;  %388 = vmatpush.msra.mxu2 %v307_v53  ;;  %v301_v59 = vld [vmem:[%s5580_s21 + $0x28] sm:$0xff]  ;;  %v299_v62 = vld [vmem:[%s5580_s21 + $0x18] sm:$0xff]  ;;  %v298_v63 = vld [vmem:[%s5580_s21 + $0x10] sm:$0xff]  ;;  %s5544_s21 = smov 16  }
  0xb9   :  { %389 = vmatpush.msra.mxu2 %v306_v54 }
  0xbb   :  { %390 = vmatpush.msra.mxu2 %v305_v55 }
  0xbd   :  { %391 = vmatpush.msra.mxu2 %v304_v56 }
  0xbf   :  { %257 = vmatmul.f32.gmra.mxu0 %v5802_v0  ;;  %392 = vmatpush.msra.mxu2 %v303_v57 }
  0xc1   :  { %393 = vmatpush.msra.mxu2 %v302_v58 }
  0xc3   :  { %394 = vmatpush.msra.mxu2 %v301_v59 }
  0xc5   :  { %395 = vmatpush.msra.mxu2 %v300_v61 }
  0xc7   :  { %396 = vmatpush.msra.mxu2 %v299_v62 }
  0xc9   :  { %v278_v7 = vpop.f32.mrf.mxu1  ;;  %397 = vmatpush.msra.mxu2 %v298_v63 }
  0xcb   :  { %398 = vmatpush.msra.mxu2 %v297_v1 }
  0xcd   :  { %399 = vmatpush.msra.mxu2 %v296_v2 }
  0xd1   :  { %v281_v14 = vpop.f32.mrf.mxu1 }
 0x134   :  { %v255_v8 = vpop.f32.mrf.mxu0 }
 0x135   :  { %v279_v9 = vadd.f32 %v278_v7, %v255_v8 }
 0x137   :  { %v284_v11 = vmax.f32 %v279_v9, 0.0 }
 0x139   :  { %v289_v13 = vmul.f32 %v5052_v10, %v284_v11 }
 0x13b   :  { %v294_v15 = vadd.f32 %v5053_v12, %v289_v13 }
 0x13c   :  { %v258_v16 = vpop.f32.mrf.mxu0 }
 0x13d   :  { %v320_v17 = vrot.slane %v294_v15, 6  ;;  %v282_v18 = vadd.f32 %v281_v14, %v258_v16  ;;  %v461_v15 = vld [vmem:[%s5595_s3 + $0x98] sm:$0xff]  ;;  %v460_v16 = vld [vmem:[%s5595_s3 + $0x90] sm:$0xff] }
 0x13e   :  { %565 = vmatpush.msrb.mxu3 %v461_v15  ;;  %v443_v15 = vld [vmem:[%s5595_s3 + $0x8] sm:$0xff] }
 0x13f   :  { %v5814_v19 = vsel %vm7244_vm0, 0.0, %v320_v17  ;;  %v326_v20 = vsel %vm7244_vm0, %v320_v17, 0.0  ;;  %v285_v21 = vmax.f32 %v282_v18, 0.0  ;;  %v459_v17 = vld [vmem:[%s5595_s3 + $0x88] sm:$0xff]  ;;  %v458_v18 = vld [vmem:[%s5595_s3 + $0x80] sm:$0xff] }
 0x140   :  { %v368_v22 = vrot.slane %v5814_v19, 4  ;;  %v369_v23 = vrot.slane %v326_v20, 4  ;;  %v356_v24 = vrot.slane %v5814_v19, 3  ;;  %v357_v25 = vrot.slane %v326_v20, 3  ;;  %566 = vmatpush.msrb.mxu3 %v460_v16  ;;  %v442_v16 = vld [vmem:[%s5595_s3] sm:$0xff] }
 0x141   :  { %v290_v26 = vmul.f32 %v5052_v10, %v285_v21  ;;  %v344_v27 = vrot.slane %v5814_v19, 2  ;;  %v345_v28 = vrot.slane %v326_v20, 2  ;;  %v332_v29 = vrot.slane %v5814_v19, 1 }
 0x142   :  { %v370_v30 = vsel %vm7243_vm4, %v368_v22, %v369_v23  ;;  %v358_v31 = vsel %vm7242_vm1, %v356_v24, %v357_v25  ;;  %v333_v32 = vrot.slane %v326_v20, 1  ;;  %567 = vmatpush.msrb.mxu3 %v459_v17  ;;  %v456_v20 = vld [vmem:[%s5595_s3 + $0x70] sm:$0xff]  ;;  %v5054_v24 = vld [vmem:[%s5585_s25] ss:$0 sm:$0xff]  ;;  %v596_v17 = vld [vmem:[%s5620_s30 + $0x18] sm:$0xff]  ;;  %s5545_s25 = smov 48  }
 0x143   :  { %v295_v33 = vadd.f32 %v5053_v12, %v290_v26  ;;  %4902 = vmatmul.msk.f32.vlgmr.msra.gmra.mxu3 %vm7250_vm5, %v370_v30  ;;  %362 = vrot.lane.b32.xlu2 %v358_v31, %s5538_s0  ;;  %v346_v34 = vsel %vm7248_vm3, %v344_v27, %v345_v28  ;;  %v5055_v26 = vld [vmem:[%s5590_s29] ss:$0 sm:$0xff]  ;;  %s7268_s29 = sld [smem:[#allocation8_spill]] }
 0x144   :  { %350 = vrot.lane.b32.xlu1 %v346_v34, %s5540_s10  ;;  %v334_v35 = vsel %vm7251_vm2, %v332_v29, %v333_v32  ;;  %568 = vmatpush.msrb.mxu3 %v458_v18  ;;  %v595_v18 = vld [vmem:[%s5620_s30 + $0x10] sm:$0xff] }
 0x145   :  { %v321_v36 = vrot.slane %v295_v33, 6  ;;  %338 = vrot.lane.b32.xlu0 %v334_v35, %s5539_s15  ;;  %648 = vmatpush.msrb.mxu0 %v596_v17 }
 0x146   :  { %844 = vmatpush.msrb.mxu2 %v596_v17 }
 0x147   :  { %v325_v37 = vsel %vm7244_vm0, 0.0, %v321_v36  ;;  %v327_v38 = vsel %vm7244_vm0, %v321_v36, 0.0  ;;  %649 = vmatpush.msrb.mxu0 %v595_v18 }
 0x148   :  { %v371_v39 = vrot.slane %v325_v37, 4  ;;  %v372_v40 = vrot.slane %v327_v38, 4  ;;  %v359_v41 = vrot.slane %v325_v37, 3  ;;  %v360_v42 = vrot.slane %v327_v38, 3  ;;  %845 = vmatpush.msrb.mxu2 %v595_v18 }
 0x149   :  { %v347_v43 = vrot.slane %v325_v37, 2  ;;  %v348_v44 = vrot.slane %v327_v38, 2  ;;  %v335_v45 = vrot.slane %v325_v37, 1  ;;  %v336_v46 = vrot.slane %v327_v38, 1 }
 0x14a   :  { %v373_v47 = vsel %vm7243_vm4, %v371_v39, %v372_v40  ;;  %v361_v48 = vsel %vm7242_vm1, %v359_v41, %v360_v42 }
 0x14b   :  { %4903 = vmatmul.msk.f32.gmra.mxu3 %vm7250_vm5, %v373_v47  ;;  %364 = vrot.lane.b32.xlu2 %v361_v48, %s5538_s0  ;;  %v349_v49 = vsel %vm7248_vm3, %v347_v43, %v348_v44  ;;  %v337_v50 = vsel %vm7251_vm2, %v335_v45, %v336_v46 }
 0x14c   :  { %352 = vrot.lane.b32.xlu1 %v349_v49, %s5540_s10 }
 0x14d   :  { %340 = vrot.lane.b32.xlu0 %v337_v50, %s5539_s15 }
 0x19d   :  { %v363_v4 = vpop.permute.xlu2 %362 }
 0x1a5   :  { %v365_v12 = vpop.permute.xlu2 %364 }
 0x1b6   :  { %v351_v3 = vpop.permute.xlu1 %350 }
 0x1b7   :  { %v339_v5 = vpop.permute.xlu0 %338 }
 0x1b8   :  { %v374_v6 = vsel %vm7250_vm5, %v5814_v19, %v339_v5  ;;  %v457_v19 = vld [vmem:[%s5595_s3 + $0x78] sm:$0xff] }
 0x1b9   :  { %v376_v7 = vsel %vm228_vm6, %v374_v6, %v351_v3  ;;  %530 = vmatpush.msrb.mxu1 %v457_v19  ;;  %v455_v3 = vld [vmem:[%s5595_s3 + $0x68] sm:$0xff]  ;;  %v453_v5 = vld [vmem:[%s5595_s3 + $0x58] sm:$0xff]  ;;  %v452_v6 = vld [vmem:[%s5595_s3 + $0x50] sm:$0xff] }
 0x1ba   :  { %v378_v8 = vsel %vm231_vm7, %v376_v7, %v363_v4  ;;  %v454_v4 = vld [vmem:[%s5595_s3 + $0x60] sm:$0xff]  ;;  %v451_v7 = vld [vmem:[%s5595_s3 + $0x48] sm:$0xff]  ;;  %v591_v19 = vld [vmem:[%s5610_s19 + $0x18] sm:$0xff] }
 0x1bb   :  { %400 = vmatmul.f32.vlgmr.msra.gmra.mxu2 %v378_v8  ;;  %531 = vmatpush.msrb.mxu1 %v456_v20  ;;  %v450_v8 = vld [vmem:[%s5595_s3 + $0x40] sm:$0xff]  ;;  %v590_v20 = vld [vmem:[%s5610_s19 + $0x10] sm:$0xff] }
 0x1bc   :  { %619 = vmatpush.msra.mxu3 %v591_v19 }
 0x1bd   :  { %532 = vmatpush.msrb.mxu1 %v455_v3 }
 0x1be   :  { %v353_v9 = vpop.permute.xlu1 %352  ;;  %620 = vmatpush.msra.mxu3 %v590_v20 }
 0x1bf   :  { %v341_v10 = vpop.permute.xlu0 %340  ;;  %533 = vmatpush.msrb.mxu1 %v454_v4 }
 0x1c0   :  { %v375_v11 = vsel %vm7250_vm5, %v325_v37, %v341_v10  ;;  %v448_v10 = vld [vmem:[%s5595_s3 + $0x30] sm:$0xff] }
 0x1c1   :  { %v377_v13 = vsel %vm228_vm6, %v375_v11, %v353_v9  ;;  %534 = vmatpush.msrb.mxu1 %v453_v5  ;;  %v449_v9 = vld [vmem:[%s5595_s3 + $0x38] sm:$0xff]  ;;  %v447_v11 = vld [vmem:[%s5595_s3 + $0x28] sm:$0xff] }
 0x1c2   :  { %v379_v14 = vsel %vm231_vm7, %v377_v13, %v365_v12  ;;  %v446_v12 = vld [vmem:[%s5595_s3 + $0x20] sm:$0xff]  ;;  %v445_v13 = vld [vmem:[%s5595_s3 + $0x18] sm:$0xff] }
 0x1c3   :  { %403 = vmatmul.f32.gmra.mxu2 %v379_v14  ;;  %535 = vmatpush.msrb.mxu1 %v452_v6  ;;  %v444_v14 = vld [vmem:[%s5595_s3 + $0x10] sm:$0xff]  ;;  %s7269_s3 = sld [smem:[#allocation9_spill]] }
 0x1c5   :  { %536 = vmatpush.msrb.mxu1 %v451_v7 }
 0x1c6   :  { %v424_v21 = vpop.f32.mrf.mxu3 }
 0x1c7   :  { %537 = vmatpush.msrb.mxu1 %v450_v8 }
 0x1c9   :  { %538 = vmatpush.msrb.mxu1 %v449_v9 }
 0x1cb   :  { %539 = vmatpush.msrb.mxu1 %v448_v10 }
 0x1cd   :  { %540 = vmatpush.msrb.mxu1 %v447_v11 }
 0x1ce   :  { %v427_v29 = vpop.f32.mrf.mxu3 }
 0x1cf   :  { %541 = vmatpush.msrb.mxu1 %v446_v12 }
 0x1d1   :  { %542 = vmatpush.msrb.mxu1 %v445_v13 }
 0x1d3   :  { %543 = vmatpush.msrb.mxu1 %v444_v14 }
 0x1d5   :  { %544 = vmatpush.msrb.mxu1 %v443_v15 }
 0x1d7   :  { %545 = vmatpush.msrb.mxu1 %v442_v16 }
 0x1d9   :  { %1277 = vmatpush.msra.mxu1 %v596_v17 }
 0x1db   :  { %1278 = vmatpush.msra.mxu1 %v595_v18 }
 0x23e   :  { %v401_v22 = vpop.f32.mrf.mxu2 }
 0x23f   :  { %v425_v23 = vadd.f32 %v424_v21, %v401_v22  ;;  %v594_v21 = vld [vmem:[%s5620_s30 + $0x8] sm:$0xff]  ;;  %v593_v22 = vld [vmem:[%s5620_s30] sm:$0xff]  ;;  %s7285_s30 = sld [smem:[#allocation13_spill]] }
 0x240   :  { %650 = vmatpush.msrb.mxu0 %v594_v21  ;;  %846 = vmatpush.msrb.mxu2 %v594_v21 }
 0x241   :  { %v430_v25 = vmax.f32 %v425_v23, 0.0  ;;  %1279 = vmatpush.msra.mxu1 %v594_v21 }
 0x242   :  { %651 = vmatpush.msrb.mxu0 %v593_v22  ;;  %847 = vmatpush.msrb.mxu2 %v593_v22 }
 0x243   :  { %v435_v27 = vmul.f32 %v5054_v24, %v430_v25  ;;  %1280 = vmatpush.msra.mxu1 %v593_v22 }
 0x244   :  { %1060 = vmatpush.msra.mxu0 %v596_v17  ;;  %1487 = vmatpush.msra.mxu2 %v596_v17 }
 0x245   :  { %v440_v28 = vadd.f32 %v5055_v26, %v435_v27 }
 0x246   :  { %v404_v30 = vpop.f32.mrf.mxu2  ;;  %1061 = vmatpush.msra.mxu0 %v595_v18  ;;  %1488 = vmatpush.msra.mxu2 %v595_v18 }
 0x247   :  { %v466_v31 = vrot.slane %v440_v28, 6  ;;  %v428_v32 = vadd.f32 %v427_v29, %v404_v30 }
 0x248   :  { %1062 = vmatpush.msra.mxu0 %v594_v21  ;;  %1489 = vmatpush.msra.mxu2 %v594_v21 }
 0x249   :  { %v5869_v33 = vsel %vm7244_vm0, 0.0, %v466_v31  ;;  %v472_v34 = vsel %vm7244_vm0, %v466_v31, 0.0  ;;  %v431_v35 = vmax.f32 %v428_v32, 0.0 }
 0x24a   :  { %v514_v36 = vrot.slane %v5869_v33, 4  ;;  %v515_v37 = vrot.slane %v472_v34, 4  ;;  %v502_v38 = vrot.slane %v5869_v33, 3  ;;  %v503_v39 = vrot.slane %v472_v34, 3  ;;  %1063 = vmatpush.msra.mxu0 %v593_v22  ;;  %1490 = vmatpush.msra.mxu2 %v593_v22 }
 0x24b   :  { %v436_v40 = vmul.f32 %v5054_v24, %v431_v35  ;;  %v490_v41 = vrot.slane %v5869_v33, 2  ;;  %v491_v42 = vrot.slane %v472_v34, 2  ;;  %v478_v43 = vrot.slane %v5869_v33, 1 }
 0x24c   :  { %v516_v44 = vsel %vm7243_vm4, %v514_v36, %v515_v37  ;;  %v504_v45 = vsel %vm7242_vm1, %v502_v38, %v503_v39  ;;  %v479_v46 = vrot.slane %v472_v34, 1  ;;  %v5541_v24 = vmov 0.0   ;;  %v589_v36 = vld [vmem:[%s5610_s19 + $0x8] sm:$0xff]  ;;  %v588_v37 = vld [vmem:[%s5610_s19] sm:$0xff]  ;;  %s7281_s19 = sld [smem:[#allocation12_spill]] }
 0x24d   :  { %v441_v47 = vadd.f32 %v5055_v26, %v436_v40  ;;  %4904 = vmatmul.msk.f32.vlgmr.msrb.gmra.mxu3 %vm7250_vm5, %v516_v44  ;;  %508 = vrot.lane.b32.xlu2 %v504_v45, %s5538_s0  ;;  %v492_v48 = vsel %vm7248_vm3, %v490_v41, %v491_v42  ;;  %v5932_v38 = vld [vmem:[%s5625_s6] ss:$0 sm:$0xff] }
 0x24e   :  { %496 = vrot.lane.b32.xlu1 %v492_v48, %s5540_s10  ;;  %v480_v49 = vsel %vm7251_vm2, %v478_v43, %v479_v46  ;;  %652 = vmatmul.f32.vlgmr.msrb.gmra.mxu0 %v5541_v24  ;;  %v5056_v46 = vld [vmem:[%s5600_s8] ss:$0 sm:$0xff]  ;;  %s7276_s8 = sld [smem:[#allocation10_spill]] }
 0x24f   :  { %v467_v50 = vrot.slane %v441_v47, 6  ;;  %484 = vrot.lane.b32.xlu0 %v480_v49, %s5539_s15  ;;  %1915 = vmatpush.msrb.mxu0 %v596_v17  ;;  %v5057_v48 = vld [vmem:[%s5605_s14] ss:$0 sm:$0xff]  ;;  %s7280_s14 = sld [smem:[#allocation11_spill]] }
 0x250   :  { %621 = vmatpush.msra.mxu3 %v589_v36 }
 0x251   :  { %v5885_v51 = vsel %vm7244_vm0, 0.0, %v467_v50  ;;  %v473_v52 = vsel %vm7244_vm0, %v467_v50, 0.0  ;;  %1916 = vmatpush.msrb.mxu0 %v595_v18 }
 0x252   :  { %v517_v53 = vrot.slane %v5885_v51, 4  ;;  %v518_v54 = vrot.slane %v473_v52, 4  ;;  %v505_v55 = vrot.slane %v5885_v51, 3  ;;  %v506_v56 = vrot.slane %v473_v52, 3  ;;  %622 = vmatpush.msra.mxu3 %v588_v37 }
 0x253   :  { %v493_v57 = vrot.slane %v5885_v51, 2  ;;  %v494_v58 = vrot.slane %v473_v52, 2  ;;  %v481_v59 = vrot.slane %v5885_v51, 1  ;;  %v482_v61 = vrot.slane %v473_v52, 1  ;;  %1917 = vmatpush.msrb.mxu0 %v594_v21 }
 0x254   :  { %v519_v62 = vsel %vm7243_vm4, %v517_v53, %v518_v54  ;;  %v507_v63 = vsel %vm7242_vm1, %v505_v55, %v506_v56  ;;  %1698 = vmatpush.msrb.mxu3 %v596_v17 }
 0x255   :  { %4905 = vmatmul.msk.f32.gmra.mxu3 %vm7250_vm5, %v519_v62  ;;  %510 = vrot.lane.b32.xlu2 %v507_v63, %s5538_s0  ;;  %v495_v1 = vsel %vm7248_vm3, %v493_v57, %v494_v58  ;;  %v483_v2 = vsel %vm7251_vm2, %v481_v59, %v482_v61  ;;  %v5059_v57 = vld [vmem:[%s7267_s9] ss:$0 sm:$0xff] }
 0x256   :  { %498 = vrot.lane.b32.xlu1 %v495_v1, %s5540_s10  ;;  %1918 = vmatpush.msrb.mxu0 %v593_v22 }
 0x257   :  { %486 = vrot.lane.b32.xlu0 %v483_v2, %s5539_s15  ;;  %1699 = vmatpush.msrb.mxu3 %v595_v18 }
 0x259   :  { %1700 = vmatpush.msrb.mxu3 %v594_v21 }
 0x25b   :  { %1701 = vmatpush.msrb.mxu3 %v593_v22 }
 0x2a7   :  { %v509_v25 = vpop.permute.xlu2 %508 }
 0x2c0   :  { %v497_v23 = vpop.permute.xlu1 %496 }
 0x2c1   :  { %v485_v26 = vpop.permute.xlu0 %484 }
 0x2c2   :  { %v520_v27 = vsel %vm7250_vm5, %v5869_v33, %v485_v26  ;;  %v511_v33 = vpop.permute.xlu2 %510 }
 0x2c3   :  { %v522_v28 = vsel %vm228_vm6, %v520_v27, %v497_v23 }
 0x2c4   :  { %v524_v29 = vsel %vm231_vm7, %v522_v28, %v509_v25 }
 0x2c5   :  { %546 = vmatmul.f32.vlgmr.msrb.gmra.mxu1 %v524_v29 }
 0x2c6   :  { %2130 = vmatpush.msrb.mxu1 %v596_v17 }
 0x2c8   :  { %v499_v30 = vpop.permute.xlu1 %498  ;;  %2131 = vmatpush.msrb.mxu1 %v595_v18 }
 0x2c9   :  { %v487_v31 = vpop.permute.xlu0 %486 }
 0x2ca   :  { %v521_v32 = vsel %vm7250_vm5, %v5885_v51, %v487_v31  ;;  %2132 = vmatpush.msrb.mxu1 %v594_v21 }
 0x2cb   :  { %v523_v34 = vsel %vm228_vm6, %v521_v32, %v499_v30  ;;  %v653_v39 = vpop.f32.mrf.mxu0 }
 0x2cc   :  { %v525_v35 = vsel %vm231_vm7, %v523_v34, %v511_v33  ;;  %2133 = vmatpush.msrb.mxu1 %v593_v22  ;;  %v654_v40 = vadd.f32 %v5932_v38, %v653_v39 }
 0x2cd   :  { %549 = vmatmul.f32.gmra.mxu1 %v525_v35 }
 0x2ce   :  { %v657_v42 = vrot.slane %v654_v40, 1  ;;  %700 = vrot.lane.b32.xlu2 %v654_v40, %s5538_s0  ;;  %v720_v43 = vrot.slane %v654_v40, 2 }
 0x2d0   :  { %v570_v41 = vpop.f32.mrf.mxu3  ;;  %702 = vrot.lane.b32.xlu0 %v657_v42, %s5538_s0  ;;  %762 = vrot.lane.b32.xlu1 %v720_v43, %s5538_s0 }
 0x2d8   :  { %v573_v51 = vpop.f32.mrf.mxu3 }
 0x342   :  { %v547_v44 = vpop.f32.mrf.mxu1  ;;  %v703_v30 = vpop.permute.xlu0 %702 }
 0x343   :  { %v571_v45 = vadd.f32 %v570_v41, %v547_v44 }
 0x345   :  { %v576_v47 = vmax.f32 %v571_v45, 0.0 }
 0x347   :  { %v581_v49 = vmul.f32 %v5056_v46, %v576_v47 }
 0x349   :  { %v586_v50 = vadd.f32 %v5057_v48, %v581_v49 }
 0x34a   :  { %v550_v52 = vpop.f32.mrf.mxu1 }
 0x34b   :  { %v574_v53 = vadd.f32 %v573_v51, %v550_v52  ;;  %4906 = vmatmul.msk.f32.vlgmr.msra.gmra.mxu3 %vm7250_vm5, %v586_v50 }
 0x34d   :  { %v577_v54 = vmax.f32 %v574_v53, 0.0 }
 0x34f   :  { %v582_v55 = vmul.f32 %v5056_v46, %v577_v54 }
 0x351   :  { %v587_v56 = vadd.f32 %v5057_v48, %v582_v55  ;;  %v763_v55 = vpop.permute.xlu1 %762 }
 0x353   :  { %4907 = vmatmul.msk.f32.gmra.mxu3 %vm7250_vm5, %v587_v56 }
 0x3ce   :  { %v624_v58 = vpop.f32.mrf.mxu3 }
 0x3cf   :  { %v5943_v59 = vadd.f32 %v5059_v57, %v624_v58 }
 0x3d1   :  { %v660_v61 = vadd.f32 %v654_v40, %v5943_v59  ;;  %v722_v62 = vadd.f32 %v657_v42, %v5943_v59 }
 0x3d3   :  { %v4908_v63 = vmul.f32 -1.442695, %v660_v61  ;;  %v4910_v1 = vmul.f32 -1.442695, %v722_v62 }
 0x3d5   :  { %5072 = vpow2.f32 %v4908_v63 }
 0x3d6   :  { %v627_v2 = vpop.f32.mrf.mxu3  ;;  %5074 = vpow2.f32 %v4910_v1 }
 0x3d7   :  { %v5947_v3 = vadd.f32 %v5059_v57, %v627_v2  ;;  %v701_v2 = vpop.permute.xlu2 %700 }
 0x3d9   :  { %v661_v4 = vadd.f32 %v657_v42, %v5947_v3  ;;  %v723_v5 = vadd.f32 %v720_v43, %v5947_v3 }
 0x3db   :  { %v5073_v6 = vpop.eup %5072  ;;  %v4909_v7 = vmul.f32 -1.442695, %v661_v4  ;;  %v4911_v10 = vmul.f32 -1.442695, %v723_v5 }
 0x3dc   :  { %v5075_v8 = vpop.eup %5074  ;;  %v5951_v9 = vadd.f32 1.0, %v5073_v6 }
 0x3dd   :  { %5076 = vpow2.f32 %v4909_v7  ;;  %v730_v11 = vadd.f32 1.0, %v5075_v8 }
 0x3de   :  { %5078 = vrcp.f32 %v5951_v9  ;;  %v681_v50 = vand.u32 2147483648, %v5951_v9  ;;  %v679_v53 = vand.u32 2147483647, %v5951_v9 }
 0x3df   :  { %5080 = vrcp.f32 %v730_v11  ;;  %v743_v21 = vand.u32 2147483648, %v730_v11  ;;  %v741_v23 = vand.u32 2147483647, %v730_v11  ;;  %vm737_vm9 = vweird.f32 %v730_v11 }
 0x3e0   :  { %5082 = vpow2.f32 %v4911_v10  ;;  %v682_v62 = vor.u32 1.1754944e-38, %v681_v50 }
 0x3e1   :  { %v744_v29 = vor.u32 1.1754944e-38, %v743_v21  ;;  %vm742_vm11 = vcmp.eq.f32.partialorder %v741_v23, 8.507059e+37 }
 0x3e3   :  { %v5077_v12 = vpop.eup %5076 }
 0x3e4   :  { %v5954_v13 = vpop.eup %5078  ;;  %v669_v14 = vadd.f32 1.0, %v5077_v12 }
 0x3e5   :  { %v5081_v15 = vpop.eup %5080  ;;  %v671_v19 = vmul.f32 %v5954_v13, %v5951_v9  ;;  %vm676_vm7 = vweird.f32 %v5954_v13 }
 0x3e6   :  { %v5083_v16 = vpop.eup %5082  ;;  %5084 = vrcp.f32 %v669_v14  ;;  %v733_v17 = vmul.f32 %v5081_v15, %v730_v11  ;;  %vm738_vm8 = vweird.f32 %v5081_v15  ;;  %v694_v34 = vand.u32 2147483647, %v669_v14 }
 0x3e7   :  { %v731_v18 = vadd.f32 1.0, %v5083_v16  ;;  %v672_v26 = vsub.f32 1.0, %v671_v19  ;;  %vm739_vm10 = vmor %vm737_vm9, %vm738_vm8  ;;  %v696_v35 = vand.u32 2147483648, %v669_v14  ;;  %vm690_vm13 = vweird.f32 %v669_v14 }
 0x3e8   :  { %v734_v20 = vsub.f32 1.0, %v733_v17  ;;  %vm695_vm8 = vcmp.eq.f32.partialorder %v694_v34, 8.507059e+37 }
 0x3e9   :  { %5086 = vrcp.f32 %v731_v18  ;;  %v673_v39 = vmul.f32 %v5954_v13, %v672_v26  ;;  %v758_v44 = vand.u32 2147483648, %v731_v18  ;;  %v697_v45 = vor.u32 1.1754944e-38, %v696_v35 }
 0x3ea   :  { %v735_v22 = vmul.f32 %v5081_v15, %v734_v20  ;;  %v756_v47 = vand.u32 2147483647, %v731_v18  ;;  %vm752_vm9 = vweird.f32 %v731_v18 }
 0x3eb   :  { %v674_v48 = vadd.f32 %v5954_v13, %v673_v39  ;;  %v759_v56 = vor.u32 1.1754944e-38, %v758_v44 }
 0x3ec   :  { %v5085_v25 = vpop.eup %5084  ;;  %v736_v28 = vadd.f32 %v5081_v15, %v735_v22 }
 0x3ed   :  { %v686_v27 = vmul.f32 %v5085_v25, %v669_v14  ;;  %vm691_vm12 = vweird.f32 %v5085_v25 }
 0x3ee   :  { %v740_v33 = vsel %vm739_vm10, %v5081_v15, %v736_v28  ;;  %vm692_vm14 = vmor %vm690_vm13, %vm691_vm12  ;;  %vm675_vm10 = vweird.f32 %v5951_v9  ;;  %vm757_vm13 = vcmp.eq.f32.partialorder %v756_v47, 8.507059e+37 }
 0x3ef   :  { %v5087_v31 = vpop.eup %5086  ;;  %v687_v32 = vsub.f32 1.0, %v686_v27  ;;  %v5958_v36 = vsel %vm742_vm11, %v744_v29, %v740_v33  ;;  %vm677_vm12 = vmor %vm675_vm10, %vm676_vm7  ;;  %vm827_vm7 = vcmask 130048  }
 0x3f0   :  { %v748_v37 = vmul.f32 %v5087_v31, %v731_v18  ;;  %v765_v41 = vmul.f32 %v5958_v36, %v703_v30  ;;  %vm753_vm15 = vweird.f32 %v5087_v31  ;;  %v678_v58 = vsel %vm677_vm12, %v5954_v13, %v674_v48 }
 0x3f1   :  { %v688_v40 = vmul.f32 %v5085_v25, %v687_v32  ;;  %vm754_vm11 = vmor %vm752_vm9, %vm753_vm15  ;;  %v795_v18 = vsub.f32 1.0, %v5958_v36  ;;  %v807_v20 = vmul.f32 0.0, %v5958_v36  ;;  %vm7245_vm15 = vcmask 1041409  }
 0x3f2   :  { %v749_v42 = vsub.f32 1.0, %v748_v37  ;;  %769 = vrot.lane.b32.xlu1 %v765_v41, %s5539_s15 }
 0x3f3   :  { %v689_v43 = vadd.f32 %v5085_v25, %v688_v40 }
 0x3f4   :  { %v750_v46 = vmul.f32 %v5087_v31, %v749_v42 }
 0x3f5   :  { %v693_v49 = vsel %vm692_vm14, %v5085_v25, %v689_v43  ;;  %vm680_vm14 = vcmp.eq.f32.partialorder %v679_v53, 8.507059e+37 }
 0x3f6   :  { %v5966_v51 = vsel %vm695_vm8, %v697_v45, %v693_v49  ;;  %v751_v52 = vadd.f32 %v5087_v31, %v750_v46  ;;  %v683_v1 = vsel %vm680_vm14, %v682_v62, %v678_v58 }
 0x3f7   :  { %v707_v54 = vmul.f32 %v703_v30, %v5966_v51  ;;  %v706_v4 = vmul.f32 %v701_v2, %v683_v1  ;;  %v780_v32 = vsub.f32 1.0, %v5966_v51  ;;  %v792_v34 = vmul.f32 0.0, %v5966_v51 }
 0x3f8   :  { %v755_v57 = vsel %vm754_vm11, %v5087_v31, %v751_v52  ;;  %v779_v36 = vsub.f32 1.0, %v683_v1  ;;  %v791_v39 = vmul.f32 0.0, %v683_v1 }
 0x3f9   :  { %v760_v61 = vsel %vm757_vm13, %v759_v56, %v755_v57  ;;  %712 = vrot.lane.b32.xlu0 %v707_v54, %s5539_s15 }
 0x3fa   :  { %v766_v63 = vmul.f32 %v763_v55, %v760_v61  ;;  %v796_v21 = vsub.f32 1.0, %v760_v61  ;;  %v808_v25 = vmul.f32 0.0, %v760_v61 }
 0x3fc   :  { %771 = vrot.lane.b32.xlu2 %v766_v63, %s5539_s15 }
 0x401   :  { %710 = vrot.lane.b32.xlu0 %v706_v4, %s5539_s15 }
 0x456   :  { %v772_v5 = vpop.permute.xlu2 %771 }
 0x457   :  { %v776_v6 = vadd.f32 %v772_v5, %v5947_v3 }
 0x459   :  { %5088 = vtanh.f32 %v776_v6 }
 0x45f   :  { %v5089_v7 = vpop.eup %5088 }
 0x460   :  { %801 = vrot.lane.b32.xlu0 %v5089_v7, %s5542_s13 }
 0x464   :  { %v770_v8 = vpop.permute.xlu1 %769 }
 0x465   :  { %v775_v9 = vadd.f32 %v770_v8, %v5943_v59 }
 0x467   :  { %5090 = vtanh.f32 %v775_v9 }
 0x46b   :  { %v713_v10 = vpop.permute.xlu0 %712 }
 0x46c   :  { %v717_v11 = vadd.f32 %v713_v10, %v5947_v3 }
 0x46d   :  { %v5091_v12 = vpop.eup %5090 }
 0x46e   :  { %5092 = vtanh.f32 %v717_v11  ;;  %799 = vrot.lane.b32.xlu2 %v5091_v12, %s5542_s13 }
 0x473   :  { %v711_v13 = vpop.permute.xlu0 %710 }
 0x474   :  { %v5093_v14 = vpop.eup %5092  ;;  %v716_v15 = vadd.f32 %v711_v13, %v5943_v59 }
 0x475   :  { %785 = vrot.lane.b32.xlu1 %v5093_v14, %s5542_s13 }
 0x476   :  { %5094 = vtanh.f32 %v716_v15 }
 0x47c   :  { %v5095_v16 = vpop.eup %5094 }
 0x47d   :  { %783 = vrot.lane.b32.xlu1 %v5095_v16, %s5542_s13 }
 0x4c8   :  { %v800_v17 = vpop.permute.xlu2 %799 }
 0x4c9   :  { %v805_v19 = vmul.f32 %v800_v17, %v795_v18 }
 0x4cb   :  { %v5985_v23 = vadd.f32 %v807_v20, %v805_v19 }
 0x4cd   :  { %v821_v28 = vrot.slane %v5985_v23, 7 }
 0x4d2   :  { %v802_v22 = vpop.permute.xlu0 %801 }
 0x4d3   :  { %v806_v26 = vmul.f32 %v802_v22, %v796_v21 }
 0x4d5   :  { %v5987_v27 = vadd.f32 %v808_v25, %v806_v26 }
 0x4d7   :  { %v822_v29 = vrot.slane %v5987_v27, 6 }
 0x4d9   :  { %v823_v30 = vsel %vm7245_vm15, %v822_v29, %v821_v28 }
 0x4da   :  { %824 = vrot.lane.b32.xlu0 %v823_v30, %s5543_s17 }
 0x4e7   :  { %v786_v31 = vpop.permute.xlu1 %785 }
 0x4e8   :  { %v790_v33 = vmul.f32 %v786_v31, %v780_v32 }
 0x4ea   :  { %v794_v35 = vadd.f32 %v792_v34, %v790_v33 }
 0x4ec   :  { %v813_v41 = vrot.slane %v794_v35, 7 }
 0x4ef   :  { %v784_v37 = vpop.permute.xlu1 %783 }
 0x4f0   :  { %v789_v40 = vmul.f32 %v784_v37, %v779_v36 }
 0x4f2   :  { %v793_v42 = vadd.f32 %v791_v39, %v789_v40 }
 0x4f4   :  { %v815_v43 = vsel %vm7245_vm15, %v813_v41, %v793_v42 }
 0x4f5   :  { %816 = vrot.lane.b32.xlu2 %v815_v43, %s5542_s13 }
 0x54c   :  { %v825_v44 = vpop.permute.xlu0 %824 }
 0x54f   :  { %v5997_v45 = vpop.permute.xlu2 %816 }
 0x550   :  { %v6001_v46 = vsel %vm827_vm7, %v5997_v45, %v825_v44 }
 0x551   :  { %4912 = vmatmul.msk.f32.vlgmr.msrb.gmra.mxu2 %vm7250_vm5, %v6001_v46 }
 0x5d4   :  { %v849_v47 = vpop.f32.mrf.mxu2 }
 0x5d5   :  { %v850_v48 = vadd.f32 %v5932_v38, %v849_v47 }
 0x5d7   :  { %898 = vrot.lane.b32.xlu1 %v850_v48, %s5538_s0  ;;  %v917_v49 = vrot.slane %v850_v48, 3  ;;  %v916_v50 = vrot.slane %v850_v48, 2  ;;  %v853_v51 = vrot.slane %v850_v48, 7  ;;  %v857_v56 = vadd.f32 %v850_v48, %v5947_v3 }
 0x5d9   :  { %962 = vrot.lane.b32.xlu0 %v917_v49, %s5538_s0  ;;  %960 = vrot.lane.b32.xlu2 %v916_v50, %s5538_s0  ;;  %v920_v52 = vadd.f32 %v916_v50, %v5943_v59  ;;  %v921_v57 = vadd.f32 %v917_v49, %v5947_v3  ;;  %v4914_v58 = vmul.f32 -1.442695, %v857_v56  ;;  %v856_v63 = vadd.f32 %v853_v51, %v5943_v59 }
 0x5db   :  { %v4915_v53 = vmul.f32 -1.442695, %v920_v52  ;;  %v4916_v62 = vmul.f32 -1.442695, %v921_v57  ;;  %v4913_v2 = vmul.f32 -1.442695, %v856_v63 }
 0x5dd   :  { %5096 = vpow2.f32 %v4915_v53 }
 0x5df   :  { %896 = vrot.lane.b32.xlu1 %v853_v51, %s5538_s0 }
 0x5e3   :  { %v5097_v54 = vpop.eup %5096 }
 0x5e4   :  { %v928_v55 = vadd.f32 1.0, %v5097_v54 }
 0x5e6   :  { %5098 = vrcp.f32 %v928_v55  ;;  %v941_v11 = vand.u32 2147483648, %v928_v55  ;;  %vm935_vm9 = vweird.f32 %v928_v55  ;;  %v939_v13 = vand.u32 2147483647, %v928_v55 }
 0x5e7   :  { %5100 = vpow2.f32 %v4914_v58 }
 0x5e8   :  { %5102 = vpow2.f32 %v4916_v62  ;;  %v942_v16 = vor.u32 1.1754944e-38, %v941_v11  ;;  %vm940_vm11 = vcmp.eq.f32.partialorder %v939_v13, 8.507059e+37 }
 0x5e9   :  { %5104 = vpow2.f32 %v4913_v2  ;;  %v992_v2 = vrot.slane %v6001_v46, 7 }
 0x5ec   :  { %v5099_v61 = vpop.eup %5098 }
 0x5ed   :  { %v931_v1 = vmul.f32 %v5099_v61, %v928_v55  ;;  %v5101_v5 = vpop.eup %5100  ;;  %vm936_vm8 = vweird.f32 %v5099_v61 }
 0x5ee   :  { %v5103_v6 = vpop.eup %5102  ;;  %v865_v8 = vadd.f32 1.0, %v5101_v5  ;;  %vm937_vm10 = vmor %vm935_vm9, %vm936_vm8 }
 0x5ef   :  { %v932_v4 = vsub.f32 1.0, %v931_v1  ;;  %v929_v9 = vadd.f32 1.0, %v5103_v6  ;;  %v5105_v12 = vpop.eup %5104  ;;  %v1015_v1 = vrot.slane %v6001_v46, 2 }
 0x5f0   :  { %5106 = vrcp.f32 %v865_v8  ;;  %v864_v15 = vadd.f32 1.0, %v5105_v12  ;;  %v892_v35 = vand.u32 2147483648, %v865_v8  ;;  %vm886_vm13 = vweird.f32 %v865_v8 }
 0x5f1   :  { %v933_v7 = vmul.f32 %v5099_v61, %v932_v4  ;;  %5108 = vrcp.f32 %v929_v9  ;;  %v890_v36 = vand.u32 2147483647, %v865_v8  ;;  %v956_v39 = vand.u32 2147483648, %v929_v9 }
 0x5f2   :  { %5110 = vrcp.f32 %v864_v15  ;;  %vm950_vm9 = vweird.f32 %v929_v9  ;;  %v954_v41 = vand.u32 2147483647, %v929_v9  ;;  %v893_v43 = vor.u32 1.1754944e-38, %v892_v35 }
 0x5f3   :  { %v934_v10 = vadd.f32 %v5099_v61, %v933_v7  ;;  %v957_v49 = vor.u32 1.1754944e-38, %v956_v39  ;;  %v877_v54 = vand.u32 2147483648, %v864_v15  ;;  %v875_v56 = vand.u32 2147483647, %v864_v15 }
 0x5f4   :  { %vm955_vm1 = vcmp.eq.f32.partialorder %v954_v41, 8.507059e+37 }
 0x5f5   :  { %v938_v14 = vsel %vm937_vm10, %v5099_v61, %v934_v10  ;;  %v878_v58 = vor.u32 1.1754944e-38, %v877_v54  ;;  %v1016_v10 = vrot.slane %v6001_v46, 3 }
 0x5f6   :  { %v5107_v17 = vpop.eup %5106  ;;  %v6014_v19 = vsel %vm940_vm11, %v942_v16, %v938_v14  ;;  %vm891_vm11 = vcmp.eq.f32.partialorder %v890_v36, 8.507059e+37 }
 0x5f7   :  { %v5109_v21 = vpop.eup %5108  ;;  %v882_v22 = vmul.f32 %v5107_v17, %v865_v8  ;;  %vm887_vm12 = vweird.f32 %v5107_v17 }
 0x5f8   :  { %v946_v25 = vmul.f32 %v5109_v21, %v929_v9  ;;  %v5111_v28 = vpop.eup %5110  ;;  %vm951_vm14 = vweird.f32 %v5109_v21  ;;  %vm888_vm8 = vmor %vm886_vm13, %vm887_vm12  ;;  %vm871_vm12 = vweird.f32 %v864_v15 }
 0x5f9   :  { %v883_v26 = vsub.f32 1.0, %v882_v22  ;;  %v867_v31 = vmul.f32 %v5111_v28, %v864_v15  ;;  %vm952_vm10 = vmor %vm950_vm9, %vm951_vm14  ;;  %vm872_vm4 = vweird.f32 %v5111_v28  ;;  %vm876_vm14 = vcmp.eq.f32.partialorder %v875_v56, 8.507059e+37 }
 0x5fa   :  { %v947_v29 = vsub.f32 1.0, %v946_v25  ;;  %vm873_vm13 = vmor %vm871_vm12, %vm872_vm4  ;;  %vm7247_vm4 = vcmask 1047559  }
 0x5fb   :  { %v884_v30 = vmul.f32 %v5107_v17, %v883_v26  ;;  %v868_v34 = vsub.f32 1.0, %v867_v31 }
 0x5fc   :  { %v948_v32 = vmul.f32 %v5109_v21, %v947_v29 }
 0x5fd   :  { %v885_v33 = vadd.f32 %v5107_v17, %v884_v30  ;;  %v869_v42 = vmul.f32 %v5111_v28, %v868_v34 }
 0x5fe   :  { %v949_v37 = vadd.f32 %v5109_v21, %v948_v32 }
 0x5ff   :  { %v889_v40 = vsel %vm888_vm8, %v5107_v17, %v885_v33  ;;  %v870_v51 = vadd.f32 %v5111_v28, %v869_v42 }
 0x600   :  { %v953_v44 = vsel %vm952_vm10, %v5109_v21, %v949_v37  ;;  %v6018_v48 = vsel %vm891_vm11, %v893_v43, %v889_v40 }
 0x601   :  { %v958_v53 = vsel %vm955_vm1, %v957_v49, %v953_v44  ;;  %v874_v57 = vsel %vm873_vm13, %v5111_v28, %v870_v51  ;;  %v981_v32 = vsub.f32 1.0, %v6018_v48  ;;  %vm7246_vm1 = vcmask 1042434  }
 0x602   :  { %v6023_v62 = vsel %vm876_vm14, %v878_v58, %v874_v57  ;;  %v1004_v28 = vsub.f32 1.0, %v958_v53 }
 0x633   :  { %v961_v18 = vpop.permute.xlu2 %960 }
 0x634   :  { %v966_v20 = vmul.f32 %v961_v18, %v6014_v19 }
 0x636   :  { %970 = vrot.lane.b32.xlu0 %v966_v20, %s5539_s15 }
 0x649   :  { %v899_v47 = vpop.permute.xlu1 %898 }
 0x64a   :  { %v903_v50 = vmul.f32 %v899_v47, %v6018_v48 }
 0x64b   :  { %v963_v52 = vpop.permute.xlu0 %962 }
 0x64c   :  { %v967_v55 = vmul.f32 %v963_v52, %v958_v53  ;;  %908 = vrot.lane.b32.xlu2 %v903_v50, %s5539_s15 }
 0x64e   :  { %972 = vrot.lane.b32.xlu1 %v967_v55, %s5539_s15 }
 0x651   :  { %v897_v61 = vpop.permute.xlu1 %896 }
 0x652   :  { %v902_v63 = vmul.f32 %v897_v61, %v6023_v62 }
 0x654   :  { %906 = vrot.lane.b32.xlu2 %v902_v63, %s5539_s15 }
 0x656   :  { %995 = vrot.lane.b32.xlu1 %v6001_v46, %s5544_s21  ;;  %v1003_v46 = vsub.f32 1.0, %v6014_v19 }
 0x65e   :  { %1017 = vrot.lane.b32.xlu1 %v1015_v1, %s5545_s25 }
 0x666   :  { %993 = vrot.lane.b32.xlu1 %v992_v2, %s5544_s21 }
 0x6a6   :  { %v909_v4 = vpop.permute.xlu2 %908 }
 0x6a7   :  { %v913_v5 = vadd.f32 %v909_v4, %v5947_v3 }
 0x6a8   :  { %v971_v6 = vpop.permute.xlu0 %970 }
 0x6a9   :  { %5112 = vtanh.f32 %v913_v5  ;;  %v976_v7 = vadd.f32 %v971_v6, %v5943_v59 }
 0x6ab   :  { %5114 = vtanh.f32 %v976_v7 }
 0x6ae   :  { %v907_v13 = vpop.permute.xlu2 %906 }
 0x6af   :  { %v5113_v8 = vpop.eup %5112  ;;  %v912_v14 = vadd.f32 %v907_v13, %v5943_v59 }
 0x6b0   :  { %986 = vrot.lane.b32.xlu0 %v5113_v8, %s5542_s13 }
 0x6b1   :  { %v5115_v9 = vpop.eup %5114 }
 0x6b2   :  { %1007 = vrot.lane.b32.xlu2 %v5115_v9, %s5542_s13 }
 0x6ba   :  { %1019 = vrot.lane.b32.xlu2 %v1016_v10, %s5545_s25 }
 0x6c0   :  { %v973_v11 = vpop.permute.xlu1 %972 }
 0x6c1   :  { %v977_v12 = vadd.f32 %v973_v11, %v5947_v3 }
 0x6c3   :  { %5116 = vtanh.f32 %v977_v12 }
 0x6c4   :  { %5118 = vtanh.f32 %v912_v14 }
 0x6c8   :  { %v996_v17 = vpop.permute.xlu1 %995 }
 0x6c9   :  { %v5117_v15 = vpop.eup %5116  ;;  %v1000_v36 = vmul.f32 %v996_v17, %v6018_v48 }
 0x6ca   :  { %1009 = vrot.lane.b32.xlu0 %v5117_v15, %s5542_s13  ;;  %v5119_v16 = vpop.eup %5118 }
 0x6d0   :  { %v1018_v21 = vpop.permute.xlu1 %1017 }
 0x6d1   :  { %v1023_v26 = vmul.f32 %v1018_v21, %v6014_v19  ;;  %v980_v19 = vsub.f32 1.0, %v6023_v62 }
 0x6d2   :  { %984 = vrot.lane.b32.xlu0 %v5119_v16, %s5542_s13 }
 0x6d8   :  { %v994_v41 = vpop.permute.xlu1 %993 }
 0x6d9   :  { %v999_v49 = vmul.f32 %v994_v41, %v6023_v62 }
 0x70c   :  { %v1008_v18 = vpop.permute.xlu2 %1007 }
 0x70d   :  { %v1013_v22 = vmul.f32 %v1008_v18, %v1003_v46 }
 0x70f   :  { %v1025_v30 = vadd.f32 %v1023_v26, %v1013_v22 }
 0x711   :  { %v1037_v37 = vrot.slane %v1025_v30, 5 }
 0x714   :  { %v1020_v25 = vpop.permute.xlu2 %1019 }
 0x715   :  { %v1024_v31 = vmul.f32 %v1020_v25, %v958_v53 }
 0x722   :  { %v987_v20 = vpop.permute.xlu0 %986 }
 0x723   :  { %v991_v34 = vmul.f32 %v987_v20, %v981_v32 }
 0x725   :  { %v1002_v42 = vadd.f32 %v1000_v36, %v991_v34 }
 0x727   :  { %v1029_v51 = vrot.slane %v1002_v42, 7 }
 0x73c   :  { %v1010_v29 = vpop.permute.xlu0 %1009 }
 0x73d   :  { %v1014_v33 = vmul.f32 %v1010_v29, %v1004_v28 }
 0x73f   :  { %v1026_v35 = vadd.f32 %v1024_v31, %v1014_v33 }
 0x741   :  { %v1038_v39 = vrot.slane %v1026_v35, 4  ;;  %v2377_v40 = vrot.slane %v1026_v35, 7 }
 0x743   :  { %v1039_v43 = vsel %vm7246_vm1, %v1038_v39, %v1037_v37  ;;  %v6050_v44 = vsel %vm7247_vm4, %v2377_v40, %v1025_v30 }
 0x744   :  { %v985_v47 = vpop.permute.xlu0 %984  ;;  %1040 = vrot.lane.b32.xlu0 %v1039_v43, %s5543_s17 }
 0x745   :  { %v990_v50 = vmul.f32 %v985_v47, %v980_v19 }
 0x747   :  { %v1001_v48 = vadd.f32 %v999_v49, %v990_v50 }
 0x749   :  { %v1031_v52 = vsel %vm7246_vm1, %v1029_v51, %v1001_v48 }
 0x74a   :  { %1032 = vrot.lane.b32.xlu2 %v1031_v52, %s5542_s13 }
 0x7a4   :  { %v6056_v53 = vpop.permute.xlu2 %1032 }
 0x7b6   :  { %v1041_v54 = vpop.permute.xlu0 %1040 }
 0x7b7   :  { %v6060_v55 = vsel %vm827_vm7, %v6056_v53, %v1041_v54 }
 0x7b8   :  { %v1045_v56 = vrot.slane %v6060_v55, 1 }
 0x7ba   :  { %4917 = vmatmul.msk.f32.vlgmr.msra.gmra.mxu0 %vm7250_vm5, %v1045_v56 }
 0x837   :  { %v1065_v57 = vpop.f32.mrf.mxu0 }
 0x838   :  { %v1066_v58 = vadd.f32 %v5932_v38, %v1065_v57 }
 0x83a   :  { %v1134_v61 = vrot.slane %v1066_v58, 4  ;;  %v1133_v62 = vrot.slane %v1066_v58, 3  ;;  %v1070_v63 = vrot.slane %v1066_v58, 7  ;;  %v1069_v1 = vrot.slane %v1066_v58, 6 }
 0x83c   :  { %1179 = vrot.lane.b32.xlu0 %v1134_v61, %s5538_s0  ;;  %1177 = vrot.lane.b32.xlu2 %v1133_v62, %s5538_s0  ;;  %v1137_v2 = vadd.f32 %v1133_v62, %v5943_v59  ;;  %v1138_v38 = vadd.f32 %v1134_v61, %v5947_v3  ;;  %v1074_v7 = vadd.f32 %v1070_v63, %v5947_v3 }
 0x83d   :  { %1115 = vrot.lane.b32.xlu1 %v1070_v63, %s5538_s0  ;;  %v1073_v12 = vadd.f32 %v1069_v1, %v5943_v59 }
 0x83e   :  { %v4920_v4 = vmul.f32 -1.442695, %v1137_v2  ;;  %v4921_v9 = vmul.f32 -1.442695, %v1138_v38  ;;  %v4919_v10 = vmul.f32 -1.442695, %v1074_v7 }
 0x83f   :  { %v4918_v14 = vmul.f32 -1.442695, %v1073_v12 }
 0x840   :  { %5120 = vpow2.f32 %v4920_v4 }
 0x845   :  { %1113 = vrot.lane.b32.xlu1 %v1069_v1, %s5538_s0 }
 0x846   :  { %v5121_v5 = vpop.eup %5120 }
 0x847   :  { %v1145_v6 = vadd.f32 1.0, %v5121_v5 }
 0x849   :  { %5122 = vrcp.f32 %v1145_v6  ;;  %v1158_v21 = vand.u32 2147483648, %v1145_v6  ;;  %vm1152_vm9 = vweird.f32 %v1145_v6  ;;  %v1156_v22 = vand.u32 2147483647, %v1145_v6 }
 0x84a   :  { %5124 = vpow2.f32 %v4921_v9 }
 0x84b   :  { %5126 = vpow2.f32 %v4919_v10  ;;  %v1159_v28 = vor.u32 1.1754944e-38, %v1158_v21  ;;  %vm1157_vm11 = vcmp.eq.f32.partialorder %v1156_v22, 8.507059e+37  ;;  %v1233_v21 = vrot.slane %v6060_v55, 5 }
 0x84c   :  { %5128 = vpow2.f32 %v4918_v14  ;;  %v1209_v14 = vrot.slane %v6060_v55, 7 }
 0x84f   :  { %v5123_v8 = vpop.eup %5122 }
 0x850   :  { %v1148_v11 = vmul.f32 %v5123_v8, %v1145_v6  ;;  %v5125_v15 = vpop.eup %5124  ;;  %vm1153_vm8 = vweird.f32 %v5123_v8 }
 0x851   :  { %v5127_v17 = vpop.eup %5126  ;;  %v1146_v18 = vadd.f32 1.0, %v5125_v15  ;;  %vm1154_vm10 = vmor %vm1152_vm9, %vm1153_vm8 }
 0x852   :  { %v1149_v13 = vsub.f32 1.0, %v1148_v11  ;;  %v1082_v20 = vadd.f32 1.0, %v5127_v17  ;;  %v5129_v26 = vpop.eup %5128 }
 0x853   :  { %5130 = vrcp.f32 %v1146_v18  ;;  %v1081_v31 = vadd.f32 1.0, %v5129_v26  ;;  %v1173_v47 = vand.u32 2147483648, %v1146_v18  ;;  %vm1167_vm14 = vweird.f32 %v1146_v18 }
 0x854   :  { %v1150_v16 = vmul.f32 %v5123_v8, %v1149_v13  ;;  %5132 = vrcp.f32 %v1082_v20  ;;  %v1171_v51 = vand.u32 2147483647, %v1146_v18  ;;  %v1109_v48 = vand.u32 2147483648, %v1082_v20 }
 0x855   :  { %5134 = vrcp.f32 %v1081_v31  ;;  %vm1103_vm9 = vweird.f32 %v1082_v20  ;;  %v1107_v52 = vand.u32 2147483647, %v1082_v20  ;;  %v1174_v56 = vor.u32 1.1754944e-38, %v1173_v47 }
 0x856   :  { %v1151_v46 = vadd.f32 %v5123_v8, %v1150_v16  ;;  %v1110_v61 = vor.u32 1.1754944e-38, %v1109_v48  ;;  %v1094_v38 = vand.u32 2147483648, %v1081_v31  ;;  %v1092_v7 = vand.u32 2147483647, %v1081_v31 }
 0x857   :  { %vm1108_vm0 = vcmp.eq.f32.partialorder %v1107_v52, 8.507059e+37  ;;  %v1232_v13 = vrot.slane %v6060_v55, 4 }
 0x858   :  { %v1155_v25 = vsel %vm1154_vm10, %v5123_v8, %v1151_v46  ;;  %v1095_v9 = vor.u32 1.1754944e-38, %v1094_v38 }
 0x859   :  { %v6073_v30 = vsel %vm1157_vm11, %v1159_v28, %v1155_v25  ;;  %v5131_v33 = vpop.eup %5130  ;;  %vm1172_vm11 = vcmp.eq.f32.partialorder %v1171_v51, 8.507059e+37 }
 0x85a   :  { %v5133_v34 = vpop.eup %5132  ;;  %v1163_v35 = vmul.f32 %v5131_v33, %v1146_v18  ;;  %vm1168_vm12 = vweird.f32 %v5131_v33 }
 0x85b   :  { %v1099_v36 = vmul.f32 %v5133_v34, %v1082_v20  ;;  %v5135_v40 = vpop.eup %5134  ;;  %vm1104_vm13 = vweird.f32 %v5133_v34  ;;  %vm1169_vm8 = vmor %vm1167_vm14, %vm1168_vm12  ;;  %vm1088_vm12 = vweird.f32 %v1081_v31  ;;  %vm1093_vm14 = vcmp.eq.f32.partialorder %v1092_v7, 8.507059e+37 }
 0x85c   :  { %v1164_v37 = vsub.f32 1.0, %v1163_v35  ;;  %v1084_v19 = vmul.f32 %v5135_v40, %v1081_v31  ;;  %vm1105_vm10 = vmor %vm1103_vm9, %vm1104_vm13  ;;  %vm1089_vm15 = vweird.f32 %v5135_v40 }
 0x85d   :  { %v1100_v39 = vsub.f32 1.0, %v1099_v36  ;;  %vm1090_vm13 = vmor %vm1088_vm12, %vm1089_vm15  ;;  %vm1885_vm15 = vcmask 1046534  }
 0x85e   :  { %v1165_v41 = vmul.f32 %v5131_v33, %v1164_v37  ;;  %v1085_v50 = vsub.f32 1.0, %v1084_v19 }
 0x85f   :  { %v1101_v42 = vmul.f32 %v5133_v34, %v1100_v39 }
 0x860   :  { %v1166_v43 = vadd.f32 %v5131_v33, %v1165_v41  ;;  %v1086_v58 = vmul.f32 %v5135_v40, %v1085_v50 }
 0x861   :  { %v1102_v49 = vadd.f32 %v5133_v34, %v1101_v42 }
 0x862   :  { %v1170_v54 = vsel %vm1169_vm8, %v5131_v33, %v1166_v43  ;;  %v1087_v6 = vadd.f32 %v5135_v40, %v1086_v58 }
 0x863   :  { %v1106_v57 = vsel %vm1105_vm10, %v5133_v34, %v1102_v49  ;;  %v1175_v63 = vsel %vm1172_vm11, %v1174_v56, %v1170_v54 }
 0x864   :  { %v1111_v4 = vsel %vm1108_vm0, %v1110_v61, %v1106_v57  ;;  %v1091_v8 = vsel %vm1090_vm13, %v5135_v40, %v1087_v6  ;;  %v1221_v40 = vsub.f32 1.0, %v1175_v63  ;;  %vm7249_vm0 = vcmask 1043459  }
 0x865   :  { %v1096_v11 = vsel %vm1093_vm14, %v1095_v9, %v1091_v8  ;;  %v1198_v43 = vsub.f32 1.0, %v1111_v4 }
 0x866   :  { %v1197_v58 = vsub.f32 1.0, %v1096_v11 }
 0x896   :  { %v1178_v29 = vpop.permute.xlu2 %1177 }
 0x897   :  { %v1183_v32 = vmul.f32 %v1178_v29, %v6073_v30 }
 0x899   :  { %1187 = vrot.lane.b32.xlu0 %v1183_v32, %s5539_s15 }
 0x8ae   :  { %v1180_v62 = vpop.permute.xlu0 %1179 }
 0x8af   :  { %v1184_v1 = vmul.f32 %v1180_v62, %v1175_v63  ;;  %v1116_v2 = vpop.permute.xlu1 %1115 }
 0x8b0   :  { %v1120_v5 = vmul.f32 %v1116_v2, %v1111_v4 }
 0x8b1   :  { %1189 = vrot.lane.b32.xlu1 %v1184_v1, %s5539_s15 }
 0x8b2   :  { %1125 = vrot.lane.b32.xlu2 %v1120_v5, %s5539_s15 }
 0x8b7   :  { %v1114_v10 = vpop.permute.xlu1 %1113 }
 0x8b8   :  { %v1119_v12 = vmul.f32 %v1114_v10, %v1096_v11  ;;  %v6114_v10 = vld [vmem:[%s5625_s6] ss:$0 sm:$0xff] }
 0x8b9   :  { %1212 = vrot.lane.b32.xlu1 %v6060_v55, %s5544_s21  ;;  %v1220_v55 = vsub.f32 1.0, %v6073_v30 }
 0x8ba   :  { %1123 = vrot.lane.b32.xlu2 %v1119_v12, %s5539_s15 }
 0x8c1   :  { %1234 = vrot.lane.b32.xlu1 %v1232_v13, %s5545_s25 }
 0x8c9   :  { %1210 = vrot.lane.b32.xlu1 %v1209_v14, %s5544_s21 }
 0x90b   :  { %v1188_v15 = vpop.permute.xlu0 %1187 }
 0x90c   :  { %v1193_v16 = vadd.f32 %v1188_v15, %v5943_v59  ;;  %v1126_v17 = vpop.permute.xlu2 %1125 }
 0x90d   :  { %v1130_v18 = vadd.f32 %v1126_v17, %v5947_v3 }
 0x90e   :  { %5136 = vtanh.f32 %v1193_v16 }
 0x90f   :  { %5138 = vtanh.f32 %v1130_v18 }
 0x914   :  { %v5137_v20 = vpop.eup %5136  ;;  %v1124_v26 = vpop.permute.xlu2 %1123 }
 0x915   :  { %v5139_v46 = vpop.eup %5138  ;;  %1224 = vrot.lane.b32.xlu2 %v5137_v20, %s5542_s13  ;;  %v1129_v28 = vadd.f32 %v1124_v26, %v5943_v59 }
 0x916   :  { %1203 = vrot.lane.b32.xlu0 %v5139_v46, %s5542_s13 }
 0x91d   :  { %1236 = vrot.lane.b32.xlu2 %v1233_v21, %s5545_s25 }
 0x923   :  { %v1190_v22 = vpop.permute.xlu1 %1189 }
 0x924   :  { %v1194_v25 = vadd.f32 %v1190_v22, %v5947_v3 }
 0x926   :  { %5140 = vtanh.f32 %v1194_v25 }
 0x927   :  { %5142 = vtanh.f32 %v1129_v28 }
 0x92b   :  { %v1213_v32 = vpop.permute.xlu1 %1212 }
 0x92c   :  { %v5141_v29 = vpop.eup %5140  ;;  %v1217_v51 = vmul.f32 %v1213_v32, %v1111_v4 }
 0x92d   :  { %1226 = vrot.lane.b32.xlu0 %v5141_v29, %s5542_s13  ;;  %v5143_v31 = vpop.eup %5142 }
 0x933   :  { %v1235_v35 = vpop.permute.xlu1 %1234 }
 0x934   :  { %v1240_v39 = vmul.f32 %v1235_v35, %v6073_v30 }
 0x935   :  { %1201 = vrot.lane.b32.xlu0 %v5143_v31, %s5542_s13 }
 0x93b   :  { %v1211_v56 = vpop.permute.xlu1 %1210 }
 0x96f   :  { %v1225_v33 = vpop.permute.xlu2 %1224 }
 0x970   :  { %v1230_v36 = vmul.f32 %v1225_v33, %v1220_v55 }
 0x972   :  { %v1242_v42 = vadd.f32 %v1240_v39, %v1230_v36 }
 0x974   :  { %v1254_v48 = vrot.slane %v1242_v42, 3 }
 0x977   :  { %v1237_v37 = vpop.permute.xlu2 %1236 }
 0x978   :  { %v1241_v19 = vmul.f32 %v1237_v37, %v1175_v63  ;;  %v1216_v63 = vmul.f32 %v1211_v56, %v1096_v11 }
 0x988   :  { %v1204_v34 = vpop.permute.xlu0 %1203 }
 0x989   :  { %v1208_v49 = vmul.f32 %v1204_v34, %v1198_v43 }
 0x98b   :  { %v1219_v57 = vadd.f32 %v1217_v51, %v1208_v49 }
 0x98d   :  { %v1246_v2 = vrot.slane %v1219_v57, 7 }
 0x99f   :  { %v1227_v41 = vpop.permute.xlu0 %1226 }
 0x9a0   :  { %v1231_v47 = vmul.f32 %v1227_v41, %v1221_v40 }
 0x9a2   :  { %v1243_v50 = vadd.f32 %v1241_v19, %v1231_v47 }
 0x9a4   :  { %v1255_v52 = vrot.slane %v1243_v50, 2  ;;  %v2365_v54 = vrot.slane %v1243_v50, 7 }
 0x9a6   :  { %v1256_v61 = vsel %vm7249_vm0, %v1255_v52, %v1254_v48  ;;  %v6100_v30 = vsel %vm1885_vm15, %v2365_v54, %v1242_v42 }
 0x9a7   :  { %v1202_v62 = vpop.permute.xlu0 %1201  ;;  %1257 = vrot.lane.b32.xlu0 %v1256_v61, %s5543_s17 }
 0x9a8   :  { %v1207_v1 = vmul.f32 %v1202_v62, %v1197_v58 }
 0x9aa   :  { %v1218_v5 = vadd.f32 %v1216_v63, %v1207_v1 }
 0x9ac   :  { %v1248_v4 = vsel %vm7249_vm0, %v1246_v2, %v1218_v5 }
 0x9ad   :  { %1249 = vrot.lane.b32.xlu2 %v1248_v4, %s5542_s13 }
 0xa07   :  { %v6105_v6 = vpop.permute.xlu2 %1249 }
 0xa19   :  { %v1258_v38 = vpop.permute.xlu0 %1257 }
 0xa1a   :  { %v6109_v7 = vsel %vm827_vm7, %v6105_v6, %v1258_v38 }
 0xa1b   :  { %v1262_v8 = vrot.slane %v6109_v7, 2  ;;  %v1444_v54 = vrot.slane %v6109_v7, 6 }
 0xa1d   :  { %4922 = vmatmul.msk.f32.vlgmr.msra.gmra.mxu1 %vm7250_vm5, %v1262_v8 }
 0xa9a   :  { %v1282_v9 = vpop.f32.mrf.mxu1 }
 0xa9b   :  { %v1283_v11 = vadd.f32 %v6114_v10, %v1282_v9 }
 0xa9d   :  { %v1350_v12 = vrot.slane %v1283_v11, 4  ;;  %v1287_v13 = vrot.slane %v1283_v11, 6  ;;  %v1286_v14 = vrot.slane %v1283_v11, 5 }
 0xa9f   :  { %1392 = vrot.lane.b32.xlu2 %v1350_v12, %s5538_s0  ;;  %1332 = vrot.lane.b32.xlu1 %v1287_v13, %s5538_s0  ;;  %v1352_v15 = vadd.f32 %v1350_v12, %v5943_v59  ;;  %v1291_v20 = vadd.f32 %v1287_v13, %v5947_v3  ;;  %v1290_v46 = vadd.f32 %v1286_v14, %v5943_v59 }
 0xaa0   :  { %1330 = vrot.lane.b32.xlu0 %v1286_v14, %s5538_s0  ;;  %v1353_v28 = vadd.f32 %v1286_v14, %v5947_v3 }
 0xaa1   :  { %v4925_v16 = vmul.f32 -1.442695, %v1352_v15  ;;  %v4924_v22 = vmul.f32 -1.442695, %v1291_v20  ;;  %v4923_v25 = vmul.f32 -1.442695, %v1290_v46 }
 0xaa2   :  { %v4926_v31 = vmul.f32 -1.442695, %v1353_v28 }
 0xaa3   :  { %5144 = vpow2.f32 %v4925_v16 }
 0xaa9   :  { %v5145_v17 = vpop.eup %5144 }
 0xaaa   :  { %v1360_v18 = vadd.f32 1.0, %v5145_v17 }
 0xaac   :  { %5146 = vrcp.f32 %v1360_v18  ;;  %v1373_v37 = vand.u32 2147483648, %v1360_v18  ;;  %vm1367_vm9 = vweird.f32 %v1360_v18  ;;  %v1371_v39 = vand.u32 2147483647, %v1360_v18 }
 0xaad   :  { %5148 = vpow2.f32 %v4924_v22 }
 0xaae   :  { %5150 = vpow2.f32 %v4923_v25  ;;  %v1374_v42 = vor.u32 1.1754944e-38, %v1373_v37  ;;  %vm1372_vm11 = vcmp.eq.f32.partialorder %v1371_v39, 8.507059e+37 }
 0xaaf   :  { %5152 = vpow2.f32 %v4926_v31 }
 0xab2   :  { %v5147_v21 = vpop.eup %5146 }
 0xab3   :  { %v1363_v26 = vmul.f32 %v5147_v21, %v1360_v18  ;;  %v5149_v32 = vpop.eup %5148  ;;  %vm1368_vm8 = vweird.f32 %v5147_v21 }
 0xab4   :  { %v5151_v34 = vpop.eup %5150  ;;  %v1299_v55 = vadd.f32 1.0, %v5149_v32  ;;  %vm1369_vm10 = vmor %vm1367_vm9, %vm1368_vm8 }
 0xab5   :  { %v1364_v29 = vsub.f32 1.0, %v1363_v26  ;;  %v1298_v35 = vadd.f32 1.0, %v5151_v34  ;;  %v5153_v40 = vpop.eup %5152 }
 0xab6   :  { %5154 = vrcp.f32 %v1299_v55  ;;  %v1361_v19 = vadd.f32 1.0, %v5153_v40  ;;  %v1326_v5 = vand.u32 2147483648, %v1299_v55  ;;  %vm1320_vm14 = vweird.f32 %v1299_v55 }
 0xab7   :  { %v1365_v33 = vmul.f32 %v5147_v21, %v1364_v29  ;;  %5156 = vrcp.f32 %v1298_v35  ;;  %v1324_v38 = vand.u32 2147483647, %v1299_v55  ;;  %v1311_v8 = vand.u32 2147483648, %v1298_v35 }
 0xab8   :  { %5158 = vrcp.f32 %v1361_v19  ;;  %vm1305_vm9 = vweird.f32 %v1298_v35  ;;  %v1309_v9 = vand.u32 2147483647, %v1298_v35  ;;  %v1327_v13 = vor.u32 1.1754944e-38, %v1326_v5 }
 0xab9   :  { %v1366_v36 = vadd.f32 %v5147_v21, %v1365_v33  ;;  %v1312_v15 = vor.u32 1.1754944e-38, %v1311_v8  ;;  %v1388_v25 = vand.u32 2147483648, %v1361_v19  ;;  %v1386_v26 = vand.u32 2147483647, %v1361_v19 }
 0xaba   :  { %vm1310_vm1 = vcmp.eq.f32.partialorder %v1309_v9, 8.507059e+37 }
 0xabb   :  { %v1370_v41 = vsel %vm1369_vm10, %v5147_v21, %v1366_v36  ;;  %v1389_v29 = vor.u32 1.1754944e-38, %v1388_v25  ;;  %v2492_v25 = vld [vmem:[%s7268_s29 + $0x68] sm:$0xff] }
 0xabc   :  { %v6124_v47 = vsel %vm1372_vm11, %v1374_v42, %v1370_v41  ;;  %v5155_v50 = vpop.eup %5154  ;;  %vm1325_vm11 = vcmp.eq.f32.partialorder %v1324_v38, 8.507059e+37 }
 0xabd   :  { %v5157_v51 = vpop.eup %5156  ;;  %v1316_v48 = vmul.f32 %v5155_v50, %v1299_v55  ;;  %vm1321_vm12 = vweird.f32 %v5155_v50 }
 0xabe   :  { %v1301_v52 = vmul.f32 %v5157_v51, %v1298_v35  ;;  %v5159_v57 = vpop.eup %5158  ;;  %vm1306_vm13 = vweird.f32 %v5157_v51  ;;  %vm1322_vm8 = vmor %vm1320_vm14, %vm1321_vm12  ;;  %vm1382_vm12 = vweird.f32 %v1361_v19  ;;  %vm1387_vm14 = vcmp.eq.f32.partialorder %v1386_v26, 8.507059e+37  ;;  %v2491_v26 = vld [vmem:[%s7268_s29 + $0x60] sm:$0xff] }
 0xabf   :  { %v1317_v56 = vsub.f32 1.0, %v1316_v48  ;;  %v1378_v62 = vmul.f32 %v5159_v57, %v1361_v19  ;;  %vm1307_vm10 = vmor %vm1305_vm9, %vm1306_vm13  ;;  %vm1383_vm4 = vweird.f32 %v5159_v57  ;;  %v1421_v35 = vrot.slane %v6109_v7, 7 }
 0xac0   :  { %v1302_v58 = vsub.f32 1.0, %v1301_v52  ;;  %vm1384_vm13 = vmor %vm1382_vm12, %vm1383_vm4  ;;  %vm1668_vm4 = vcmask 1045509  }
 0xac1   :  { %v1318_v61 = vmul.f32 %v5155_v50, %v1317_v56  ;;  %v1379_v2 = vsub.f32 1.0, %v1378_v62 }
 0xac2   :  { %v1303_v63 = vmul.f32 %v5157_v51, %v1302_v58 }
 0xac3   :  { %v1319_v1 = vadd.f32 %v5155_v50, %v1318_v61  ;;  %v1380_v12 = vmul.f32 %v5159_v57, %v1379_v2  ;;  %v1432_v2 = vsub.f32 1.0, %v6124_v47 }
 0xac4   :  { %v1304_v4 = vadd.f32 %v5157_v51, %v1303_v63 }
 0xac5   :  { %v1323_v11 = vsel %vm1322_vm8, %v5155_v50, %v1319_v1  ;;  %v1381_v21 = vadd.f32 %v5159_v57, %v1380_v12  ;;  %v2493_v50 = vld [vmem:[%s7268_s29 + $0x70] sm:$0xff] }
 0xac6   :  { %v1308_v14 = vsel %vm1307_vm10, %v5157_v51, %v1304_v4  ;;  %v1328_v17 = vsel %vm1325_vm11, %v1327_v13, %v1323_v11 }
 0xac7   :  { %v1313_v46 = vsel %vm1310_vm1, %v1312_v15, %v1308_v14  ;;  %v1385_v28 = vsel %vm1384_vm13, %v5159_v57, %v1381_v21  ;;  %v1410_v56 = vsub.f32 1.0, %v1328_v17  ;;  %vm1458_vm1 = vcmask 1044484  }
 0xac8   :  { %v1390_v31 = vsel %vm1387_vm14, %v1389_v29, %v1385_v28  ;;  %v1409_v63 = vsub.f32 1.0, %v1313_v46  ;;  %v2490_v28 = vld [vmem:[%s7268_s29 + $0x58] sm:$0xff]  ;;  %v2489_v29 = vld [vmem:[%s7268_s29 + $0x50] sm:$0xff] }
 0xac9   :  { %v1433_v15 = vsub.f32 1.0, %v1390_v31 }
 0xaf9   :  { %v1393_v43 = vpop.permute.xlu2 %1392 }
 0xafa   :  { %v1395_v49 = vmul.f32 %v1393_v43, %v6124_v47 }
 0xafc   :  { %1399 = vrot.lane.b32.xlu2 %v1395_v49, %s5539_s15  ;;  %v2494_v49 = vld [vmem:[%s7268_s29 + $0x78] sm:$0xff] }
 0xafd   :  { %2497 = vmatpush.msrb.mxu2 %v2494_v49 }
 0xaff   :  { %2498 = vmatpush.msrb.mxu2 %v2493_v50 }
 0xb01   :  { %2499 = vmatpush.msrb.mxu2 %v2492_v25 }
 0xb03   :  { %2500 = vmatpush.msrb.mxu2 %v2491_v26 }
 0xb04   :  { %1445 = vrot.lane.b32.xlu2 %v1444_v54, %s5545_s25 }
 0xb05   :  { %2501 = vmatpush.msrb.mxu2 %v2490_v28 }
 0xb07   :  { %2502 = vmatpush.msrb.mxu2 %v2489_v29 }
 0xb11   :  { %v1333_v16 = vpop.permute.xlu1 %1332 }
 0xb12   :  { %v1337_v18 = vmul.f32 %v1333_v16, %v1328_v17  ;;  %v1331_v20 = vpop.permute.xlu0 %1330 }
 0xb13   :  { %v1336_v22 = vmul.f32 %v1331_v20, %v1313_v46  ;;  %v1396_v32 = vmul.f32 %v1390_v31, %v1331_v20 }
 0xb14   :  { %1342 = vrot.lane.b32.xlu1 %v1337_v18, %s5539_s15 }
 0xb15   :  { %1340 = vrot.lane.b32.xlu0 %v1336_v22, %s5539_s15 }
 0xb1c   :  { %1401 = vrot.lane.b32.xlu1 %v1396_v32, %s5539_s15  ;;  %v2487_v32 = vld [vmem:[%s7268_s29 + $0x40] sm:$0xff] }
 0xb1d   :  { %1424 = vrot.lane.b32.xlu0 %v6109_v7, %s5544_s21 }
 0xb56   :  { %v1400_v33 = vpop.permute.xlu2 %1399 }
 0xb57   :  { %v1405_v34 = vadd.f32 %v1400_v33, %v5943_v59  ;;  %v2486_v33 = vld [vmem:[%s7268_s29 + $0x38] sm:$0xff] }
 0xb59   :  { %5160 = vtanh.f32 %v1405_v34  ;;  %v2485_v34 = vld [vmem:[%s7268_s29 + $0x30] sm:$0xff] }
 0xb5e   :  { %v1446_v51 = vpop.permute.xlu2 %1445 }
 0xb5f   :  { %v5161_v55 = vpop.eup %5160  ;;  %v1451_v11 = vmul.f32 %v1446_v51, %v6124_v47 }
 0xb60   :  { %1436 = vrot.lane.b32.xlu1 %v5161_v55, %s5542_s13  ;;  %v2484_v55 = vld [vmem:[%s7268_s29 + $0x28] sm:$0xff] }
 0xb68   :  { %1422 = vrot.lane.b32.xlu1 %v1421_v35, %s5544_s21 }
 0xb86   :  { %v1343_v36 = vpop.permute.xlu1 %1342 }
 0xb87   :  { %v1347_v37 = vadd.f32 %v1343_v36, %v5947_v3  ;;  %v1341_v39 = vpop.permute.xlu0 %1340  ;;  %v2482_v36 = vld [vmem:[%s7268_s29 + $0x18] sm:$0xff] }
 0xb88   :  { %v1346_v40 = vadd.f32 %v1341_v39, %v5943_v59  ;;  %v2480_v39 = vld [vmem:[%s7268_s29 + $0x8] sm:$0xff] }
 0xb89   :  { %5162 = vtanh.f32 %v1347_v37  ;;  %v2481_v37 = vld [vmem:[%s7268_s29 + $0x10] sm:$0xff] }
 0xb8a   :  { %5164 = vtanh.f32 %v1346_v40  ;;  %v2479_v40 = vld [vmem:[%s7268_s29] sm:$0xff] }
 0xb8e   :  { %v1402_v41 = vpop.permute.xlu1 %1401 }
 0xb8f   :  { %v5163_v42 = vpop.eup %5162  ;;  %v1406_v19 = vadd.f32 %v1402_v41, %v5947_v3  ;;  %v1425_v52 = vpop.permute.xlu0 %1424 }
 0xb90   :  { %v5165_v43 = vpop.eup %5164  ;;  %1415 = vrot.lane.b32.xlu2 %v5163_v42, %s5542_s13  ;;  %v1429_v58 = vmul.f32 %v1425_v52, %v1328_v17 }
 0xb91   :  { %5166 = vtanh.f32 %v1406_v19  ;;  %1413 = vrot.lane.b32.xlu0 %v5165_v43, %s5542_s13 }
 0xb97   :  { %v5167_v7 = vpop.eup %5166 }
 0xb98   :  { %1438 = vrot.lane.b32.xlu2 %v5167_v7, %s5542_s13 }
 0xb99   :  { %1447 = vrot.lane.b32.xlu0 %v1421_v35, %s5545_s25  ;;  %v2483_v35 = vld [vmem:[%s7268_s29 + $0x20] sm:$0xff] }
 0xbd2   :  { %v1437_v48 = vpop.permute.xlu1 %1436 }
 0xbd3   :  { %v1442_v38 = vmul.f32 %v1437_v48, %v1432_v2 }
 0xbd5   :  { %v1453_v14 = vadd.f32 %v1451_v11, %v1442_v38 }
 0xbd7   :  { %v1465_v20 = vrot.slane %v1453_v14, 1 }
 0xbda   :  { %v1423_v61 = vpop.permute.xlu1 %1422 }
 0xbdb   :  { %v1428_v5 = vmul.f32 %v1423_v61, %v1313_v46 }
 0xbea   :  { %v1416_v54 = vpop.permute.xlu2 %1415 }
 0xbeb   :  { %v1420_v57 = vmul.f32 %v1416_v54, %v1410_v56  ;;  %v6188_v56 = vld [vmem:[%s7269_s3] ss:$0 sm:$0xff] }
 0xbed   :  { %v1431_v62 = vadd.f32 %v1429_v58, %v1420_v57  ;;  %v6191_v57 = vld [vmem:[%s5648_s12] ss:$0 sm:$0xff]  ;;  %s7288_s12 = sld [smem:[#allocation16_spill]] }
 0xbef   :  { %v1457_v8 = vrot.slane %v1431_v62, 7 }
 0xbf2   :  { %v1439_v13 = vpop.permute.xlu2 %1438 }
 0xbf3   :  { %v1443_v17 = vmul.f32 %v1439_v13, %v1433_v15 }
 0xc03   :  { %v1414_v1 = vpop.permute.xlu0 %1413 }
 0xc04   :  { %v1419_v4 = vmul.f32 %v1414_v1, %v1409_v63 }
 0xc06   :  { %v1430_v9 = vadd.f32 %v1428_v5, %v1419_v4 }
 0xc08   :  { %v1459_v12 = vsel %vm1458_vm1, %v1457_v8, %v1430_v9 }
 0xc09   :  { %1460 = vrot.lane.b32.xlu1 %v1459_v12, %s5542_s13 }
 0xc0b   :  { %v1448_v16 = vpop.permute.xlu0 %1447 }
 0xc0c   :  { %v1452_v18 = vmul.f32 %v1448_v16, %v1390_v31  ;;  %v2488_v31 = vld [vmem:[%s7268_s29 + $0x48] sm:$0xff] }
 0xc0d   :  { %2503 = vmatpush.msrb.mxu2 %v2488_v31 }
 0xc0e   :  { %v1454_v46 = vadd.f32 %v1452_v18, %v1443_v17 }
 0xc0f   :  { %2504 = vmatpush.msrb.mxu2 %v2487_v32 }
 0xc10   :  { %v2353_v47 = vrot.slane %v1454_v46, 7  ;;  %v1466_v21 = vsel %vm1458_vm1, %v1454_v46, %v1465_v20 }
 0xc11   :  { %1467 = vrot.lane.b32.xlu2 %v1466_v21, %s5543_s17  ;;  %2505 = vmatpush.msrb.mxu2 %v2486_v33 }
 0xc12   :  { %v6155_v22 = vsel %vm1668_vm4, %v2353_v47, %v1453_v14 }
 0xc13   :  { %2506 = vmatpush.msrb.mxu2 %v2485_v34 }
 0xc15   :  { %2507 = vmatpush.msrb.mxu2 %v2484_v55 }
 0xc17   :  { %2508 = vmatpush.msrb.mxu2 %v2483_v35 }
 0xc19   :  { %2509 = vmatpush.msrb.mxu2 %v2482_v36 }
 0xc1b   :  { %2510 = vmatpush.msrb.mxu2 %v2481_v37 }
 0xc1d   :  { %2511 = vmatpush.msrb.mxu2 %v2480_v39 }
 0xc1f   :  { %2512 = vmatpush.msrb.mxu2 %v2479_v40 }
 0xc6b   :  { %v1468_v41 = vpop.permute.xlu2 %1467 }
 0xc7b   :  { %v6171_v42 = vpop.permute.xlu1 %1460 }
 0xc7c   :  { %v6175_v19 = vsel %vm827_vm7, %v6171_v42, %v1468_v41 }
 0xc7d   :  { %v1472_v43 = vrot.slane %v6175_v19, 3 }
 0xc7f   :  { %4927 = vmatmul.msk.f32.vlgmr.msra.gmra.mxu2 %vm7250_vm5, %v1472_v43 }
 0xc87   :  { %2513 = vmatmul.f32.vlgmr.msrb.gmra.mxu2 %v5795_v60 }
 0xc8f   :  { %2516 = vmatmul.f32.gmra.mxu2 %v5802_v0 }
 0xd02   :  { %v1492_v7 = vpop.f32.mrf.mxu2 }
 0xd03   :  { %v1493_v49 = vadd.f32 %v6114_v10, %v1492_v7 }
 0xd05   :  { %v1560_v50 = vrot.slane %v1493_v49, 6  ;;  %v1497_v51 = vrot.slane %v1493_v49, 5  ;;  %v1496_v48 = vrot.slane %v1493_v49, 4 }
 0xd07   :  { %1602 = vrot.lane.b32.xlu1 %v1560_v50, %s5538_s0  ;;  %1542 = vrot.lane.b32.xlu0 %v1497_v51, %s5538_s0  ;;  %v1563_v61 = vadd.f32 %v1560_v50, %v5947_v3  ;;  %v1501_v62 = vadd.f32 %v1497_v51, %v5947_v3  ;;  %v1562_v63 = vadd.f32 %v1497_v51, %v5943_v59 }
 0xd08   :  { %1540 = vrot.lane.b32.xlu2 %v1496_v48, %s5538_s0  ;;  %v1500_v4 = vadd.f32 %v1496_v48, %v5943_v59 }
 0xd09   :  { %v4931_v1 = vmul.f32 -1.442695, %v1563_v61  ;;  %v4929_v2 = vmul.f32 -1.442695, %v1501_v62  ;;  %v4930_v5 = vmul.f32 -1.442695, %v1562_v63 }
 0xd0a   :  { %v6185_v52 = vpop.f32.mrf.mxu2  ;;  %v4928_v8 = vmul.f32 -1.442695, %v1500_v4 }
 0xd0b   :  { %5168 = vpow2.f32 %v4931_v1 }
 0xd0c   :  { %5170 = vpow2.f32 %v4929_v2 }
 0xd0d   :  { %5172 = vpow2.f32 %v4930_v5 }
 0xd0e   :  { %5174 = vpow2.f32 %v4928_v8 }
 0xd11   :  { %v5169_v38 = vpop.eup %5168 }
 0xd12   :  { %v2517_v54 = vpop.f32.mrf.mxu2  ;;  %v5171_v9 = vpop.eup %5170  ;;  %v1571_v12 = vadd.f32 1.0, %v5169_v38 }
 0xd13   :  { %v2521_v60 = vmax.f32 %v2517_v54, 0.0  ;;  %v5173_v11 = vpop.eup %5172  ;;  %v1509_v13 = vadd.f32 1.0, %v5171_v9 }
 0xd14   :  { %v1570_v14 = vadd.f32 1.0, %v5173_v11  ;;  %5176 = vrcp.f32 %v1571_v12  ;;  %v5175_v15 = vpop.eup %5174  ;;  %vm1592_vm9 = vweird.f32 %v1571_v12  ;;  %v1598_v40 = vand.u32 2147483648, %v1571_v12 }
 0xd15   :  { %v2526_v0 = vmul.f32 %v6188_v56, %v2521_v60  ;;  %5178 = vrcp.f32 %v1509_v13  ;;  %v6201_v17 = vadd.f32 1.0, %v5175_v15  ;;  %vm1530_vm13 = vweird.f32 %v1509_v13 }
 0xd16   :  { %5180 = vrcp.f32 %v1570_v14  ;;  %v1536_v41 = vand.u32 2147483648, %v1509_v13  ;;  %v1583_v43 = vand.u32 2147483648, %v1570_v14  ;;  %v1596_v7 = vand.u32 2147483647, %v1571_v12 }
 0xd17   :  { %v6195_v58 = vadd.f32 %v6191_v57, %v2526_v0  ;;  %5182 = vrcp.f32 %v6201_v17  ;;  %v1534_v50 = vand.u32 2147483647, %v1509_v13  ;;  %vm1577_vm3 = vweird.f32 %v1570_v14 }
 0xd18   :  { %v1581_v51 = vand.u32 2147483647, %v1570_v14  ;;  %v1599_v62 = vor.u32 1.1754944e-38, %v1598_v40  ;;  %v1537_v63 = vor.u32 1.1754944e-38, %v1536_v41  ;;  %v1584_v1 = vor.u32 1.1754944e-38, %v1583_v43 }
 0xd19   :  { %v1519_v15 = vand.u32 2147483647, %v6201_v17 }
 0xd1a   :  { %v5177_v16 = vpop.eup %5176 }
 0xd1b   :  { %v5179_v18 = vpop.eup %5178  ;;  %v1588_v46 = vmul.f32 %v5177_v16, %v1571_v12  ;;  %vm1593_vm8 = vweird.f32 %v5177_v16 }
 0xd1c   :  { %v5181_v20 = vpop.eup %5180  ;;  %v1526_v47 = vmul.f32 %v5179_v18, %v1509_v13  ;;  %vm1531_vm10 = vweird.f32 %v5179_v18  ;;  %vm6205_vm12 = vmor %vm1592_vm9, %vm1593_vm8  ;;  %vm1597_vm8 = vcmp.eq.f32.partialorder %v1596_v7, 8.507059e+37  ;;  %vm1535_vm9 = vcmp.eq.f32.partialorder %v1534_v50, 8.507059e+37 }
 0xd1d   :  { %v1573_v21 = vmul.f32 %v5181_v20, %v1570_v14  ;;  %v1589_v25 = vsub.f32 1.0, %v1588_v46  ;;  %v5183_v29 = vpop.eup %5182  ;;  %vm1578_vm11 = vweird.f32 %v5181_v20  ;;  %vm6209_vm14 = vmor %vm1530_vm13, %vm1531_vm10  ;;  %vm1582_vm10 = vcmp.eq.f32.partialorder %v1581_v51, 8.507059e+37 }
 0xd1e   :  { %v1527_v26 = vsub.f32 1.0, %v1526_v47  ;;  %v1511_v31 = vmul.f32 %v5183_v29, %v6201_v17  ;;  %vm6214_vm0 = vmor %vm1577_vm3, %vm1578_vm11  ;;  %vm1516_vm3 = vweird.f32 %v5183_v29  ;;  %v1521_v14 = vand.u32 2147483648, %v6201_v17 }
 0xd1f   :  { %v1574_v28 = vsub.f32 1.0, %v1573_v21  ;;  %v1590_v32 = vmul.f32 %v5177_v16, %v1589_v25 }
 0xd20   :  { %v1528_v33 = vmul.f32 %v5179_v18, %v1527_v26  ;;  %v1512_v55 = vsub.f32 1.0, %v1511_v31 }
 0xd21   :  { %v1575_v34 = vmul.f32 %v5181_v20, %v1574_v28  ;;  %v1591_v35 = vadd.f32 %v5177_v16, %v1590_v32 }
 0xd22   :  { %v1529_v36 = vadd.f32 %v5179_v18, %v1528_v33  ;;  %v1513_v54 = vmul.f32 %v5183_v29, %v1512_v55 }
 0xd23   :  { %v1576_v37 = vadd.f32 %v5181_v20, %v1575_v34  ;;  %v1595_v60 = vsel %vm6205_vm12, %v5177_v16, %v1591_v35  ;;  %vm1520_vm12 = vcmp.eq.f32.partialorder %v1519_v15, 8.507059e+37  ;;  %v1654_v35 = vrot.slane %v6175_v19, 1 }
 0xd24   :  { %v1533_v0 = vsel %vm6209_vm14, %v5179_v18, %v1529_v36  ;;  %v1600_v5 = vsel %vm1597_vm8, %v1599_v62, %v1595_v60  ;;  %v1514_v9 = vadd.f32 %v5183_v29, %v1513_v54 }
 0xd25   :  { %v1580_v61 = vsel %vm6214_vm0, %v5181_v20, %v1576_v37  ;;  %v1538_v38 = vsel %vm1535_vm9, %v1537_v63, %v1533_v0  ;;  %vm1515_vm0 = vweird.f32 %v6201_v17  ;;  %v1522_v20 = vor.u32 1.1754944e-38, %v1521_v14 }
 0xd26   :  { %v1585_v8 = vsel %vm1582_vm10, %v1584_v1, %v1580_v61  ;;  %vm1517_vm11 = vmor %vm1515_vm0, %vm1516_vm3  ;;  %v1631_v17 = vrot.slane %v6175_v19, 7  ;;  %v1643_v51 = vsub.f32 1.0, %v1600_v5  ;;  %v1620_v60 = vsub.f32 1.0, %v1538_v38 }
 0xd27   :  { %v1518_v16 = vsel %vm1517_vm11, %v5183_v29, %v1514_v9  ;;  %v1642_v43 = vsub.f32 1.0, %v1585_v8 }
 0xd28   :  { %v1523_v46 = vsel %vm1520_vm12, %v1522_v20, %v1518_v16 }
 0xd62   :  { %v1541_v18 = vpop.permute.xlu2 %1540 }
 0xd63   :  { %v1546_v47 = vmul.f32 %v1541_v18, %v1523_v46 }
 0xd79   :  { %v1603_v2 = vpop.permute.xlu1 %1602  ;;  %v1543_v4 = vpop.permute.xlu0 %1542 }
 0xd7a   :  { %v1606_v11 = vmul.f32 %v1603_v2, %v1600_v5  ;;  %v1547_v12 = vmul.f32 %v1543_v4, %v1538_v38  ;;  %v1605_v13 = vmul.f32 %v1585_v8, %v1543_v4 }
 0xd7c   :  { %1609 = vrot.lane.b32.xlu1 %v1605_v13, %s5539_s15  ;;  %1552 = vrot.lane.b32.xlu0 %v1547_v12, %s5539_s15  ;;  %v1619_v13 = vsub.f32 1.0, %v1523_v46 }
 0xd7d   :  { %1611 = vrot.lane.b32.xlu2 %v1606_v11, %s5539_s15 }
 0xd84   :  { %1550 = vrot.lane.b32.xlu0 %v1546_v47, %s5539_s15 }
 0xd85   :  { %1634 = vrot.lane.b32.xlu2 %v6175_v19, %s5544_s21 }
 0xd8d   :  { %1655 = vrot.lane.b32.xlu2 %v6175_v19, %s5545_s25 }
 0xd95   :  { %1632 = vrot.lane.b32.xlu2 %v1631_v17, %s5544_s21 }
 0xdd7   :  { %v1612_v29 = vpop.permute.xlu2 %1611 }
 0xdd8   :  { %v1616_v31 = vadd.f32 %v1612_v29, %v5947_v3 }
 0xddf   :  { %v1635_v39 = vpop.permute.xlu2 %1634 }
 0xde0   :  { %v1639_v1 = vmul.f32 %v1635_v39, %v1538_v38 }
 0xde7   :  { %v1656_v7 = vpop.permute.xlu2 %1655 }
 0xde8   :  { %v1661_v50 = vmul.f32 %v1656_v7, %v1585_v8 }
 0xdee   :  { %v1610_v21 = vpop.permute.xlu1 %1609  ;;  %v1553_v25 = vpop.permute.xlu0 %1552 }
 0xdef   :  { %v1615_v26 = vadd.f32 %v1610_v21, %v5943_v59  ;;  %v1557_v28 = vadd.f32 %v1553_v25, %v5947_v3  ;;  %v1633_v11 = vpop.permute.xlu2 %1632 }
 0xdf1   :  { %5184 = vtanh.f32 %v1615_v26 }
 0xdf2   :  { %5186 = vtanh.f32 %v1557_v28 }
 0xdf3   :  { %5188 = vtanh.f32 %v1616_v31 }
 0xdf6   :  { %v1551_v34 = vpop.permute.xlu0 %1550 }
 0xdf7   :  { %v5185_v32 = vpop.eup %5184  ;;  %v1556_v55 = vadd.f32 %v1551_v34, %v5943_v59 }
 0xdf8   :  { %v5187_v33 = vpop.eup %5186  ;;  %1646 = vrot.lane.b32.xlu0 %v5185_v32, %s5542_s13 }
 0xdf9   :  { %1625 = vrot.lane.b32.xlu1 %v5187_v33, %s5542_s13  ;;  %v5189_v36 = vpop.eup %5188  ;;  %5190 = vtanh.f32 %v1556_v55 }
 0xdff   :  { %v5191_v37 = vpop.eup %5190 }
 0xe00   :  { %1657 = vrot.lane.b32.xlu0 %v1654_v35, %s5545_s25 }
 0xe01   :  { %1648 = vrot.lane.b32.xlu1 %v5189_v36, %s5542_s13 }
 0xe09   :  { %1623 = vrot.lane.b32.xlu1 %v5191_v37, %s5542_s13 }
 0xe6a   :  { %v1647_v40 = vpop.permute.xlu0 %1646 }
 0xe6b   :  { %v1626_v41 = vpop.permute.xlu1 %1625  ;;  %v1652_v49 = vmul.f32 %v1647_v40, %v1642_v43 }
 0xe6c   :  { %v1630_v62 = vmul.f32 %v1626_v41, %v1620_v60 }
 0xe6d   :  { %v1663_v0 = vadd.f32 %v1661_v50, %v1652_v49 }
 0xe6e   :  { %v1641_v12 = vadd.f32 %v1639_v1, %v1630_v62 }
 0xe6f   :  { %v1675_v2 = vrot.slane %v1663_v0, 7 }
 0xe70   :  { %v1667_v18 = vrot.slane %v1641_v12, 7 }
 0xe72   :  { %v1658_v48 = vpop.permute.xlu0 %1657 }
 0xe73   :  { %v1649_v54 = vpop.permute.xlu1 %1648  ;;  %v1662_v19 = vmul.f32 %v1658_v48, %v1600_v5  ;;  %v1638_v5 = vmul.f32 %v1633_v11, %v1523_v46 }
 0xe74   :  { %v1653_v61 = vmul.f32 %v1649_v54, %v1643_v51 }
 0xe76   :  { %v1664_v63 = vadd.f32 %v1662_v19, %v1653_v61 }
 0xe78   :  { %v1676_v4 = vrot.slane %v1664_v63, 6  ;;  %v2341_v9 = vrot.slane %v1664_v63, 7 }
 0xe7a   :  { %v1677_v14 = vsel %vm1668_vm4, %v1676_v4, %v1675_v2  ;;  %v6250_v8 = vsel %vm1458_vm1, %v2341_v9, %v1663_v0 }
 0xe7b   :  { %v1624_v15 = vpop.permute.xlu1 %1623  ;;  %1678 = vrot.lane.b32.xlu1 %v1677_v14, %s5543_s17 }
 0xe7c   :  { %v1629_v16 = vmul.f32 %v1624_v15, %v1619_v13 }
 0xe7e   :  { %v1640_v20 = vadd.f32 %v1638_v5, %v1629_v16 }
 0xe80   :  { %v1669_v38 = vsel %vm1668_vm4, %v1667_v18, %v1640_v20 }
 0xe81   :  { %1670 = vrot.lane.b32.xlu0 %v1669_v38, %s5542_s13 }
 0xeed   :  { %v1679_v47 = vpop.permute.xlu1 %1678 }
 0xef3   :  { %v6255_v17 = vpop.permute.xlu0 %1670 }
 0xef4   :  { %v6259_v21 = vsel %vm827_vm7, %v6255_v17, %v1679_v47 }
 0xef5   :  { %v1683_v25 = vrot.slane %v6259_v21, 4 }
 0xef7   :  { %4932 = vmatmul.msk.f32.vlgmr.msrb.gmra.mxu3 %vm7250_vm5, %v1683_v25 }
 0xf7a   :  { %v1703_v26 = vpop.f32.mrf.mxu3 }
 0xf7b   :  { %v1704_v46 = vadd.f32 %v6114_v10, %v1703_v26 }
 0xf7d   :  { %v1772_v28 = vrot.slane %v1704_v46, 7  ;;  %v1771_v29 = vrot.slane %v1704_v46, 6  ;;  %v1708_v31 = vrot.slane %v1704_v46, 4  ;;  %v1707_v32 = vrot.slane %v1704_v46, 3 }
 0xf7f   :  { %1817 = vrot.lane.b32.xlu1 %v1772_v28, %s5538_s0  ;;  %1815 = vrot.lane.b32.xlu0 %v1771_v29, %s5538_s0  ;;  %v1712_v33 = vadd.f32 %v1708_v31, %v5947_v3  ;;  %v1711_v55 = vadd.f32 %v1707_v32, %v5943_v59  ;;  %v1776_v39 = vadd.f32 %v1772_v28, %v5947_v3 }
 0xf80   :  { %1753 = vrot.lane.b32.xlu2 %v1708_v31, %s5538_s0  ;;  %v1775_v40 = vadd.f32 %v1771_v29, %v5943_v59 }
 0xf81   :  { %v4934_v34 = vmul.f32 -1.442695, %v1712_v33  ;;  %v4933_v35 = vmul.f32 -1.442695, %v1711_v55  ;;  %v4936_v43 = vmul.f32 -1.442695, %v1776_v39 }
 0xf82   :  { %v4935_v49 = vmul.f32 -1.442695, %v1775_v40 }
 0xf83   :  { %5192 = vpow2.f32 %v4934_v34 }
 0xf84   :  { %5194 = vpow2.f32 %v4933_v35 }
 0xf88   :  { %1751 = vrot.lane.b32.xlu2 %v1707_v32, %s5538_s0 }
 0xf89   :  { %v5193_v10 = vpop.eup %5192 }
 0xf8a   :  { %v1720_v36 = vadd.f32 1.0, %v5193_v10  ;;  %v5195_v37 = vpop.eup %5194 }
 0xf8b   :  { %v1719_v41 = vadd.f32 1.0, %v5195_v37 }
 0xf8c   :  { %5196 = vrcp.f32 %v1720_v36  ;;  %v1747_v2 = vand.u32 2147483648, %v1720_v36  ;;  %vm1741_vm14 = vweird.f32 %v1720_v36  ;;  %v1745_v4 = vand.u32 2147483647, %v1720_v36 }
 0xf8d   :  { %5198 = vrcp.f32 %v1719_v41  ;;  %v1732_v20 = vand.u32 2147483648, %v1719_v41  ;;  %vm1726_vm3 = vweird.f32 %v1719_v41  ;;  %v1730_v38 = vand.u32 2147483647, %v1719_v41 }
 0xf8e   :  { %5200 = vpow2.f32 %v4936_v43  ;;  %v1748_v12 = vor.u32 1.1754944e-38, %v1747_v2  ;;  %vm1746_vm9 = vcmp.eq.f32.partialorder %v1745_v4, 8.507059e+37 }
 0xf8f   :  { %5202 = vpow2.f32 %v4935_v49  ;;  %v1733_v46 = vor.u32 1.1754944e-38, %v1732_v20  ;;  %vm1731_vm11 = vcmp.eq.f32.partialorder %v1730_v38, 8.507059e+37  ;;  %v2553_v20 = vld [vmem:[%s7276_s8 + $0x58] sm:$0xff]  ;;  %v2552_v38 = vld [vmem:[%s7276_s8 + $0x50] sm:$0xff] }
 0xf92   :  { %v5197_v7 = vpop.eup %5196 }
 0xf93   :  { %v1737_v50 = vmul.f32 %v5197_v7, %v1720_v36  ;;  %v5199_v48 = vpop.eup %5198  ;;  %vm1742_vm13 = vweird.f32 %v5197_v7 }
 0xf94   :  { %v5201_v54 = vpop.eup %5200  ;;  %v1722_v0 = vmul.f32 %v5199_v48, %v1719_v41  ;;  %vm1743_vm8 = vmor %vm1741_vm14, %vm1742_vm13  ;;  %vm1727_vm10 = vweird.f32 %v5199_v48 }
 0xf95   :  { %v1738_v51 = vsub.f32 1.0, %v1737_v50  ;;  %v5203_v19 = vpop.eup %5202  ;;  %v1784_v61 = vadd.f32 1.0, %v5201_v54  ;;  %vm1728_vm0 = vmor %vm1726_vm3, %vm1727_vm10  ;;  %v2520_v50 = vmax.f32 %v6185_v52, 0.0 }
 0xf96   :  { %v1783_v62 = vadd.f32 1.0, %v5203_v19  ;;  %v1723_v1 = vsub.f32 1.0, %v1722_v0 }
 0xf97   :  { %v1739_v60 = vmul.f32 %v5197_v7, %v1738_v51  ;;  %5204 = vrcp.f32 %v1784_v61  ;;  %vm1805_vm14 = vweird.f32 %v1784_v61  ;;  %v1811_v36 = vand.u32 2147483648, %v1784_v61 }
 0xf98   :  { %5206 = vrcp.f32 %v1783_v62  ;;  %v1724_v11 = vmul.f32 %v5199_v48, %v1723_v1  ;;  %v1796_v37 = vand.u32 2147483648, %v1783_v62  ;;  %v1809_v39 = vand.u32 2147483647, %v1784_v61 }
 0xf99   :  { %v1740_v63 = vadd.f32 %v5197_v7, %v1739_v60  ;;  %v1794_v40 = vand.u32 2147483647, %v1783_v62  ;;  %v1870_v1 = vrot.slane %v6259_v21, 2 }
 0xf9a   :  { %v1725_v18 = vadd.f32 %v5199_v48, %v1724_v11  ;;  %v1797_v49 = vor.u32 1.1754944e-38, %v1796_v37  ;;  %vm1810_vm3 = vcmp.eq.f32.partialorder %v1809_v39, 8.507059e+37 }
 0xf9b   :  { %v1744_v9 = vsel %vm1743_vm8, %v5197_v7, %v1740_v63  ;;  %v1812_v7 = vor.u32 1.1754944e-38, %v1811_v36  ;;  %v2542_v36 = vld [vmem:[%s7276_s8] sm:$0xff] }
 0xf9c   :  { %v6272_v15 = vsel %vm1746_vm9, %v1748_v12, %v1744_v9  ;;  %v1729_v26 = vsel %vm1728_vm0, %v5199_v48, %v1725_v18  ;;  %vm1790_vm9 = vweird.f32 %v1783_v62  ;;  %vm1795_vm0 = vcmp.eq.f32.partialorder %v1794_v40, 8.507059e+37  ;;  %v2554_v18 = vld [vmem:[%s7276_s8 + $0x60] sm:$0xff] }
 0xf9d   :  { %v5205_v13 = vpop.eup %5204  ;;  %v6276_v29 = vsel %vm1731_vm11, %v1733_v46, %v1729_v26  ;;  %vm2442_vm11 = vcmask 1040384   ;;  %v2549_v26 = vld [vmem:[%s7276_s8 + $0x38] sm:$0xff]  ;;  %v2548_v46 = vld [vmem:[%s7276_s8 + $0x30] sm:$0xff] }
 0xf9e   :  { %v5207_v5 = vpop.eup %5206  ;;  %v1801_v47 = vmul.f32 %v5205_v13, %v1784_v61  ;;  %vm1806_vm12 = vweird.f32 %v5205_v13  ;;  %v2525_v61 = vmul.f32 %v6188_v56, %v2520_v50  ;;  %v1847_v56 = vrot.slane %v6259_v21, 7 }
 0xf9f   :  { %v1786_v25 = vmul.f32 %v5207_v5, %v1783_v62  ;;  %vm1791_vm13 = vweird.f32 %v5207_v5  ;;  %vm1807_vm8 = vmor %vm1805_vm14, %vm1806_vm12  ;;  %vm7277_vm12 = vcmask 1043459  }
 0xfa0   :  { %v1802_v31 = vsub.f32 1.0, %v1801_v47  ;;  %vm1792_vm10 = vmor %vm1790_vm9, %vm1791_vm13  ;;  %v2530_v62 = vadd.f32 %v6191_v57, %v2525_v61  ;;  %v2551_v47 = vld [vmem:[%s7276_s8 + $0x48] sm:$0xff]  ;;  %vm7278_vm13 = vcmask 1045504  }
 0xfa1   :  { %v1787_v32 = vsub.f32 1.0, %v1786_v25  ;;  %v2550_v25 = vld [vmem:[%s7276_s8 + $0x40] sm:$0xff]  ;;  %vm7279_vm14 = vmmov %vm7278_vm13 }
 0xfa2   :  { %v1803_v34 = vmul.f32 %v5205_v13, %v1802_v31  ;;  %v2534_v52 = vrot.slane %v2530_v62, 7  ;;  %v2546_v31 = vld [vmem:[%s7276_s8 + $0x20] sm:$0xff] }
 0xfa3   :  { %v1788_v55 = vmul.f32 %v5207_v5, %v1787_v32  ;;  %v2545_v32 = vld [vmem:[%s7276_s8 + $0x18] sm:$0xff] }
 0xfa4   :  { %v1804_v35 = vadd.f32 %v5205_v13, %v1803_v34  ;;  %v2538_v63 = vsel %vm2442_vm11, -inf, %v2534_v52  ;;  %v1871_v52 = vrot.slane %v6259_v21, 3 }
 0xfa5   :  { %v1789_v10 = vadd.f32 %v5207_v5, %v1788_v55  ;;  %v2540_v2 = vmax.f32 %v2530_v62, %v2538_v63  ;;  %v2543_v55 = vld [vmem:[%s7276_s8 + $0x8] sm:$0xff] }
 0xfa6   :  { %v1808_v41 = vsel %vm1807_vm8, %v5205_v13, %v1804_v35 }
 0xfa7   :  { %v1793_v43 = vsel %vm1792_vm10, %v5207_v5, %v1789_v10  ;;  %v6281_v48 = vsel %vm1810_vm3, %v1812_v7, %v1808_v41  ;;  %v2570_v4 = vrot.slane %v2540_v2, 7  ;;  %v2556_v5 = vld [vmem:[%s7276_s8 + $0x70] sm:$0xff] }
 0xfa8   :  { %v6283_v19 = vsel %vm1795_vm0, %v1797_v49, %v1793_v43 }
 0xfa9   :  { %v6299_v57 = vsel %vm2442_vm11, 0.0, %v2570_v4  ;;  %v6302_v9 = vsel %vm2442_vm11, %v2570_v4, 0.0  ;;  %v1836_v4 = vsub.f32 1.0, %v6272_v15 }
 0xfaa   :  { %v2582_v11 = vrot.slane %v6299_v57, 1  ;;  %v2583_v12 = vrot.slane %v6302_v9, 1 }
 0xfac   :  { %v2584_v13 = vsel %vm7251_vm2, %v2582_v11, %v2583_v12 }
 0xfda   :  { %v1754_v14 = vpop.permute.xlu2 %1753 }
 0xfdb   :  { %v1758_v16 = vmul.f32 %v1754_v14, %v6272_v15  ;;  %v2557_v14 = vld [vmem:[%s7276_s8 + $0x78] sm:$0xff] }
 0xfdc   :  { %2606 = vmatpush.msra.mxu3 %v2557_v14 }
 0xfdd   :  { %1763 = vrot.lane.b32.xlu0 %v1758_v16, %s5539_s15  ;;  %v2555_v16 = vld [vmem:[%s7276_s8 + $0x68] sm:$0xff] }
 0xfde   :  { %2607 = vmatpush.msra.mxu3 %v2556_v5  ;;  %v1835_v5 = vsub.f32 1.0, %v6276_v29 }
 0xfe0   :  { %2608 = vmatpush.msra.mxu3 %v2555_v16 }
 0xfe2   :  { %v1752_v28 = vpop.permute.xlu2 %1751  ;;  %2609 = vmatpush.msra.mxu3 %v2554_v18 }
 0xfe3   :  { %v1757_v33 = vmul.f32 %v1752_v28, %v6276_v29  ;;  %v2547_v28 = vld [vmem:[%s7276_s8 + $0x28] sm:$0xff] }
 0xfe4   :  { %2610 = vmatpush.msra.mxu3 %v2553_v20 }
 0xfe5   :  { %1761 = vrot.lane.b32.xlu0 %v1757_v33, %s5539_s15  ;;  %v2544_v33 = vld [vmem:[%s7276_s8 + $0x10] sm:$0xff] }
 0xfe6   :  { %2611 = vmatpush.msra.mxu3 %v2552_v38 }
 0xfe8   :  { %2612 = vmatpush.msra.mxu3 %v2551_v47 }
 0xfea   :  { %2613 = vmatpush.msra.mxu3 %v2550_v25 }
 0xfec   :  { %2614 = vmatpush.msra.mxu3 %v2549_v26 }
 0xfee   :  { %2615 = vmatpush.msra.mxu3 %v2548_v46 }
 0xff0   :  { %2616 = vmatpush.msra.mxu3 %v2547_v28 }
 0xff1   :  { %v1818_v51 = vpop.permute.xlu1 %1817  ;;  %v1816_v54 = vpop.permute.xlu0 %1815 }
 0xff2   :  { %v1822_v60 = vmul.f32 %v1818_v51, %v6281_v48  ;;  %v1821_v0 = vmul.f32 %v1816_v54, %v6283_v19  ;;  %2617 = vmatpush.msra.mxu3 %v2546_v31  ;;  %v1858_v31 = vsub.f32 1.0, %v6283_v19 }
 0xff4   :  { %1825 = vrot.lane.b32.xlu1 %v1821_v0, %s5539_s15  ;;  %1827 = vrot.lane.b32.xlu2 %v1822_v60, %s5539_s15 }
 0xff5   :  { %2618 = vmatpush.msra.mxu3 %v2545_v32 }
 0xff7   :  { %2619 = vmatpush.msra.mxu3 %v2544_v33 }
 0xff9   :  { %2620 = vmatpush.msra.mxu3 %v2543_v55 }
 0xffb   :  { %2621 = vmatpush.msra.mxu3 %v2542_v36 }
 0xffc   :  { %1850 = vrot.lane.b32.xlu2 %v6259_v21, %s5544_s21 }
0x1004   :  { %1872 = vrot.lane.b32.xlu2 %v1870_v1, %s5545_s25  ;;  %v2535_v1 = vrot.slane %v6195_v58, 7 }
0x100c   :  { %1848 = vrot.lane.b32.xlu2 %v1847_v56, %s5544_s21  ;;  %v2539_v56 = vsel %vm2442_vm11, -inf, %v2535_v1 }
0x1014   :  { %2588 = vrot.lane.b32.xlu2 %v2584_v13, %s5540_s10  ;;  %v2541_v13 = vmax.f32 %v6195_v58, %v2539_v56  ;;  %v2594_v56 = vrot.slane %v6299_v57, 2 }
0x1016   :  { %v2571_v20 = vrot.slane %v2541_v13, 7 }
0x1018   :  { %v2575_v26 = vsel %vm2442_vm11, 0.0, %v2571_v20 }
0x1019   :  { %v2585_v58 = vrot.slane %v2575_v26, 1 }
0x104e   :  { %v1828_v34 = vpop.permute.xlu2 %1827 }
0x104f   :  { %v1764_v35 = vpop.permute.xlu0 %1763  ;;  %v1832_v37 = vadd.f32 %v1828_v34, %v5947_v3  ;;  %v1859_v34 = vsub.f32 1.0, %v6281_v48 }
0x1050   :  { %v1768_v10 = vadd.f32 %v1764_v35, %v5947_v3 }
0x1052   :  { %5208 = vtanh.f32 %v1768_v10 }
0x1053   :  { %5210 = vtanh.f32 %v1832_v37 }
0x1056   :  { %v1851_v39 = vpop.permute.xlu2 %1850 }
0x1057   :  { %v1762_v41 = vpop.permute.xlu0 %1761  ;;  %v1855_v12 = vmul.f32 %v1851_v39, %v6272_v15  ;;  %v2577_v15 = vsel %vm2442_vm11, %v2571_v20, 0.0 }
0x1058   :  { %v5209_v40 = vpop.eup %5208  ;;  %v1767_v43 = vadd.f32 %v1762_v41, %v5943_v59  ;;  %v2586_v28 = vrot.slane %v2577_v15, 1  ;;  %v2598_v13 = vrot.slane %v2577_v15, 2 }
0x1059   :  { %1841 = vrot.lane.b32.xlu1 %v5209_v40, %s5542_s13  ;;  %v5211_v49 = vpop.eup %5210 }
0x105a   :  { %5212 = vtanh.f32 %v1767_v43 }
0x105e   :  { %v1873_v7 = vpop.permute.xlu2 %1872 }
0x105f   :  { %v1878_v33 = vmul.f32 %v1873_v7, %v6283_v19  ;;  %v2565_v7 = vld [vmem:[%s7276_s8 + $0xb8] sm:$0xff] }
0x1060   :  { %v5213_v60 = vpop.eup %5212  ;;  %2637 = vmatpush.msra.mxu0 %v2565_v7 }
0x1061   :  { %1864 = vrot.lane.b32.xlu1 %v5211_v49, %s5542_s13  ;;  %v2564_v49 = vld [vmem:[%s7276_s8 + $0xb0] sm:$0xff] }
0x1062   :  { %2638 = vmatpush.msra.mxu0 %v2564_v49 }
0x1066   :  { %v1826_v50 = vpop.permute.xlu1 %1825  ;;  %v1849_v51 = vpop.permute.xlu2 %1848 }
0x1067   :  { %v1831_v54 = vadd.f32 %v1826_v50, %v5943_v59  ;;  %v1854_v21 = vmul.f32 %v1849_v51, %v6276_v29  ;;  %v2587_v29 = vsel %vm7251_vm2, %v2585_v58, %v2586_v28  ;;  %v2563_v50 = vld [vmem:[%s7276_s8 + $0xa8] sm:$0xff]  ;;  %v2561_v51 = vld [vmem:[%s7276_s8 + $0x98] sm:$0xff] }
0x1068   :  { %2639 = vmatpush.msra.mxu0 %v2563_v50 }
0x1069   :  { %5214 = vtanh.f32 %v1831_v54  ;;  %1839 = vrot.lane.b32.xlu1 %v5213_v60, %s5542_s13  ;;  %v2560_v54 = vld [vmem:[%s7276_s8 + $0x90] sm:$0xff]  ;;  %v2559_v60 = vld [vmem:[%s7276_s8 + $0x88] sm:$0xff] }
0x106e   :  { %v2589_v0 = vpop.permute.xlu2 %2588 }
0x106f   :  { %v5215_v61 = vpop.eup %5214  ;;  %v2600_v62 = vsel %vm228_vm6, %v6299_v57, %v2589_v0  ;;  %v2558_v0 = vld [vmem:[%s7276_s8 + $0x80] sm:$0xff] }
0x1070   :  { %2622 = vmatmul.f32.vlgmr.msra.gmra.mxu3 %v2600_v62  ;;  %1862 = vrot.lane.b32.xlu0 %v5215_v61, %s5542_s13 }
0x1078   :  { %1874 = vrot.lane.b32.xlu0 %v1871_v52, %s5545_s25 }
0x10cb   :  { %v1842_v63 = vpop.permute.xlu1 %1841 }
0x10cc   :  { %v1846_v11 = vmul.f32 %v1842_v63, %v1836_v4  ;;  %v2595_v4 = vrot.slane %v6302_v9, 2 }
0x10ce   :  { %v1857_v14 = vadd.f32 %v1855_v12, %v1846_v11  ;;  %v2596_v11 = vsel %vm7278_vm13, %v2594_v56, %v2595_v4  ;;  %v2597_v12 = vrot.slane %v2575_v26, 2 }
0x10d0   :  { %v1884_v38 = vrot.slane %v1857_v14, 7  ;;  %v2599_v14 = vsel %vm7279_vm14, %v2597_v12, %v2598_v13 }
0x10d3   :  { %v1865_v2 = vpop.permute.xlu1 %1864 }
0x10d4   :  { %v1869_v35 = vmul.f32 %v1865_v2, %v1859_v34 }
0x10db   :  { %v1840_v16 = vpop.permute.xlu1 %1839 }
0x10dc   :  { %v1845_v18 = vmul.f32 %v1840_v16, %v1835_v5  ;;  %v5473_v16 = vld [vmem:[%s5625_s6] ss:$0 sm:$0xff] }
0x10de   :  { %v1856_v47 = vadd.f32 %v1854_v21, %v1845_v18 }
0x10e0   :  { %v1886_v25 = vsel %vm1885_vm15, %v1884_v38, %v1856_v47 }
0x10e1   :  { %1887 = vrot.lane.b32.xlu0 %v1886_v25, %s5542_s13 }
0x10e2   :  { %v1863_v46 = vpop.permute.xlu0 %1862 }
0x10e3   :  { %v1868_v32 = vmul.f32 %v1863_v46, %v1858_v31 }
0x10e5   :  { %v1880_v10 = vadd.f32 %v1878_v33, %v1868_v32 }
0x10e7   :  { %v1892_v39 = vrot.slane %v1880_v10, 5 }
0x10e9   :  { %2590 = vrot.lane.b32.xlu0 %v2587_v29, %s5540_s10  ;;  %s5495_s10 = scalar_lea.hbm %s5718_s28, 16 }
0x10ea   :  { %v1875_v55 = vpop.permute.xlu0 %1874 }
0x10eb   :  { %v1879_v36 = vmul.f32 %v1875_v55, %v6281_v48  ;;  %v2562_v48 = vld [vmem:[%s7276_s8 + $0xa0] sm:$0xff] }
0x10ec   :  { %2640 = vmatpush.msra.mxu0 %v2562_v48 }
0x10ed   :  { %v1881_v37 = vadd.f32 %v1879_v36, %v1869_v35 }
0x10ee   :  { %2641 = vmatpush.msra.mxu0 %v2561_v51 }
0x10ef   :  { %v1893_v40 = vrot.slane %v1881_v37, 4  ;;  %v2329_v41 = vrot.slane %v1881_v37, 7 }
0x10f0   :  { %2642 = vmatpush.msra.mxu0 %v2560_v54 }
0x10f1   :  { %v1894_v19 = vsel %vm1885_vm15, %v1893_v40, %v1892_v39  ;;  %v6355_v43 = vsel %vm7277_vm12, %v2329_v41, %v1880_v10 }
0x10f2   :  { %1895 = vrot.lane.b32.xlu1 %v1894_v19, %s5543_s17  ;;  %2643 = vmatpush.msra.mxu0 %v2559_v60 }
0x10f4   :  { %2644 = vmatpush.msra.mxu0 %v2558_v0 }
0x1153   :  { %v6366_v61 = vpop.permute.xlu0 %1887 }
0x115b   :  { %v2591_v62 = vpop.permute.xlu0 %2590 }
0x115c   :  { %v2601_v52 = vsel %vm228_vm6, %v2575_v26, %v2591_v62 }
0x115d   :  { %2625 = vmatmul.f32.gmra.mxu3 %v2601_v52 }
0x1164   :  { %v1896_v63 = vpop.permute.xlu1 %1895 }
0x1165   :  { %v6371_v1 = vsel %vm827_vm7, %v6366_v61, %v1896_v63 }
0x1166   :  { %v1900_v2 = vrot.slane %v6371_v1, 5 }
0x1168   :  { %4937 = vmatmul.msk.f32.vlgmr.msrb.gmra.mxu0 %vm7250_vm5, %v1900_v2 }
0x1170   :  { %4947 = vmatmul.msk.f32.vlgmr.msra.gmra.mxu0 %vm228_vm6, %v2596_v11 }
0x1178   :  { %4948 = vmatmul.msk.f32.gmra.mxu0 %vm228_vm6, %v2599_v14 }
0x11e5   :  { %v1920_v5 = vpop.f32.mrf.mxu0 }
0x11e6   :  { %v1921_v21 = vadd.f32 %v5473_v16, %v1920_v5 }
0x11e8   :  { %2033 = vrot.lane.b32.xlu0 %v1921_v21, %s5538_s0  ;;  %v1988_v18 = vrot.slane %v1921_v21, 7  ;;  %v1925_v20 = vrot.slane %v1921_v21, 3  ;;  %v1924_v57 = vrot.slane %v1921_v21, 2  ;;  %v1992_v26 = vadd.f32 %v1921_v21, %v5947_v3 }
0x11ea   :  { %2031 = vrot.lane.b32.xlu2 %v1988_v18, %s5538_s0  ;;  %1970 = vrot.lane.b32.xlu1 %v1925_v20, %s5538_s0  ;;  %v1991_v9 = vadd.f32 %v1988_v18, %v5943_v59  ;;  %v1929_v15 = vadd.f32 %v1925_v20, %v5947_v3  ;;  %v4941_v46 = vmul.f32 -1.442695, %v1992_v26  ;;  %v1928_v32 = vadd.f32 %v1924_v57, %v5943_v59 }
0x11ec   :  { %v4940_v38 = vmul.f32 -1.442695, %v1991_v9  ;;  %v4939_v28 = vmul.f32 -1.442695, %v1929_v15  ;;  %v4938_v34 = vmul.f32 -1.442695, %v1928_v32 }
0x11ee   :  { %5216 = vpow2.f32 %v4940_v38 }
0x11f2   :  { %1968 = vrot.lane.b32.xlu1 %v1924_v57, %s5538_s0 }
0x11f4   :  { %v5217_v47 = vpop.eup %5216 }
0x11f5   :  { %v1999_v25 = vadd.f32 1.0, %v5217_v47 }
0x11f7   :  { %5218 = vrcp.f32 %v1999_v25  ;;  %v2012_v39 = vand.u32 2147483648, %v1999_v25  ;;  %vm2006_vm8 = vweird.f32 %v1999_v25  ;;  %v2010_v40 = vand.u32 2147483647, %v1999_v25 }
0x11f8   :  { %5220 = vpow2.f32 %v4941_v46 }
0x11f9   :  { %5222 = vpow2.f32 %v4939_v28  ;;  %v2013_v7 = vor.u32 1.1754944e-38, %v2012_v39  ;;  %vm2011_vm10 = vcmp.eq.f32.partialorder %v2010_v40, 8.507059e+37 }
0x11fa   :  { %5224 = vpow2.f32 %v4938_v34 }
0x11fd   :  { %v5219_v58 = vpop.eup %5218 }
0x11fe   :  { %v2002_v31 = vmul.f32 %v5219_v58, %v1999_v25  ;;  %v5221_v33 = vpop.eup %5220  ;;  %vm2007_vm6 = vweird.f32 %v5219_v58 }
0x11ff   :  { %v5223_v55 = vpop.eup %5222  ;;  %v2000_v10 = vadd.f32 1.0, %v5221_v33  ;;  %vm2008_vm9 = vmor %vm2006_vm8, %vm2007_vm6 }
0x1200   :  { %v2003_v29 = vsub.f32 1.0, %v2002_v31  ;;  %v1937_v36 = vadd.f32 1.0, %v5223_v55  ;;  %v5225_v41 = vpop.eup %5224  ;;  %v2623_v55 = vpop.f32.mrf.mxu3 }
0x1201   :  { %5226 = vrcp.f32 %v2000_v10  ;;  %v1936_v50 = vadd.f32 1.0, %v5225_v41  ;;  %vm2021_vm0 = vweird.f32 %v2000_v10  ;;  %v2027_v14 = vand.u32 2147483648, %v2000_v10  ;;  %v5062_v41 = vld [vmem:[%s7280_s14] ss:$0 sm:$0xff] }
0x1202   :  { %v2004_v35 = vmul.f32 %v5219_v58, %v2003_v29  ;;  %5228 = vrcp.f32 %v1937_v36  ;;  %v2025_v5 = vand.u32 2147483647, %v2000_v10  ;;  %v1964_v18 = vand.u32 2147483648, %v1937_v36 }
0x1203   :  { %5230 = vrcp.f32 %v1936_v50  ;;  %vm1958_vm14 = vweird.f32 %v1937_v36  ;;  %v1962_v57 = vand.u32 2147483647, %v1937_v36  ;;  %v2028_v9 = vor.u32 1.1754944e-38, %v2027_v14 }
0x1204   :  { %v2005_v37 = vadd.f32 %v5219_v58, %v2004_v35  ;;  %vm2026_vm8 = vcmp.eq.f32.partialorder %v2025_v5, 8.507059e+37  ;;  %v1965_v15 = vor.u32 1.1754944e-38, %v1964_v18  ;;  %v1949_v33 = vand.u32 2147483648, %v1936_v50 }
0x1205   :  { %v1947_v34 = vand.u32 2147483647, %v1936_v50 }
0x1206   :  { %v2009_v19 = vsel %vm2008_vm9, %v5219_v58, %v2005_v37  ;;  %vm1963_vm9 = vcmp.eq.f32.partialorder %v1962_v57, 8.507059e+37  ;;  %v2646_v58 = vpop.f32.mrf.mxu0 }
0x1207   :  { %v5227_v49 = vpop.eup %5226  ;;  %v6392_v51 = vsel %vm2011_vm10, %v2013_v7, %v2009_v19  ;;  %v2647_v35 = vadd.f32 %v2646_v58, %v2623_v55 }
0x1208   :  { %v5229_v60 = vpop.eup %5228  ;;  %v2017_v0 = vmul.f32 %v5227_v49, %v2000_v10  ;;  %vm2022_vm3 = vweird.f32 %v5227_v49 }
0x1209   :  { %v1954_v62 = vmul.f32 %v5229_v60, %v1937_v36  ;;  %v5231_v4 = vpop.eup %5230  ;;  %vm1959_vm12 = vweird.f32 %v5229_v60  ;;  %vm2023_vm13 = vmor %vm2021_vm0, %vm2022_vm3  ;;  %vm1943_vm3 = vweird.f32 %v1936_v50  ;;  %v1950_v36 = vor.u32 1.1754944e-38, %v1949_v33 }
0x120a   :  { %v2018_v52 = vsub.f32 1.0, %v2017_v0  ;;  %v1939_v12 = vmul.f32 %v5231_v4, %v1936_v50  ;;  %vm1960_vm6 = vmor %vm1958_vm14, %vm1959_vm12  ;;  %vm1944_vm10 = vweird.f32 %v5231_v4  ;;  %vm1948_vm12 = vcmp.eq.f32.partialorder %v1947_v34, 8.507059e+37 }
0x120b   :  { %v1955_v63 = vsub.f32 1.0, %v1954_v62  ;;  %vm1945_vm0 = vmor %vm1943_vm3, %vm1944_vm10  ;;  %v2652_v40 = vmax.f32 %v2647_v35, 0.0  ;;  %v2074_v35 = vsub.f32 1.0, %v6392_v51  ;;  %vm7283_vm14 = vcmask 1047559  }
0x120c   :  { %v2019_v56 = vmul.f32 %v5227_v49, %v2018_v52  ;;  %v1940_v21 = vsub.f32 1.0, %v1939_v12  ;;  %vm2714_vm10 = vcmask 392192  }
0x120d   :  { %v1956_v11 = vmul.f32 %v5229_v60, %v1955_v63  ;;  %v2657_v50 = vmul.f32 %v5062_v41, %v2652_v40 }
0x120e   :  { %v2020_v13 = vadd.f32 %v5227_v49, %v2019_v56  ;;  %v1941_v47 = vmul.f32 %v5231_v4, %v1940_v21  ;;  %v2649_v7 = vpop.f32.mrf.mxu0 }
0x120f   :  { %v1957_v16 = vadd.f32 %v5229_v60, %v1956_v11 }
0x1210   :  { %v2024_v20 = vsel %vm2023_vm13, %v5227_v49, %v2020_v13  ;;  %v1942_v29 = vadd.f32 %v5231_v4, %v1941_v47  ;;  %v2626_v49 = vpop.f32.mrf.mxu3  ;;  %vm7282_vm13 = vcmask 1045504  }
0x1211   :  { %v1961_v38 = vsel %vm1960_vm6, %v5229_v60, %v1957_v16  ;;  %v6396_v25 = vsel %vm2026_vm8, %v2028_v9, %v2024_v20  ;;  %v2086_v60 = vrot.slane %v6371_v1, 4  ;;  %vm7284_vm6 = vcmask 1042434   ;;  %vm7286_vm8 = vmmov %vm7283_vm14 }
0x1212   :  { %v6399_v31 = vsel %vm1963_vm9, %v1965_v15, %v1961_v38  ;;  %v1946_v10 = vsel %vm1945_vm0, %v5231_v4, %v1942_v29  ;;  %v2063_v4 = vrot.slane %v6371_v1, 7  ;;  %vm7287_vm9 = vmmov %vm7282_vm13 }
0x1213   :  { %v6404_v39 = vsel %vm1948_vm12, %v1950_v36, %v1946_v10 }
0x1244   :  { %v2032_v48 = vpop.permute.xlu2 %2031 }
0x1245   :  { %v2037_v54 = vmul.f32 %v2032_v48, %v6392_v51  ;;  %v5063_v48 = vld [vmem:[%s7281_s19] ss:$0 sm:$0xff] }
0x1246   :  { %v2662_v0 = vadd.f32 %v5063_v48, %v2657_v50 }
0x1247   :  { %2041 = vrot.lane.b32.xlu0 %v2037_v54, %s5539_s15  ;;  %v2650_v54 = vadd.f32 %v2649_v7, %v2626_v49 }
0x1248   :  { %v2674_v52 = vrot.slane %v2662_v0, 7 }
0x1249   :  { %v2653_v62 = vmax.f32 %v2650_v54, 0.0 }
0x124a   :  { %v6416_v56 = vsel %vm2442_vm11, 0.0, %v2674_v52  ;;  %v6420_v12 = vsel %vm2442_vm11, %v2674_v52, 0.0 }
0x124b   :  { %v2658_v63 = vmul.f32 %v5062_v41, %v2653_v62  ;;  %v2686_v13 = vrot.slane %v6416_v56, 1  ;;  %v2687_v14 = vrot.slane %v6420_v12, 1  ;;  %v2075_v41 = vsub.f32 1.0, %v6396_v25 }
0x124d   :  { %v2663_v11 = vadd.f32 %v5063_v48, %v2658_v63  ;;  %v2688_v16 = vsel %vm7251_vm2, %v2686_v13, %v2687_v14 }
0x124f   :  { %v2675_v5 = vrot.slane %v2663_v11, 7 }
0x1251   :  { %v6426_v21 = vsel %vm2442_vm11, 0.0, %v2675_v5  ;;  %v2681_v18 = vsel %vm2442_vm11, %v2675_v5, 0.0 }
0x1252   :  { %v2701_v20 = vrot.slane %v6426_v21, 2  ;;  %v2702_v57 = vrot.slane %v2681_v18, 2  ;;  %v2689_v11 = vrot.slane %v6426_v21, 1  ;;  %v2690_v13 = vrot.slane %v2681_v18, 1 }
0x1254   :  { %v2703_v9 = vsel %vm7282_vm13, %v2701_v20, %v2702_v57  ;;  %v2051_v20 = vsub.f32 1.0, %v6404_v39 }
0x125a   :  { %v2034_v26 = vpop.permute.xlu0 %2033 }
0x125b   :  { %v2038_v46 = vmul.f32 %v2034_v26, %v6396_v25 }
0x125c   :  { %v1971_v28 = vpop.permute.xlu1 %1970 }
0x125d   :  { %v1975_v32 = vmul.f32 %v1971_v28, %v6399_v31  ;;  %2043 = vrot.lane.b32.xlu1 %v2038_v46, %s5539_s15 }
0x125f   :  { %1980 = vrot.lane.b32.xlu2 %v1975_v32, %s5539_s15 }
0x1264   :  { %v1969_v37 = vpop.permute.xlu1 %1968 }
0x1265   :  { %v1974_v19 = vmul.f32 %v1969_v37, %v6404_v39  ;;  %2066 = vrot.lane.b32.xlu1 %v6371_v1, %s5544_s21 }
0x1267   :  { %1978 = vrot.lane.b32.xlu2 %v1974_v19, %s5539_s15 }
0x126d   :  { %2087 = vrot.lane.b32.xlu1 %v2086_v60, %s5545_s25 }
0x1275   :  { %2064 = vrot.lane.b32.xlu1 %v2063_v4, %s5544_s21 }
0x127d   :  { %2692 = vrot.lane.b32.xlu1 %v2688_v16, %s5544_s21  ;;  %v2691_v16 = vsel %vm7251_vm2, %v2689_v11, %v2690_v13 }
0x1285   :  { %2706 = vrot.lane.b32.xlu1 %v2703_v9, %s5539_s15 }
0x12b9   :  { %v2042_v38 = vpop.permute.xlu0 %2041  ;;  %v1981_v58 = vpop.permute.xlu2 %1980 }
0x12ba   :  { %v2047_v47 = vadd.f32 %v2042_v38, %v5943_v59  ;;  %v1985_v28 = vadd.f32 %v1981_v58, %v5947_v3  ;;  %v2669_v58 = vld [vmem:[%s7285_s30 + $0x28] sm:$0xff] }
0x12bb   :  { %2731 = vmatpush.msra.mxu1 %v2669_v58 }
0x12bc   :  { %5232 = vtanh.f32 %v2047_v47 }
0x12c1   :  { %v1979_v29 = vpop.permute.xlu2 %1978 }
0x12c2   :  { %v5233_v26 = vpop.eup %5232  ;;  %v1984_v33 = vadd.f32 %v1979_v29, %v5943_v59  ;;  %v2665_v29 = vld [vmem:[%s7285_s30 + $0x8] sm:$0xff] }
0x12c3   :  { %2078 = vrot.lane.b32.xlu2 %v5233_v26, %s5542_s13  ;;  %v2698_v26 = vrot.slane %v6416_v56, 2 }
0x12cb   :  { %2089 = vrot.lane.b32.xlu2 %v1900_v2, %s5545_s25 }
0x12cf   :  { %v2044_v15 = vpop.permute.xlu1 %2043 }
0x12d0   :  { %v2048_v46 = vadd.f32 %v2044_v15, %v5947_v3  ;;  %v2699_v15 = vrot.slane %v6420_v12, 2 }
0x12d2   :  { %5234 = vtanh.f32 %v2048_v46  ;;  %v2700_v46 = vsel %vm7287_vm9, %v2698_v26, %v2699_v15 }
0x12d3   :  { %5236 = vtanh.f32 %v1985_v28  ;;  %v2667_v28 = vld [vmem:[%s7285_s30 + $0x18] sm:$0xff] }
0x12d4   :  { %5238 = vtanh.f32 %v1984_v33  ;;  %v2664_v33 = vld [vmem:[%s7285_s30] sm:$0xff] }
0x12d7   :  { %v2067_v2 = vpop.permute.xlu1 %2066 }
0x12d8   :  { %v5235_v32 = vpop.eup %5234 }
0x12d9   :  { %2080 = vrot.lane.b32.xlu0 %v5235_v32, %s5542_s13  ;;  %v5237_v34 = vpop.eup %5236  ;;  %v2666_v32 = vld [vmem:[%s7285_s30 + $0x10] sm:$0xff] }
0x12da   :  { %v5239_v1 = vpop.eup %5238 }
0x12df   :  { %v2088_v10 = vpop.permute.xlu1 %2087 }
0x12e0   :  { %v2093_v40 = vmul.f32 %v2088_v10, %v6392_v51  ;;  %v2052_v51 = vsub.f32 1.0, %v6399_v31 }
0x12e1   :  { %2057 = vrot.lane.b32.xlu0 %v5237_v34, %s5542_s13 }
0x12e7   :  { %v2065_v14 = vpop.permute.xlu1 %2064 }
0x12e8   :  { %v2070_v9 = vmul.f32 %v2065_v14, %v6404_v39  ;;  %v2668_v39 = vld [vmem:[%s7285_s30 + $0x20] sm:$0xff] }
0x12e9   :  { %2055 = vrot.lane.b32.xlu0 %v5239_v1, %s5542_s13  ;;  %2732 = vmatpush.msra.mxu1 %v2668_v39 }
0x12eb   :  { %2733 = vmatpush.msra.mxu1 %v2667_v28 }
0x12ed   :  { %2734 = vmatpush.msra.mxu1 %v2666_v32 }
0x12ef   :  { %2735 = vmatpush.msra.mxu1 %v2665_v29 }
0x12f1   :  { %2736 = vmatpush.msra.mxu1 %v2664_v33 }
0x131d   :  { %v2079_v55 = vpop.permute.xlu2 %2078 }
0x131e   :  { %v2084_v36 = vmul.f32 %v2079_v55, %v2074_v35  ;;  %v2759_v55 = vld [vmem:[%s7288_s12 + $0x18] sm:$0xff]  ;;  %v2693_v35 = vpop.permute.xlu1 %2692 }
0x1320   :  { %v2095_v7 = vadd.f32 %v2093_v40, %v2084_v36  ;;  %v2710_v36 = vsel %vm827_vm7, %v6416_v56, %v2693_v35  ;;  %v2790_v56 = vld [vmem:[%s7289_s11 + $0x8] sm:$0xff] }
0x1321   :  { %2815 = vmatpush.msrb.mxu0 %v2790_v56 }
0x1322   :  { %v2107_v54 = vrot.slane %v2095_v7, 3 }
0x1325   :  { %v2090_v37 = vpop.permute.xlu2 %2089 }
0x1326   :  { %v2094_v49 = vmul.f32 %v2090_v37, %v6396_v25  ;;  %v2071_v25 = vmul.f32 %v2067_v2, %v6399_v31 }
0x134b   :  { %v2081_v19 = vpop.permute.xlu0 %2080 }
0x134c   :  { %v2085_v50 = vmul.f32 %v2081_v19, %v2075_v41  ;;  %v2707_v19 = vpop.permute.xlu1 %2706 }
0x134e   :  { %v2096_v48 = vadd.f32 %v2094_v49, %v2085_v50  ;;  %v2758_v49 = vld [vmem:[%s7288_s12 + $0x10] sm:$0xff]  ;;  %v2757_v50 = vld [vmem:[%s7288_s12 + $0x8] sm:$0xff] }
0x1350   :  { %v2108_v60 = vrot.slane %v2096_v48, 2  ;;  %v2317_v0 = vrot.slane %v2096_v48, 7  ;;  %v2756_v48 = vld [vmem:[%s7288_s12] sm:$0xff] }
0x1352   :  { %v2109_v62 = vsel %vm7283_vm14, %v2108_v60, %v2107_v54  ;;  %v6450_v52 = vsel %vm7284_vm6, %v2317_v0, %v2095_v7  ;;  %v2789_v54 = vld [vmem:[%s7289_s11] sm:$0xff] }
0x1353   :  { %2110 = vrot.lane.b32.xlu0 %v2109_v62, %s5543_s17  ;;  %v2058_v63 = vpop.permute.xlu0 %2057  ;;  %2816 = vmatpush.msrb.mxu0 %v2789_v54  ;;  %v5065_v0 = vld [vmem:[%s7291_s16] ss:$0 sm:$0xff] }
0x1354   :  { %v2062_v4 = vmul.f32 %v2058_v63, %v2052_v51 }
0x1356   :  { %v2073_v5 = vadd.f32 %v2071_v25, %v2062_v4  ;;  %v5474_v4 = vld [vmem:[%s5560_s5] sm:$0xff] }
0x1358   :  { %v2099_v47 = vrot.slane %v2073_v5, 7  ;;  %v5475_v5 = vld [vmem:[%s5560_s5 + $0x8] sm:$0xff]  ;;  %s7293_s5 = sld [smem:[#allocation19_spill]] }
0x135b   :  { %2694 = vrot.lane.b32.xlu0 %v2691_v16, %s5544_s21  ;;  %v2056_v57 = vpop.permute.xlu0 %2055 }
0x135c   :  { %v2061_v38 = vmul.f32 %v2056_v57, %v2051_v20 }
0x135e   :  { %v2072_v18 = vadd.f32 %v2070_v9, %v2061_v38  ;;  %v5066_v9 = vld [vmem:[%s7292_s18] ss:$0 sm:$0xff] }
0x1360   :  { %v2101_v31 = vsel %vm7286_vm8, %v2099_v47, %v2072_v18 }
0x1361   :  { %2102 = vrot.lane.b32.xlu2 %v2101_v31, %s5542_s13 }
0x1369   :  { %2704 = vrot.lane.b32.xlu2 %v2700_v46, %s5539_s15 }
0x13bb   :  { %v6472_v34 = vpop.permute.xlu2 %2102 }
0x13c3   :  { %v2705_v10 = vpop.permute.xlu2 %2704 }
0x13c4   :  { %v2712_v37 = vsel %vm7250_vm5, %v2710_v36, %v2705_v10 }
0x13c5   :  { %v2111_v12 = vpop.permute.xlu0 %2110 }
0x13c6   :  { %v6476_v1 = vsel %vm827_vm7, %v6472_v34, %v2111_v12 }
0x13c7   :  { %v2115_v2 = vrot.slane %v6476_v1, 6 }
0x13c9   :  { %4942 = vmatmul.msk.f32.vlgmr.msrb.gmra.mxu1 %vm7250_vm5, %v2115_v2 }
0x13ca   :  { %2778 = vmatpush.msrb.mxu1 %v2759_v55 }
0x13cc   :  { %2779 = vmatpush.msrb.mxu1 %v2758_v49 }
0x13cd   :  { %v2695_v40 = vpop.permute.xlu0 %2694 }
0x13ce   :  { %v2711_v41 = vsel %vm827_vm7, %v6426_v21, %v2695_v40  ;;  %2780 = vmatpush.msrb.mxu1 %v2757_v50  ;;  %v5064_v21 = vld [vmem:[%s7290_s24] ss:$0 sm:$0xff] }
0x13cf   :  { %v2713_v7 = vsel %vm7250_vm5, %v2711_v41, %v2707_v19 }
0x13d0   :  { %2781 = vmatpush.msrb.mxu1 %v2756_v48 }
0x13d1   :  { %4949 = vmatmul.msk.f32.vlgmr.msra.gmra.mxu1 %vm2714_vm10, %v2712_v37 }
0x13d9   :  { %4950 = vmatmul.msk.f32.gmra.mxu1 %vm2714_vm10, %v2713_v7 }
0x1446   :  { %v6494_v60 = vpop.f32.mrf.mxu1 }
0x144e   :  { %v2738_v62 = vpop.f32.mrf.mxu1 }
0x144f   :  { %v2747_v63 = vmul.f32 %v5064_v21, %v2738_v62 }
0x1451   :  { %v2752_v51 = vadd.f32 %v5065_v0, %v2747_v63 }
0x1453   :  { %v2754_v11 = vadd.f32 %v5474_v4, %v2752_v51 }
0x1455   :  { %4951 = vmatmul.msk.f32.vlgmr.msrb.gmra.mxu1 %vm7250_vm5, %v2754_v11 }
0x1456   :  { %v2741_v13 = vpop.f32.mrf.mxu1 }
0x1457   :  { %v2748_v25 = vmul.f32 %v5064_v21, %v2741_v13  ;;  %v4958_v21 = vld [vmem:[%s7289_s11 + $0x18] sm:$0xff] }
0x1458   :  { %2918 = vmatpush.msra.mxu2 %v4958_v21 }
0x1459   :  { %v2753_v14 = vadd.f32 %v5065_v0, %v2748_v25  ;;  %v4957_v0 = vld [vmem:[%s7289_s11 + $0x10] sm:$0xff] }
0x145a   :  { %2919 = vmatpush.msra.mxu2 %v4957_v0 }
0x145b   :  { %v2755_v16 = vadd.f32 %v5475_v5, %v2753_v14 }
0x145d   :  { %4952 = vmatmul.msk.f32.gmra.mxu1 %vm7250_vm5, %v2755_v16 }
0x14d2   :  { %v2783_v20 = vpop.f32.mrf.mxu1 }
0x14d3   :  { %2876 = vrot.lane.b32.xlu0 %v2783_v20, %s5544_s21  ;;  %4953 = vmatmul.msk.f32.vlgmr.msrb.gmra.mxu0 %vm827_vm7, %v2783_v20 }
0x14da   :  { %v2786_v57 = vpop.f32.mrf.mxu1 }
0x14db   :  { %4954 = vmatmul.msk.f32.gmra.mxu0 %vm827_vm7, %v2786_v57 }
0x1545   :  { %v2877_v49 = vpop.permute.xlu0 %2876 }
0x1550   :  { %v2818_v38 = vpop.f32.mrf.mxu0 }
0x1551   :  { %v2819_v47 = vadd.f32 %v5066_v9, %v2818_v38 }
0x1553   :  { %v2862_v18 = vmax.f32 %v2819_v47, 0.0  ;;  %v4955_v46 = vmul.f32 -1.442695, %v2819_v47 }
0x1555   :  { %2866 = vrot.lane.b32.xlu2 %v2862_v18, %s5544_s21  ;;  %5240 = vpow2.f32 %v4955_v46 }
0x1558   :  { %v2821_v31 = vpop.f32.mrf.mxu0 }
0x1559   :  { %v2822_v26 = vadd.f32 %v5066_v9, %v2821_v31 }
0x155b   :  { %v2863_v15 = vmax.f32 %v2822_v26, 0.0  ;;  %v5241_v58 = vpop.eup %5240  ;;  %v4956_v33 = vmul.f32 -1.442695, %v2822_v26 }
0x155c   :  { %v2830_v39 = vadd.f32 1.0, %v5241_v58 }
0x155d   :  { %2878 = vrot.lane.b32.xlu2 %v2786_v57, %s5544_s21  ;;  %2868 = vrot.lane.b32.xlu1 %v2863_v15, %s5544_s21  ;;  %v5067_v15 = vld [vmem:[%s7292_s18 + $0x1] ss:$0 sm:$0xff] }
0x155e   :  { %5242 = vrcp.f32 %v2830_v39  ;;  %v2843_v35 = vand.u32 2147483648, %v2830_v39  ;;  %vm2837_vm0 = vweird.f32 %v2830_v39  ;;  %v2841_v10 = vand.u32 2147483647, %v2830_v39 }
0x155f   :  { %5244 = vpow2.f32 %v4956_v33 }
0x1560   :  { %v2844_v37 = vor.u32 1.1754944e-38, %v2843_v35  ;;  %vm2842_vm13 = vcmp.eq.f32.partialorder %v2841_v10, 8.507059e+37  ;;  %v6525_v10 = vld [vmem:[%s5708_s4 + $0x8] sm:$0xff] }
0x1561   :  { %3044 = vmatpush.msra.mxu1 %v6525_v10  ;;  %3239 = vmatpush.msra.mxu0 %v6525_v10 }
0x1562   :  { %3879 = vmatpush.msrb.mxu2 %v6525_v10 }
0x1564   :  { %v5243_v28 = vpop.eup %5242 }
0x1565   :  { %v2833_v32 = vmul.f32 %v5243_v28, %v2830_v39  ;;  %vm2838_vm3 = vweird.f32 %v5243_v28  ;;  %v5245_v40 = vpop.eup %5244 }
0x1566   :  { %vm2839_vm12 = vmor %vm2837_vm0, %vm2838_vm3  ;;  %v2831_v19 = vadd.f32 1.0, %v5245_v40 }
0x1567   :  { %v2834_v29 = vsub.f32 1.0, %v2833_v32 }
0x1568   :  { %5246 = vrcp.f32 %v2831_v19  ;;  %v2858_v13 = vand.u32 2147483648, %v2831_v19  ;;  %vm2852_vm6 = vweird.f32 %v2831_v19  ;;  %v2856_v25 = vand.u32 2147483647, %v2831_v19 }
0x1569   :  { %v2835_v12 = vmul.f32 %v5243_v28, %v2834_v29 }
0x156a   :  { %v2859_v5 = vor.u32 1.1754944e-38, %v2858_v13  ;;  %vm2857_vm9 = vcmp.eq.f32.partialorder %v2856_v25, 8.507059e+37  ;;  %v2984_v25 = vld [vmem:[%s7293_s5 + $0x8] sm:$0xff] }
0x156b   :  { %v2836_v55 = vadd.f32 %v5243_v28, %v2835_v12  ;;  %3016 = vmatpush.msrb.mxu3 %v2984_v25 }
0x156d   :  { %v2840_v36 = vsel %vm2839_vm12, %v5243_v28, %v2836_v55 }
0x156e   :  { %v2845_v41 = vsel %vm2842_vm13, %v2844_v37, %v2840_v36  ;;  %v5247_v62 = vpop.eup %5246  ;;  %v6528_v36 = vld [vmem:[%s5708_s4] sm:$0xff]  ;;  %s7294_s4 = sld [smem:[#allocation20_spill]] }
0x156f   :  { %v2874_v7 = vsub.f32 1.0, %v2845_v41  ;;  %v2848_v63 = vmul.f32 %v5247_v62, %v2831_v19  ;;  %vm2853_vm14 = vweird.f32 %v5247_v62  ;;  %3045 = vmatpush.msra.mxu1 %v6528_v36  ;;  %3240 = vmatpush.msra.mxu0 %v6528_v36 }
0x1570   :  { %vm2854_vm8 = vmor %vm2852_vm6, %vm2853_vm14  ;;  %3046 = vmatmul.f32.vlgmr.msra.gmra.mxu1 %v5541_v24  ;;  %3880 = vmatpush.msrb.mxu2 %v6528_v36 }
0x1571   :  { %v2882_v56 = vmul.f32 %v2877_v49, %v2874_v7  ;;  %v2849_v51 = vsub.f32 1.0, %v2848_v63  ;;  %3670 = vmatpush.msrb.mxu0 %v6525_v10  ;;  %3454 = vmatpush.msrb.mxu1 %v6525_v10 }
0x1573   :  { %v2850_v4 = vmul.f32 %v5247_v62, %v2849_v51  ;;  %3671 = vmatpush.msrb.mxu0 %v6528_v36  ;;  %3455 = vmatpush.msrb.mxu1 %v6528_v36 }
0x1575   :  { %v2851_v11 = vadd.f32 %v5247_v62, %v2850_v4  ;;  %4305 = vmatpush.msra.mxu1 %v6525_v10 }
0x1577   :  { %v2855_v14 = vsel %vm2854_vm8, %v5247_v62, %v2851_v11  ;;  %4306 = vmatpush.msra.mxu1 %v6528_v36 }
0x1578   :  { %v2860_v16 = vsel %vm2857_vm9, %v2859_v5, %v2855_v14  ;;  %v2983_v14 = vld [vmem:[%s7293_s5] sm:$0xff] }
0x1579   :  { %v2875_v57 = vsub.f32 1.0, %v2860_v16  ;;  %3017 = vmatpush.msrb.mxu3 %v2983_v14 }
0x157b   :  { %4089 = vmatpush.msra.mxu3 %v6525_v10 }
0x157d   :  { %4090 = vmatpush.msra.mxu3 %v6528_v36 }
0x15af   :  { %v2867_v50 = vpop.permute.xlu2 %2866 }
0x15b0   :  { %v2872_v48 = vmul.f32 %v2867_v50, %v2845_v41 }
0x15b2   :  { %v6509_v54 = vadd.f32 %v2882_v56, %v2872_v48 }
0x15b4   :  { %2896 = vrot.lane.b32.xlu0 %v6509_v54, %s5542_s13 }
0x15b7   :  { %v2879_v20 = vpop.permute.xlu2 %2878 }
0x15b8   :  { %v2883_v38 = vmul.f32 %v2879_v20, %v2875_v57 }
0x15cf   :  { %v2869_v9 = vpop.permute.xlu1 %2868 }
0x15d0   :  { %v2873_v47 = vmul.f32 %v2869_v9, %v2860_v16 }
0x15d2   :  { %v6515_v18 = vadd.f32 %v2883_v38, %v2873_v47 }
0x15d4   :  { %2898 = vrot.lane.b32.xlu1 %v6515_v18, %s5542_s13 }
0x1626   :  { %v2897_v31 = vpop.permute.xlu0 %2896 }
0x1627   :  { %4960 = vmatmul.msk.f32.vlgmr.msra.gmra.mxu2 %vm827_vm7, %v2897_v31 }
0x1646   :  { %v2899_v26 = vpop.permute.xlu1 %2898 }
0x1647   :  { %4961 = vmatmul.msk.f32.gmra.mxu2 %vm827_vm7, %v2899_v26 }
0x16aa   :  { %v2921_v46 = vpop.f32.mrf.mxu2 }
0x16ab   :  { %v2922_v58 = vadd.f32 %v5067_v15, %v2921_v46 }
0x16ad   :  { %v2965_v39 = vmax.f32 %v2922_v58, 0.0  ;;  %v4962_v33 = vmul.f32 -1.442695, %v2922_v58 }
0x16af   :  { %2969 = vrot.lane.b32.xlu2 %v2965_v39, %s5544_s21  ;;  %5248 = vpow2.f32 %v4962_v33 }
0x16b5   :  { %v5249_v12 = vpop.eup %5248 }
0x16b6   :  { %v2933_v55 = vadd.f32 1.0, %v5249_v12 }
0x16b8   :  { %5250 = vrcp.f32 %v2933_v55  ;;  %v2946_v7 = vand.u32 2147483648, %v2933_v55  ;;  %vm2940_vm3 = vweird.f32 %v2933_v55  ;;  %v2944_v24 = vand.u32 2147483647, %v2933_v55 }
0x16ba   :  { %v2947_v50 = vor.u32 1.1754944e-38, %v2946_v7  ;;  %vm2945_vm12 = vcmp.eq.f32.partialorder %v2944_v24, 8.507059e+37 }
0x16be   :  { %v5251_v35 = vpop.eup %5250 }
0x16bf   :  { %v2936_v37 = vmul.f32 %v5251_v35, %v2933_v55  ;;  %vm2941_vm10 = vweird.f32 %v5251_v35 }
0x16c0   :  { %vm2942_vm0 = vmor %vm2940_vm3, %vm2941_vm10 }
0x16c1   :  { %v2937_v40 = vsub.f32 1.0, %v2936_v37 }
0x16c3   :  { %v2938_v41 = vmul.f32 %v5251_v35, %v2937_v40 }
0x16c5   :  { %v2939_v19 = vadd.f32 %v5251_v35, %v2938_v41 }
0x16c7   :  { %v2943_v49 = vsel %vm2942_vm0, %v5251_v35, %v2939_v19  ;;  %v5069_v35 = vld [vmem:[%s7294_s4] ss:$0 sm:$0xff] }
0x16c8   :  { %v2948_v48 = vsel %vm2945_vm12, %v2947_v50, %v2943_v49 }
0x16c9   :  { %v2977_v56 = vsub.f32 1.0, %v2948_v48 }
0x16ca   :  { %v2924_v28 = vpop.f32.mrf.mxu2 }
0x16cb   :  { %v2925_v32 = vadd.f32 %v5067_v15, %v2924_v28  ;;  %v2979_v0 = vmul.f32 %v2977_v56, %v6509_v54 }
0x16cd   :  { %v2966_v29 = vmax.f32 %v2925_v32, 0.0  ;;  %v4963_v51 = vmul.f32 -1.442695, %v2925_v32  ;;  %v6553_v32 = vld [vmem:[%s5713_s22] ss:$0 sm:$0xff] }
0x16cf   :  { %2971 = vrot.lane.b32.xlu0 %v2966_v29, %s5544_s21  ;;  %5252 = vpow2.f32 %v4963_v51  ;;  %v3047_v29 = vpop.f32.mrf.mxu1 }
0x16d0   :  { %v3048_v33 = vadd.f32 %v6553_v32, %v3047_v29 }
0x16d2   :  { %v3051_v12 = vrot.slane %v3048_v33, 1  ;;  %v3114_v55 = vrot.slane %v3048_v33, 2 }
0x16d5   :  { %v5253_v4 = vpop.eup %5252 }
0x16d6   :  { %v2934_v11 = vadd.f32 1.0, %v5253_v4 }
0x16d7   :  { %3096 = vrot.lane.b32.xlu0 %v3051_v12, %s5542_s13 }
0x16d8   :  { %5254 = vrcp.f32 %v2934_v11  ;;  %v2961_v57 = vand.u32 2147483648, %v2934_v11  ;;  %vm2955_vm14 = vweird.f32 %v2934_v11  ;;  %v2959_v9 = vand.u32 2147483647, %v2934_v11 }
0x16da   :  { %v2962_v47 = vor.u32 1.1754944e-38, %v2961_v57  ;;  %vm2960_vm8 = vcmp.eq.f32.partialorder %v2959_v9, 8.507059e+37 }
0x16de   :  { %v5255_v13 = vpop.eup %5254 }
0x16df   :  { %v2951_v5 = vmul.f32 %v5255_v13, %v2934_v11  ;;  %vm2956_vm13 = vweird.f32 %v5255_v13 }
0x16e0   :  { %vm2957_vm6 = vmor %vm2955_vm14, %vm2956_vm13 }
0x16e1   :  { %v2952_v16 = vsub.f32 1.0, %v2951_v5 }
0x16e3   :  { %v2953_v54 = vmul.f32 %v5255_v13, %v2952_v16 }
0x16e5   :  { %v2954_v20 = vadd.f32 %v5255_v13, %v2953_v54 }
0x16e7   :  { %v2958_v38 = vsel %vm2957_vm6, %v5255_v13, %v2954_v20 }
0x16e8   :  { %v2963_v31 = vsel %vm2960_vm8, %v2962_v47, %v2958_v38 }
0x16e9   :  { %v2978_v26 = vsub.f32 1.0, %v2963_v31 }
0x16eb   :  { %v2980_v58 = vmul.f32 %v2978_v26, %v6515_v18 }
0x1709   :  { %v2970_v21 = vpop.permute.xlu2 %2969 }
0x170a   :  { %v2975_v62 = vmul.f32 %v2970_v21, %v2948_v48 }
0x170c   :  { %v2981_v63 = vadd.f32 %v2979_v0, %v2975_v62 }
0x170e   :  { %2994 = vrot.lane.b32.xlu1 %v2981_v63, %s5542_s13 }
0x1716   :  { %3156 = vrot.lane.b32.xlu1 %v3114_v55, %s5542_s13 }
0x1741   :  { %v2972_v15 = vpop.permute.xlu0 %2971 }
0x1742   :  { %v2976_v46 = vmul.f32 %v2972_v15, %v2963_v31 }
0x1744   :  { %v2982_v39 = vadd.f32 %v2980_v58, %v2976_v46 }
0x1746   :  { %2996 = vrot.lane.b32.xlu2 %v2982_v39, %s5542_s13 }
0x1749   :  { %v6565_v4 = vpop.permute.xlu0 %3096 }
0x174e   :  { %3094 = vrot.lane.b32.xlu2 %v3048_v33, %s5542_s13 }
0x1780   :  { %v2995_v28 = vpop.permute.xlu1 %2994 }
0x1781   :  { %4964 = vmatmul.msk.f32.vlgmr.msrb.gmra.mxu3 %vm827_vm7, %v2995_v28 }
0x17a0   :  { %v2997_v18 = vpop.permute.xlu2 %2996 }
0x17a1   :  { %4965 = vmatmul.msk.f32.gmra.mxu3 %vm827_vm7, %v2997_v18 }
0x1804   :  { %v3019_v37 = vpop.f32.mrf.mxu3 }
0x1805   :  { %v6561_v40 = vadd.f32 %v5069_v35, %v3019_v37 }
0x1807   :  { %v3116_v41 = vadd.f32 %v3051_v12, %v6561_v40  ;;  %v3054_v50 = vadd.f32 %v3048_v33, %v6561_v40 }
0x1809   :  { %v4968_v19 = vmul.f32 -1.442695, %v3116_v41  ;;  %v4966_v0 = vmul.f32 -1.442695, %v3054_v50 }
0x180b   :  { %5256 = vpow2.f32 %v4968_v19 }
0x1811   :  { %v5257_v7 = vpop.eup %5256 }
0x1812   :  { %v3124_v24 = vadd.f32 1.0, %v5257_v7 }
0x1814   :  { %5258 = vrcp.f32 %v3124_v24  ;;  %v3137_v21 = vand.u32 2147483648, %v3124_v24  ;;  %v3135_v63 = vand.u32 2147483647, %v3124_v24  ;;  %vm3131_vm10 = vweird.f32 %v3124_v24 }
0x1815   :  { %5260 = vpow2.f32 %v4966_v0 }
0x1816   :  { %v3138_v11 = vor.u32 1.1754944e-38, %v3137_v21  ;;  %vm3136_vm0 = vcmp.eq.f32.partialorder %v3135_v63, 8.507059e+37  ;;  %v3157_v21 = vpop.permute.xlu1 %3156 }
0x181a   :  { %v5259_v49 = vpop.eup %5258 }
0x181b   :  { %v3127_v48 = vmul.f32 %v5259_v49, %v3124_v24  ;;  %vm3132_vm9 = vweird.f32 %v5259_v49  ;;  %v5261_v57 = vpop.eup %5260 }
0x181c   :  { %vm3133_vm3 = vmor %vm3131_vm10, %vm3132_vm9  ;;  %v3062_v47 = vadd.f32 1.0, %v5261_v57 }
0x181d   :  { %v3128_v56 = vsub.f32 1.0, %v3127_v48 }
0x181e   :  { %vm3069_vm5 = vweird.f32 %v3062_v47 }
0x181f   :  { %v3129_v62 = vmul.f32 %v5259_v49, %v3128_v56 }
0x1821   :  { %v3130_v51 = vadd.f32 %v5259_v49, %v3129_v62 }
0x1823   :  { %v3134_v13 = vsel %vm3133_vm3, %v5259_v49, %v3130_v51 }
0x1824   :  { %v6567_v25 = vsel %vm3136_vm0, %v3138_v11, %v3134_v13  ;;  %v3022_v14 = vpop.f32.mrf.mxu3 }
0x1825   :  { %v3159_v5 = vmul.f32 %v6567_v25, %v6565_v4  ;;  %v6571_v16 = vadd.f32 %v5069_v35, %v3022_v14  ;;  %v3075_v14 = vand.u32 2147483648, %v3062_v47 }
0x1827   :  { %v3055_v54 = vadd.f32 %v3051_v12, %v6571_v16  ;;  %v3117_v20 = vadd.f32 %v3114_v55, %v6571_v16  ;;  %3163 = vrot.lane.b32.xlu1 %v3159_v5, %s5544_s21 }
0x1829   :  { %v4967_v9 = vmul.f32 -1.442695, %v3055_v54  ;;  %v4969_v38 = vmul.f32 -1.442695, %v3117_v20  ;;  %v3073_v20 = vand.u32 2147483647, %v3062_v47 }
0x182b   :  { %5262 = vpow2.f32 %v4969_v38  ;;  %v3076_v38 = vor.u32 1.1754944e-38, %v3075_v14 }
0x182c   :  { %5264 = vpow2.f32 %v4967_v9 }
0x182d   :  { %5266 = vrcp.f32 %v3062_v47 }
0x1831   :  { %v5263_v31 = vpop.eup %5262 }
0x1832   :  { %v5265_v26 = vpop.eup %5264  ;;  %v3125_v15 = vadd.f32 1.0, %v5263_v31  ;;  %v3095_v31 = vpop.permute.xlu2 %3094 }
0x1833   :  { %v3063_v46 = vadd.f32 1.0, %v5265_v26  ;;  %v5267_v58 = vpop.eup %5266 }
0x1834   :  { %5268 = vrcp.f32 %v3125_v15  ;;  %v3065_v39 = vmul.f32 %v5267_v58, %v3062_v47  ;;  %v3152_v35 = vand.u32 2147483648, %v3125_v15  ;;  %v3150_v19 = vand.u32 2147483647, %v3125_v15 }
0x1835   :  { %5270 = vrcp.f32 %v3063_v46  ;;  %v3090_v7 = vand.u32 2147483648, %v3063_v46  ;;  %v3088_v50 = vand.u32 2147483647, %v3063_v46  ;;  %vm3146_vm14 = vweird.f32 %v3125_v15 }
0x1836   :  { %v3066_v12 = vsub.f32 1.0, %v3065_v39  ;;  %v3153_v56 = vor.u32 1.1754944e-38, %v3152_v35  ;;  %vm3084_vm8 = vweird.f32 %v3063_v46  ;;  %vm3070_vm9 = vweird.f32 %v5267_v58 }
0x1837   :  { %vm3151_vm10 = vcmp.eq.f32.partialorder %v3150_v19, 8.507059e+37  ;;  %v3091_v63 = vor.u32 1.1754944e-38, %v3090_v7  ;;  %vm3089_vm0 = vcmp.eq.f32.partialorder %v3088_v50, 8.507059e+37  ;;  %v3201_v7 = vmul.f32 0.0, %v6567_v25 }
0x1838   :  { %v3067_v24 = vmul.f32 %v5267_v58, %v3066_v12 }
0x183a   :  { %v5269_v28 = vpop.eup %5268  ;;  %v3068_v51 = vadd.f32 %v5267_v58, %v3067_v24 }
0x183b   :  { %v5271_v29 = vpop.eup %5270  ;;  %v3142_v33 = vmul.f32 %v5269_v28, %v3125_v15  ;;  %vm3147_vm12 = vweird.f32 %v5269_v28 }
0x183c   :  { %v3080_v55 = vmul.f32 %v5271_v29, %v3063_v46  ;;  %vm3085_vm13 = vweird.f32 %v5271_v29  ;;  %vm3148_vm6 = vmor %vm3146_vm14, %vm3147_vm12 }
0x183d   :  { %v3143_v18 = vsub.f32 1.0, %v3142_v33  ;;  %vm3086_vm3 = vmor %vm3084_vm8, %vm3085_vm13  ;;  %vm3074_vm13 = vcmp.eq.f32.partialorder %v3073_v20, 8.507059e+37 }
0x183e   :  { %v3081_v37 = vsub.f32 1.0, %v3080_v55  ;;  %vm3071_vm12 = vmor %vm3069_vm5, %vm3070_vm9  ;;  %vm7295_vm5 = vcmask 1041409  }
0x183f   :  { %v3144_v41 = vmul.f32 %v5269_v28, %v3143_v18  ;;  %v3072_v9 = vsel %vm3071_vm12, %v5267_v58, %v3068_v51  ;;  %vm7296_vm14 = vmmov %vm7295_vm5 }
0x1840   :  { %v3082_v49 = vmul.f32 %v5271_v29, %v3081_v37  ;;  %v3077_v26 = vsel %vm3074_vm13, %v3076_v38, %v3072_v9 }
0x1841   :  { %v3145_v48 = vadd.f32 %v5269_v28, %v3144_v41  ;;  %v3100_v15 = vmul.f32 %v3095_v31, %v3077_v26  ;;  %v3189_v41 = vsub.f32 1.0, %v6567_v25  ;;  %v3173_v20 = vsub.f32 1.0, %v3077_v26 }
0x1842   :  { %v3083_v0 = vadd.f32 %v5271_v29, %v3082_v49 }
0x1843   :  { %v3149_v62 = vsel %vm3148_vm6, %v5269_v28, %v3145_v48  ;;  %vm3220_vm6 = vcmask 64512  }
0x1844   :  { %v3154_v11 = vsel %vm3151_vm10, %v3153_v56, %v3149_v62  ;;  %v3087_v13 = vsel %vm3086_vm3, %v5271_v29, %v3083_v0 }
0x1845   :  { %v3160_v5 = vmul.f32 %v3157_v21, %v3154_v11  ;;  %v3092_v54 = vsel %vm3089_vm0, %v3091_v63, %v3087_v13  ;;  %v3190_v24 = vsub.f32 1.0, %v3154_v11  ;;  %v3202_v48 = vmul.f32 0.0, %v3154_v11 }
0x1846   :  { %v3101_v57 = vmul.f32 %v6565_v4, %v3092_v54  ;;  %v3174_v13 = vsub.f32 1.0, %v3092_v54  ;;  %v3186_v14 = vmul.f32 0.0, %v3092_v54  ;;  %v3185_v11 = vmul.f32 0.0, %v3077_v26 }
0x1847   :  { %3165 = vrot.lane.b32.xlu2 %v3160_v5, %s5544_s21 }
0x1848   :  { %3106 = vrot.lane.b32.xlu0 %v3101_v57, %s5544_s21 }
0x1850   :  { %3104 = vrot.lane.b32.xlu0 %v3100_v15, %s5544_s21 }
0x1899   :  { %v3164_v46 = vpop.permute.xlu1 %3163 }
0x189a   :  { %v3169_v39 = vadd.f32 %v3164_v46, %v6561_v40 }
0x189c   :  { %5272 = vtanh.f32 %v3169_v39 }
0x18a1   :  { %v3166_v47 = vpop.permute.xlu2 %3165 }
0x18a2   :  { %v5273_v4 = vpop.eup %5272  ;;  %v3170_v28 = vadd.f32 %v3166_v47, %v6571_v16 }
0x18a3   :  { %3193 = vrot.lane.b32.xlu2 %v5273_v4, %s5546_s27 }
0x18a4   :  { %5274 = vtanh.f32 %v3170_v28 }
0x18aa   :  { %v5275_v58 = vpop.eup %5274 }
0x18ab   :  { %3195 = vrot.lane.b32.xlu0 %v5275_v58, %s5546_s27 }
0x18ba   :  { %v3107_v29 = vpop.permute.xlu0 %3106 }
0x18bb   :  { %v3111_v33 = vadd.f32 %v3107_v29, %v6571_v16 }
0x18bd   :  { %5276 = vtanh.f32 %v3111_v33 }
0x18c2   :  { %v3105_v12 = vpop.permute.xlu0 %3104 }
0x18c3   :  { %v5277_v55 = vpop.eup %5276  ;;  %v3110_v18 = vadd.f32 %v3105_v12, %v6561_v40 }
0x18c4   :  { %3179 = vrot.lane.b32.xlu1 %v5277_v55, %s5546_s27 }
0x18c5   :  { %5278 = vtanh.f32 %v3110_v18 }
0x18cb   :  { %v5279_v35 = vpop.eup %5278 }
0x18cc   :  { %3177 = vrot.lane.b32.xlu1 %v5279_v35, %s5546_s27 }
0x18fd   :  { %v3194_v37 = vpop.permute.xlu2 %3193 }
0x18fe   :  { %v3199_v19 = vmul.f32 %v3194_v37, %v3189_v41 }
0x1900   :  { %v6591_v50 = vadd.f32 %v3201_v7, %v3199_v19 }
0x1902   :  { %v3214_v0 = vrot.slane %v6591_v50, 7 }
0x191d   :  { %v3196_v49 = vpop.permute.xlu0 %3195 }
0x191e   :  { %v3200_v56 = vmul.f32 %v3196_v49, %v3190_v24 }
0x1920   :  { %v6593_v21 = vadd.f32 %v3202_v48, %v3200_v56 }
0x1922   :  { %v3215_v62 = vrot.slane %v6593_v21, 6 }
0x1924   :  { %v3216_v63 = vsel %vm7295_vm5, %v3215_v62, %v3214_v0 }
0x1925   :  { %3217 = vrot.lane.b32.xlu0 %v3216_v63, %s5547_s23 }
0x1936   :  { %v3180_v51 = vpop.permute.xlu1 %3179 }
0x1937   :  { %v3184_v25 = vmul.f32 %v3180_v51, %v3174_v13 }
0x1939   :  { %v3188_v5 = vadd.f32 %v3186_v14, %v3184_v25 }
0x193b   :  { %v3207_v38 = vrot.slane %v3188_v5, 7 }
0x193e   :  { %v3178_v57 = vpop.permute.xlu1 %3177 }
0x193f   :  { %v3183_v9 = vmul.f32 %v3178_v57, %v3173_v20 }
0x1941   :  { %v3187_v31 = vadd.f32 %v3185_v11, %v3183_v9 }
0x1943   :  { %v3208_v15 = vsel %vm7296_vm14, %v3207_v38, %v3187_v31 }
0x1944   :  { %3209 = vrot.lane.b32.xlu2 %v3208_v15, %s5546_s27 }
0x1997   :  { %v3218_v46 = vpop.permute.xlu0 %3217 }
0x199e   :  { %v6601_v39 = vpop.permute.xlu2 %3209 }
0x199f   :  { %v6605_v47 = vsel %vm3220_vm6, %v6601_v39, %v3218_v46 }
0x19a0   :  { %4970 = vmatmul.msk.f32.vlgmr.msra.gmra.mxu0 %vm827_vm7, %v6605_v47 }
0x19a1   :  { %4519 = vmatpush.msra.mxu0 %v6525_v10 }
0x19a3   :  { %4520 = vmatpush.msra.mxu0 %v6528_v36 }
0x1a1d   :  { %v3242_v54 = vpop.f32.mrf.mxu0 }
0x1a1e   :  { %v3243_v26 = vadd.f32 %v6553_v32, %v3242_v54 }
0x1a20   :  { %3291 = vrot.lane.b32.xlu1 %v3243_v26, %s5542_s13  ;;  %v3310_v4 = vrot.slane %v3243_v26, 3  ;;  %v3309_v28 = vrot.slane %v3243_v26, 2  ;;  %v3246_v58 = vrot.slane %v3243_v26, 7  ;;  %v3250_v12 = vadd.f32 %v3243_v26, %v6571_v16 }
0x1a22   :  { %3355 = vrot.lane.b32.xlu0 %v3310_v4, %s5542_s13  ;;  %3353 = vrot.lane.b32.xlu2 %v3309_v28, %s5542_s13  ;;  %v3313_v29 = vadd.f32 %v3309_v28, %v6561_v40  ;;  %v3314_v55 = vadd.f32 %v3310_v4, %v6571_v16  ;;  %v4972_v18 = vmul.f32 -1.442695, %v3250_v12  ;;  %v3249_v41 = vadd.f32 %v3246_v58, %v6561_v40 }
0x1a24   :  { %v4973_v33 = vmul.f32 -1.442695, %v3313_v29  ;;  %v4974_v37 = vmul.f32 -1.442695, %v3314_v55  ;;  %v4971_v7 = vmul.f32 -1.442695, %v3249_v41 }
0x1a26   :  { %5280 = vpow2.f32 %v4973_v33 }
0x1a28   :  { %3289 = vrot.lane.b32.xlu1 %v3246_v58, %s5542_s13 }
0x1a2c   :  { %v5281_v10 = vpop.eup %5280 }
0x1a2d   :  { %v3321_v36 = vadd.f32 1.0, %v5281_v10 }
0x1a2f   :  { %5282 = vrcp.f32 %v3321_v36  ;;  %v3334_v51 = vand.u32 2147483648, %v3321_v36  ;;  %vm3328_vm9 = vweird.f32 %v3321_v36  ;;  %v3332_v25 = vand.u32 2147483647, %v3321_v36 }
0x1a30   :  { %5284 = vpow2.f32 %v4972_v18 }
0x1a31   :  { %5286 = vpow2.f32 %v4974_v37  ;;  %v3335_v20 = vor.u32 1.1754944e-38, %v3334_v51  ;;  %vm3333_vm3 = vcmp.eq.f32.partialorder %v3332_v25, 8.507059e+37 }
0x1a32   :  { %5288 = vpow2.f32 %v4971_v7 }
0x1a35   :  { %v5283_v35 = vpop.eup %5282 }
0x1a36   :  { %v3324_v19 = vmul.f32 %v5283_v35, %v3321_v36  ;;  %v5285_v49 = vpop.eup %5284  ;;  %vm3329_vm8 = vweird.f32 %v5283_v35 }
0x1a37   :  { %v5287_v48 = vpop.eup %5286  ;;  %v3258_v0 = vadd.f32 1.0, %v5285_v49  ;;  %vm3330_vm10 = vmor %vm3328_vm9, %vm3329_vm8 }
0x1a38   :  { %v3325_v24 = vsub.f32 1.0, %v3324_v19  ;;  %v3322_v62 = vadd.f32 1.0, %v5287_v48  ;;  %v5289_v13 = vpop.eup %5288 }
0x1a39   :  { %5290 = vrcp.f32 %v3258_v0  ;;  %v3257_v5 = vadd.f32 1.0, %v5289_v13  ;;  %v3285_v36 = vand.u32 2147483648, %v3258_v0  ;;  %vm3279_vm12 = vweird.f32 %v3258_v0 }
0x1a3a   :  { %v3326_v56 = vmul.f32 %v5283_v35, %v3325_v24  ;;  %5292 = vrcp.f32 %v3322_v62  ;;  %v3283_v12 = vand.u32 2147483647, %v3258_v0  ;;  %v3349_v18 = vand.u32 2147483648, %v3322_v62 }
0x1a3b   :  { %5294 = vrcp.f32 %v3257_v5  ;;  %vm3343_vm14 = vweird.f32 %v3322_v62  ;;  %v3347_v37 = vand.u32 2147483647, %v3322_v62  ;;  %v3286_v19 = vor.u32 1.1754944e-38, %v3285_v36 }
0x1a3c   :  { %v3327_v63 = vadd.f32 %v5283_v35, %v3326_v56  ;;  %vm3284_vm9 = vcmp.eq.f32.partialorder %v3283_v12, 8.507059e+37  ;;  %v3350_v48 = vor.u32 1.1754944e-38, %v3349_v18  ;;  %v3270_v13 = vand.u32 2147483648, %v3257_v5 }
0x1a3e   :  { %v3331_v14 = vsel %vm3330_vm10, %v5283_v35, %v3327_v63  ;;  %vm3348_vm10 = vcmp.eq.f32.partialorder %v3347_v37, 8.507059e+37 }
0x1a3f   :  { %v5291_v57 = vpop.eup %5290  ;;  %v6620_v9 = vsel %vm3333_vm3, %v3335_v20, %v3331_v14  ;;  %v3271_v20 = vor.u32 1.1754944e-38, %v3270_v13 }
0x1a40   :  { %v5293_v31 = vpop.eup %5292  ;;  %v3275_v15 = vmul.f32 %v5291_v57, %v3258_v0  ;;  %vm3280_vm0 = vweird.f32 %v5291_v57 }
0x1a41   :  { %v3339_v46 = vmul.f32 %v5293_v31, %v3322_v62  ;;  %v5295_v26 = vpop.eup %5294  ;;  %vm3344_vm13 = vweird.f32 %v5293_v31  ;;  %vm3281_vm5 = vmor %vm3279_vm12, %vm3280_vm0  ;;  %vm3264_vm0 = vweird.f32 %v3257_v5  ;;  %v3268_v62 = vand.u32 2147483647, %v3257_v5 }
0x1a42   :  { %v3276_v54 = vsub.f32 1.0, %v3275_v15  ;;  %v3260_v58 = vmul.f32 %v5295_v26, %v3257_v5  ;;  %vm3345_vm8 = vmor %vm3343_vm14, %vm3344_vm13  ;;  %vm3265_vm3 = vweird.f32 %v5295_v26  ;;  %v3385_v5 = vrot.slane %v6605_v47, 7 }
0x1a43   :  { %v3340_v4 = vsub.f32 1.0, %v3339_v46  ;;  %vm3266_vm12 = vmor %vm3264_vm0, %vm3265_vm3  ;;  %vm3269_vm13 = vcmp.eq.f32.partialorder %v3268_v62, 8.507059e+37  ;;  %vm7298_vm14 = vcmask 1047559  }
0x1a44   :  { %v3277_v28 = vmul.f32 %v5291_v57, %v3276_v54  ;;  %v3261_v10 = vsub.f32 1.0, %v3260_v58  ;;  %v3409_v58 = vrot.slane %v6605_v47, 3 }
0x1a45   :  { %v3341_v29 = vmul.f32 %v5293_v31, %v3340_v4 }
0x1a46   :  { %v3278_v33 = vadd.f32 %v5291_v57, %v3277_v28  ;;  %v3262_v41 = vmul.f32 %v5295_v26, %v3261_v10 }
0x1a47   :  { %v3342_v55 = vadd.f32 %v5293_v31, %v3341_v29 }
0x1a48   :  { %v3282_v35 = vsel %vm3281_vm5, %v5291_v57, %v3278_v33  ;;  %v3263_v0 = vadd.f32 %v5295_v26, %v3262_v41  ;;  %vm7297_vm5 = vcmask 1042434  }
0x1a49   :  { %v3346_v7 = vsel %vm3345_vm8, %v5293_v31, %v3342_v55  ;;  %v6624_v49 = vsel %vm3284_vm9, %v3286_v19, %v3282_v35  ;;  %v3408_v31 = vrot.slane %v6605_v47, 2  ;;  %vm7299_vm8 = vmmov %vm7297_vm5 }
0x1a4a   :  { %v3351_v51 = vsel %vm3348_vm10, %v3350_v48, %v3346_v7  ;;  %v3267_v14 = vsel %vm3266_vm12, %v5295_v26, %v3263_v0  ;;  %v3374_v13 = vsub.f32 1.0, %v6624_v49 }
0x1a4b   :  { %v3397_v48 = vsub.f32 1.0, %v3351_v51 }
0x1a7c   :  { %v3354_v11 = vpop.permute.xlu2 %3353 }
0x1a7d   :  { %v3359_v38 = vmul.f32 %v3354_v11, %v6620_v9  ;;  %v3272_v11 = vsel %vm3269_vm13, %v3271_v20, %v3267_v14 }
0x1a7f   :  { %3363 = vrot.lane.b32.xlu0 %v3359_v38, %s5544_s21 }
0x1a92   :  { %v3292_v24 = vpop.permute.xlu1 %3291 }
0x1a93   :  { %v3296_v56 = vmul.f32 %v3292_v24, %v6624_v49 }
0x1a94   :  { %v3356_v63 = vpop.permute.xlu0 %3355 }
0x1a95   :  { %v3360_v25 = vmul.f32 %v3356_v63, %v3351_v51  ;;  %3301 = vrot.lane.b32.xlu2 %v3296_v56, %s5544_s21 }
0x1a97   :  { %3365 = vrot.lane.b32.xlu1 %v3360_v25, %s5544_s21 }
0x1a9a   :  { %v3290_v57 = vpop.permute.xlu1 %3289 }
0x1a9b   :  { %v3295_v38 = vmul.f32 %v3290_v57, %v3272_v11 }
0x1a9d   :  { %3299 = vrot.lane.b32.xlu2 %v3295_v38, %s5544_s21 }
0x1a9f   :  { %3388 = vrot.lane.b32.xlu1 %v6605_v47, %s5548_s26  ;;  %v3396_v47 = vsub.f32 1.0, %v6620_v9 }
0x1aa7   :  { %3410 = vrot.lane.b32.xlu1 %v3408_v31, %s5549_s20 }
0x1aaf   :  { %3386 = vrot.lane.b32.xlu1 %v3385_v5, %s5548_s26 }
0x1aef   :  { %v3302_v15 = vpop.permute.xlu2 %3301 }
0x1af0   :  { %v3306_v46 = vadd.f32 %v3302_v15, %v6571_v16 }
0x1af1   :  { %v3364_v54 = vpop.permute.xlu0 %3363 }
0x1af2   :  { %5296 = vtanh.f32 %v3306_v46  ;;  %v3369_v26 = vadd.f32 %v3364_v54, %v6561_v40  ;;  %v3373_v46 = vsub.f32 1.0, %v3272_v11 }
0x1af4   :  { %5298 = vtanh.f32 %v3369_v26 }
0x1af7   :  { %v3300_v10 = vpop.permute.xlu2 %3299 }
0x1af8   :  { %v5297_v4 = vpop.eup %5296  ;;  %v3305_v36 = vadd.f32 %v3300_v10, %v6561_v40 }
0x1af9   :  { %3379 = vrot.lane.b32.xlu0 %v5297_v4, %s5546_s27 }
0x1afa   :  { %v5299_v28 = vpop.eup %5298 }
0x1afb   :  { %3400 = vrot.lane.b32.xlu2 %v5299_v28, %s5546_s27 }
0x1b03   :  { %3412 = vrot.lane.b32.xlu2 %v3409_v58, %s5549_s20 }
0x1b09   :  { %v3366_v29 = vpop.permute.xlu1 %3365 }
0x1b0a   :  { %v3370_v33 = vadd.f32 %v3366_v29, %v6571_v16 }
0x1b0c   :  { %5300 = vtanh.f32 %v3370_v33 }
0x1b0d   :  { %5302 = vtanh.f32 %v3305_v36 }
0x1b11   :  { %v3389_v18 = vpop.permute.xlu1 %3388 }
0x1b12   :  { %v5301_v12 = vpop.eup %5300  ;;  %v3393_v20 = vmul.f32 %v3389_v18, %v6624_v49 }
0x1b13   :  { %3402 = vrot.lane.b32.xlu0 %v5301_v12, %s5546_s27  ;;  %v5303_v55 = vpop.eup %5302 }
0x1b19   :  { %v3411_v41 = vpop.permute.xlu1 %3410 }
0x1b1a   :  { %v3416_v24 = vmul.f32 %v3411_v41, %v6620_v9 }
0x1b1b   :  { %3377 = vrot.lane.b32.xlu0 %v5303_v55, %s5546_s27 }
0x1b21   :  { %v3387_v5 = vpop.permute.xlu1 %3386 }
0x1b55   :  { %v3401_v35 = vpop.permute.xlu2 %3400 }
0x1b56   :  { %v3406_v19 = vmul.f32 %v3401_v35, %v3396_v47 }
0x1b58   :  { %v3418_v0 = vadd.f32 %v3416_v24, %v3406_v19 }
0x1b5a   :  { %v3429_v57 = vrot.slane %v3418_v0, 5 }
0x1b5d   :  { %v3413_v7 = vpop.permute.xlu2 %3412 }
0x1b5e   :  { %v3417_v63 = vmul.f32 %v3413_v7, %v3351_v51  ;;  %v3392_v51 = vmul.f32 %v3387_v5, %v3272_v11 }
0x1b6b   :  { %v3380_v37 = vpop.permute.xlu0 %3379 }
0x1b6c   :  { %v3384_v62 = vmul.f32 %v3380_v37, %v3374_v13 }
0x1b6e   :  { %v3395_v15 = vadd.f32 %v3393_v20, %v3384_v62 }
0x1b70   :  { %v3422_v28 = vrot.slane %v3395_v15, 7 }
0x1b85   :  { %v3403_v56 = vpop.permute.xlu0 %3402 }
0x1b86   :  { %v3407_v25 = vmul.f32 %v3403_v56, %v3397_v48 }
0x1b88   :  { %v3419_v14 = vadd.f32 %v3417_v63, %v3407_v25 }
0x1b8a   :  { %v3430_v38 = vrot.slane %v3419_v14, 4  ;;  %v4764_v31 = vrot.slane %v3419_v14, 7 }
0x1b8c   :  { %v3431_v54 = vsel %vm7297_vm5, %v3430_v38, %v3429_v57  ;;  %v6652_v9 = vsel %vm7298_vm14, %v4764_v31, %v3418_v0 }
0x1b8d   :  { %v3378_v26 = vpop.permute.xlu0 %3377  ;;  %3432 = vrot.lane.b32.xlu0 %v3431_v54, %s5547_s23 }
0x1b8e   :  { %v3383_v4 = vmul.f32 %v3378_v26, %v3373_v46 }
0x1b90   :  { %v3394_v58 = vadd.f32 %v3392_v51, %v3383_v4 }
0x1b92   :  { %v3423_v49 = vsel %vm7299_vm8, %v3422_v28, %v3394_v58 }
0x1b93   :  { %3424 = vrot.lane.b32.xlu2 %v3423_v49, %s5546_s27 }
0x1bed   :  { %v6657_v29 = vpop.permute.xlu2 %3424 }
0x1bff   :  { %v3433_v33 = vpop.permute.xlu0 %3432 }
0x1c00   :  { %v6661_v10 = vsel %vm3220_vm6, %v6657_v29, %v3433_v33 }
0x1c01   :  { %v3437_v36 = vrot.slane %v6661_v10, 1 }
0x1c03   :  { %4975 = vmatmul.msk.f32.vlgmr.msrb.gmra.mxu1 %vm827_vm7, %v3437_v36 }
0x1c80   :  { %v3457_v12 = vpop.f32.mrf.mxu1 }
0x1c81   :  { %v3458_v11 = vadd.f32 %v6553_v32, %v3457_v12 }
0x1c83   :  { %v3526_v55 = vrot.slane %v3458_v11, 4  ;;  %v3525_v18 = vrot.slane %v3458_v11, 3  ;;  %v3462_v35 = vrot.slane %v3458_v11, 7  ;;  %v3461_v37 = vrot.slane %v3458_v11, 6 }
0x1c85   :  { %3571 = vrot.lane.b32.xlu0 %v3526_v55, %s5542_s13  ;;  %3569 = vrot.lane.b32.xlu2 %v3525_v18, %s5542_s13  ;;  %v3529_v47 = vadd.f32 %v3525_v18, %v6561_v40  ;;  %v3530_v24 = vadd.f32 %v3526_v55, %v6571_v16  ;;  %v3466_v48 = vadd.f32 %v3462_v35, %v6571_v16 }
0x1c86   :  { %3507 = vrot.lane.b32.xlu1 %v3462_v35, %s5542_s13  ;;  %v3465_v25 = vadd.f32 %v3461_v37, %v6561_v40 }
0x1c87   :  { %v4978_v41 = vmul.f32 -1.442695, %v3529_v47  ;;  %v4979_v0 = vmul.f32 -1.442695, %v3530_v24  ;;  %v4977_v63 = vmul.f32 -1.442695, %v3466_v48 }
0x1c88   :  { %v4976_v14 = vmul.f32 -1.442695, %v3465_v25 }
0x1c89   :  { %5304 = vpow2.f32 %v4978_v41 }
0x1c8e   :  { %3505 = vrot.lane.b32.xlu1 %v3461_v37, %s5542_s13 }
0x1c8f   :  { %v5305_v19 = vpop.eup %5304 }
0x1c90   :  { %v3537_v7 = vadd.f32 1.0, %v5305_v19 }
0x1c92   :  { %5306 = vrcp.f32 %v3537_v7  ;;  %v3550_v46 = vand.u32 2147483648, %v3537_v7  ;;  %vm3544_vm10 = vweird.f32 %v3537_v7  ;;  %v3548_v54 = vand.u32 2147483647, %v3537_v7 }
0x1c93   :  { %5308 = vpow2.f32 %v4979_v0 }
0x1c94   :  { %5310 = vpow2.f32 %v4977_v63  ;;  %v3551_v4 = vor.u32 1.1754944e-38, %v3550_v46  ;;  %vm3549_vm0 = vcmp.eq.f32.partialorder %v3548_v54, 8.507059e+37 }
0x1c95   :  { %5312 = vpow2.f32 %v4976_v14 }
0x1c98   :  { %v5307_v56 = vpop.eup %5306 }
0x1c99   :  { %v3540_v13 = vmul.f32 %v5307_v56, %v3537_v7  ;;  %v5309_v20 = vpop.eup %5308  ;;  %vm3545_vm9 = vweird.f32 %v5307_v56 }
0x1c9a   :  { %v5311_v38 = vpop.eup %5310  ;;  %v3538_v31 = vadd.f32 1.0, %v5309_v20  ;;  %vm3546_vm3 = vmor %vm3544_vm10, %vm3545_vm9 }
0x1c9b   :  { %v3541_v62 = vsub.f32 1.0, %v3540_v13  ;;  %v3474_v5 = vadd.f32 1.0, %v5311_v38  ;;  %v5313_v51 = vpop.eup %5312 }
0x1c9c   :  { %5314 = vrcp.f32 %v3538_v31  ;;  %v3473_v49 = vadd.f32 1.0, %v5313_v51  ;;  %v3565_v24 = vand.u32 2147483648, %v3538_v31  ;;  %vm3559_vm5 = vweird.f32 %v3538_v31 }
0x1c9d   :  { %v3542_v57 = vmul.f32 %v5307_v56, %v3541_v62  ;;  %5316 = vrcp.f32 %v3474_v5  ;;  %v3563_v0 = vand.u32 2147483647, %v3538_v31  ;;  %v3501_v63 = vand.u32 2147483648, %v3474_v5 }
0x1c9e   :  { %5318 = vrcp.f32 %v3473_v49  ;;  %vm3495_vm8 = vweird.f32 %v3474_v5  ;;  %v3499_v13 = vand.u32 2147483647, %v3474_v5  ;;  %v3566_v62 = vor.u32 1.1754944e-38, %v3565_v24 }
0x1c9f   :  { %v3543_v15 = vadd.f32 %v5307_v56, %v3542_v57  ;;  %vm3564_vm10 = vcmp.eq.f32.partialorder %v3563_v0, 8.507059e+37  ;;  %v3502_v57 = vor.u32 1.1754944e-38, %v3501_v63 }
0x1ca1   :  { %v3547_v26 = vsel %vm3546_vm3, %v5307_v56, %v3543_v15  ;;  %vm3500_vm3 = vcmp.eq.f32.partialorder %v3499_v13, 8.507059e+37 }
0x1ca2   :  { %v6674_v58 = vsel %vm3549_vm0, %v3551_v4, %v3547_v26  ;;  %v5315_v36 = vpop.eup %5314 }
0x1ca3   :  { %v5317_v12 = vpop.eup %5316  ;;  %v3555_v11 = vmul.f32 %v5315_v36, %v3538_v31  ;;  %vm3560_vm12 = vweird.f32 %v5315_v36  ;;  %v3486_v31 = vand.u32 2147483648, %v3473_v49 }
0x1ca4   :  { %v3491_v55 = vmul.f32 %v5317_v12, %v3474_v5  ;;  %v5319_v37 = vpop.eup %5318  ;;  %vm3496_vm13 = vweird.f32 %v5317_v12  ;;  %vm3561_vm14 = vmor %vm3559_vm5, %vm3560_vm12  ;;  %vm3480_vm12 = vweird.f32 %v3473_v49  ;;  %v3484_v5 = vand.u32 2147483647, %v3473_v49 }
0x1ca5   :  { %v3556_v18 = vsub.f32 1.0, %v3555_v11  ;;  %v3476_v19 = vmul.f32 %v5319_v37, %v3473_v49  ;;  %vm3497_vm9 = vmor %vm3495_vm8, %vm3496_vm13  ;;  %vm3481_vm0 = vweird.f32 %v5319_v37 }
0x1ca6   :  { %v3492_v35 = vsub.f32 1.0, %v3491_v55  ;;  %vm3482_vm13 = vmor %vm3480_vm12, %vm3481_vm0  ;;  %vm3485_vm5 = vcmp.eq.f32.partialorder %v3484_v5, 8.507059e+37  ;;  %v3624_v55 = vrot.slane %v6661_v10, 4 }
0x1ca7   :  { %v3557_v47 = vmul.f32 %v5315_v36, %v3556_v18  ;;  %v3477_v56 = vsub.f32 1.0, %v3476_v19  ;;  %v3601_v18 = vrot.slane %v6661_v10, 7 }
0x1ca8   :  { %v3493_v41 = vmul.f32 %v5317_v12, %v3492_v35 }
0x1ca9   :  { %v3558_v7 = vadd.f32 %v5315_v36, %v3557_v47  ;;  %v3478_v20 = vmul.f32 %v5319_v37, %v3477_v56 }
0x1caa   :  { %v3494_v48 = vadd.f32 %v5317_v12, %v3493_v41 }
0x1cab   :  { %v3562_v25 = vsel %vm3561_vm14, %v5315_v36, %v3558_v7  ;;  %v3479_v4 = vadd.f32 %v5319_v37, %v3478_v20  ;;  %v3625_v7 = vrot.slane %v6661_v10, 5  ;;  %vm7300_vm14 = vcmask 1043459  }
0x1cac   :  { %v3498_v14 = vsel %vm3497_vm9, %v5317_v12, %v3494_v48  ;;  %v3567_v15 = vsel %vm3564_vm10, %v3566_v62, %v3562_v25  ;;  %vm7301_vm8 = vmmov %vm7300_vm14 }
0x1cad   :  { %v3503_v26 = vsel %vm3500_vm3, %v3502_v57, %v3498_v14 }
0x1cae   :  { %v3590_v5 = vsub.f32 1.0, %v3503_v26 }
0x1cdf   :  { %v3570_v28 = vpop.permute.xlu2 %3569 }
0x1ce0   :  { %v3575_v33 = vmul.f32 %v3570_v28, %v6674_v58  ;;  %v3483_v28 = vsel %vm3482_vm13, %v5319_v37, %v3479_v4 }
0x1ce2   :  { %3579 = vrot.lane.b32.xlu0 %v3575_v33, %s5544_s21  ;;  %v3487_v33 = vor.u32 1.1754944e-38, %v3486_v31 }
0x1ce4   :  { %v3488_v12 = vsel %vm3485_vm5, %v3487_v33, %v3483_v28 }
0x1cf7   :  { %v3572_v38 = vpop.permute.xlu0 %3571 }
0x1cf8   :  { %v3576_v46 = vmul.f32 %v3572_v38, %v3567_v15  ;;  %v3508_v54 = vpop.permute.xlu1 %3507 }
0x1cf9   :  { %v3512_v51 = vmul.f32 %v3508_v54, %v3503_v26  ;;  %v3613_v54 = vsub.f32 1.0, %v3567_v15 }
0x1cfa   :  { %3581 = vrot.lane.b32.xlu1 %v3576_v46, %s5544_s21 }
0x1cfb   :  { %3517 = vrot.lane.b32.xlu2 %v3512_v51, %s5544_s21 }
0x1d00   :  { %v3506_v36 = vpop.permute.xlu1 %3505 }
0x1d01   :  { %v3511_v11 = vmul.f32 %v3506_v36, %v3488_v12 }
0x1d02   :  { %3604 = vrot.lane.b32.xlu1 %v6661_v10, %s5548_s26  ;;  %v3612_v10 = vsub.f32 1.0, %v6674_v58 }
0x1d03   :  { %3515 = vrot.lane.b32.xlu2 %v3511_v11, %s5544_s21 }
0x1d0a   :  { %3626 = vrot.lane.b32.xlu1 %v3624_v55, %s5549_s20 }
0x1d12   :  { %3602 = vrot.lane.b32.xlu1 %v3601_v18, %s5548_s26 }
0x1d54   :  { %v3580_v49 = vpop.permute.xlu0 %3579 }
0x1d55   :  { %v3585_v35 = vadd.f32 %v3580_v49, %v6561_v40  ;;  %v3518_v37 = vpop.permute.xlu2 %3517 }
0x1d56   :  { %v3522_v47 = vadd.f32 %v3518_v37, %v6571_v16 }
0x1d57   :  { %5320 = vtanh.f32 %v3585_v35 }
0x1d58   :  { %5322 = vtanh.f32 %v3522_v47  ;;  %v3589_v47 = vsub.f32 1.0, %v3488_v12 }
0x1d5d   :  { %v5321_v41 = vpop.eup %5320  ;;  %v3516_v56 = vpop.permute.xlu2 %3515 }
0x1d5e   :  { %v5323_v19 = vpop.eup %5322  ;;  %3616 = vrot.lane.b32.xlu2 %v5321_v41, %s5546_s27  ;;  %v3521_v0 = vadd.f32 %v3516_v56, %v6561_v40 }
0x1d5f   :  { %3595 = vrot.lane.b32.xlu0 %v5323_v19, %s5546_s27 }
0x1d66   :  { %3628 = vrot.lane.b32.xlu2 %v3625_v7, %s5549_s20 }
0x1d6c   :  { %v3582_v24 = vpop.permute.xlu1 %3581 }
0x1d6d   :  { %v3586_v48 = vadd.f32 %v3582_v24, %v6571_v16 }
0x1d6f   :  { %5324 = vtanh.f32 %v3586_v48 }
0x1d70   :  { %5326 = vtanh.f32 %v3521_v0 }
0x1d74   :  { %v3605_v25 = vpop.permute.xlu1 %3604 }
0x1d75   :  { %v5325_v63 = vpop.eup %5324  ;;  %v3609_v11 = vmul.f32 %v3605_v25, %v3503_v26 }
0x1d76   :  { %3618 = vrot.lane.b32.xlu0 %v5325_v63, %s5546_s27  ;;  %v5327_v13 = vpop.eup %5326 }
0x1d7c   :  { %v3627_v20 = vpop.permute.xlu1 %3626 }
0x1d7d   :  { %v3632_v46 = vmul.f32 %v3627_v20, %v6674_v58 }
0x1d7e   :  { %3593 = vrot.lane.b32.xlu0 %v5327_v13, %s5546_s27 }
0x1d84   :  { %v3603_v35 = vpop.permute.xlu1 %3602 }
0x1db8   :  { %v3617_v62 = vpop.permute.xlu2 %3616 }
0x1db9   :  { %v3622_v57 = vmul.f32 %v3617_v62, %v3612_v10 }
0x1dbb   :  { %v3634_v4 = vadd.f32 %v3632_v46, %v3622_v57 }
0x1dbd   :  { %v3645_v55 = vrot.slane %v3634_v4, 3 }
0x1dc0   :  { %v3629_v38 = vpop.permute.xlu2 %3628 }
0x1dc1   :  { %v3633_v31 = vmul.f32 %v3629_v38, %v3567_v15  ;;  %v3608_v15 = vmul.f32 %v3603_v35, %v3488_v12 }
0x1dd1   :  { %v3596_v14 = vpop.permute.xlu0 %3595 }
0x1dd2   :  { %v3600_v33 = vmul.f32 %v3596_v14, %v3590_v5 }
0x1dd4   :  { %v3611_v37 = vadd.f32 %v3609_v11, %v3600_v33 }
0x1dd6   :  { %v3638_v24 = vrot.slane %v3611_v37, 7 }
0x1de8   :  { %v3619_v51 = vpop.permute.xlu0 %3618 }
0x1de9   :  { %v3623_v28 = vmul.f32 %v3619_v51, %v3613_v54 }
0x1deb   :  { %v3635_v36 = vadd.f32 %v3633_v31, %v3623_v28 }
0x1ded   :  { %v3646_v18 = vrot.slane %v3635_v36, 2  ;;  %v4752_v49 = vrot.slane %v3635_v36, 7 }
0x1def   :  { %v3647_v41 = vsel %vm7300_vm14, %v3646_v18, %v3645_v55  ;;  %v6701_v19 = vsel %vm1885_vm15, %v4752_v49, %v3634_v4 }
0x1df0   :  { %v3594_v58 = vpop.permute.xlu0 %3593  ;;  %3648 = vrot.lane.b32.xlu0 %v3647_v41, %s5547_s23 }
0x1df1   :  { %v3599_v7 = vmul.f32 %v3594_v58, %v3589_v47 }
0x1df3   :  { %v3610_v48 = vadd.f32 %v3608_v15, %v3599_v7 }
0x1df5   :  { %v3639_v26 = vsel %vm7301_vm8, %v3638_v24, %v3610_v48 }
0x1df6   :  { %3640 = vrot.lane.b32.xlu2 %v3639_v26, %s5546_s27 }
0x1e50   :  { %v6706_v56 = vpop.permute.xlu2 %3640 }
0x1e62   :  { %v3649_v0 = vpop.permute.xlu0 %3648 }
0x1e63   :  { %v6710_v63 = vsel %vm3220_vm6, %v6706_v56, %v3649_v0 }
0x1e64   :  { %v3653_v13 = vrot.slane %v6710_v63, 2 }
0x1e66   :  { %4980 = vmatmul.msk.f32.vlgmr.msrb.gmra.mxu0 %vm827_vm7, %v3653_v13 }
0x1ee3   :  { %v3673_v25 = vpop.f32.mrf.mxu0 }
0x1ee4   :  { %v3674_v12 = vadd.f32 %v6553_v32, %v3673_v25 }
0x1ee6   :  { %v3677_v62 = vrot.slane %v3674_v12, 5  ;;  %v3678_v14 = vrot.slane %v3674_v12, 6  ;;  %v3741_v10 = vrot.slane %v3674_v12, 4 }
0x1ee8   :  { %3783 = vrot.lane.b32.xlu2 %v3741_v10, %s5542_s13  ;;  %3723 = vrot.lane.b32.xlu1 %v3678_v14, %s5542_s13  ;;  %v3743_v20 = vadd.f32 %v3741_v10, %v6561_v40  ;;  %v3681_v54 = vadd.f32 %v3677_v62, %v6561_v40  ;;  %v3682_v32 = vadd.f32 %v3678_v14, %v6571_v16  ;;  %v3835_v14 = vrot.slane %v6710_v63, 6 }
0x1ee9   :  { %3721 = vrot.lane.b32.xlu0 %v3677_v62, %s5542_s13  ;;  %v3744_v28 = vadd.f32 %v3677_v62, %v6571_v16 }
0x1eea   :  { %v4983_v57 = vmul.f32 -1.442695, %v3743_v20  ;;  %v4981_v4 = vmul.f32 -1.442695, %v3681_v54  ;;  %v4982_v31 = vmul.f32 -1.442695, %v3682_v32 }
0x1eeb   :  { %v4984_v36 = vmul.f32 -1.442695, %v3744_v28 }
0x1eec   :  { %5328 = vpow2.f32 %v4983_v57 }
0x1ef2   :  { %v5329_v38 = vpop.eup %5328 }
0x1ef3   :  { %v3751_v46 = vadd.f32 1.0, %v5329_v38 }
0x1ef5   :  { %5330 = vrcp.f32 %v3751_v46  ;;  %v3764_v47 = vand.u32 2147483648, %v3751_v46  ;;  %vm3758_vm10 = vweird.f32 %v3751_v46  ;;  %v3762_v41 = vand.u32 2147483647, %v3751_v46 }
0x1ef6   :  { %5332 = vpow2.f32 %v4981_v4 }
0x1ef7   :  { %5334 = vpow2.f32 %v4982_v31  ;;  %v3765_v7 = vor.u32 1.1754944e-38, %v3764_v47  ;;  %vm3763_vm0 = vcmp.eq.f32.partialorder %v3762_v41, 8.507059e+37 }
0x1ef8   :  { %5336 = vpow2.f32 %v4984_v36 }
0x1efb   :  { %v5331_v51 = vpop.eup %5330 }
0x1efc   :  { %v3754_v5 = vmul.f32 %v5331_v51, %v3751_v46  ;;  %v5333_v11 = vpop.eup %5332  ;;  %vm3759_vm9 = vweird.f32 %v5331_v51 }
0x1efd   :  { %v5335_v18 = vpop.eup %5334  ;;  %v3689_v49 = vadd.f32 1.0, %v5333_v11  ;;  %vm3760_vm3 = vmor %vm3758_vm10, %vm3759_vm9 }
0x1efe   :  { %v3755_v33 = vsub.f32 1.0, %v3754_v5  ;;  %v3690_v35 = vadd.f32 1.0, %v5335_v18  ;;  %v5337_v15 = vpop.eup %5336 }
0x1eff   :  { %5338 = vrcp.f32 %v3689_v49  ;;  %v3752_v26 = vadd.f32 1.0, %v5337_v15  ;;  %vm3696_vm5 = vweird.f32 %v3689_v49  ;;  %v3702_v5 = vand.u32 2147483648, %v3689_v49 }
0x1f00   :  { %v3756_v55 = vmul.f32 %v5331_v51, %v3755_v33  ;;  %5340 = vrcp.f32 %v3690_v35  ;;  %v3717_v31 = vand.u32 2147483648, %v3690_v35  ;;  %vm3711_vm14 = vweird.f32 %v3690_v35 }
0x1f01   :  { %5342 = vrcp.f32 %v3752_v26  ;;  %v3715_v28 = vand.u32 2147483647, %v3690_v35  ;;  %v3700_v33 = vand.u32 2147483647, %v3689_v49  ;;  %vm3773_vm2 = vweird.f32 %v3752_v26 }
0x1f02   :  { %v3757_v37 = vadd.f32 %v5331_v51, %v3756_v55  ;;  %v3718_v18 = vor.u32 1.1754944e-38, %v3717_v31 }
0x1f03   :  { %vm3716_vm10 = vcmp.eq.f32.partialorder %v3715_v28, 8.507059e+37 }
0x1f04   :  { %v3761_v58 = vsel %vm3760_vm3, %v5331_v51, %v3757_v37  ;;  %v3703_v37 = vor.u32 1.1754944e-38, %v3702_v5  ;;  %vm3701_vm3 = vcmp.eq.f32.partialorder %v3700_v33, 8.507059e+37 }
0x1f05   :  { %v6722_v48 = vsel %vm3763_vm0, %v3765_v7, %v3761_v58  ;;  %v5339_v13 = vpop.eup %5338 }
0x1f06   :  { %v5341_v25 = vpop.eup %5340  ;;  %v3692_v62 = vmul.f32 %v5339_v13, %v3689_v49  ;;  %vm3697_vm12 = vweird.f32 %v5339_v13 }
0x1f07   :  { %v3707_v12 = vmul.f32 %v5341_v25, %v3690_v35  ;;  %v5343_v57 = vpop.eup %5342  ;;  %vm3712_vm13 = vweird.f32 %v5341_v25  ;;  %vm3698_vm8 = vmor %vm3696_vm5, %vm3697_vm12  ;;  %v3777_v35 = vand.u32 2147483647, %v3752_v26 }
0x1f08   :  { %v3693_v20 = vsub.f32 1.0, %v3692_v62  ;;  %v3769_v54 = vmul.f32 %v5343_v57, %v3752_v26  ;;  %vm3713_vm9 = vmor %vm3711_vm14, %vm3712_vm13  ;;  %vm3774_vm0 = vweird.f32 %v5343_v57 }
0x1f09   :  { %v3708_v10 = vsub.f32 1.0, %v3707_v12  ;;  %v3779_v12 = vand.u32 2147483648, %v3752_v26  ;;  %vm3775_vm12 = vmor %vm3773_vm2, %vm3774_vm0  ;;  %vm3778_vm13 = vcmp.eq.f32.partialorder %v3777_v35, 8.507059e+37 }
0x1f0a   :  { %v3694_v46 = vmul.f32 %v5339_v13, %v3693_v20  ;;  %v3770_v4 = vsub.f32 1.0, %v3769_v54  ;;  %v3812_v20 = vrot.slane %v6710_v63, 7 }
0x1f0b   :  { %v3709_v38 = vmul.f32 %v5341_v25, %v3708_v10 }
0x1f0c   :  { %v3695_v51 = vadd.f32 %v5339_v13, %v3694_v46  ;;  %v3771_v55 = vmul.f32 %v5343_v57, %v3770_v4 }
0x1f0d   :  { %v3710_v32 = vadd.f32 %v5341_v25, %v3709_v38 }
0x1f0e   :  { %v3699_v11 = vsel %vm3698_vm8, %v5339_v13, %v3695_v51  ;;  %v3780_v13 = vor.u32 1.1754944e-38, %v3779_v12 }
0x1f0f   :  { %v3714_v36 = vsel %vm3713_vm9, %v5341_v25, %v3710_v32  ;;  %v3704_v15 = vsel %vm3701_vm3, %v3703_v37, %v3699_v11 }
0x1f10   :  { %v3719_v41 = vsel %vm3716_vm10, %v3718_v18, %v3714_v36 }
0x1f11   :  { %v3801_v11 = vsub.f32 1.0, %v3719_v41 }
0x1f42   :  { %v3784_v24 = vpop.permute.xlu2 %3783 }
0x1f43   :  { %v3786_v0 = vmul.f32 %v3784_v24, %v6722_v48 }
0x1f45   :  { %3790 = vrot.lane.b32.xlu2 %v3786_v0, %s5544_s21  ;;  %v3772_v0 = vadd.f32 %v5343_v57, %v3771_v55 }
0x1f47   :  { %v3776_v49 = vsel %vm3775_vm12, %v5343_v57, %v3772_v0 }
0x1f48   :  { %v3781_v25 = vsel %vm3778_vm13, %v3780_v13, %v3776_v49 }
0x1f4d   :  { %3836 = vrot.lane.b32.xlu2 %v3835_v14, %s5549_s20 }
0x1f5a   :  { %v3724_v47 = vpop.permute.xlu1 %3723 }
0x1f5b   :  { %v3722_v58 = vpop.permute.xlu0 %3721  ;;  %v3728_v7 = vmul.f32 %v3724_v47, %v3719_v41 }
0x1f5c   :  { %v3727_v24 = vmul.f32 %v3722_v58, %v3704_v15  ;;  %v3787_v62 = vmul.f32 %v3781_v25, %v3722_v58  ;;  %v3800_v58 = vsub.f32 1.0, %v3704_v15 }
0x1f5d   :  { %3733 = vrot.lane.b32.xlu1 %v3728_v7, %s5544_s21 }
0x1f5e   :  { %3731 = vrot.lane.b32.xlu0 %v3727_v24, %s5544_s21  ;;  %v3823_v24 = vsub.f32 1.0, %v6722_v48 }
0x1f65   :  { %3792 = vrot.lane.b32.xlu1 %v3787_v62, %s5544_s21 }
0x1f66   :  { %3815 = vrot.lane.b32.xlu0 %v6710_v63, %s5548_s26 }
0x1f9f   :  { %v3791_v14 = vpop.permute.xlu2 %3790 }
0x1fa0   :  { %v3796_v10 = vadd.f32 %v3791_v14, %v6561_v40 }
0x1fa2   :  { %5344 = vtanh.f32 %v3796_v10 }
0x1fa7   :  { %v3837_v5 = vpop.permute.xlu2 %3836 }
0x1fa8   :  { %v5345_v26 = vpop.eup %5344  ;;  %v3842_v62 = vmul.f32 %v3837_v5, %v6722_v48  ;;  %v6762_v5 = vld [vmem:[%s5713_s22] ss:$0 sm:$0xff] }
0x1fa9   :  { %3827 = vrot.lane.b32.xlu1 %v5345_v26, %s5546_s27 }
0x1fb1   :  { %3813 = vrot.lane.b32.xlu1 %v3812_v20, %s5548_s26 }
0x1fcf   :  { %v3734_v57 = vpop.permute.xlu1 %3733 }
0x1fd0   :  { %v3732_v38 = vpop.permute.xlu0 %3731  ;;  %v3738_v46 = vadd.f32 %v3734_v57, %v6571_v16 }
0x1fd1   :  { %v3737_v54 = vadd.f32 %v3732_v38, %v6561_v40 }
0x1fd2   :  { %5346 = vtanh.f32 %v3738_v46 }
0x1fd3   :  { %5348 = vtanh.f32 %v3737_v54 }
0x1fd7   :  { %v3793_v32 = vpop.permute.xlu1 %3792 }
0x1fd8   :  { %v5347_v51 = vpop.eup %5346  ;;  %v3797_v4 = vadd.f32 %v3793_v32, %v6571_v16  ;;  %v3816_v33 = vpop.permute.xlu0 %3815 }
0x1fd9   :  { %v5349_v31 = vpop.eup %5348  ;;  %3806 = vrot.lane.b32.xlu2 %v5347_v51, %s5546_s27  ;;  %v3820_v18 = vmul.f32 %v3816_v33, %v3719_v41  ;;  %v3824_v41 = vsub.f32 1.0, %v3781_v25 }
0x1fda   :  { %5350 = vtanh.f32 %v3797_v4  ;;  %3804 = vrot.lane.b32.xlu0 %v5349_v31, %s5546_s27 }
0x1fe0   :  { %v5351_v63 = vpop.eup %5350 }
0x1fe1   :  { %3829 = vrot.lane.b32.xlu2 %v5351_v63, %s5546_s27 }
0x1fe2   :  { %3838 = vrot.lane.b32.xlu0 %v3812_v20, %s5549_s20 }
0x201b   :  { %v3828_v28 = vpop.permute.xlu1 %3827 }
0x201c   :  { %v3833_v35 = vmul.f32 %v3828_v28, %v3823_v24 }
0x201e   :  { %v3844_v26 = vadd.f32 %v3842_v62, %v3833_v35 }
0x2020   :  { %v3855_v46 = vrot.slane %v3844_v26, 1 }
0x2023   :  { %v3814_v37 = vpop.permute.xlu1 %3813 }
0x2024   :  { %v3819_v0 = vmul.f32 %v3814_v37, %v3704_v15 }
0x2033   :  { %v3807_v36 = vpop.permute.xlu2 %3806 }
0x2034   :  { %v3811_v55 = vmul.f32 %v3807_v36, %v3801_v11 }
0x2036   :  { %v3822_v47 = vadd.f32 %v3820_v18, %v3811_v55 }
0x2038   :  { %v3848_v49 = vrot.slane %v3822_v47, 7 }
0x203b   :  { %v3830_v10 = vpop.permute.xlu2 %3829 }
0x203c   :  { %v3834_v57 = vmul.f32 %v3830_v10, %v3824_v41 }
0x204c   :  { %v3805_v7 = vpop.permute.xlu0 %3804 }
0x204d   :  { %v3810_v12 = vmul.f32 %v3805_v7, %v3800_v58 }
0x204f   :  { %v3821_v13 = vadd.f32 %v3819_v0, %v3810_v12 }
0x2051   :  { %v3849_v14 = vsel %vm1458_vm1, %v3848_v49, %v3821_v13 }
0x2052   :  { %3850 = vrot.lane.b32.xlu1 %v3849_v14, %s5546_s27 }
0x2054   :  { %v3839_v20 = vpop.permute.xlu0 %3838 }
0x2055   :  { %v3843_v38 = vmul.f32 %v3839_v20, %v3781_v25 }
0x2057   :  { %v3845_v54 = vadd.f32 %v3843_v38, %v3834_v57 }
0x2059   :  { %v4740_v15 = vrot.slane %v3845_v54, 7  ;;  %v3856_v32 = vsel %vm1458_vm1, %v3845_v54, %v3855_v46 }
0x205a   :  { %3857 = vrot.lane.b32.xlu2 %v3856_v32, %s5547_s23 }
0x205b   :  { %v6751_v48 = vsel %vm1668_vm4, %v4740_v15, %v3844_v26 }
0x20b4   :  { %v3858_v51 = vpop.permute.xlu2 %3857 }
0x20c4   :  { %v6753_v4 = vpop.permute.xlu1 %3850 }
0x20c5   :  { %v6757_v31 = vsel %vm3220_vm6, %v6753_v4, %v3858_v51 }
0x20c6   :  { %v3862_v63 = vrot.slane %v6757_v31, 3 }
0x20c8   :  { %4985 = vmatmul.msk.f32.vlgmr.msrb.gmra.mxu2 %vm827_vm7, %v3862_v63 }
0x214b   :  { %v3882_v25 = vpop.f32.mrf.mxu2 }
0x214c   :  { %v3883_v28 = vadd.f32 %v6762_v5, %v3882_v25 }
0x214e   :  { %v3886_v33 = vrot.slane %v3883_v28, 4  ;;  %v3887_v36 = vrot.slane %v3883_v28, 5  ;;  %v3950_v11 = vrot.slane %v3883_v28, 6 }
0x2150   :  { %3992 = vrot.lane.b32.xlu1 %v3950_v11, %s5542_s13  ;;  %3932 = vrot.lane.b32.xlu0 %v3887_v36, %s5542_s13  ;;  %v3891_v55 = vadd.f32 %v3887_v36, %v6571_v16  ;;  %v3953_v18 = vadd.f32 %v3950_v11, %v6571_v16  ;;  %v3952_v37 = vadd.f32 %v3887_v36, %v6561_v40 }
0x2151   :  { %3930 = vrot.lane.b32.xlu2 %v3886_v33, %s5542_s13  ;;  %v3890_v24 = vadd.f32 %v3886_v33, %v6561_v40 }
0x2152   :  { %v4987_v47 = vmul.f32 -1.442695, %v3891_v55  ;;  %v4989_v58 = vmul.f32 -1.442695, %v3953_v18  ;;  %v4988_v7 = vmul.f32 -1.442695, %v3952_v37 }
0x2153   :  { %v4986_v12 = vmul.f32 -1.442695, %v3890_v24 }
0x2154   :  { %5352 = vpow2.f32 %v4987_v47 }
0x2155   :  { %5354 = vpow2.f32 %v4989_v58 }
0x2156   :  { %5356 = vpow2.f32 %v4988_v7 }
0x2157   :  { %5358 = vpow2.f32 %v4986_v12 }
0x215a   :  { %v5353_v0 = vpop.eup %5352 }
0x215b   :  { %v5355_v35 = vpop.eup %5354  ;;  %v3899_v13 = vadd.f32 1.0, %v5353_v0 }
0x215c   :  { %v5357_v49 = vpop.eup %5356  ;;  %v3961_v62 = vadd.f32 1.0, %v5355_v35 }
0x215d   :  { %v3960_v14 = vadd.f32 1.0, %v5357_v49  ;;  %5360 = vrcp.f32 %v3899_v13  ;;  %v5359_v10 = vpop.eup %5358  ;;  %vm3920_vm14 = vweird.f32 %v3899_v13  ;;  %v3926_v24 = vand.u32 2147483648, %v3899_v13 }
0x215e   :  { %5362 = vrcp.f32 %v3961_v62  ;;  %v6772_v41 = vadd.f32 1.0, %v5359_v10  ;;  %v3988_v55 = vand.u32 2147483648, %v3961_v62  ;;  %vm3982_vm9 = vweird.f32 %v3961_v62 }
0x215f   :  { %5364 = vrcp.f32 %v3960_v14  ;;  %v3986_v58 = vand.u32 2147483647, %v3961_v62  ;;  %v3973_v0 = vand.u32 2147483648, %v3960_v14  ;;  %v3924_v12 = vand.u32 2147483647, %v3899_v13 }
0x2160   :  { %5366 = vrcp.f32 %v6772_v41  ;;  %vm3967_vm0 = vweird.f32 %v3960_v14  ;;  %v3971_v35 = vand.u32 2147483647, %v3960_v14 }
0x2161   :  { %vm3987_vm13 = vcmp.eq.f32.partialorder %v3986_v58, 8.507059e+37 }
0x2163   :  { %v5361_v26 = vpop.eup %5360 }
0x2164   :  { %v5363_v20 = vpop.eup %5362  ;;  %v3916_v46 = vmul.f32 %v5361_v26, %v3899_v13  ;;  %vm3921_vm2 = vweird.f32 %v5361_v26 }
0x2165   :  { %v5365_v57 = vpop.eup %5364  ;;  %v3978_v38 = vmul.f32 %v5363_v20, %v3961_v62  ;;  %vm3983_vm5 = vweird.f32 %v5363_v20  ;;  %vm6776_vm10 = vmor %vm3920_vm14, %vm3921_vm2  ;;  %vm3925_vm2 = vcmp.eq.f32.partialorder %v3924_v12, 8.507059e+37 }
0x2166   :  { %v3963_v54 = vmul.f32 %v5365_v57, %v3960_v14  ;;  %v3917_v32 = vsub.f32 1.0, %v3916_v46  ;;  %v5367_v63 = vpop.eup %5366  ;;  %vm3968_vm8 = vweird.f32 %v5365_v57  ;;  %vm3984_vm3 = vmor %vm3982_vm9, %vm3983_vm5  ;;  %v3989_v46 = vor.u32 1.1754944e-38, %v3988_v55 }
0x2167   :  { %v3979_v15 = vsub.f32 1.0, %v3978_v38  ;;  %v3901_v28 = vmul.f32 %v5367_v63, %v6772_v41  ;;  %vm6780_vm12 = vmor %vm3967_vm0, %vm3968_vm8  ;;  %vm3972_vm5 = vcmp.eq.f32.partialorder %v3971_v35, 8.507059e+37  ;;  %vm3906_vm14 = vweird.f32 %v5367_v63 }
0x2168   :  { %v3964_v51 = vsub.f32 1.0, %v3963_v54  ;;  %v3918_v33 = vmul.f32 %v5361_v26, %v3917_v32  ;;  %v3974_v32 = vor.u32 1.1754944e-38, %v3973_v0  ;;  %vm3905_vm8 = vweird.f32 %v6772_v41 }
0x2169   :  { %v3980_v25 = vmul.f32 %v5363_v20, %v3979_v15  ;;  %v3902_v18 = vsub.f32 1.0, %v3901_v28  ;;  %v3927_v15 = vor.u32 1.1754944e-38, %v3926_v24  ;;  %vm3907_vm9 = vmor %vm3905_vm8, %vm3906_vm14 }
0x216a   :  { %v3965_v36 = vmul.f32 %v5365_v57, %v3964_v51  ;;  %v3919_v37 = vadd.f32 %v5361_v26, %v3918_v33 }
0x216b   :  { %v3981_v11 = vadd.f32 %v5363_v20, %v3980_v25  ;;  %v3903_v38 = vmul.f32 %v5367_v63, %v3902_v18 }
0x216c   :  { %v3966_v47 = vadd.f32 %v5365_v57, %v3965_v36  ;;  %v3923_v62 = vsel %vm6776_vm10, %v5361_v26, %v3919_v37 }
0x216d   :  { %v3985_v49 = vsel %vm3984_vm3, %v5363_v20, %v3981_v11  ;;  %v3928_v25 = vsel %vm3925_vm2, %v3927_v15, %v3923_v62  ;;  %v3904_v33 = vadd.f32 %v5367_v63, %v3903_v38  ;;  %v3911_v11 = vand.u32 2147483648, %v6772_v41 }
0x216e   :  { %v3970_v54 = vsel %vm6780_vm12, %v5365_v57, %v3966_v47  ;;  %v6788_v13 = vsel %vm3987_vm13, %v3989_v46, %v3985_v49  ;;  %v3909_v57 = vand.u32 2147483647, %v6772_v41  ;;  %v4021_v41 = vrot.slane %v6757_v31, 7 }
0x216f   :  { %v3975_v28 = vsel %vm3972_vm5, %v3974_v32, %v3970_v54  ;;  %v3908_v55 = vsel %vm3907_vm9, %v5367_v63, %v3904_v33  ;;  %v3912_v37 = vor.u32 1.1754944e-38, %v3911_v11  ;;  %v4044_v62 = vrot.slane %v6757_v31, 1 }
0x2170   :  { %vm3910_vm10 = vcmp.eq.f32.partialorder %v3909_v57, 8.507059e+37  ;;  %v4033_v11 = vsub.f32 1.0, %v6788_v13 }
0x2171   :  { %v3913_v47 = vsel %vm3910_vm10, %v3912_v37, %v3908_v55 }
0x21ab   :  { %v3931_v18 = vpop.permute.xlu2 %3930 }
0x21ac   :  { %v3936_v58 = vmul.f32 %v3931_v18, %v3913_v47  ;;  %v4010_v18 = vsub.f32 1.0, %v3928_v25 }
0x21c2   :  { %v3993_v51 = vpop.permute.xlu1 %3992  ;;  %v3933_v20 = vpop.permute.xlu0 %3932 }
0x21c3   :  { %v3996_v14 = vmul.f32 %v3993_v51, %v6788_v13  ;;  %v3937_v36 = vmul.f32 %v3933_v20, %v3928_v25  ;;  %v3995_v26 = vmul.f32 %v3975_v28, %v3933_v20  ;;  %v4032_v20 = vsub.f32 1.0, %v3975_v28 }
0x21c5   :  { %4001 = vrot.lane.b32.xlu2 %v3996_v14, %s5544_s21  ;;  %3999 = vrot.lane.b32.xlu1 %v3995_v26, %s5544_s21 }
0x21c6   :  { %3942 = vrot.lane.b32.xlu0 %v3937_v36, %s5544_s21 }
0x21cd   :  { %4024 = vrot.lane.b32.xlu2 %v6757_v31, %s5548_s26 }
0x21ce   :  { %3940 = vrot.lane.b32.xlu0 %v3936_v58, %s5544_s21 }
0x21d5   :  { %4045 = vrot.lane.b32.xlu2 %v6757_v31, %s5549_s20 }
0x21dd   :  { %4022 = vrot.lane.b32.xlu2 %v4021_v41, %s5548_s26 }
0x221f   :  { %v4002_v12 = vpop.permute.xlu2 %4001 }
0x2220   :  { %v4006_v35 = vadd.f32 %v4002_v12, %v6571_v16 }
0x2227   :  { %v4025_v32 = vpop.permute.xlu2 %4024 }
0x222f   :  { %v4046_v33 = vpop.permute.xlu2 %4045 }
0x2230   :  { %v4051_v26 = vmul.f32 %v4046_v33, %v3975_v28 }
0x2237   :  { %v4000_v7 = vpop.permute.xlu1 %3999 }
0x2238   :  { %v3943_v24 = vpop.permute.xlu0 %3942  ;;  %v4005_v63 = vadd.f32 %v4000_v7, %v6561_v40 }
0x2239   :  { %v3947_v0 = vadd.f32 %v3943_v24, %v6571_v16  ;;  %v4029_v24 = vmul.f32 %v4025_v32, %v3928_v25 }
0x223a   :  { %5368 = vtanh.f32 %v4005_v63 }
0x223b   :  { %5370 = vtanh.f32 %v3947_v0 }
0x223c   :  { %5372 = vtanh.f32 %v4006_v35  ;;  %v4023_v35 = vpop.permute.xlu2 %4022 }
0x2240   :  { %v5369_v49 = vpop.eup %5368  ;;  %v3941_v38 = vpop.permute.xlu0 %3940 }
0x2241   :  { %v5371_v10 = vpop.eup %5370  ;;  %4036 = vrot.lane.b32.xlu0 %v5369_v49, %s5546_s27  ;;  %v3946_v46 = vadd.f32 %v3941_v38, %v6561_v40 }
0x2242   :  { %4015 = vrot.lane.b32.xlu1 %v5371_v10, %s5546_s27  ;;  %v5373_v54 = vpop.eup %5372  ;;  %v4009_v10 = vsub.f32 1.0, %v3913_v47 }
0x2243   :  { %5374 = vtanh.f32 %v3946_v46 }
0x2249   :  { %4047 = vrot.lane.b32.xlu0 %v4044_v62, %s5549_s20  ;;  %v5375_v15 = vpop.eup %5374 }
0x224a   :  { %4038 = vrot.lane.b32.xlu1 %v5373_v54, %s5546_s27 }
0x2252   :  { %4013 = vrot.lane.b32.xlu1 %v5375_v15, %s5546_s27 }
0x22b3   :  { %v4037_v51 = vpop.permute.xlu0 %4036 }
0x22b4   :  { %v4016_v14 = vpop.permute.xlu1 %4015  ;;  %v4042_v36 = vmul.f32 %v4037_v51, %v4032_v20 }
0x22b5   :  { %v4020_v41 = vmul.f32 %v4016_v14, %v4010_v18 }
0x22b6   :  { %v4053_v37 = vadd.f32 %v4051_v26, %v4042_v36 }
0x22b7   :  { %v4031_v49 = vadd.f32 %v4029_v24, %v4020_v41 }
0x22b8   :  { %v4064_v63 = vrot.slane %v4053_v37, 7 }
0x22b9   :  { %v4057_v54 = vrot.slane %v4031_v49, 7 }
0x22bb   :  { %v4048_v57 = vpop.permute.xlu0 %4047 }
0x22bc   :  { %v4039_v31 = vpop.permute.xlu1 %4038  ;;  %v4052_v55 = vmul.f32 %v4048_v57, %v6788_v13  ;;  %v4028_v13 = vmul.f32 %v4023_v35, %v3913_v47 }
0x22bd   :  { %v4043_v58 = vmul.f32 %v4039_v31, %v4033_v11 }
0x22bf   :  { %v4054_v7 = vadd.f32 %v4052_v55, %v4043_v58 }
0x22c1   :  { %v4065_v0 = vrot.slane %v4054_v7, 6  ;;  %v4728_v12 = vrot.slane %v4054_v7, 7 }
0x22c3   :  { %v4066_v28 = vsel %vm1668_vm4, %v4065_v0, %v4064_v63  ;;  %v6818_v38 = vsel %vm1458_vm1, %v4728_v12, %v4053_v37 }
0x22c4   :  { %v4014_v46 = vpop.permute.xlu1 %4013  ;;  %4067 = vrot.lane.b32.xlu1 %v4066_v28, %s5547_s23 }
0x22c5   :  { %v4019_v62 = vmul.f32 %v4014_v46, %v4009_v10 }
0x22c7   :  { %v4030_v15 = vadd.f32 %v4028_v13, %v4019_v62 }
0x22c9   :  { %v4058_v25 = vsel %vm1668_vm4, %v4057_v54, %v4030_v15 }
0x22ca   :  { %4059 = vrot.lane.b32.xlu0 %v4058_v25, %s5546_s27 }
0x2336   :  { %v4068_v32 = vpop.permute.xlu1 %4067 }
0x233c   :  { %v6823_v51 = vpop.permute.xlu0 %4059 }
0x233d   :  { %v6827_v14 = vsel %vm3220_vm6, %v6823_v51, %v4068_v32 }
0x233e   :  { %v4072_v20 = vrot.slane %v6827_v14, 4 }
0x2340   :  { %4990 = vmatmul.msk.f32.vlgmr.msra.gmra.mxu3 %vm827_vm7, %v4072_v20 }
0x23c3   :  { %v4092_v33 = vpop.f32.mrf.mxu3 }
0x23c4   :  { %v4093_v47 = vadd.f32 %v6762_v5, %v4092_v33 }
0x23c6   :  { %v4161_v36 = vrot.slane %v4093_v47, 7  ;;  %v4160_v26 = vrot.slane %v4093_v47, 6  ;;  %v4097_v11 = vrot.slane %v4093_v47, 4  ;;  %v4096_v57 = vrot.slane %v4093_v47, 3 }
0x23c8   :  { %4206 = vrot.lane.b32.xlu1 %v4161_v36, %s5542_s13  ;;  %4204 = vrot.lane.b32.xlu0 %v4160_v26, %s5542_s13  ;;  %v4101_v31 = vadd.f32 %v4097_v11, %v6571_v16  ;;  %v4100_v18 = vadd.f32 %v4096_v57, %v6561_v40  ;;  %v4165_v24 = vadd.f32 %v4161_v36, %v6571_v16 }
0x23c9   :  { %4142 = vrot.lane.b32.xlu2 %v4097_v11, %s5542_s13  ;;  %v4164_v63 = vadd.f32 %v4160_v26, %v6561_v40 }
0x23ca   :  { %v4992_v55 = vmul.f32 -1.442695, %v4101_v31  ;;  %v4991_v37 = vmul.f32 -1.442695, %v4100_v18  ;;  %v4994_v12 = vmul.f32 -1.442695, %v4165_v24 }
0x23cb   :  { %v4993_v49 = vmul.f32 -1.442695, %v4164_v63 }
0x23cc   :  { %5376 = vpow2.f32 %v4992_v55 }
0x23cd   :  { %5378 = vpow2.f32 %v4991_v37 }
0x23d1   :  { %4140 = vrot.lane.b32.xlu2 %v4096_v57, %s5542_s13 }
0x23d2   :  { %v5377_v58 = vpop.eup %5376 }
0x23d3   :  { %v4109_v41 = vadd.f32 1.0, %v5377_v58  ;;  %v5379_v7 = vpop.eup %5378 }
0x23d4   :  { %v4108_v0 = vadd.f32 1.0, %v5379_v7 }
0x23d5   :  { %5380 = vrcp.f32 %v4109_v41  ;;  %v4136_v47 = vand.u32 2147483648, %v4109_v41  ;;  %vm4130_vm4 = vweird.f32 %v4109_v41  ;;  %v4134_v36 = vand.u32 2147483647, %v4109_v41 }
0x23d6   :  { %5382 = vrcp.f32 %v4108_v0  ;;  %v4121_v24 = vand.u32 2147483648, %v4108_v0  ;;  %vm4115_vm13 = vweird.f32 %v4108_v0  ;;  %v4119_v63 = vand.u32 2147483647, %v4108_v0 }
0x23d7   :  { %5384 = vpow2.f32 %v4994_v12  ;;  %v4137_v57 = vor.u32 1.1754944e-38, %v4136_v47  ;;  %vm4135_vm0 = vcmp.eq.f32.partialorder %v4134_v36, 8.507059e+37 }
0x23d8   :  { %5386 = vpow2.f32 %v4993_v49  ;;  %v4122_v49 = vor.u32 1.1754944e-38, %v4121_v24  ;;  %vm4120_vm5 = vcmp.eq.f32.partialorder %v4119_v63, 8.507059e+37 }
0x23db   :  { %v5381_v35 = vpop.eup %5380 }
0x23dc   :  { %v4126_v10 = vmul.f32 %v5381_v35, %v4109_v41  ;;  %v5383_v46 = vpop.eup %5382  ;;  %vm4131_vm1 = vweird.f32 %v5381_v35 }
0x23dd   :  { %v5385_v13 = vpop.eup %5384  ;;  %v4111_v15 = vmul.f32 %v5383_v46, %v4108_v0  ;;  %vm4132_vm3 = vmor %vm4130_vm4, %vm4131_vm1  ;;  %vm4116_vm12 = vweird.f32 %v5383_v46 }
0x23de   :  { %v4127_v28 = vsub.f32 1.0, %v4126_v10  ;;  %v5387_v62 = vpop.eup %5386  ;;  %v4173_v25 = vadd.f32 1.0, %v5385_v13  ;;  %vm4117_vm2 = vmor %vm4115_vm13, %vm4116_vm12  ;;  %vm7306_vm12 = vcmask 1043459  }
0x23df   :  { %v4172_v32 = vadd.f32 1.0, %v5387_v62  ;;  %v4112_v33 = vsub.f32 1.0, %v4111_v15 }
0x23e0   :  { %v4128_v54 = vmul.f32 %v5381_v35, %v4127_v28  ;;  %5388 = vrcp.f32 %v4173_v25  ;;  %vm4194_vm9 = vweird.f32 %v4173_v25  ;;  %v4200_v47 = vand.u32 2147483648, %v4173_v25 }
0x23e1   :  { %5390 = vrcp.f32 %v4172_v32  ;;  %v4113_v11 = vmul.f32 %v5383_v46, %v4112_v33  ;;  %v4198_v36 = vand.u32 2147483647, %v4173_v25  ;;  %vm4179_vm1 = vweird.f32 %v4172_v32 }
0x23e2   :  { %v4129_v20 = vadd.f32 %v5381_v35, %v4128_v54 }
0x23e3   :  { %v4114_v7 = vadd.f32 %v5383_v46, %v4113_v11 }
0x23e4   :  { %v4133_v26 = vsel %vm4132_vm3, %v5381_v35, %v4129_v20  ;;  %vm4199_vm3 = vcmp.eq.f32.partialorder %v4198_v36, 8.507059e+37 }
0x23e5   :  { %v6840_v18 = vsel %vm4135_vm0, %v4137_v57, %v4133_v26  ;;  %v4118_v35 = vsel %vm4117_vm2, %v5383_v46, %v4114_v7  ;;  %v4185_v46 = vand.u32 2147483648, %v4172_v32  ;;  %v4183_v26 = vand.u32 2147483647, %v4172_v32 }
0x23e6   :  { %v5389_v31 = vpop.eup %5388  ;;  %v6844_v28 = vsel %vm4120_vm5, %v4122_v49, %v4118_v35 }
0x23e7   :  { %v5391_v37 = vpop.eup %5390  ;;  %v4190_v41 = vmul.f32 %v5389_v31, %v4173_v25  ;;  %vm4195_vm14 = vweird.f32 %v5389_v31  ;;  %vm4184_vm0 = vcmp.eq.f32.partialorder %v4183_v26, 8.507059e+37  ;;  %v4259_v25 = vrot.slane %v6827_v14, 2 }
0x23e8   :  { %v4175_v12 = vmul.f32 %v5391_v37, %v4172_v32  ;;  %vm4180_vm8 = vweird.f32 %v5391_v37  ;;  %vm4196_vm10 = vmor %vm4194_vm9, %vm4195_vm14  ;;  %v4236_v32 = vrot.slane %v6827_v14, 7 }
0x23e9   :  { %v4191_v13 = vsub.f32 1.0, %v4190_v41  ;;  %vm4181_vm4 = vmor %vm4179_vm1, %vm4180_vm8 }
0x23ea   :  { %v4176_v62 = vsub.f32 1.0, %v4175_v12 }
0x23eb   :  { %v4192_v15 = vmul.f32 %v5389_v31, %v4191_v13 }
0x23ec   :  { %v4177_v20 = vmul.f32 %v5391_v37, %v4176_v62 }
0x23ed   :  { %v4193_v33 = vadd.f32 %v5389_v31, %v4192_v15 }
0x23ee   :  { %v4178_v0 = vadd.f32 %v5391_v37, %v4177_v20 }
0x23ef   :  { %v4197_v11 = vsel %vm4196_vm10, %v5389_v31, %v4193_v33 }
0x23f0   :  { %v4182_v57 = vsel %vm4181_vm4, %v5391_v37, %v4178_v0 }
0x2423   :  { %v4143_v55 = vpop.permute.xlu2 %4142 }
0x2424   :  { %v4147_v58 = vmul.f32 %v4143_v55, %v6840_v18  ;;  %v4201_v55 = vor.u32 1.1754944e-38, %v4200_v47 }
0x2426   :  { %4152 = vrot.lane.b32.xlu0 %v4147_v58, %s5544_s21  ;;  %v4186_v58 = vor.u32 1.1754944e-38, %v4185_v46  ;;  %v4202_v24 = vsel %vm4199_vm3, %v4201_v55, %v4197_v11  ;;  %v4260_v46 = vrot.slane %v6827_v14, 3  ;;  %v4225_v55 = vsub.f32 1.0, %v6840_v18 }
0x2428   :  { %v4187_v41 = vsel %vm4184_vm0, %v4186_v58, %v4182_v57 }
0x242b   :  { %v4141_v10 = vpop.permute.xlu2 %4140 }
0x242c   :  { %v4146_v54 = vmul.f32 %v4141_v10, %v6844_v28 }
0x242e   :  { %4150 = vrot.lane.b32.xlu0 %v4146_v54, %s5544_s21 }
0x243a   :  { %v4207_v7 = vpop.permute.xlu1 %4206  ;;  %v4205_v63 = vpop.permute.xlu0 %4204 }
0x243b   :  { %v4211_v12 = vmul.f32 %v4207_v7, %v4202_v24  ;;  %v4210_v35 = vmul.f32 %v4205_v63, %v4187_v41 }
0x243d   :  { %4214 = vrot.lane.b32.xlu1 %v4210_v35, %s5544_s21  ;;  %4216 = vrot.lane.b32.xlu2 %v4211_v12, %s5544_s21  ;;  %v4224_v35 = vsub.f32 1.0, %v6844_v28 }
0x2445   :  { %4239 = vrot.lane.b32.xlu2 %v6827_v14, %s5548_s26 }
0x244d   :  { %4261 = vrot.lane.b32.xlu2 %v4259_v25, %s5549_s20 }
0x2455   :  { %4237 = vrot.lane.b32.xlu2 %v4236_v32, %s5548_s26 }
0x2497   :  { %v4217_v49 = vpop.permute.xlu2 %4216 }
0x2498   :  { %v4153_v31 = vpop.permute.xlu0 %4152  ;;  %v4221_v10 = vadd.f32 %v4217_v49, %v6571_v16 }
0x2499   :  { %v4157_v37 = vadd.f32 %v4153_v31, %v6571_v16 }
0x249b   :  { %5392 = vtanh.f32 %v4157_v37 }
0x249c   :  { %5394 = vtanh.f32 %v4221_v10 }
0x249f   :  { %v4240_v36 = vpop.permute.xlu2 %4239 }
0x24a0   :  { %v4151_v62 = vpop.permute.xlu0 %4150  ;;  %v4244_v7 = vmul.f32 %v4240_v36, %v6840_v18 }
0x24a1   :  { %v5393_v13 = vpop.eup %5392  ;;  %v4156_v54 = vadd.f32 %v4151_v62, %v6561_v40 }
0x24a2   :  { %4230 = vrot.lane.b32.xlu1 %v5393_v13, %s5546_s27  ;;  %v5395_v15 = vpop.eup %5394  ;;  %v4247_v13 = vsub.f32 1.0, %v4187_v41 }
0x24a3   :  { %5396 = vtanh.f32 %v4156_v54 }
0x24a7   :  { %v4262_v11 = vpop.permute.xlu2 %4261 }
0x24a8   :  { %v4267_v54 = vmul.f32 %v4262_v11, %v4187_v41 }
0x24a9   :  { %v5397_v0 = vpop.eup %5396 }
0x24aa   :  { %4253 = vrot.lane.b32.xlu1 %v5395_v15, %s5546_s27  ;;  %v4248_v15 = vsub.f32 1.0, %v4202_v24 }
0x24af   :  { %v4215_v20 = vpop.permute.xlu1 %4214  ;;  %v4238_v63 = vpop.permute.xlu2 %4237 }
0x24b0   :  { %v4220_v33 = vadd.f32 %v4215_v20, %v6561_v40  ;;  %v4243_v32 = vmul.f32 %v4238_v63, %v6844_v28 }
0x24b2   :  { %5398 = vtanh.f32 %v4220_v33  ;;  %4228 = vrot.lane.b32.xlu1 %v5397_v0, %s5546_s27 }
0x24b8   :  { %v5399_v47 = vpop.eup %5398 }
0x24b9   :  { %4251 = vrot.lane.b32.xlu0 %v5399_v47, %s5546_s27 }
0x24c1   :  { %4263 = vrot.lane.b32.xlu0 %v4260_v46, %s5549_s20 }
0x2514   :  { %v4231_v26 = vpop.permute.xlu1 %4230 }
0x2515   :  { %v4235_v58 = vmul.f32 %v4231_v26, %v4225_v55 }
0x2517   :  { %v4246_v12 = vadd.f32 %v4244_v7, %v4235_v58 }
0x2519   :  { %v4273_v14 = vrot.slane %v4246_v12, 7 }
0x251c   :  { %v4254_v57 = vpop.permute.xlu1 %4253 }
0x251d   :  { %v4258_v20 = vmul.f32 %v4254_v57, %v4248_v15 }
0x2524   :  { %v4229_v25 = vpop.permute.xlu1 %4228 }
0x2525   :  { %v4234_v31 = vmul.f32 %v4229_v25, %v4224_v35 }
0x2527   :  { %v4245_v37 = vadd.f32 %v4243_v32, %v4234_v31 }
0x2529   :  { %v4274_v49 = vsel %vm1885_vm15, %v4273_v14, %v4245_v37 }
0x252a   :  { %4275 = vrot.lane.b32.xlu0 %v4274_v49, %s5546_s27 }
0x252b   :  { %v4252_v10 = vpop.permute.xlu0 %4251 }
0x252c   :  { %v4257_v62 = vmul.f32 %v4252_v10, %v4247_v13 }
0x252e   :  { %v4269_v33 = vadd.f32 %v4267_v54, %v4257_v62 }
0x2530   :  { %v4280_v46 = vrot.slane %v4269_v33, 5 }
0x2533   :  { %v4264_v18 = vpop.permute.xlu0 %4263 }
0x2534   :  { %v4268_v0 = vmul.f32 %v4264_v18, %v4202_v24 }
0x2536   :  { %v4270_v47 = vadd.f32 %v4268_v0, %v4258_v20 }
0x2538   :  { %v4281_v36 = vrot.slane %v4270_v47, 4  ;;  %v4716_v28 = vrot.slane %v4270_v47, 7 }
0x253a   :  { %v4282_v26 = vsel %vm1885_vm15, %v4281_v36, %v4280_v46  ;;  %v6874_v55 = vsel %vm7306_vm12, %v4716_v28, %v4269_v33 }
0x253b   :  { %4283 = vrot.lane.b32.xlu1 %v4282_v26, %s5547_s23 }
0x259c   :  { %v6877_v58 = vpop.permute.xlu0 %4275 }
0x25ad   :  { %v4284_v7 = vpop.permute.xlu1 %4283 }
0x25ae   :  { %v6881_v41 = vsel %vm3220_vm6, %v6877_v58, %v4284_v7 }
0x25af   :  { %v4288_v24 = vrot.slane %v6881_v41, 5 }
0x25b1   :  { %4995 = vmatmul.msk.f32.vlgmr.msra.gmra.mxu1 %vm827_vm7, %v4288_v24 }
0x262e   :  { %v4308_v11 = vpop.f32.mrf.mxu1 }
0x262f   :  { %v4309_v57 = vadd.f32 %v6762_v5, %v4308_v11 }
0x2631   :  { %4421 = vrot.lane.b32.xlu1 %v4309_v57, %s5542_s13  ;;  %v4376_v63 = vrot.slane %v4309_v57, 7  ;;  %v4313_v12 = vrot.slane %v4309_v57, 3  ;;  %v4312_v35 = vrot.slane %v4309_v57, 2  ;;  %v4380_v10 = vadd.f32 %v4309_v57, %v6571_v16 }
0x2633   :  { %4419 = vrot.lane.b32.xlu0 %v4376_v63, %s5542_s13  ;;  %4358 = vrot.lane.b32.xlu2 %v4313_v12, %s5542_s13  ;;  %v4317_v25 = vadd.f32 %v4313_v12, %v6571_v16  ;;  %v4316_v31 = vadd.f32 %v4312_v35, %v6561_v40  ;;  %v4379_v13 = vadd.f32 %v4376_v63, %v6561_v40  ;;  %v4999_v54 = vmul.f32 -1.442695, %v4380_v10 }
0x2635   :  { %v4997_v32 = vmul.f32 -1.442695, %v4317_v25  ;;  %v4996_v14 = vmul.f32 -1.442695, %v4316_v31  ;;  %v4998_v18 = vmul.f32 -1.442695, %v4379_v13 }
0x2637   :  { %5400 = vpow2.f32 %v4997_v32 }
0x2638   :  { %5402 = vpow2.f32 %v4996_v14 }
0x263b   :  { %4356 = vrot.lane.b32.xlu2 %v4312_v35, %s5542_s13 }
0x263d   :  { %v5401_v37 = vpop.eup %5400 }
0x263e   :  { %v4325_v5 = vadd.f32 1.0, %v5401_v37  ;;  %v5403_v49 = vpop.eup %5402 }
0x263f   :  { %v4324_v62 = vadd.f32 1.0, %v5403_v49 }
0x2640   :  { %5404 = vrcp.f32 %v4325_v5  ;;  %v4352_v63 = vand.u32 2147483648, %v4325_v5  ;;  %vm4346_vm13 = vweird.f32 %v4325_v5  ;;  %v4350_v12 = vand.u32 2147483647, %v4325_v5 }
0x2641   :  { %5406 = vrcp.f32 %v4324_v62  ;;  %vm4331_vm8 = vweird.f32 %v4324_v62 }
0x2642   :  { %5408 = vpow2.f32 %v4999_v54  ;;  %v4353_v32 = vor.u32 1.1754944e-38, %v4352_v63  ;;  %vm4351_vm5 = vcmp.eq.f32.partialorder %v4350_v12, 8.507059e+37  ;;  %v4337_v54 = vand.u32 2147483648, %v4324_v62 }
0x2643   :  { %5410 = vpow2.f32 %v4998_v18 }
0x2646   :  { %v5405_v15 = vpop.eup %5404 }
0x2647   :  { %v4342_v20 = vmul.f32 %v5405_v15, %v4325_v5  ;;  %v5407_v0 = vpop.eup %5406  ;;  %vm4347_vm15 = vweird.f32 %v5405_v15  ;;  %v4335_v5 = vand.u32 2147483647, %v4324_v62 }
0x2648   :  { %v5409_v47 = vpop.eup %5408  ;;  %v4327_v28 = vmul.f32 %v5407_v0, %v4324_v62  ;;  %vm4348_vm2 = vmor %vm4346_vm13, %vm4347_vm15  ;;  %vm4332_vm14 = vweird.f32 %v5407_v0 }
0x2649   :  { %v4343_v33 = vsub.f32 1.0, %v4342_v20  ;;  %v5411_v46 = vpop.eup %5410  ;;  %v4388_v26 = vadd.f32 1.0, %v5409_v47  ;;  %vm4333_vm9 = vmor %vm4331_vm8, %vm4332_vm14  ;;  %vm4336_vm10 = vcmp.eq.f32.partialorder %v4335_v5, 8.507059e+37 }
0x264a   :  { %v4387_v7 = vadd.f32 1.0, %v5411_v46  ;;  %v4328_v57 = vsub.f32 1.0, %v4327_v28 }
0x264b   :  { %v4344_v36 = vmul.f32 %v5405_v15, %v4343_v33  ;;  %5412 = vrcp.f32 %v4388_v26  ;;  %v4338_v33 = vor.u32 1.1754944e-38, %v4337_v54  ;;  %v4415_v62 = vand.u32 2147483648, %v4388_v26 }
0x264c   :  { %5414 = vrcp.f32 %v4387_v7  ;;  %v4329_v25 = vmul.f32 %v5407_v0, %v4328_v57  ;;  %vm4409_vm4 = vweird.f32 %v4388_v26  ;;  %vm4394_vm12 = vweird.f32 %v4387_v7 }
0x264d   :  { %v4345_v11 = vadd.f32 %v5405_v15, %v4344_v36 }
0x264e   :  { %v4330_v10 = vadd.f32 %v5407_v0, %v4329_v25  ;;  %v4400_v25 = vand.u32 2147483648, %v4387_v7 }
0x264f   :  { %v4349_v35 = vsel %vm4348_vm2, %v5405_v15, %v4345_v11 }
0x2650   :  { %v6896_v37 = vsel %vm4351_vm5, %v4353_v32, %v4349_v35  ;;  %v4334_v15 = vsel %vm4333_vm9, %v5407_v0, %v4330_v10  ;;  %v4413_v35 = vand.u32 2147483647, %v4388_v26 }
0x2651   :  { %v5413_v31 = vpop.eup %5412  ;;  %v6900_v36 = vsel %vm4336_vm10, %v4338_v33, %v4334_v15 }
0x2652   :  { %v5415_v13 = vpop.eup %5414  ;;  %v4405_v18 = vmul.f32 %v5413_v31, %v4388_v26  ;;  %vm4410_vm1 = vweird.f32 %v5413_v31  ;;  %vm4414_vm13 = vcmp.eq.f32.partialorder %v4413_v35, 8.507059e+37 }
0x2653   :  { %v4390_v20 = vmul.f32 %v5415_v13, %v4387_v7  ;;  %vm4395_vm3 = vweird.f32 %v5415_v13  ;;  %vm4411_vm0 = vmor %vm4409_vm4, %vm4410_vm1 }
0x2654   :  { %v4406_v47 = vsub.f32 1.0, %v4405_v18  ;;  %vm4396_vm15 = vmor %vm4394_vm12, %vm4395_vm3  ;;  %v4401_v18 = vor.u32 1.1754944e-38, %v4400_v25 }
0x2655   :  { %v4391_v11 = vsub.f32 1.0, %v4390_v20 }
0x2656   :  { %v4407_v57 = vmul.f32 %v5413_v31, %v4406_v47 }
0x2657   :  { %v4392_v63 = vmul.f32 %v5415_v13, %v4391_v11 }
0x2658   :  { %v4408_v12 = vadd.f32 %v5413_v31, %v4407_v57 }
0x2659   :  { %v4393_v0 = vadd.f32 %v5415_v13, %v4392_v63 }
0x265a   :  { %v4412_v32 = vsel %vm4411_vm0, %v5413_v31, %v4408_v12  ;;  %v4451_v31 = vrot.slane %v6881_v41, 7  ;;  %vm7307_vm0 = vcmask 1047559  }
0x265b   :  { %v4397_v10 = vsel %vm4396_vm15, %v5415_v13, %v4393_v0  ;;  %v5477_v13 = vld [vmem:[%s5625_s6] ss:$0 sm:$0xff]  ;;  %vm7308_vm12 = vmmov %vm7307_vm0  ;;  %vm7309_vm15 = vcmask 1042434   ;;  %s7316_s6 = sld [smem:[#allocation7_spill]] }
0x265c   :  { %v6920_v47 = vadd.f32 %v5477_v13, %v6494_v60 }
0x268d   :  { %v4359_v14 = vpop.permute.xlu2 %4358 }
0x268e   :  { %v4363_v49 = vmul.f32 %v4359_v14, %v6896_v37  ;;  %v4398_v14 = vand.u32 2147483647, %v4387_v7  ;;  %v4474_v7 = vrot.slane %v6881_v41, 4 }
0x2690   :  { %4368 = vrot.lane.b32.xlu0 %v4363_v49, %s5544_s21  ;;  %v4416_v49 = vor.u32 1.1754944e-38, %v4415_v62  ;;  %vm4399_vm2 = vcmp.eq.f32.partialorder %v4398_v14, 8.507059e+37 }
0x2691   :  { %v6907_v20 = vsel %vm4399_vm2, %v4401_v18, %v4397_v10 }
0x2692   :  { %v6904_v5 = vsel %vm4414_vm13, %v4416_v49, %v4412_v32 }
0x2695   :  { %v4357_v46 = vpop.permute.xlu2 %4356 }
0x2696   :  { %v4362_v28 = vmul.f32 %v4357_v46, %v6900_v36  ;;  %v2139_v46 = vrot.slane %v6920_v47, 1 }
0x2698   :  { %4366 = vrot.lane.b32.xlu0 %v4362_v28, %s5544_s21  ;;  %v2143_v28 = vadd.f32 %v2139_v46, %v5943_v59  ;;  %v2205_v57 = vadd.f32 %v2139_v46, %v5947_v3 }
0x269a   :  { %v4943_v11 = vmul.f32 -1.442695, %v2143_v28  ;;  %v4946_v63 = vmul.f32 -1.442695, %v2205_v57 }
0x269c   :  { %5416 = vpow2.f32 %v4943_v11 }
0x269d   :  { %5418 = vpow2.f32 %v4946_v63 }
0x26a2   :  { %v5417_v12 = vpop.eup %5416 }
0x26a3   :  { %v4422_v54 = vpop.permute.xlu1 %4421  ;;  %v2151_v62 = vadd.f32 1.0, %v5417_v12  ;;  %v5419_v60 = vpop.eup %5418 }
0x26a4   :  { %v4426_v15 = vmul.f32 %v4422_v54, %v6904_v5  ;;  %v2213_v14 = vadd.f32 1.0, %v5419_v60 }
0x26a5   :  { %v4420_v26 = vpop.permute.xlu0 %4419  ;;  %vm2158_vm14 = vweird.f32 %v2151_v62  ;;  %v2162_v60 = vand.u32 2147483647, %v2151_v62 }
0x26a6   :  { %v4425_v33 = vmul.f32 %v4420_v26, %v6907_v20  ;;  %4431 = vrot.lane.b32.xlu2 %v4426_v15, %s5544_s21  ;;  %vm2234_vm1 = vweird.f32 %v2213_v14 }
0x26a7   :  { %vm2163_vm9 = vcmp.eq.f32.partialorder %v2162_v60, 8.507059e+37 }
0x26a8   :  { %4429 = vrot.lane.b32.xlu1 %v4425_v33, %s5544_s21 }
0x26ae   :  { %4454 = vrot.lane.b32.xlu2 %v6881_v41, %s5548_s26 }
0x26b6   :  { %4475 = vrot.lane.b32.xlu2 %v4474_v7, %s5549_s20 }
0x26be   :  { %4452 = vrot.lane.b32.xlu2 %v4451_v31, %s5548_s26 }
0x26c6   :  { %2183 = vrot.lane.b32.xlu2 %v2139_v46, %s5538_s0 }
0x2700   :  { %v4432_v35 = vpop.permute.xlu2 %4431 }
0x2701   :  { %v4436_v0 = vadd.f32 %v4432_v35, %v6571_v16 }
0x2702   :  { %v4369_v25 = vpop.permute.xlu0 %4368 }
0x2703   :  { %5420 = vtanh.f32 %v4436_v0  ;;  %v4373_v32 = vadd.f32 %v4369_v25, %v6571_v16  ;;  %v2164_v0 = vand.u32 2147483648, %v2151_v62 }
0x2704   :  { %5422 = vrcp.f32 %v2151_v62 }
0x2705   :  { %5424 = vtanh.f32 %v4373_v32 }
0x2706   :  { %5426 = vrcp.f32 %v2213_v14 }
0x2708   :  { %v4455_v49 = vpop.permute.xlu2 %4454 }
0x2709   :  { %v5421_v10 = vpop.eup %5420  ;;  %v4459_v60 = vmul.f32 %v4455_v49, %v6896_v37 }
0x270a   :  { %v5423_v54 = vpop.eup %5422  ;;  %4468 = vrot.lane.b32.xlu1 %v5421_v10, %s5546_s27  ;;  %v4367_v18 = vpop.permute.xlu0 %4366 }
0x270b   :  { %v2154_v15 = vmul.f32 %v5423_v54, %v2151_v62  ;;  %v4372_v26 = vadd.f32 %v4367_v18, %v6561_v40  ;;  %v5425_v7 = vpop.eup %5424  ;;  %vm2159_vm5 = vweird.f32 %v5423_v54  ;;  %v2165_v18 = vor.u32 1.1754944e-38, %v2164_v0 }
0x270c   :  { %v5427_v13 = vpop.eup %5426  ;;  %vm2160_vm8 = vmor %vm2158_vm14, %vm2159_vm5  ;;  %v4440_v0 = vsub.f32 1.0, %v6896_v37 }
0x270d   :  { %v2155_v31 = vsub.f32 1.0, %v2154_v15  ;;  %5428 = vtanh.f32 %v4372_v26  ;;  %v2230_v28 = vmul.f32 %v5427_v13, %v2213_v14  ;;  %vm2235_vm10 = vweird.f32 %v5427_v13 }
0x270e   :  { %vm2236_vm4 = vmor %vm2234_vm1, %vm2235_vm10 }
0x270f   :  { %v2156_v46 = vmul.f32 %v5423_v54, %v2155_v31  ;;  %v2231_v12 = vsub.f32 1.0, %v2230_v28 }
0x2710   :  { %v6930_v33 = vpop.permute.xlu2 %4475 }
0x2711   :  { %v2157_v63 = vadd.f32 %v5423_v54, %v2156_v46  ;;  %v2232_v10 = vmul.f32 %v5427_v13, %v2231_v12  ;;  %v2240_v46 = vand.u32 2147483648, %v2213_v14  ;;  %v4481_v49 = vmul.f32 %v6930_v33, %v6907_v20 }
0x2712   :  { %4445 = vrot.lane.b32.xlu1 %v5425_v7, %s5546_s27 }
0x2713   :  { %v5429_v57 = vpop.eup %5428  ;;  %v2161_v32 = vsel %vm2160_vm8, %v5423_v54, %v2157_v63  ;;  %v2233_v7 = vadd.f32 %v5427_v13, %v2232_v10  ;;  %v2241_v54 = vor.u32 1.1754944e-38, %v2240_v46 }
0x2714   :  { %v6935_v15 = vsel %vm2163_vm9, %v2165_v18, %v2161_v32  ;;  %v4439_v32 = vsub.f32 1.0, %v6900_v36 }
0x2715   :  { %v2237_v62 = vsel %vm2236_vm4, %v5427_v13, %v2233_v7 }
0x2718   :  { %v4453_v11 = vpop.permute.xlu2 %4452 }
0x2719   :  { %v4458_v18 = vmul.f32 %v4453_v11, %v6900_v36  ;;  %v4463_v36 = vsub.f32 1.0, %v6904_v5 }
0x271a   :  { %v4430_v35 = vpop.permute.xlu1 %4429  ;;  %4443 = vrot.lane.b32.xlu1 %v5429_v57, %s5546_s27  ;;  %v2238_v57 = vand.u32 2147483647, %v2213_v14 }
0x271b   :  { %v4435_v25 = vadd.f32 %v4430_v35, %v6561_v40 }
0x271c   :  { %vm2239_vm3 = vcmp.eq.f32.partialorder %v2238_v57, 8.507059e+37 }
0x271d   :  { %5430 = vtanh.f32 %v4435_v25  ;;  %v6940_v63 = vsel %vm2239_vm3, %v2241_v54, %v2237_v62 }
0x2720   :  { %v2184_v26 = vpop.permute.xlu2 %2183 }
0x2721   :  { %v2189_v31 = vmul.f32 %v2184_v26, %v6935_v15  ;;  %v2248_v12 = vmul.f32 %v6940_v63, %v2184_v26 }
0x2723   :  { %v5431_v28 = vpop.eup %5430  ;;  %2193 = vrot.lane.b32.xlu2 %v2189_v31, %s5539_s15 }
0x2724   :  { %4466 = vrot.lane.b32.xlu0 %v5431_v28, %s5546_s27  ;;  %v4462_v28 = vsub.f32 1.0, %v6907_v20 }
0x272b   :  { %2253 = vrot.lane.b32.xlu2 %v2248_v12, %s5539_s15 }
0x272c   :  { %4477 = vrot.lane.b32.xlu0 %v4288_v24, %s5549_s20  ;;  %v2140_v24 = vrot.slane %v6920_v47, 2 }
0x272e   :  { %v2144_v20 = vadd.f32 %v2140_v24, %v5947_v3 }
0x2730   :  { %v4944_v33 = vmul.f32 -1.442695, %v2144_v20 }
0x2732   :  { %5432 = vpow2.f32 %v4944_v33 }
0x277c   :  { %v4469_v35 = vpop.permute.xlu1 %4468 }
0x277d   :  { %v4473_v57 = vmul.f32 %v4469_v35, %v4463_v36  ;;  %v5433_v35 = vpop.eup %5432 }
0x2784   :  { %v4446_v14 = vpop.permute.xlu1 %4445 }
0x2785   :  { %v4450_v25 = vmul.f32 %v4446_v14, %v4440_v0 }
0x2787   :  { %v4461_v13 = vadd.f32 %v4459_v60, %v4450_v25 }
0x2789   :  { %v4487_v7 = vrot.slane %v4461_v13, 7 }
0x278c   :  { %v4444_v10 = vpop.permute.xlu1 %4443 }
0x278d   :  { %v4449_v26 = vmul.f32 %v4444_v10, %v4439_v32  ;;  %v2204_v32 = vadd.f32 %v6920_v47, %v5943_v59 }
0x278f   :  { %v4460_v31 = vadd.f32 %v4458_v18, %v4449_v26  ;;  %v4945_v10 = vmul.f32 -1.442695, %v2204_v32 }
0x2791   :  { %v4488_v46 = vsel %vm7307_vm0, %v4487_v7, %v4460_v31 }
0x2792   :  { %4489 = vrot.lane.b32.xlu0 %v4488_v46, %s5546_s27 }
0x2796   :  { %v4467_v41 = vpop.permute.xlu0 %4466 }
0x2797   :  { %v4472_v37 = vmul.f32 %v4467_v41, %v4462_v28 }
0x2799   :  { %v4483_v62 = vadd.f32 %v4481_v49, %v4472_v37 }
0x279a   :  { %2185 = vrot.lane.b32.xlu0 %v2140_v24, %s5538_s0 }
0x279b   :  { %v4494_v14 = vrot.slane %v4483_v62, 3 }
0x279e   :  { %v4478_v11 = vpop.permute.xlu0 %4477 }
0x279f   :  { %v4482_v54 = vmul.f32 %v4478_v11, %v6904_v5  ;;  %v2152_v5 = vadd.f32 1.0, %v5433_v35 }
0x27a1   :  { %v4484_v12 = vadd.f32 %v4482_v54, %v4473_v57  ;;  %5434 = vrcp.f32 %v2152_v5  ;;  %v2179_v37 = vand.u32 2147483648, %v2152_v5  ;;  %vm2173_vm2 = vweird.f32 %v2152_v5 }
0x27a2   :  { %5436 = vpow2.f32 %v4945_v10  ;;  %v2177_v49 = vand.u32 2147483647, %v2152_v5 }
0x27a3   :  { %v4495_v0 = vrot.slane %v4484_v12, 2  ;;  %v4704_v25 = vrot.slane %v4484_v12, 7  ;;  %v2180_v11 = vor.u32 1.1754944e-38, %v2179_v37 }
0x27a4   :  { %vm2178_vm14 = vcmp.eq.f32.partialorder %v2177_v49, 8.507059e+37 }
0x27a5   :  { %v4496_v60 = vsel %vm7308_vm12, %v4495_v0, %v4494_v14  ;;  %v6962_v13 = vsel %vm7309_vm15, %v4704_v25, %v4483_v62 }
0x27a6   :  { %4497 = vrot.lane.b32.xlu1 %v4496_v60, %s5547_s23 }
0x27a7   :  { %v5435_v18 = vpop.eup %5434 }
0x27a8   :  { %v2169_v26 = vmul.f32 %v5435_v18, %v2152_v5  ;;  %v5437_v7 = vpop.eup %5436  ;;  %vm2174_vm13 = vweird.f32 %v5435_v18 }
0x27a9   :  { %v2212_v46 = vadd.f32 1.0, %v5437_v7  ;;  %vm2175_vm5 = vmor %vm2173_vm2, %vm2174_vm13 }
0x27aa   :  { %v2170_v31 = vsub.f32 1.0, %v2169_v26 }
0x27ab   :  { %5438 = vrcp.f32 %v2212_v46  ;;  %v2225_v35 = vand.u32 2147483648, %v2212_v46  ;;  %vm2219_vm9 = vweird.f32 %v2212_v46  ;;  %v2223_v5 = vand.u32 2147483647, %v2212_v46 }
0x27ac   :  { %v2171_v41 = vmul.f32 %v5435_v18, %v2170_v31  ;;  %v2194_v31 = vpop.permute.xlu2 %2193 }
0x27ad   :  { %v2226_v10 = vor.u32 1.1754944e-38, %v2225_v35  ;;  %vm2224_vm1 = vcmp.eq.f32.partialorder %v2223_v5, 8.507059e+37 }
0x27ae   :  { %2244 = vrot.lane.b32.xlu1 %v6920_v47, %s5538_s0  ;;  %v2172_v24 = vadd.f32 %v5435_v18, %v2171_v41 }
0x27b0   :  { %v2176_v36 = vsel %vm2175_vm5, %v5435_v18, %v2172_v24 }
0x27b1   :  { %v5439_v47 = vpop.eup %5438  ;;  %v6972_v57 = vsel %vm2178_vm14, %v2180_v11, %v2176_v36 }
0x27b2   :  { %v2215_v12 = vmul.f32 %v5439_v47, %v2212_v46  ;;  %vm2220_vm8 = vweird.f32 %v5439_v47 }
0x27b3   :  { %vm2221_vm10 = vmor %vm2219_vm9, %vm2220_vm8 }
0x27b4   :  { %v2216_v14 = vsub.f32 1.0, %v2215_v12  ;;  %v2254_v46 = vpop.permute.xlu2 %2253 }
0x27b5   :  { %v2258_v41 = vadd.f32 %v2254_v46, %v5947_v3 }
0x27b6   :  { %v2217_v0 = vmul.f32 %v5439_v47, %v2216_v14 }
0x27b7   :  { %5440 = vtanh.f32 %v2258_v41 }
0x27b8   :  { %v2218_v20 = vadd.f32 %v5439_v47, %v2217_v0 }
0x27ba   :  { %v2222_v32 = vsel %vm2221_vm10, %v5439_v47, %v2218_v20  ;;  %v5478_v47 = vld [vmem:[%s5713_s22] ss:$0 sm:$0xff]  ;;  %s4851_s22 = sshll.u32 %s5718_s28, 4  ;;  %s4852_s22 = int_to_ptr.hbm [resolvable:$true] %s4851_s22 }
0x27bb   :  { %v6984_v18 = vsel %vm2224_vm1, %v2226_v10, %v2222_v32  ;;  %s5491_s0 = sshra.s32 %s4852_s22, 4  ;;  %s5492_s0 = int_to_ptr.hbm [resolvable:$true] %s5491_s0 }
0x27bc   :  { %p5496_p1 = scmp.lt.s32.totalorder %s5492_s0, %s5718_s28 }
0x27bd   :  { %v5441_v24 = vpop.eup %5440 }
0x2804   :  { %v6970_v28 = vpop.permute.xlu0 %4489 }
0x280c   :  { %v2186_v62 = vpop.permute.xlu0 %2185 }
0x280d   :  { %v2190_v54 = vmul.f32 %v2186_v62, %v6972_v57 }
0x280f   :  { %2195 = vrot.lane.b32.xlu0 %v2190_v54, %s5539_s15  ;;  %v2199_v54 = vadd.f32 %v2194_v31, %v5943_v59 }
0x2811   :  { %5442 = vtanh.f32 %v2199_v54 }
0x2817   :  { %v5443_v35 = vpop.eup %5442 }
0x2818   :  { %v4498_v25 = vpop.permute.xlu1 %4497 }
0x2819   :  { %v6978_v60 = vsel %vm3220_vm6, %v6970_v28, %v4498_v25 }
0x281a   :  { %v4502_v33 = vrot.slane %v6978_v60, 6 }
0x281c   :  { %5000 = vmatmul.msk.f32.vlgmr.msra.gmra.mxu0 %vm827_vm7, %v4502_v33 }
0x2820   :  { %v2245_v26 = vpop.permute.xlu1 %2244 }
0x2821   :  { %v2247_v7 = vmul.f32 %v2245_v26, %v6984_v18 }
0x2823   :  { %2251 = vrot.lane.b32.xlu0 %v2247_v7, %s5539_s15  ;;  %s5493_s15 = scalar_lea.hbm %s5492_s0, 16 }
0x2824   :  { %p5494_p0 = scmp.ne.s32.totalorder %s5492_s0, %s5493_s15  ;;  %p5497_p2 = scmp.lt.s32.totalorder %s5495_s10, %s5493_s15 }
0x2826   :  { %p5498_p3 = por %p5497_p2, %p5496_p1 }
0x2828   :  { %p5499_p4 = pnand %p5498_p3, %p5494_p0 }
0x282b   :  { %2319 = vrot.lane.b32.xlu0 %v6450_v52, %s5543_s17 }
0x2833   :  { %2331 = vrot.lane.b32.xlu0 %v6355_v43, %s5543_s17 }
0x283b   :  { %2343 = vrot.lane.b32.xlu0 %v6250_v8, %s5543_s17  ;;  %v2273_v8 = vrot.slane %v6476_v1, 7 }
0x2843   :  { %2290 = vrot.lane.b32.xlu0 %v5441_v24, %s5542_s13 }
0x2881   :  { %v2196_v37 = vpop.permute.xlu0 %2195 }
0x2895   :  { %v6996_v49 = vpop.permute.xlu0 %2251 }
0x2899   :  { %v4522_v36 = vpop.f32.mrf.mxu0 }
0x289a   :  { %v4523_v11 = vadd.f32 %v5478_v47, %v4522_v36 }
0x289c   :  { %4631 = vrot.lane.b32.xlu2 %v4523_v11, %s5542_s13  ;;  %v4526_v52 = vrot.slane %v4523_v11, 1  ;;  %v4527_v12 = vrot.slane %v4523_v11, 2 }
0x289d   :  { %v2320_v43 = vpop.permute.xlu0 %2319 }
0x289e   :  { %v2322_v62 = vsel %vm827_vm7, %v6056_v53, %v2320_v43  ;;  %4570 = vrot.lane.b32.xlu1 %v4526_v52, %s5542_s13  ;;  %v2200_v53 = vadd.f32 %v2196_v37, %v5947_v3  ;;  %v4530_v46 = vadd.f32 %v4526_v52, %v6561_v40  ;;  %v4592_v37 = vadd.f32 %v4526_v52, %v6571_v16 }
0x289f   :  { %2324 = vst [vmem:[#allocation1] sm:$0xff] %v2322_v62  ;;  %v4531_v36 = vadd.f32 %v4527_v12, %v6571_v16 }
0x28a0   :  { %5444 = vtanh.f32 %v2200_v53  ;;  %v5001_v24 = vmul.f32 -1.442695, %v4530_v46  ;;  %v5004_v47 = vmul.f32 -1.442695, %v4592_v37 }
0x28a1   :  { %v5002_v43 = vmul.f32 -1.442695, %v4531_v36 }
0x28a4   :  { %2274 = vrot.lane.b32.xlu2 %v2273_v8, %s5544_s21 }
0x28a5   :  { %v2332_v14 = vpop.permute.xlu0 %2331 }
0x28a6   :  { %v7006_v0 = vld [vmem:[#allocation1 + $0x1] ss:$9 sm:$0xff]  ;;  %v2334_v20 = vsel %vm827_vm7, %v6105_v6, %v2332_v14  ;;  %4572 = vrot.lane.b32.xlu1 %v4527_v12, %s5542_s13  ;;  %v5445_v3 = vpop.eup %5444  ;;  %v4591_v6 = vadd.f32 %v4523_v11, %v6561_v40 }
0x28a7   :  { %v7008_v25 = vld [vmem:[#allocation1 + $0x2] ss:$9 sm:$0xff] }
0x28a8   :  { %2336 = vst [vmem:[#allocation1] sm:$0xff] %v2334_v20  ;;  %v5003_v7 = vmul.f32 -1.442695, %v4591_v6 }
0x28aa   :  { %5446 = vpow2.f32 %v5003_v7 }
0x28ac   :  { %2276 = vrot.lane.b32.xlu2 %v6476_v1, %s5544_s21 }
0x28ad   :  { %v2344_v5 = vpop.permute.xlu0 %2343 }
0x28ae   :  { %v2346_v26 = vsel %vm827_vm7, %v6171_v42, %v2344_v5  ;;  %2265 = vrot.lane.b32.xlu1 %v5443_v35, %s5542_s13 }
0x28af   :  { %v7016_v32 = vld [vmem:[#allocation1 + $0x2] ss:$9 sm:$0xff] }
0x28b0   :  { %v7018_v10 = vld [vmem:[#allocation1 + $0x3] ss:$9 sm:$0xff]  ;;  %v5447_v42 = vpop.eup %5446 }
0x28b1   :  { %2348 = vst [vmem:[#allocation1] sm:$0xff] %v2346_v26  ;;  %v4599_v31 = vadd.f32 1.0, %v5447_v42 }
0x28b3   :  { %5448 = vrcp.f32 %v4599_v31  ;;  %v4612_v14 = vand.u32 2147483648, %v4599_v31  ;;  %vm4606_vm3 = vweird.f32 %v4599_v31  ;;  %v4610_v20 = vand.u32 2147483647, %v4599_v31 }
0x28b4   :  { %2355 = vrot.lane.b32.xlu2 %v6155_v22, %s5543_s17  ;;  %5450 = vpow2.f32 %v5001_v24 }
0x28b5   :  { %5452 = vpow2.f32 %v5004_v47  ;;  %v4613_v52 = vor.u32 1.1754944e-38, %v4612_v14  ;;  %vm4611_vm12 = vcmp.eq.f32.partialorder %v4610_v20, 8.507059e+37 }
0x28b6   :  { %2267 = vrot.lane.b32.xlu1 %v5445_v3, %s5542_s13  ;;  %5454 = vpow2.f32 %v5002_v43 }
0x28b9   :  { %v5449_v41 = vpop.eup %5448 }
0x28ba   :  { %v4602_v22 = vmul.f32 %v5449_v41, %v4599_v31  ;;  %v5451_v11 = vpop.eup %5450  ;;  %vm4607_vm4 = vweird.f32 %v5449_v41 }
0x28bb   :  { %v4538_v54 = vadd.f32 1.0, %v5451_v11  ;;  %vm4608_vm0 = vmor %vm4606_vm3, %vm4607_vm4  ;;  %v5453_v35 = vpop.eup %5452 }
0x28bc   :  { %2367 = vrot.lane.b32.xlu2 %v6100_v30, %s5543_s17  ;;  %v4603_v30 = vsub.f32 1.0, %v4602_v22  ;;  %v5455_v5 = vpop.eup %5454  ;;  %v4600_v3 = vadd.f32 1.0, %v5453_v35 }
0x28bd   :  { %5456 = vrcp.f32 %v4538_v54  ;;  %v4539_v7 = vadd.f32 1.0, %v5455_v5  ;;  %vm4545_vm13 = vweird.f32 %v4538_v54  ;;  %v4549_v14 = vand.u32 2147483647, %v4538_v54  ;;  %v7043_v5 = vld [vmem:[#allocation1 + $0x3] ss:$9 sm:$0xff] }
0x28be   :  { %2298 = vrot.lane.b32.xlu1 %v2273_v8, %s5545_s25  ;;  %v4604_v62 = vmul.f32 %v5449_v41, %v4603_v30  ;;  %5458 = vrcp.f32 %v4600_v3  ;;  %vm4621_vm9 = vweird.f32 %v4600_v3 }
0x28bf   :  { %5460 = vrcp.f32 %v4539_v7  ;;  %vm4550_vm5 = vcmp.eq.f32.partialorder %v4549_v14, 8.507059e+37  ;;  %vm4560_vm1 = vweird.f32 %v4539_v7 }
0x28c0   :  { %v4605_v8 = vadd.f32 %v5449_v41, %v4604_v62 }
0x28c2   :  { %v4609_v53 = vsel %vm4608_vm0, %v5449_v41, %v4605_v8  ;;  %v4551_v8 = vand.u32 2147483648, %v4538_v54 }
0x28c3   :  { %v7033_v26 = vsel %vm4611_vm12, %v4613_v52, %v4609_v53  ;;  %v5457_v42 = vpop.eup %5456  ;;  %vm7312_vm12 = vcmask 1041409  }
0x28c4   :  { %v4541_v31 = vmul.f32 %v5457_v42, %v4538_v54  ;;  %v5459_v41 = vpop.eup %5458  ;;  %vm4546_vm15 = vweird.f32 %v5457_v42 }
0x28c5   :  { %v5461_v22 = vpop.eup %5460  ;;  %v4617_v36 = vmul.f32 %v5459_v41, %v4600_v3  ;;  %vm4547_vm2 = vmor %vm4545_vm13, %vm4546_vm15  ;;  %vm4622_vm14 = vweird.f32 %v5459_v41  ;;  %vm2447_vm15 = vcmask 1042432   ;;  %vm7313_vm13 = vcmask 1041408  }
0x28c6   :  { %v4542_v24 = vsub.f32 1.0, %v4541_v31  ;;  %v4556_v30 = vmul.f32 %v5461_v22, %v4539_v7  ;;  %vm4561_vm8 = vweird.f32 %v5461_v22  ;;  %vm7052_vm10 = vmor %vm4621_vm9, %vm4622_vm14 }
0x28c7   :  { %v4618_v62 = vsub.f32 1.0, %v4617_v36  ;;  %v4627_v36 = vand.u32 2147483648, %v4600_v3  ;;  %vm4562_vm4 = vmor %vm4560_vm1, %vm4561_vm8  ;;  %vm7318_vm8 = vcmask 1044480   ;;  %vm7321_vm1 = vcmask 1045504  }
0x28c8   :  { %v4543_v37 = vmul.f32 %v5457_v42, %v4542_v24  ;;  %v4557_v11 = vsub.f32 1.0, %v4556_v30  ;;  %v4566_v30 = vand.u32 2147483648, %v4539_v7  ;;  %vm7319_vm9 = vmmov %vm7318_vm8 }
0x28c9   :  { %v4619_v53 = vmul.f32 %v5459_v41, %v4618_v62  ;;  %v4625_v62 = vand.u32 2147483647, %v4600_v3  ;;  %v4628_v14 = vor.u32 1.1754944e-38, %v4627_v36 }
0x28ca   :  { %v4544_v43 = vadd.f32 %v5457_v42, %v4543_v37  ;;  %v4558_v35 = vmul.f32 %v5461_v22, %v4557_v11 }
0x28cb   :  { %vm4626_vm3 = vcmp.eq.f32.partialorder %v4625_v62, 8.507059e+37 }
0x28cc   :  { %v4548_v20 = vsel %vm4547_vm2, %v5457_v42, %v4544_v43  ;;  %v4620_v42 = vadd.f32 %v5459_v41, %v4619_v53  ;;  %v4559_v37 = vadd.f32 %v5461_v22, %v4558_v35  ;;  %v4567_v53 = vor.u32 1.1754944e-38, %v4566_v30  ;;  %vm7314_vm2 = vmmov %vm7313_vm13 }
0x28ce   :  { %v4624_v11 = vsel %vm7052_vm10, %v5459_v41, %v4620_v42  ;;  %vm7320_vm10 = vmmov %vm7312_vm12 }
0x28f6   :  { %v4632_v12 = vpop.permute.xlu2 %4631 }
0x28f7   :  { %v4634_v6 = vmul.f32 %v4632_v12, %v7033_v26  ;;  %v7045_v12 = vld [vmem:[#allocation1 + $0x4] ss:$9 sm:$0xff] }
0x28f9   :  { %4638 = vrot.lane.b32.xlu2 %v4634_v6, %s5544_s21 }
0x28fe   :  { %v7037_v46 = vpop.permute.xlu2 %2274 }
0x2901   :  { %2379 = vrot.lane.b32.xlu2 %v6050_v44, %s5543_s17  ;;  %v4552_v44 = vor.u32 1.1754944e-38, %v4551_v8  ;;  %v4563_v8 = vsel %vm4562_vm4, %v5461_v22, %v4559_v37  ;;  %v2261_v37 = vsub.f32 1.0, %v6935_v15  ;;  %vm7322_vm4 = vcmask 1046528  }
0x2903   :  { %v7049_v24 = vsel %vm4550_vm5, %v4552_v44, %v4548_v20  ;;  %v7067_v44 = vsel %vm4626_vm3, %v4628_v14, %v4624_v11  ;;  %v2291_v11 = vpop.permute.xlu0 %2290  ;;  %vm7315_vm5 = vcmask 1043456   ;;  %vm7323_vm3 = vmmov %vm7321_vm1 }
0x2904   :  { %vm7317_vm14 = vmmov %vm7315_vm5 }
0x2906   :  { %v7041_v47 = vpop.permute.xlu2 %2276 }
0x2907   :  { %v2281_v30 = vmul.f32 %v7041_v47, %v6972_v57 }
0x290e   :  { %v2356_v52 = vpop.permute.xlu2 %2355 }
0x290f   :  { %v2358_v6 = vsel %vm827_vm7, %v6255_v17, %v2356_v52  ;;  %v4564_v17 = vand.u32 2147483647, %v4539_v7  ;;  %v2257_v7 = vadd.f32 %v6996_v49, %v5943_v59  ;;  %v2280_v49 = vmul.f32 %v7037_v46, %v6935_v15 }
0x2910   :  { %2360 = vst [vmem:[#allocation1] sm:$0xff] %v2358_v6  ;;  %v4571_v31 = vpop.permute.xlu1 %4570  ;;  %v4660_v15 = vrot.slane %v6978_v60, 7 }
0x2911   :  { %v4576_v54 = vmul.f32 %v4571_v31, %v7049_v24  ;;  %vm4565_vm0 = vcmp.eq.f32.partialorder %v4564_v17, 8.507059e+37  ;;  %v4635_v6 = vmul.f32 %v7067_v44, %v4571_v31  ;;  %5462 = vtanh.f32 %v2257_v7 }
0x2912   :  { %v7069_v41 = vsel %vm4565_vm0, %v4567_v53, %v4563_v8  ;;  %v2262_v31 = vsub.f32 1.0, %v6972_v57  ;;  %vm7324_vm0 = vcmask 261120  }
0x2913   :  { %4580 = vrot.lane.b32.xlu1 %v4576_v54, %s5544_s21 }
0x2916   :  { %v2368_v20 = vpop.permute.xlu2 %2367 }
0x2917   :  { %v7059_v35 = vld [vmem:[#allocation1 + $0x4] ss:$9 sm:$0xff]  ;;  %v2370_v3 = vsel %vm827_vm7, %v6366_v61, %v2368_v20  ;;  %v5463_v42 = vpop.eup %5462 }
0x2918   :  { %v7061_v52 = vld [vmem:[#allocation1 + $0x5] ss:$9 sm:$0xff]  ;;  %v4573_v22 = vpop.permute.xlu1 %4572 }
0x2919   :  { %2372 = vst [vmem:[#allocation1] sm:$0xff] %v2370_v3  ;;  %v4577_v54 = vmul.f32 %v4573_v22, %v7069_v41  ;;  %v2285_v22 = vsub.f32 1.0, %v6940_v63 }
0x291b   :  { %4582 = vrot.lane.b32.xlu0 %v4577_v54, %s5544_s21  ;;  %4640 = vrot.lane.b32.xlu1 %v4635_v6, %s5544_s21  ;;  %v2295_v6 = vmul.f32 %v2291_v11, %v2285_v22 }
0x2920   :  { %v2266_v61 = vpop.permute.xlu1 %2265  ;;  %v7102_v46 = vld [vmem:[#allocation1 + $0x6] ss:$9 sm:$0xff] }
0x2921   :  { %v2271_v59 = vmul.f32 %v2266_v61, %v2261_v37 }
0x2923   :  { %2296 = vrot.lane.b32.xlu1 %v2115_v2, %s5545_s25  ;;  %2288 = vrot.lane.b32.xlu0 %v5463_v42, %s5542_s13  ;;  %v2282_v43 = vadd.f32 %v2280_v49, %v2271_v59  ;;  %v2398_v2 = vrot.slane %v5987_v27, 7  ;;  %v7100_v27 = vld [vmem:[#allocation1 + $0x5] ss:$9 sm:$0xff]  ;;  %v2284_v42 = vsub.f32 1.0, %v6984_v18 }
0x2928   :  { %v2268_v36 = vpop.permute.xlu1 %2267 }
0x2929   :  { %v2272_v62 = vmul.f32 %v2268_v36, %v2262_v31 }
0x292b   :  { %v2283_v17 = vadd.f32 %v2281_v30, %v2272_v62  ;;  %2399 = vrot.lane.b32.xlu1 %v5985_v23, %s5543_s17  ;;  %2392 = vrot.lane.b32.xlu0 %v2282_v43, %s5542_s13 }
0x292d   :  { %v2391_v1 = vrot.slane %v2283_v17, 7 }
0x292f   :  { %2394 = vrot.lane.b32.xlu2 %v2391_v1, %s5542_s13 }
0x2930   :  { %v2299_v47 = vpop.permute.xlu1 %2298 }
0x2933   :  { %4706 = vrot.lane.b32.xlu1 %v6962_v13, %s5547_s23  ;;  %2401 = vrot.lane.b32.xlu0 %v2398_v2, %s5543_s17 }
0x2937   :  { %4685 = vrot.lane.b32.xlu2 %v4660_v15, %s5549_s20 }
0x293b   :  { %4718 = vrot.lane.b32.xlu1 %v6874_v55, %s5547_s23  ;;  %4661 = vrot.lane.b32.xlu0 %v4660_v15, %s5548_s26 }
0x2943   :  { %4663 = vrot.lane.b32.xlu0 %v6978_v60, %s5548_s26  ;;  %v4785_v60 = vrot.slane %v6593_v21, 7 }
0x2953   :  { %v4639_v23 = vpop.permute.xlu2 %4638 }
0x2954   :  { %v4644_v61 = vadd.f32 %v4639_v23, %v6561_v40 }
0x295b   :  { %v2380_v57 = vpop.permute.xlu2 %2379 }
0x295c   :  { %v2382_v13 = vsel %vm827_vm7, %v6472_v34, %v2380_v57  ;;  %v2303_v34 = vmul.f32 %v2299_v47, %v6940_v63 }
0x295d   :  { %2384 = vst [vmem:[#allocation1] sm:$0xff] %v2382_v13 }
0x295e   :  { %v2305_v54 = vadd.f32 %v2303_v34, %v2295_v6 }
0x2960   :  { %v2308_v30 = vrot.slane %v2305_v54, 7 }
0x2964   :  { %v7119_v1 = vld [vmem:[#allocation1 + $0x6] ss:$9 sm:$0xff] }
0x2965   :  { %v7122_v2 = vld [vmem:[#allocation1 + $0x7] ss:$9 sm:$0xff] }
0x2985   :  { %v4581_v8 = vpop.permute.xlu1 %4580 }
0x2986   :  { %v4586_v55 = vadd.f32 %v4581_v8, %v6561_v40 }
0x2988   :  { %5464 = vtanh.f32 %v4586_v55 }
0x2989   :  { %v2395_v15 = vpop.permute.xlu2 %2394 }
0x298d   :  { %v4641_v14 = vpop.permute.xlu1 %4640  ;;  %v4583_v20 = vpop.permute.xlu0 %4582 }
0x298e   :  { %v5465_v53 = vpop.eup %5464  ;;  %v4645_v3 = vadd.f32 %v4641_v14, %v6571_v16  ;;  %v4587_v7 = vadd.f32 %v4583_v20, %v6571_v16 }
0x298f   :  { %4652 = vrot.lane.b32.xlu2 %v5465_v53, %s5546_s27 }
0x2990   :  { %5466 = vtanh.f32 %v4645_v3  ;;  %v4649_v3 = vsub.f32 1.0, %v7069_v41 }
0x2991   :  { %5468 = vtanh.f32 %v4587_v7  ;;  %v4686_v21 = vpop.permute.xlu2 %4685 }
0x2992   :  { %5470 = vtanh.f32 %v4644_v61  ;;  %v4672_v61 = vsub.f32 1.0, %v7067_v44 }
0x2995   :  { %v2297_v37 = vpop.permute.xlu1 %2296  ;;  %v2289_v59 = vpop.permute.xlu0 %2288 }
0x2996   :  { %v5467_v49 = vpop.eup %5466  ;;  %v2302_v31 = vmul.f32 %v2297_v37, %v6984_v18  ;;  %v2294_v16 = vmul.f32 %v2289_v59, %v2284_v42  ;;  %v2415_v37 = vperm.slane %v7008_v25, 0  ;;  %v2426_v25 = vperm.slane %v7059_v35, 0 }
0x2997   :  { %v5469_v36 = vpop.eup %5468  ;;  %4677 = vrot.lane.b32.xlu1 %v5467_v49, %s5546_s27  ;;  %v4690_v49 = vmul.f32 %v4686_v21, %v7067_v44  ;;  %v4671_v44 = vsub.f32 1.0, %v7033_v26  ;;  %v2434_v21 = vperm.slane %v7119_v1, 0 }
0x2998   :  { %v2304_v63 = vadd.f32 %v2302_v31, %v2294_v16  ;;  %4654 = vrot.lane.b32.xlu2 %v5469_v36, %s5546_s27  ;;  %v5471_v17 = vpop.eup %5470  ;;  %v2418_v31 = vperm.slane %v7016_v32, 0  ;;  %v2419_v36 = vperm.slane %v7018_v10, 0  ;;  %v2423_v32 = vperm.slane %v7045_v12, 0 }
0x2999   :  { %v2427_v10 = vperm.slane %v7061_v52, 0  ;;  %v2430_v12 = vperm.slane %v7100_v27, 0 }
0x299a   :  { %v2309_v43 = vsel %vm7312_vm12, %v2308_v30, %v2304_v63  ;;  %v2422_v30 = vperm.slane %v7043_v5, 0  ;;  %vm7325_vm12 = vmmov %vm7322_vm4 }
0x299b   :  { %2310 = vrot.lane.b32.xlu0 %v2309_v43, %s5543_s17 }
0x299d   :  { %v2400_v40 = vpop.permute.xlu1 %2399  ;;  %v2393_v62 = vpop.permute.xlu0 %2392 }
0x299e   :  { %v2405_v18 = vsel %vm827_vm7, %v2393_v62, %v2400_v40 }
0x299f   :  { %4675 = vrot.lane.b32.xlu1 %v5471_v17, %s5546_s27  ;;  %2409 = vst [vmem:[#allocation1] sm:$0xff] %v2405_v18 }
0x29a0   :  { %4683 = vrot.lane.b32.xlu2 %v4502_v33, %s5549_s20 }
0x29a3   :  { %4730 = vrot.lane.b32.xlu0 %v6818_v38, %s5547_s23 }
0x29a5   :  { %v2402_v23 = vpop.permute.xlu0 %2401  ;;  %v4707_v47 = vpop.permute.xlu1 %4706 }
0x29a6   :  { %v2406_v57 = vsel %vm827_vm7, %v2395_v15, %v2402_v23  ;;  %v7131_v13 = vld [vmem:[#allocation1 + $0x7] ss:$9 sm:$0xff]  ;;  %v4709_v38 = vsel %vm3220_vm6, %v6657_v29, %v4707_v47  ;;  %v4648_v29 = vsub.f32 1.0, %v7049_v24 }
0x29a7   :  { %4742 = vrot.lane.b32.xlu1 %v6751_v48, %s5547_s23  ;;  %2412 = vst [vmem:[#allocation1] sm:$0xff] %v2406_v57  ;;  %v2431_v57 = vperm.slane %v7102_v46, 0 }
0x29a8   :  { %4754 = vrot.lane.b32.xlu2 %v6701_v19, %s5547_s23 }
0x29ab   :  { %4766 = vrot.lane.b32.xlu0 %v6652_v9, %s5547_s23 }
0x29ad   :  { %v4719_v48 = vpop.permute.xlu1 %4718  ;;  %v4662_v8 = vpop.permute.xlu0 %4661 }
0x29ae   :  { %v7142_v33 = vld [vmem:[#allocation1] ss:$9 sm:$0xff]  ;;  %v4721_v19 = vsel %vm3220_vm6, %v6706_v56, %v4719_v48  ;;  %v4667_v14 = vmul.f32 %v4662_v8, %v7049_v24  ;;  %v2414_v24 = vperm.slane %v7006_v0, 0 }
0x29af   :  { %4788 = vrot.lane.b32.xlu1 %v4785_v60, %s5547_s23  ;;  %4711 = vst [vmem:[#allocation1] sm:$0xff] %v4709_v38  ;;  %v2435_v38 = vperm.slane %v7122_v2, 0 }
0x29b0   :  { %4786 = vrot.lane.b32.xlu2 %v6591_v50, %s5547_s23 }
0x29b5   :  { %v4664_v50 = vpop.permute.xlu0 %4663 }
0x29b6   :  { %v7149_v11 = vld [vmem:[#allocation1 + $0x1] ss:$9 sm:$0xff]  ;;  %v4668_v7 = vmul.f32 %v4664_v50, %v7069_v41 }
0x29b7   :  { %v7151_v9 = vld [vmem:[#allocation1 + $0x2] ss:$9 sm:$0xff] }
0x29b8   :  { %4723 = vst [vmem:[#allocation1] sm:$0xff] %v4721_v19 }
0x29bf   :  { %v4725_v2 = vld [vmem:[#allocation1 + $0x2] ss:$9 sm:$0xff] }
0x29e9   :  { %v4653_v55 = vpop.permute.xlu2 %4652 }
0x29ea   :  { %v4658_v20 = vmul.f32 %v4653_v55, %v4648_v29  ;;  %v5070_v55 = vld [vmem:[%s7316_s6] ss:$0 sm:$0xff] }
0x29ec   :  { %v4669_v53 = vadd.f32 %v4667_v14, %v4658_v20  ;;  %v4727_v14 = vld [vmem:[#allocation1 + $0x3] ss:$9 sm:$0xff] }
0x29ee   :  { %4779 = vrot.lane.b32.xlu1 %v4669_v53, %s5546_s27  ;;  %v2438_v53 = vperm.slane %v7131_v13, 0 }
0x29f2   :  { %v4655_v56 = vpop.permute.xlu2 %4654 }
0x29f3   :  { %v4659_v22 = vmul.f32 %v4655_v56, %v4649_v3 }
0x29f5   :  { %v4670_v34 = vadd.f32 %v4668_v7, %v4659_v22 }
0x29f7   :  { %v4778_v6 = vrot.slane %v4670_v34, 7 }
0x29f9   :  { %4781 = vrot.lane.b32.xlu0 %v4778_v6, %s5546_s27 }
0x29fa   :  { %v4684_v16 = vpop.permute.xlu2 %4683 }
0x29fb   :  { %v4689_v5 = vmul.f32 %v4684_v16, %v7033_v26  ;;  %v2439_v26 = vperm.slane %v7142_v33, 0 }
0x2a09   :  { %v4678_v54 = vpop.permute.xlu1 %4677 }
0x2a0a   :  { %v4682_v42 = vmul.f32 %v4678_v54, %v4672_v61  ;;  %v4755_v54 = vpop.permute.xlu2 %4754 }
0x2a0b   :  { %v4757_v13 = vsel %vm3220_vm6, %v6877_v58, %v4755_v54 }
0x2a0c   :  { %v4692_v0 = vadd.f32 %v4690_v49, %v4682_v42 }
0x2a0d   :  { %v2311_v59 = vpop.permute.xlu0 %2310 }
0x2a0e   :  { %v2313_v41 = vsel %vm827_vm7, %v5997_v45, %v2311_v59  ;;  %v4695_v47 = vrot.slane %v4692_v0, 7 }
0x2a0f   :  { %v2315_v63 = vrot.slane %v2313_v41, 1  ;;  %v2443_v43 = vsel %vm2442_vm11, %v2313_v41, %v2414_v24 }
0x2a10   :  { %v2445_v40 = vsel %vm7313_vm13, %v2443_v43, %v2418_v31  ;;  %vm7326_vm13 = vmmov %vm7324_vm0 }
0x2a11   :  { %v2444_v62 = vsel %vm2442_vm11, %v2315_v63, %v2415_v37  ;;  %v2448_v45 = vsel %vm2447_vm15, %v2445_v40, %v2422_v30  ;;  %v4676_v17 = vpop.permute.xlu1 %4675  ;;  %v4805_v40 = vperm.slane %v4725_v2, 0 }
0x2a12   :  { %v2446_v18 = vsel %vm7314_vm2, %v2444_v62, %v2419_v36  ;;  %v2450_v15 = vsel %vm7315_vm5, %v2448_v45, %v2426_v25  ;;  %v4681_v35 = vmul.f32 %v4676_v17, %v4671_v44  ;;  %v4787_v31 = vpop.permute.xlu2 %4786  ;;  %v4801_v25 = vperm.slane %v7149_v11, 0 }
0x2a13   :  { %v2449_v23 = vsel %vm2447_vm15, %v2446_v18, %v2423_v32  ;;  %v2452_v8 = vsel %vm7319_vm9, %v2450_v15, %v2430_v12  ;;  %v4802_v32 = vperm.slane %v7151_v9, 0  ;;  %v4806_v17 = vperm.slane %v4727_v14, 0 }
0x2a14   :  { %v4691_v60 = vadd.f32 %v4689_v5, %v4681_v35  ;;  %v2451_v52 = vsel %vm7317_vm14, %v2449_v23, %v2427_v10  ;;  %v2454_v1 = vsel %vm7323_vm3, %v2452_v8, %v2434_v21  ;;  %vm7328_vm14 = vmmov %vm7318_vm8 }
0x2a15   :  { %v4731_v48 = vpop.permute.xlu0 %4730  ;;  %v2453_v19 = vsel %vm7318_vm8, %v2451_v52, %v2431_v57  ;;  %v2456_v3 = vsel %vm7325_vm12, %v2454_v1, %v2438_v53  ;;  %vm7329_vm8 = vmmov %vm7315_vm5 }
0x2a16   :  { %v4733_v46 = vsel %vm3220_vm6, %v6753_v4, %v4731_v48  ;;  %v4696_v27 = vsel %vm7320_vm10, %v4695_v47, %v4691_v60  ;;  %v2455_v29 = vsel %vm7321_vm1, %v2453_v19, %v2435_v38  ;;  %v2462_v7 = vmul.f32 %v5070_v55, %v2456_v3  ;;  %vm7331_vm10 = vmmov %vm7322_vm4 }
0x2a17   :  { %4697 = vrot.lane.b32.xlu2 %v4696_v27, %s5547_s23  ;;  %v2457_v33 = vsel %vm7322_vm4, %v2455_v29, %v2439_v26  ;;  %4735 = vst [vmem:[#allocation1] sm:$0xff] %v4733_v46 }
0x2a18   :  { %v2463_v20 = vmul.f32 %v5070_v55, %v2457_v33  ;;  %v2464_v6 = vsel %vm7326_vm13, %v2462_v7, 0.0 }
0x2a19   :  { %v4743_v4 = vpop.permute.xlu1 %4742 }
0x2a1a   :  { %v2467_v50 = vsel %vm7324_vm0, %v2463_v20, 0.0  ;;  %v4745_v56 = vsel %vm3220_vm6, %v6823_v51, %v4743_v4 }
0x2a1b   :  { %2468 = vadd.xlane.f32.xlu1 %v2467_v50 }
0x2a1d   :  { %v4767_v24 = vpop.permute.xlu0 %4766 }
0x2a1e   :  { %v4737_v22 = vld [vmem:[#allocation1 + $0x3] ss:$9 sm:$0xff]  ;;  %v4769_v37 = vsel %vm3220_vm6, %v6970_v28, %v4767_v24 }
0x2a1f   :  { %v4739_v34 = vld [vmem:[#allocation1 + $0x4] ss:$9 sm:$0xff]  ;;  %v4809_v62 = vperm.slane %v4737_v22, 0 }
0x2a20   :  { %4747 = vst [vmem:[#allocation1] sm:$0xff] %v4745_v56  ;;  %v4810_v18 = vperm.slane %v4739_v34, 0 }
0x2a21   :  { %v4789_v49 = vpop.permute.xlu1 %4788 }
0x2a23   :  { %2465 = vadd.xlane.f32.xlu0 %v2464_v6 }
0x2a27   :  { %v4749_v61 = vld [vmem:[#allocation1 + $0x4] ss:$9 sm:$0xff] }
0x2a28   :  { %v4751_v42 = vld [vmem:[#allocation1 + $0x5] ss:$9 sm:$0xff]  ;;  %v4813_v10 = vperm.slane %v4749_v61, 0 }
0x2a29   :  { %4759 = vst [vmem:[#allocation1] sm:$0xff] %v4757_v13  ;;  %v4814_v23 = vperm.slane %v4751_v42, 0 }
0x2a30   :  { %v4761_v59 = vld [vmem:[#allocation1 + $0x5] ss:$9 sm:$0xff] }
0x2a31   :  { %v4763_v51 = vld [vmem:[#allocation1 + $0x6] ss:$9 sm:$0xff]  ;;  %v4817_v15 = vperm.slane %v4761_v59, 0 }
0x2a32   :  { %4771 = vst [vmem:[#allocation1] sm:$0xff] %v4769_v37  ;;  %v4818_v47 = vperm.slane %v4763_v51, 0 }
0x2a39   :  { %v4773_v36 = vld [vmem:[#allocation1 + $0x6] ss:$9 sm:$0xff] }
0x2a3a   :  { %v4775_v30 = vld [vmem:[#allocation1 + $0x7] ss:$9 sm:$0xff]  ;;  %v4821_v9 = vperm.slane %v4773_v36, 0 }
0x2a3b   :  { %v4822_v26 = vperm.slane %v4775_v30, 0 }
0x2a60   :  { %v4780_v41 = vpop.permute.xlu1 %4779 }
0x2a61   :  { %v4792_v16 = vsel %vm3220_vm6, %v4780_v41, %v4787_v31 }
0x2a62   :  { %4796 = vst [vmem:[#allocation1] sm:$0xff] %v4792_v16 }
0x2a69   :  { %v4798_v43 = vld [vmem:[#allocation1 + $0x7] ss:$9 sm:$0xff] }
0x2a6a   :  { %v4825_v52 = vperm.slane %v4798_v43, 0 }
0x2a6b   :  { %v4782_v63 = vpop.permute.xlu0 %4781 }
0x2a6c   :  { %v4793_v58 = vsel %vm3220_vm6, %v4782_v63, %v4789_v49 }
0x2a6d   :  { %4799 = vst [vmem:[#allocation1] sm:$0xff] %v4793_v58 }
0x2a71   :  { %v4698_v0 = vpop.permute.xlu2 %4697 }
0x2a72   :  { %v4700_v28 = vsel %vm3220_vm6, %v6601_v39, %v4698_v0  ;;  %vm7327_vm6 = vmmov %vm7314_vm2 }
0x2a73   :  { %v4702_v44 = vrot.slane %v4700_v28, 1  ;;  %v4829_v45 = vsel %vm2442_vm11, %v4700_v28, %v4801_v25 }
0x2a74   :  { %v4831_v5 = vsel %vm7314_vm2, %v4829_v45, %v4805_v40  ;;  %v4800_v12 = vld [vmem:[#allocation1] ss:$9 sm:$0xff] }
0x2a75   :  { %v4830_v35 = vsel %vm2442_vm11, %v4702_v44, %v4802_v32  ;;  %v4833_v11 = vsel %vm2447_vm15, %v4831_v5, %v4809_v62  ;;  %vm7330_vm11 = vmmov %vm7321_vm1  ;;  %v4826_v8 = vperm.slane %v4800_v12, 0 }
0x2a76   :  { %v4832_v39 = vsel %vm7327_vm6, %v4830_v35, %v4806_v17  ;;  %v4835_v57 = vsel %vm7315_vm5, %v4833_v11, %v4813_v10 }
0x2a77   :  { %v4834_v60 = vsel %vm2447_vm15, %v4832_v39, %v4810_v18  ;;  %v4837_v38 = vsel %vm7328_vm14, %v4835_v57, %v4817_v15  ;;  %vm7332_vm15 = vmmov %vm7322_vm4 }
0x2a78   :  { %v4836_v48 = vsel %vm7329_vm8, %v4834_v60, %v4814_v23  ;;  %v4839_v19 = vsel %vm7330_vm11, %v4837_v38, %v4821_v9 }
0x2a79   :  { %v4838_v21 = vsel %vm7319_vm9, %v4836_v48, %v4818_v47  ;;  %v4841_v46 = vsel %vm7331_vm10, %v4839_v19, %v4825_v52 }
0x2a7a   :  { %v4840_v27 = vsel %vm7321_vm1, %v4838_v21, %v4822_v26  ;;  %4843 = vst.msk [vmem:[#allocation3] sm:$0xff] %vm827_vm7, %v4841_v46 }
0x2a7b   :  { %v4842_v29 = vsel %vm7332_vm15, %v4840_v27, %v4826_v8 }
0x2a7c   :  { %4844 = vst.msk [vmem:[#allocation3 + $0x8] sm:$0xff] %vm827_vm7, %v4842_v29 }
0x2a7d   :  { %5502 = shalt.err (!%p5499_p4)
}
0x2a7e   :  { %s5551_s9 = smov 128   ;;  %v5071_v55 = vld [vmem:[#allocation2] ss:$0 sm:$0xff]  ;;  %vm2476_vm4 = vcmask 7168  }
0x2a7f   :  { %4857 = dma.vmem_to_hbm [thread:$0]  %s4850_s2, 256, %s4852_s22, [#allocation4], %s5551_s9, %s5551_s9, %s5548_s26  }
0x2a8e   :  { %v2469_v2 = vpop.xlane.xlu1 %2468 }
0x2a8f   :  { %v2475_v14 = vadd.f32 %v5071_v55, %v2469_v2 }
0x2a91   :  { %2478 = vst.msk [vmem:[%s5723_s7 + $0x8] sm:$0xff] %vm2476_vm4, %v2475_v14 }
0x2a96   :  { %v2466_v33 = vpop.xlane.xlu0 %2465 }
0x2a97   :  { %v2474_v20 = vadd.f32 %v5071_v55, %v2466_v33 }
0x2a99   :  { %2477 = vst.msk [vmem:[%s5723_s7] sm:$0xff] %vm2476_vm4, %v2474_v20 }
0x2a9a   :  { %5503 = dma.done.wait [#allocation4], 256  }
0x2a9b   :  { %5504 = vsyncadd [#allocation4], 4294967040 }
0x2a9c   :  { %4866 = vsyncpa [#allocation4], 1 }

</bundles_post_ra>
